<compile_context>
chip_gen: v5e
topology: v5e:2x2
jax: 0.10.0
libtpu: 0.0.40
codegen_flags: <defaults>
</compile_context>

<pallas_src>
import functools
import math

import jax
import jax.numpy as jnp
from jax import lax
from jax.experimental import pallas as pl
from jax.experimental.pallas import tpu as pltpu

ALPHA = 0.2                      # LeakyReLU negative slope used by the module
MASK_VALUE = -9000000000000000.0


def _vmem_limit_bytes():
    # <=48 MiB is safe on v7x (64 MiB physical / TC); use more on 128 MiB parts.
    try:
        cap = pltpu.get_tpu_info().vmem_capacity_bytes
        return int(min(100 * 1024 * 1024, 0.75 * cap))
    except Exception:
        return 48 * 1024 * 1024


VMEM_LIMIT = _vmem_limit_bytes()
TILE_BUDGET = VMEM_LIMIT // 3     # working-set budget used to derive row tiles


def _leaky(y, alpha):
    return jnp.where(y >= 0, y, alpha * y)


def _act(y, act, alpha):
    if act == "relu":
        return jnp.maximum(y, 0.0)
    if act == "leaky":
        return _leaky(y, alpha)
    return y


def _tile_rows(M, per_row_bytes, fixed_bytes=0, align=128, cap=32768):
    """Largest row tile (multiple of `align`) whose working set fits the budget."""
    avail = max(TILE_BUDGET - fixed_bytes, per_row_bytes * align)
    t = (avail // max(per_row_bytes, 1)) // align * align
    t = int(max(align, min(t, cap)))
    return M if M <= t else t


# ------------------------------------------------------ fused 2-layer MLP ---
def _mlp2_kernel(x_ref, w1_ref, b1_ref, w2_ref, b2_ref, o_ref, *, act1, act2, alpha):
    h = jnp.dot(x_ref[...].astype(jnp.bfloat16), w1_ref[...].astype(jnp.bfloat16),
                preferred_element_type=jnp.float32) + b1_ref[...]
    h = _act(h, act1, alpha)
    y = jnp.dot(h.astype(jnp.bfloat16), w2_ref[...].astype(jnp.bfloat16),
                preferred_element_type=jnp.float32) + b2_ref[...]
    o_ref[...] = _act(y, act2, alpha)


def mlp2_pallas(x, w1, b1, w2, b2, act1, act2, alpha=ALPHA):
    """y = act2(act1(x @ w1 + b1) @ w2 + b2), row-tiled with pipelining."""
    M, K = x.shape
    Hd = w1.shape[1]
    Cout = w2.shape[1]
    per_row = 4 * (2 * K + Hd + Hd // 2 + 2 * Cout) + 16
    fixed = 8 * (K * Hd + Hd * Cout + Hd + Cout)
    tile_m = _tile_rows(M, per_row, fixed)
    grid = (pl.cdiv(M, tile_m),)
    return pl.pallas_call(
        functools.partial(_mlp2_kernel, act1=act1, act2=act2, alpha=alpha),
        out_shape=jax.ShapeDtypeStruct((M, Cout), jnp.float32),
        grid=grid,
        in_specs=[
            pl.BlockSpec((tile_m, K), lambda i: (i, 0)),
            pl.BlockSpec((K, Hd), lambda i: (0, 0)),
            pl.BlockSpec((1, Hd), lambda i: (0, 0)),
            pl.BlockSpec((Hd, Cout), lambda i: (0, 0)),
            pl.BlockSpec((1, Cout), lambda i: (0, 0)),
        ],
        out_specs=pl.BlockSpec((tile_m, Cout), lambda i: (i, 0)),
        compiler_params=pltpu.CompilerParams(
            dimension_semantics=("parallel",), vmem_limit_bytes=VMEM_LIMIT),
    )(x, w1, b1.reshape(1, Hd), w2, b2.reshape(1, Cout))


# ------------------- fused edge path: stem + per-head wf/af + mask, bf16 out ---
def _edge_cp_kernel(e_ref, adjr_ref, we_ref, be_ref, emb_ref, embb_ref,
                    wf_ref, bf_ref, afT_ref, afb_ref, o_ref, *, alpha):
    e = e_ref[...].astype(jnp.bfloat16)                                  # (tm, 2)
    h1 = jnp.dot(e, we_ref[...].astype(jnp.bfloat16),
                 preferred_element_type=jnp.float32) + be_ref[...]
    h1 = jnp.maximum(h1, 0.0)                                            # relu(edge_w*)
    ef = jnp.dot(h1.astype(jnp.bfloat16), emb_ref[...].astype(jnp.bfloat16),
                 preferred_element_type=jnp.float32) + embb_ref[...]
    ef = jnp.maximum(ef, 0.0)                                            # relu(edge_embedding)
    f = jnp.dot(ef.astype(jnp.bfloat16), wf_ref[...].astype(jnp.bfloat16),
                preferred_element_type=jnp.float32) + bf_ref[...]
    f = _leaky(f, alpha)                                                 # (tm, H*out_f)
    # cp^T directly:  cpT[h, m] = sum_k afT[h, k] * f[m, k]  (NT contraction)
    cpT = lax.dot_general(afT_ref[...].astype(jnp.bfloat16), f.astype(jnp.bfloat16),
                          (((1,), (1,)), ((), ())),
                          preferred_element_type=jnp.float32)            # (H, tm)
    cpT = _leaky(cpT + afb_ref[...], alpha)
    # Adjacency mask fused: emit the already-masked logit bias, bf16, lane-dense.
    # (Exactness relies on no fully-masked rows; wrapper keeps adj diag = 1.)
    o_ref[...] = jnp.where(adjr_ref[...] > 0, cpT, MASK_VALUE).astype(o_ref.dtype)


def edge_cp_pallas(e_in, adj_row, w_edge, b_edge, emb_w, emb_b,
                   wf_cat, bf_cat, afT, afb, alpha=ALPHA):
    M2 = e_in.shape[0]
    E = emb_w.shape[0]
    HOF = wf_cat.shape[1]
    H = afT.shape[0]
    per_row = 4 * (2 * 2 + 1 + 2 * E + 2 * HOF) + 4 * H
    fixed = 8 * (2 * E + E * E + E * HOF + H * HOF + 2 * E + HOF + H)
    tile_m = _tile_rows(M2, per_row, fixed)
    grid = (pl.cdiv(M2, tile_m),)
    return pl.pallas_call(
        functools.partial(_edge_cp_kernel, alpha=alpha),
        out_shape=jax.ShapeDtypeStruct((H, M2), jnp.bfloat16),
        grid=grid,
        in_specs=[
            pl.BlockSpec((tile_m, 2), lambda i: (i, 0)),
            pl.BlockSpec((1, tile_m), lambda i: (0, i)),
            pl.BlockSpec((2, E), lambda i: (0, 0)),
            pl.BlockSpec((1, E), lambda i: (0, 0)),
            pl.BlockSpec((E, E), lambda i: (0, 0)),
            pl.BlockSpec((1, E), lambda i: (0, 0)),
            pl.BlockSpec((E, HOF), lambda i: (0, 0)),
            pl.BlockSpec((1, HOF), lambda i: (0, 0)),
            pl.BlockSpec((H, HOF), lambda i: (0, 0)),
            pl.BlockSpec((H, 1), lambda i: (0, 0)),
        ],
        out_specs=pl.BlockSpec((H, tile_m), lambda i: (0, i)),
        compiler_params=pltpu.CompilerParams(
            dimension_semantics=("parallel",), vmem_limit_bytes=VMEM_LIMIT),
    )(e_in, adj_row, w_edge, b_edge, emb_w, emb_b, wf_cat, bf_cat, afT, afb)


# ----------------------------- attention: query-tiled, projection cached once ---
def _gat_attn_kernel(x_ref, cp_ref, wproj_ref, bproj_ref, ws2T_ref, bs2_ref,
                     o_ref, hh_sc, s1_sc, s2_sc, *, nheads, out_f, tq, alpha):
    qi = pl.program_id(1)
    hof = nheads * out_f

    @pl.when(qi == 0)
    def _project():                                   # once per batch element
        x = x_ref[0].astype(jnp.bfloat16)                                # (N, Fin)
        proj = jnp.dot(x, wproj_ref[...].astype(jnp.bfloat16),
                       preferred_element_type=jnp.float32) + bproj_ref[...]
        hh_sc[...] = proj[:, :hof].astype(jnp.bfloat16)                  # values, all heads
        s1_sc[...] = proj[:, hof:]                                       # (N, H)
        s2_sc[...] = lax.dot_general(                                    # (H, N), lane-dense
            ws2T_ref[...].astype(jnp.bfloat16), x,
            (((1,), (1,)), ((), ())),
            preferred_element_type=jnp.float32) + bs2_ref[...]

    q0 = pl.multiple_of(qi * tq, tq)
    s1_tile = s1_sc[pl.ds(q0, tq), :]                                    # (tq, H)
    for h in range(nheads):
        # pair[i, j] = s1_i + s2_j : pure VPU broadcast-add (no K=2 MXU matmul).
        pair = s1_tile[:, h:h + 1] + s2_sc[h:h + 1, :]                   # (tq, N)
        logits = _leaky(pair, alpha) + cp_ref[h, 0].astype(jnp.float32)  # cp pre-masked
        logits = logits - jnp.max(logits, axis=-1, keepdims=True)
        p = jnp.exp(logits)
        attn = p * pl.reciprocal(jnp.sum(p, axis=-1, keepdims=True), approx=True)
        o_ref[0, :, h * out_f:(h + 1) * out_f] = jnp.dot(
            attn.astype(jnp.bfloat16), hh_sc[:, h * out_f:(h + 1) * out_f],
            preferred_element_type=jnp.float32)


def _pick_tq(N):
    if N <= 256:
        return N
    for t in (256, 128, 64, 32, 16, 8):
        if N % t == 0:
            return t
    return N


def attention_pallas(x, cp, wproj, bproj, ws2T, bs2, nheads, out_f, alpha=ALPHA):
    bs, N, Fin = x.shape
    hof = nheads * out_f
    tq = _pick_tq(N)
    grid = (bs, N // tq)
    return pl.pallas_call(
        functools.partial(_gat_attn_kernel, nheads=nheads, out_f=out_f, tq=tq,
                          alpha=alpha),
        out_shape=jax.ShapeDtypeStruct((bs, N, hof), jnp.float32),
        grid=grid,
        in_specs=[
            pl.BlockSpec((1, N, Fin), lambda b, q: (b, 0, 0)),
            pl.BlockSpec((nheads, 1, tq, N), lambda b, q: (0, b, q, 0)),
            pl.BlockSpec((Fin, hof + nheads), lambda b, q: (0, 0)),
            pl.BlockSpec((1, hof + nheads), lambda b, q: (0, 0)),
            pl.BlockSpec((nheads, Fin), lambda b, q: (0, 0)),
            pl.BlockSpec((nheads, 1), lambda b, q: (0, 0)),
        ],
        out_specs=pl.BlockSpec((1, tq, hof), lambda b, q: (b, q, 0)),
        scratch_shapes=[
            pltpu.VMEM((N, hof), jnp.bfloat16),       # cached values hh, all heads
            pltpu.VMEM((N, nheads), jnp.float32),     # cached s1
            pltpu.VMEM((nheads, N), jnp.float32),     # cached s2 (row layout)
        ],
        compiler_params=pltpu.CompilerParams(
            dimension_semantics=("parallel", "arbitrary"),
            vmem_limit_bytes=VMEM_LIMIT),
    )(x, cp, wproj, bproj, ws2T, bs2)


# ---------- per-node norm (mean/var over batch & per-head features) + fusions ---
def _head_norm_kernel(h_ref, ind_ref, indT_ref, *rest, lastact, alpha, denom,
                      has_res, head_avg):
    o_ref = rest[-1]
    h = h_ref[...]                                                       # (bs, tn, F)
    ind = ind_ref[...]                                                   # (F, H)
    indT = indT_ref[...]                                                 # (H, F)
    hsum = jnp.sum(h, axis=0)                                            # (tn, F)
    mean = jnp.dot(hsum, ind, preferred_element_type=jnp.float32) * (1.0 / denom)
    mean_f = jnp.dot(mean, indT, preferred_element_type=jnp.float32)     # (tn, F)
    d = h - mean_f[None]
    dsq = jnp.sum(d * d, axis=0)                                         # (tn, F)
    var = jnp.dot(dsq, ind, preferred_element_type=jnp.float32) * (1.0 / denom)
    scale = lax.rsqrt(1e-05 + var)                                       # (tn, H)
    scale_f = jnp.dot(scale, indT, preferred_element_type=jnp.float32)   # (tn, F)
    y = d * scale_f[None]
    if lastact:
        y = _leaky(y, alpha)
    idx = 0
    if has_res:
        y = y + rest[idx][...]
        idx += 1
    if head_avg:
        avg = rest[idx][...]                                             # (F, out_f)
        bsz, tn, F = y.shape
        ym = jnp.dot(y.reshape(bsz * tn, F), avg, preferred_element_type=jnp.float32)
        ym = jnp.maximum(ym, 0.0)                                        # fused relu
        o_ref[...] = ym.reshape(bsz, tn, avg.shape[1])
    else:
        o_ref[...] = y


def head_norm_pallas(h_cat, nheads_eff, out_f, lastact, residual=None,
                     head_avg=False, alpha=ALPHA):
    bs, N, F = h_cat.shape
    tile_n = N if N <= 512 else 256
    grid = (pl.cdiv(N, tile_n),)
    eye = jnp.eye(nheads_eff, dtype=jnp.float32)
    ind = jnp.repeat(eye, out_f, axis=0)                                 # (F, H)
    indT = jnp.transpose(ind)                                            # (H, F)
    args = [h_cat, ind, indT]
    in_specs = [
        pl.BlockSpec((bs, tile_n, F), lambda i: (0, i, 0)),
        pl.BlockSpec((F, nheads_eff), lambda i: (0, 0)),
        pl.BlockSpec((nheads_eff, F), lambda i: (0, 0)),
    ]
    if residual is not None:
        args.append(residual)
        in_specs.append(pl.BlockSpec((bs, tile_n, F), lambda i: (0, i, 0)))
    out_dim = F
    if head_avg:
        avg = jnp.tile(jnp.eye(out_f, dtype=jnp.float32), (nheads_eff, 1)) / nheads_eff
        args.append(avg)
        in_specs.append(pl.BlockSpec((F, out_f), lambda i: (0, 0)))
        out_dim = out_f
    return pl.pallas_call(
        functools.partial(_head_norm_kernel, lastact=lastact, alpha=alpha,
                          denom=float(bs * out_f),
                          has_res=residual is not None, head_avg=head_avg),
        out_shape=jax.ShapeDtypeStruct((bs, N, out_dim), jnp.float32),
        grid=grid,
        in_specs=in_specs,
        out_specs=pl.BlockSpec((bs, tile_n, out_dim), lambda i: (0, i, 0)),
        compiler_params=pltpu.CompilerParams(
            dimension_semantics=("parallel",), vmem_limit_bytes=VMEM_LIMIT),
    )(*args)


# ----------------------------------------------------------- weight folding ---
def _block_diag(mats):
    rows = sum(m.shape[0] for m in mats)
    cols = sum(m.shape[1] for m in mats)
    out = jnp.zeros((rows, cols), jnp.float32)
    r = c = 0
    for m in mats:
        out = out.at[r:r + m.shape[0], c:c + m.shape[1]].set(m)
        r += m.shape[0]
        c += m.shape[1]
    return out


def _fold_fg(w, k_in, fg):
    # x tiled fg times along features, then @ w  ==  x @ (sum of fg row blocks of w)
    return w.reshape(fg, k_in, w.shape[-1]).sum(axis=0)


# ---------------------------------------------- one GraphAttentionLayer_EFA ---
def gat_layer_efa(heads, x_in, e_in, adj_row, stem, N, lastact,
                  residual=None, head_avg=False, alpha=ALPHA):
    bs = x_in.shape[0]
    Fin = x_in.shape[-1]
    H = len(heads)
    out_f = heads[0]["wh"].shape[1]

    # Fold attention vector `ah` into ONE wide node projection (all heads):
    #   ah(h1_i + h2_j) = x_i.(wh1@ah_w) + x_j.(wh2@ah_w) + biases
    wh_all = jnp.concatenate([hp["wh"] for hp in heads], axis=1)          # (Fin, H*out_f)
    ws1_all = jnp.concatenate(
        [hp["wh1"] @ hp["ah_w"].reshape(out_f, 1) for hp in heads], axis=1)   # (Fin, H)
    wproj = jnp.concatenate([wh_all, ws1_all], axis=1)                    # (Fin, H*out_f+H)
    bh_all = jnp.concatenate([hp["wh_b"] for hp in heads])
    bs1_all = jnp.stack([jnp.dot(hp["wh1_b"], hp["ah_w"]) + hp["ah_b"] for hp in heads])
    bproj = jnp.concatenate([bh_all, bs1_all])[None, :]
    ws2T = jnp.stack([(hp["wh2"] @ hp["ah_w"].reshape(out_f, 1)).reshape(Fin)
                      for hp in heads])                                   # (H, Fin)
    bs2 = jnp.stack([jnp.dot(hp["wh2_b"], hp["ah_w"]) for hp in heads]).reshape(H, 1)

    # Edge path weights for all heads of this layer.
    wf_cat = jnp.concatenate([hp["wf"] for hp in heads], axis=1)              # (E, H*out_f)
    bf_cat = jnp.concatenate([hp["wf_b"] + hp["bf"] for hp in heads])[None]   # (1, H*out_f)
    afT = _block_diag([hp["af_w"].reshape(1, out_f) for hp in heads])         # (H, H*out_f)
    afb = jnp.stack([hp["af_b"] for hp in heads]).reshape(H, 1)               # (H, 1)

    cp = edge_cp_pallas(e_in, adj_row,
                        stem["w_edge"], stem["b_edge"], stem["emb_w"], stem["emb_b"],
                        wf_cat, bf_cat, afT, afb, alpha)                  # (H, bs*N*N) bf16
    cp = cp.reshape(H, bs, N, N)                                          # masked logit bias

    h_attn = attention_pallas(x_in, cp, wproj, bproj, ws2T, bs2, H, out_f, alpha)
    return head_norm_pallas(h_attn, H, out_f, lastact, residual=residual,
                            head_avg=head_avg, alpha=alpha)


# ---------------------------------------------------------------- GAT_EFA ---
def gat_efa_forward(params, x_c, x_d, x_tw, x_dual, edge, adj,
                    *, feature_gain, nlayer, alpha=ALPHA):
    fg = feature_gain
    bs, N, _ = x_c.shape
    nfeat = params["node_embedding"].shape[0]

    # Node stem: fg-fold + block-diagonal fuse of node_w1..4, then node_embedding.
    w_node = _block_diag([_fold_fg(params["node_w1"], 2, fg),
                          _fold_fg(params["node_w2"], 1, fg),
                          _fold_fg(params["node_w3"], 2, fg),
                          _fold_fg(params["node_w4"], 1, fg)])            # (6, nfeat)
    b_node = jnp.concatenate([params["node_w1_b"], params["node_w2_b"],
                              params["node_w3_b"], params["node_w4_b"]])
    x_in = jnp.concatenate([x_c, x_d, x_tw, x_dual], axis=-1).reshape(bs * N, 6)
    node_feats = mlp2_pallas(x_in, w_node, b_node,
                             params["node_embedding"], params["node_embedding_b"],
                             act1="relu", act2="relu").reshape(bs, N, nfeat)

    # Edge stem weights (folded); the stem matmuls themselves are fused into
    # edge_cp_pallas, so edge_feats (bs*N*N, E) is never materialized in HBM.
    stem = {
        "w_edge": _block_diag([_fold_fg(params["edge_w1"], 1, fg),
                               _fold_fg(params["edge_w2"], 1, fg)]),      # (2, nedgef)
        "b_edge": jnp.concatenate([params["edge_w1_b"], params["edge_w2_b"]])[None],
        "emb_w": params["edge_embedding"],
        "emb_b": params["edge_embedding_b"][None],
    }
    e_in = jnp.stack([edge, adj], axis=-1).reshape(bs * N * N, 2)
    adj_row = adj.reshape(1, bs * N * N)

    # TODO(synk): nn.Dropout layers are identity here (inference / eval mode).
    x = gat_layer_efa(params["attn"][0], node_feats, e_in, adj_row, stem, N,
                      lastact=True, alpha=alpha)
    for j in range(1, nlayer - 1):
        x = gat_layer_efa(params["attn"][j], x, e_in, adj_row, stem, N,
                          lastact=True, residual=x, alpha=alpha)          # residual fused
    out_heads = params["attn"][nlayer - 1]
    out_f = out_heads[0]["wh"].shape[1]
    x = gat_layer_efa(out_heads, x, e_in, adj_row, stem, N,
                      lastact=False, head_avg=True, alpha=alpha)          # (bs, N, out_f), relu'd

    # Fused output head: relu(x@W1+b1)@W2+b2.
    y = mlp2_pallas(x.reshape(bs * N, out_f),
                    params["out_layer1"], params["out_layer1_b"],
                    params["out_layer2"], params["out_layer2_b"],
                    act1="relu", act2=None)
    y = y.reshape(bs, N, -1)
    return jnp.squeeze(y, axis=-1) if y.shape[-1] == 1 else y


# ---------------------------------------------------------- parameter init ---
def _init_linear(key, fan_in, fan_out):
    k1, k2 = jax.random.split(key)
    bound = 1.0 / math.sqrt(fan_in)
    w = jax.random.uniform(k1, (fan_in, fan_out), jnp.float32, -bound, bound)
    b = jax.random.uniform(k2, (fan_out,), jnp.float32, -bound, bound)
    return w, b


def _init_head(key, in_f, in_e, out_f):
    keys = jax.random.split(key, 7)
    p = {}
    p["wh"], p["wh_b"] = _init_linear(keys[0], in_f, out_f)
    p["wh1"], p["wh1_b"] = _init_linear(keys[1], in_f, out_f)
    p["wh2"], p["wh2_b"] = _init_linear(keys[2], in_f, out_f)
    ahw, ahb = _init_linear(keys[3], out_f, 1)
    p["ah_w"], p["ah_b"] = ahw.reshape(out_f), ahb.reshape(())
    p["wf"], p["wf_b"] = _init_linear(keys[4], in_e, out_f)
    afw, afb = _init_linear(keys[5], out_f, 1)
    p["af_w"], p["af_b"] = afw.reshape(out_f), afb.reshape(())
    lim = 1.414 * math.sqrt(6.0 / (1 + out_f))            # xavier_uniform, gain=1.414
    p["bf"] = jax.random.uniform(keys[6], (out_f,), jnp.float32, -lim, lim)
    return p


def init_gat_efa_params(key, nfeat, nedgef, nhid, nclass, nheads, noutheads,
                        nlayer, feature_gain):
    keys = jax.random.split(key, 12 + nlayer)
    params = {}
    params["node_w1"], params["node_w1_b"] = _init_linear(keys[0], 2 * feature_gain, nfeat // 4)
    params["node_w2"], params["node_w2_b"] = _init_linear(keys[1], 1 * feature_gain, nfeat // 4)
    params["node_w3"], params["node_w3_b"] = _init_linear(keys[2], 2 * feature_gain, nfeat // 4)
    params["node_w4"], params["node_w4_b"] = _init_linear(keys[3], 1 * feature_gain, nfeat // 4)
    params["edge_w1"], params["edge_w1_b"] = _init_linear(keys[4], 1 * feature_gain, nedgef // 2)
    params["edge_w2"], params["edge_w2_b"] = _init_linear(keys[5], 1 * feature_gain, nedgef // 2)
    params["node_embedding"], params["node_embedding_b"] = _init_linear(keys[6], nfeat, nfeat)
    params["edge_embedding"], params["edge_embedding_b"] = _init_linear(keys[7], nedgef, nedgef)
    params["out_layer1"], params["out_layer1_b"] = _init_linear(keys[8], nhid, nhid // 2)
    params["out_layer2"], params["out_layer2_b"] = _init_linear(keys[9], nhid // 2, nclass)

    attn = []
    hk = jax.random.split(keys[10], nheads)
    attn.append([_init_head(hk[i], nfeat, nedgef, nhid) for i in range(nheads)])
    for j in range(1, nlayer - 1):
        hk = jax.random.split(keys[11 + j], nheads)
        attn.append([_init_head(hk[i], nhid * nheads, nedgef, nhid) for i in range(nheads)])
    hk = jax.random.split(keys[11], noutheads)
    attn.append([_init_head(hk[i], nhid * nheads, nedgef, nhid) for i in range(noutheads)])
    params["attn"] = attn
    return params


# --------------------------------------------------------------------- main --
if __name__ == "__main__":
    # small, consistent shapes
    bs, N = 2, 16
    nfeat, nedgef, nhid, nclass = 32, 16, 16, 1
    nheads, noutheads, nlayer, feature_gain = 4, 2, 2, 10

    key = jax.random.PRNGKey(0)
    kp, kc, kd, kt, ku, ke, ka = jax.random.split(key, 7)

    params = init_gat_efa_params(kp, nfeat, nedgef, nhid, nclass,
                                 nheads, noutheads, nlayer, feature_gain)

    x_c = jax.random.normal(kc, (bs, N, 2), jnp.float32)
    x_d = jax.random.normal(kd, (bs, N, 1), jnp.float32)
    x_tw = jax.random.normal(kt, (bs, N, 2), jnp.float32)
    x_dual = jax.random.normal(ku, (bs, N, 1), jnp.float32)
    edge = jax.random.uniform(ke, (bs, N, N), jnp.float32)
    adj = (jax.random.uniform(ka, (bs, N, N)) > 0.5).astype(jnp.float32)
    idx = jnp.arange(N)
    adj = adj.at[:, idx, idx].set(1.0)   # ensure every row attends to something

    fwd = jax.jit(functools.partial(gat_efa_forward,
                                    feature_gain=feature_gain, nlayer=nlayer))
    out = fwd(params, x_c, x_d, x_tw, x_dual, edge, adj)
    out = jax.block_until_ready(out)
    assert out.shape == (bs, N), out.shape
    assert bool(jnp.all(jnp.isfinite(out)))
    print("KERNEL_OK")
</pallas_src>

<mosaic_0001>
module attributes {stable_mosaic.version = 11 : i64} {
  func.func @_mlp2_kernel(%arg0: i32, %arg1: memref<32x6xf32, #tpu.memory_space<vmem>>, %arg2: memref<6x32xf32, #tpu.memory_space<vmem>>, %arg3: memref<1x32xf32, #tpu.memory_space<vmem>>, %arg4: memref<32x32xf32, #tpu.memory_space<vmem>>, %arg5: memref<1x32xf32, #tpu.memory_space<vmem>>, %arg6: memref<32x32xf32, #tpu.memory_space<vmem>>) attributes {dimension_semantics = [#tpu.dimension_semantics<parallel>], iteration_bounds = array<i64: 1>, scalar_prefetch = 0 : i64, scratch_operands = 0 : i64, tpu.core_type = #tpu.core_type<tc>, window_params = [{transform_indices = @transform_0, window_bounds = array<i64: 32, 6>}, {pipeline_mode = #tpu.pipeline_mode<synchronous>, transform_indices = @transform_1, window_bounds = array<i64: 6, 32>}, {pipeline_mode = #tpu.pipeline_mode<synchronous>, transform_indices = @transform_2, window_bounds = array<i64: 1, 32>}, {pipeline_mode = #tpu.pipeline_mode<synchronous>, transform_indices = @transform_3, window_bounds = array<i64: 32, 32>}, {pipeline_mode = #tpu.pipeline_mode<synchronous>, transform_indices = @transform_4, window_bounds = array<i64: 1, 32>}, {transform_indices = @transform_5, window_bounds = array<i64: 32, 32>}]} {
    %c0 = arith.constant 0 : index
    %c0_0 = arith.constant 0 : index
    %0 = vector.load %arg1[%c0, %c0_0] : memref<32x6xf32, #tpu.memory_space<vmem>>, vector<32x6xf32>
    %1 = arith.truncf %0 : vector<32x6xf32> to vector<32x6xbf16>
    %c0_1 = arith.constant 0 : index
    %c0_2 = arith.constant 0 : index
    %2 = vector.load %arg2[%c0_1, %c0_2] : memref<6x32xf32, #tpu.memory_space<vmem>>, vector<6x32xf32>
    %3 = arith.truncf %2 : vector<6x32xf32> to vector<6x32xbf16>
    %cst = arith.constant dense<0.000000e+00> : vector<32x32xf32>
    %4 = tpu.matmul %1, %3, %cst {dimension_numbers = #tpu.dot_dimension_numbers<[1], [0], [0], [1], [0, 0, 1, 1], [], []>} : vector<32x6xbf16>, vector<6x32xbf16>, vector<32x32xf32> -> vector<32x32xf32>
    %c0_3 = arith.constant 0 : index
    %c0_4 = arith.constant 0 : index
    %5 = vector.load %arg3[%c0_3, %c0_4] : memref<1x32xf32, #tpu.memory_space<vmem>>, vector<1x32xf32>
    %6 = vector.broadcast %5 : vector<1x32xf32> to vector<32x32xf32>
    %7 = arith.addf %4, %6 : vector<32x32xf32>
    %cst_5 = arith.constant 0.000000e+00 : f32
    %8 = vector.broadcast %cst_5 : f32 to vector<32x32xf32>
    %9 = arith.maximumf %7, %8 : vector<32x32xf32>
    %10 = arith.truncf %9 : vector<32x32xf32> to vector<32x32xbf16>
    %c0_6 = arith.constant 0 : index
    %c0_7 = arith.constant 0 : index
    %11 = vector.load %arg4[%c0_6, %c0_7] : memref<32x32xf32, #tpu.memory_space<vmem>>, vector<32x32xf32>
    %12 = arith.truncf %11 : vector<32x32xf32> to vector<32x32xbf16>
    %cst_8 = arith.constant dense<0.000000e+00> : vector<32x32xf32>
    %13 = tpu.matmul %10, %12, %cst_8 {dimension_numbers = #tpu.dot_dimension_numbers<[1], [0], [0], [1], [0, 0, 1, 1], [], []>} : vector<32x32xbf16>, vector<32x32xbf16>, vector<32x32xf32> -> vector<32x32xf32>
    %c0_9 = arith.constant 0 : index
    %c0_10 = arith.constant 0 : index
    %14 = vector.load %arg5[%c0_9, %c0_10] : memref<1x32xf32, #tpu.memory_space<vmem>>, vector<1x32xf32>
    %15 = vector.broadcast %14 : vector<1x32xf32> to vector<32x32xf32>
    %16 = arith.addf %13, %15 : vector<32x32xf32>
    %cst_11 = arith.constant 0.000000e+00 : f32
    %17 = vector.broadcast %cst_11 : f32 to vector<32x32xf32>
    %18 = arith.maximumf %16, %17 : vector<32x32xf32>
    %c0_12 = arith.constant 0 : index
    %c0_13 = arith.constant 0 : index
    %19 = vector.load %arg6[%c0_12, %c0_13] : memref<32x32xf32, #tpu.memory_space<vmem>>, vector<32x32xf32>
    tpu.vector_store %arg6[%c0_12, %c0_13], %18 {strides = array<i32>} : memref<32x32xf32, #tpu.memory_space<vmem>>, vector<32x32xf32>,
    return
  }
  func.func @transform_0(%arg0: i32) -> (i32, i32) {
    %c0_i32 = arith.constant 0 : i32
    %c0_i32_0 = arith.constant 0 : i32
    return %arg0, %c0_i32 : i32, i32
  }
  func.func @transform_1(%arg0: i32) -> (i32, i32) {
    %c0_i32 = arith.constant 0 : i32
    %c0_i32_0 = arith.constant 0 : i32
    %c0_i32_1 = arith.constant 0 : i32
    return %c0_i32, %c0_i32_0 : i32, i32
  }
  func.func @transform_2(%arg0: i32) -> (i32, i32) {
    %c0_i32 = arith.constant 0 : i32
    %c0_i32_0 = arith.constant 0 : i32
    %c0_i32_1 = arith.constant 0 : i32
    return %c0_i32, %c0_i32_0 : i32, i32
  }
  func.func @transform_3(%arg0: i32) -> (i32, i32) {
    %c0_i32 = arith.constant 0 : i32
    %c0_i32_0 = arith.constant 0 : i32
    %c0_i32_1 = arith.constant 0 : i32
    return %c0_i32, %c0_i32_0 : i32, i32
  }
  func.func @transform_4(%arg0: i32) -> (i32, i32) {
    %c0_i32 = arith.constant 0 : i32
    %c0_i32_0 = arith.constant 0 : i32
    %c0_i32_1 = arith.constant 0 : i32
    return %c0_i32, %c0_i32_0 : i32, i32
  }
  func.func @transform_5(%arg0: i32) -> (i32, i32) {
    %c0_i32 = arith.constant 0 : i32
    %c0_i32_0 = arith.constant 0 : i32
    return %arg0, %c0_i32 : i32, i32
  }
}

module attributes {stable_mosaic.version = 11 : i64} {
  func.func @_edge_cp_kernel(%arg0: i32, %arg1: memref<512x2xf32, #tpu.memory_space<vmem>>, %arg2: memref<1x512xf32, #tpu.memory_space<vmem>>, %arg3: memref<2x16xf32, #tpu.memory_space<vmem>>, %arg4: memref<1x16xf32, #tpu.memory_space<vmem>>, %arg5: memref<16x16xf32, #tpu.memory_space<vmem>>, %arg6: memref<1x16xf32, #tpu.memory_space<vmem>>, %arg7: memref<16x32xf32, #tpu.memory_space<vmem>>, %arg8: memref<1x32xf32, #tpu.memory_space<vmem>>, %arg9: memref<2x32xf32, #tpu.memory_space<vmem>>, %arg10: memref<2x1xf32, #tpu.memory_space<vmem>>, %arg11: memref<2x512xbf16, #tpu.memory_space<vmem>>) attributes {dimension_semantics = [#tpu.dimension_semantics<parallel>], iteration_bounds = array<i64: 1>, scalar_prefetch = 0 : i64, scratch_operands = 0 : i64, tpu.core_type = #tpu.core_type<tc>, window_params = [{transform_indices = @transform_0, window_bounds = array<i64: 512, 2>}, {transform_indices = @transform_1, window_bounds = array<i64: 1, 512>}, {pipeline_mode = #tpu.pipeline_mode<synchronous>, transform_indices = @transform_2, window_bounds = array<i64: 2, 16>}, {pipeline_mode = #tpu.pipeline_mode<synchronous>, transform_indices = @transform_3, window_bounds = array<i64: 1, 16>}, {pipeline_mode = #tpu.pipeline_mode<synchronous>, transform_indices = @transform_4, window_bounds = array<i64: 16, 16>}, {pipeline_mode = #tpu.pipeline_mode<synchronous>, transform_indices = @transform_5, window_bounds = array<i64: 1, 16>}, {pipeline_mode = #tpu.pipeline_mode<synchronous>, transform_indices = @transform_6, window_bounds = array<i64: 16, 32>}, {pipeline_mode = #tpu.pipeline_mode<synchronous>, transform_indices = @transform_7, window_bounds = array<i64: 1, 32>}, {pipeline_mode = #tpu.pipeline_mode<synchronous>, transform_indices = @transform_8, window_bounds = array<i64: 2, 32>}, {pipeline_mode = #tpu.pipeline_mode<synchronous>, transform_indices = @transform_9, window_bounds = array<i64: 2, 1>}, {transform_indices = @transform_10, window_bounds = array<i64: 2, 512>}]} {
    %c0 = arith.constant 0 : index
    %c0_0 = arith.constant 0 : index
    %0 = vector.load %arg1[%c0, %c0_0] : memref<512x2xf32, #tpu.memory_space<vmem>>, vector<512x2xf32>
    %1 = arith.truncf %0 : vector<512x2xf32> to vector<512x2xbf16>
    %c0_1 = arith.constant 0 : index
    %c0_2 = arith.constant 0 : index
    %2 = vector.load %arg3[%c0_1, %c0_2] : memref<2x16xf32, #tpu.memory_space<vmem>>, vector<2x16xf32>
    %3 = arith.truncf %2 : vector<2x16xf32> to vector<2x16xbf16>
    %cst = arith.constant dense<0.000000e+00> : vector<512x16xf32>
    %4 = tpu.matmul %1, %3, %cst {dimension_numbers = #tpu.dot_dimension_numbers<[1], [0], [0], [1], [0, 0, 1, 1], [], []>} : vector<512x2xbf16>, vector<2x16xbf16>, vector<512x16xf32> -> vector<512x16xf32>
    %c0_3 = arith.constant 0 : index
    %c0_4 = arith.constant 0 : index
    %5 = vector.load %arg4[%c0_3, %c0_4] : memref<1x16xf32, #tpu.memory_space<vmem>>, vector<1x16xf32>
    %6 = vector.broadcast %5 : vector<1x16xf32> to vector<512x16xf32>
    %7 = arith.addf %4, %6 : vector<512x16xf32>
    %cst_5 = arith.constant 0.000000e+00 : f32
    %8 = vector.broadcast %cst_5 : f32 to vector<512x16xf32>
    %9 = arith.maximumf %7, %8 : vector<512x16xf32>
    %10 = arith.truncf %9 : vector<512x16xf32> to vector<512x16xbf16>
    %c0_6 = arith.constant 0 : index
    %c0_7 = arith.constant 0 : index
    %11 = vector.load %arg5[%c0_6, %c0_7] : memref<16x16xf32, #tpu.memory_space<vmem>>, vector<16x16xf32>
    %12 = arith.truncf %11 : vector<16x16xf32> to vector<16x16xbf16>
    %cst_8 = arith.constant dense<0.000000e+00> : vector<512x16xf32>
    %13 = tpu.matmul %10, %12, %cst_8 {dimension_numbers = #tpu.dot_dimension_numbers<[1], [0], [0], [1], [0, 0, 1, 1], [], []>} : vector<512x16xbf16>, vector<16x16xbf16>, vector<512x16xf32> -> vector<512x16xf32>
    %c0_9 = arith.constant 0 : index
    %c0_10 = arith.constant 0 : index
    %14 = vector.load %arg6[%c0_9, %c0_10] : memref<1x16xf32, #tpu.memory_space<vmem>>, vector<1x16xf32>
    %15 = vector.broadcast %14 : vector<1x16xf32> to vector<512x16xf32>
    %16 = arith.addf %13, %15 : vector<512x16xf32>
    %cst_11 = arith.constant 0.000000e+00 : f32
    %17 = vector.broadcast %cst_11 : f32 to vector<512x16xf32>
    %18 = arith.maximumf %16, %17 : vector<512x16xf32>
    %19 = arith.truncf %18 : vector<512x16xf32> to vector<512x16xbf16>
    %c0_12 = arith.constant 0 : index
    %c0_13 = arith.constant 0 : index
    %20 = vector.load %arg7[%c0_12, %c0_13] : memref<16x32xf32, #tpu.memory_space<vmem>>, vector<16x32xf32>
    %21 = arith.truncf %20 : vector<16x32xf32> to vector<16x32xbf16>
    %cst_14 = arith.constant dense<0.000000e+00> : vector<512x32xf32>
    %22 = tpu.matmul %19, %21, %cst_14 {dimension_numbers = #tpu.dot_dimension_numbers<[1], [0], [0], [1], [0, 0, 1, 1], [], []>} : vector<512x16xbf16>, vector<16x32xbf16>, vector<512x32xf32> -> vector<512x32xf32>
    %c0_15 = arith.constant 0 : index
    %c0_16 = arith.constant 0 : index
    %23 = vector.load %arg8[%c0_15, %c0_16] : memref<1x32xf32, #tpu.memory_space<vmem>>, vector<1x32xf32>
    %24 = vector.broadcast %23 : vector<1x32xf32> to vector<512x32xf32>
    %25 = arith.addf %22, %24 : vector<512x32xf32>
    %cst_17 = arith.constant 0.000000e+00 : f32
    %26 = vector.broadcast %cst_17 : f32 to vector<512x32xf32>
    %27 = arith.cmpf oge, %25, %26 : vector<512x32xf32>
    %cst_18 = arith.constant 2.000000e-01 : f32
    %28 = vector.broadcast %cst_18 : f32 to vector<512x32xf32>
    %29 = arith.mulf %28, %25 : vector<512x32xf32>
    %30 = arith.select %27, %25, %29 : vector<512x32xi1>, vector<512x32xf32>
    %c0_19 = arith.constant 0 : index
    %c0_20 = arith.constant 0 : index
    %31 = vector.load %arg9[%c0_19, %c0_20] : memref<2x32xf32, #tpu.memory_space<vmem>>, vector<2x32xf32>
    %32 = arith.truncf %31 : vector<2x32xf32> to vector<2x32xbf16>
    %33 = arith.truncf %30 : vector<512x32xf32> to vector<512x32xbf16>
    %cst_21 = arith.constant dense<0.000000e+00> : vector<2x512xf32>
    %34 = tpu.matmul %32, %33, %cst_21 {dimension_numbers = #tpu.dot_dimension_numbers<[1], [1], [0], [0], [0, 0, 1, 0], [], []>} : vector<2x32xbf16>, vector<512x32xbf16>, vector<2x512xf32> -> vector<2x512xf32>
    %c0_22 = arith.constant 0 : index
    %c0_23 = arith.constant 0 : index
    %35 = vector.load %arg10[%c0_22, %c0_23] : memref<2x1xf32, #tpu.memory_space<vmem>>, vector<2x1xf32>
    %36 = vector.broadcast %35 : vector<2x1xf32> to vector<2x512xf32>
    %37 = arith.addf %34, %36 : vector<2x512xf32>
    %cst_24 = arith.constant 0.000000e+00 : f32
    %38 = vector.broadcast %cst_24 : f32 to vector<2x512xf32>
    %39 = arith.cmpf oge, %37, %38 : vector<2x512xf32>
    %cst_25 = arith.constant 2.000000e-01 : f32
    %40 = vector.broadcast %cst_25 : f32 to vector<2x512xf32>
    %41 = arith.mulf %40, %37 : vector<2x512xf32>
    %42 = arith.select %39, %37, %41 : vector<2x512xi1>, vector<2x512xf32>
    %c0_26 = arith.constant 0 : index
    %c0_27 = arith.constant 0 : index
    %43 = vector.load %arg2[%c0_26, %c0_27] : memref<1x512xf32, #tpu.memory_space<vmem>>, vector<1x512xf32>
    %cst_28 = arith.constant 0.000000e+00 : f32
    %44 = vector.broadcast %cst_28 : f32 to vector<1x512xf32>
    %45 = arith.cmpf ogt, %43, %44 : vector<1x512xf32>
    %cst_29 = arith.constant -9.000000e+15 : f32
    %46 = vector.shape_cast %45 : vector<1x512xi1> to vector<1x512xi1>
    %47 = vector.broadcast %46 : vector<1x512xi1> to vector<2x512xi1>
    %48 = vector.broadcast %cst_29 : f32 to vector<2x512xf32>
    %49 = arith.select %47, %42, %48 : vector<2x512xi1>, vector<2x512xf32>
    %50 = arith.truncf %49 : vector<2x512xf32> to vector<2x512xbf16>
    %c0_30 = arith.constant 0 : index
    %c0_31 = arith.constant 0 : index
    %51 = vector.load %arg11[%c0_30, %c0_31] : memref<2x512xbf16, #tpu.memory_space<vmem>>, vector<2x512xbf16>
    tpu.vector_store %arg11[%c0_30, %c0_31], %50 {strides = array<i32>} : memref<2x512xbf16, #tpu.memory_space<vmem>>, vector<2x512xbf16>,
    return
  }
  func.func @transform_0(%arg0: i32) -> (i32, i32) {
    %c0_i32 = arith.constant 0 : i32
    %c0_i32_0 = arith.constant 0 : i32
    return %arg0, %c0_i32 : i32, i32
  }
  func.func @transform_1(%arg0: i32) -> (i32, i32) {
    %c0_i32 = arith.constant 0 : i32
    %c0_i32_0 = arith.constant 0 : i32
    return %c0_i32, %arg0 : i32, i32
  }
  func.func @transform_2(%arg0: i32) -> (i32, i32) {
    %c0_i32 = arith.constant 0 : i32
    %c0_i32_0 = arith.constant 0 : i32
    %c0_i32_1 = arith.constant 0 : i32
    return %c0_i32, %c0_i32_0 : i32, i32
  }
  func.func @transform_3(%arg0: i32) -> (i32, i32) {
    %c0_i32 = arith.constant 0 : i32
    %c0_i32_0 = arith.constant 0 : i32
    %c0_i32_1 = arith.constant 0 : i32
    return %c0_i32, %c0_i32_0 : i32, i32
  }
  func.func @transform_4(%arg0: i32) -> (i32, i32) {
    %c0_i32 = arith.constant 0 : i32
    %c0_i32_0 = arith.constant 0 : i32
    %c0_i32_1 = arith.constant 0 : i32
    return %c0_i32, %c0_i32_0 : i32, i32
  }
  func.func @transform_5(%arg0: i32) -> (i32, i32) {
    %c0_i32 = arith.constant 0 : i32
    %c0_i32_0 = arith.constant 0 : i32
    %c0_i32_1 = arith.constant 0 : i32
    return %c0_i32, %c0_i32_0 : i32, i32
  }
  func.func @transform_6(%arg0: i32) -> (i32, i32) {
    %c0_i32 = arith.constant 0 : i32
    %c0_i32_0 = arith.constant 0 : i32
    %c0_i32_1 = arith.constant 0 : i32
    return %c0_i32, %c0_i32_0 : i32, i32
  }
  func.func @transform_7(%arg0: i32) -> (i32, i32) {
    %c0_i32 = arith.constant 0 : i32
    %c0_i32_0 = arith.constant 0 : i32
    %c0_i32_1 = arith.constant 0 : i32
    return %c0_i32, %c0_i32_0 : i32, i32
  }
  func.func @transform_8(%arg0: i32) -> (i32, i32) {
    %c0_i32 = arith.constant 0 : i32
    %c0_i32_0 = arith.constant 0 : i32
    %c0_i32_1 = arith.constant 0 : i32
    return %c0_i32, %c0_i32_0 : i32, i32
  }
  func.func @transform_9(%arg0: i32) -> (i32, i32) {
    %c0_i32 = arith.constant 0 : i32
    %c0_i32_0 = arith.constant 0 : i32
    %c0_i32_1 = arith.constant 0 : i32
    return %c0_i32, %c0_i32_0 : i32, i32
  }
  func.func @transform_10(%arg0: i32) -> (i32, i32) {
    %c0_i32 = arith.constant 0 : i32
    %c0_i32_0 = arith.constant 0 : i32
    return %c0_i32, %arg0 : i32, i32
  }
}

module attributes {stable_mosaic.version = 11 : i64} {
  func.func @_edge_cp_kernel(%arg0: i32, %arg1: memref<512x2xf32, #tpu.memory_space<vmem>>, %arg2: memref<1x512xf32, #tpu.memory_space<vmem>>, %arg3: memref<2x16xf32, #tpu.memory_space<vmem>>, %arg4: memref<1x16xf32, #tpu.memory_space<vmem>>, %arg5: memref<16x16xf32, #tpu.memory_space<vmem>>, %arg6: memref<1x16xf32, #tpu.memory_space<vmem>>, %arg7: memref<16x64xf32, #tpu.memory_space<vmem>>, %arg8: memref<1x64xf32, #tpu.memory_space<vmem>>, %arg9: memref<4x64xf32, #tpu.memory_space<vmem>>, %arg10: memref<4x1xf32, #tpu.memory_space<vmem>>, %arg11: memref<4x512xbf16, #tpu.memory_space<vmem>>) attributes {dimension_semantics = [#tpu.dimension_semantics<parallel>], iteration_bounds = array<i64: 1>, scalar_prefetch = 0 : i64, scratch_operands = 0 : i64, tpu.core_type = #tpu.core_type<tc>, window_params = [{transform_indices = @transform_0, window_bounds = array<i64: 512, 2>}, {transform_indices = @transform_1, window_bounds = array<i64: 1, 512>}, {pipeline_mode = #tpu.pipeline_mode<synchronous>, transform_indices = @transform_2, window_bounds = array<i64: 2, 16>}, {pipeline_mode = #tpu.pipeline_mode<synchronous>, transform_indices = @transform_3, window_bounds = array<i64: 1, 16>}, {pipeline_mode = #tpu.pipeline_mode<synchronous>, transform_indices = @transform_4, window_bounds = array<i64: 16, 16>}, {pipeline_mode = #tpu.pipeline_mode<synchronous>, transform_indices = @transform_5, window_bounds = array<i64: 1, 16>}, {pipeline_mode = #tpu.pipeline_mode<synchronous>, transform_indices = @transform_6, window_bounds = array<i64: 16, 64>}, {pipeline_mode = #tpu.pipeline_mode<synchronous>, transform_indices = @transform_7, window_bounds = array<i64: 1, 64>}, {pipeline_mode = #tpu.pipeline_mode<synchronous>, transform_indices = @transform_8, window_bounds = array<i64: 4, 64>}, {pipeline_mode = #tpu.pipeline_mode<synchronous>, transform_indices = @transform_9, window_bounds = array<i64: 4, 1>}, {transform_indices = @transform_10, window_bounds = array<i64: 4, 512>}]} {
    %c0 = arith.constant 0 : index
    %c0_0 = arith.constant 0 : index
    %0 = vector.load %arg1[%c0, %c0_0] : memref<512x2xf32, #tpu.memory_space<vmem>>, vector<512x2xf32>
    %1 = arith.truncf %0 : vector<512x2xf32> to vector<512x2xbf16>
    %c0_1 = arith.constant 0 : index
    %c0_2 = arith.constant 0 : index
    %2 = vector.load %arg3[%c0_1, %c0_2] : memref<2x16xf32, #tpu.memory_space<vmem>>, vector<2x16xf32>
    %3 = arith.truncf %2 : vector<2x16xf32> to vector<2x16xbf16>
    %cst = arith.constant dense<0.000000e+00> : vector<512x16xf32>
    %4 = tpu.matmul %1, %3, %cst {dimension_numbers = #tpu.dot_dimension_numbers<[1], [0], [0], [1], [0, 0, 1, 1], [], []>} : vector<512x2xbf16>, vector<2x16xbf16>, vector<512x16xf32> -> vector<512x16xf32>
    %c0_3 = arith.constant 0 : index
    %c0_4 = arith.constant 0 : index
    %5 = vector.load %arg4[%c0_3, %c0_4] : memref<1x16xf32, #tpu.memory_space<vmem>>, vector<1x16xf32>
    %6 = vector.broadcast %5 : vector<1x16xf32> to vector<512x16xf32>
    %7 = arith.addf %4, %6 : vector<512x16xf32>
    %cst_5 = arith.constant 0.000000e+00 : f32
    %8 = vector.broadcast %cst_5 : f32 to vector<512x16xf32>
    %9 = arith.maximumf %7, %8 : vector<512x16xf32>
    %10 = arith.truncf %9 : vector<512x16xf32> to vector<512x16xbf16>
    %c0_6 = arith.constant 0 : index
    %c0_7 = arith.constant 0 : index
    %11 = vector.load %arg5[%c0_6, %c0_7] : memref<16x16xf32, #tpu.memory_space<vmem>>, vector<16x16xf32>
    %12 = arith.truncf %11 : vector<16x16xf32> to vector<16x16xbf16>
    %cst_8 = arith.constant dense<0.000000e+00> : vector<512x16xf32>
    %13 = tpu.matmul %10, %12, %cst_8 {dimension_numbers = #tpu.dot_dimension_numbers<[1], [0], [0], [1], [0, 0, 1, 1], [], []>} : vector<512x16xbf16>, vector<16x16xbf16>, vector<512x16xf32> -> vector<512x16xf32>
    %c0_9 = arith.constant 0 : index
    %c0_10 = arith.constant 0 : index
    %14 = vector.load %arg6[%c0_9, %c0_10] : memref<1x16xf32, #tpu.memory_space<vmem>>, vector<1x16xf32>
    %15 = vector.broadcast %14 : vector<1x16xf32> to vector<512x16xf32>
    %16 = arith.addf %13, %15 : vector<512x16xf32>
    %cst_11 = arith.constant 0.000000e+00 : f32
    %17 = vector.broadcast %cst_11 : f32 to vector<512x16xf32>
    %18 = arith.maximumf %16, %17 : vector<512x16xf32>
    %19 = arith.truncf %18 : vector<512x16xf32> to vector<512x16xbf16>
    %c0_12 = arith.constant 0 : index
    %c0_13 = arith.constant 0 : index
    %20 = vector.load %arg7[%c0_12, %c0_13] : memref<16x64xf32, #tpu.memory_space<vmem>>, vector<16x64xf32>
    %21 = arith.truncf %20 : vector<16x64xf32> to vector<16x64xbf16>
    %cst_14 = arith.constant dense<0.000000e+00> : vector<512x64xf32>
    %22 = tpu.matmul %19, %21, %cst_14 {dimension_numbers = #tpu.dot_dimension_numbers<[1], [0], [0], [1], [0, 0, 1, 1], [], []>} : vector<512x16xbf16>, vector<16x64xbf16>, vector<512x64xf32> -> vector<512x64xf32>
    %c0_15 = arith.constant 0 : index
    %c0_16 = arith.constant 0 : index
    %23 = vector.load %arg8[%c0_15, %c0_16] : memref<1x64xf32, #tpu.memory_space<vmem>>, vector<1x64xf32>
    %24 = vector.broadcast %23 : vector<1x64xf32> to vector<512x64xf32>
    %25 = arith.addf %22, %24 : vector<512x64xf32>
    %cst_17 = arith.constant 0.000000e+00 : f32
    %26 = vector.broadcast %cst_17 : f32 to vector<512x64xf32>
    %27 = arith.cmpf oge, %25, %26 : vector<512x64xf32>
    %cst_18 = arith.constant 2.000000e-01 : f32
    %28 = vector.broadcast %cst_18 : f32 to vector<512x64xf32>
    %29 = arith.mulf %28, %25 : vector<512x64xf32>
    %30 = arith.select %27, %25, %29 : vector<512x64xi1>, vector<512x64xf32>
    %c0_19 = arith.constant 0 : index
    %c0_20 = arith.constant 0 : index
    %31 = vector.load %arg9[%c0_19, %c0_20] : memref<4x64xf32, #tpu.memory_space<vmem>>, vector<4x64xf32>
    %32 = arith.truncf %31 : vector<4x64xf32> to vector<4x64xbf16>
    %33 = arith.truncf %30 : vector<512x64xf32> to vector<512x64xbf16>
    %cst_21 = arith.constant dense<0.000000e+00> : vector<4x512xf32>
    %34 = tpu.matmul %32, %33, %cst_21 {dimension_numbers = #tpu.dot_dimension_numbers<[1], [1], [0], [0], [0, 0, 1, 0], [], []>} : vector<4x64xbf16>, vector<512x64xbf16>, vector<4x512xf32> -> vector<4x512xf32>
    %c0_22 = arith.constant 0 : index
    %c0_23 = arith.constant 0 : index
    %35 = vector.load %arg10[%c0_22, %c0_23] : memref<4x1xf32, #tpu.memory_space<vmem>>, vector<4x1xf32>
    %36 = vector.broadcast %35 : vector<4x1xf32> to vector<4x512xf32>
    %37 = arith.addf %34, %36 : vector<4x512xf32>
    %cst_24 = arith.constant 0.000000e+00 : f32
    %38 = vector.broadcast %cst_24 : f32 to vector<4x512xf32>
    %39 = arith.cmpf oge, %37, %38 : vector<4x512xf32>
    %cst_25 = arith.constant 2.000000e-01 : f32
    %40 = vector.broadcast %cst_25 : f32 to vector<4x512xf32>
    %41 = arith.mulf %40, %37 : vector<4x512xf32>
    %42 = arith.select %39, %37, %41 : vector<4x512xi1>, vector<4x512xf32>
    %c0_26 = arith.constant 0 : index
    %c0_27 = arith.constant 0 : index
    %43 = vector.load %arg2[%c0_26, %c0_27] : memref<1x512xf32, #tpu.memory_space<vmem>>, vector<1x512xf32>
    %cst_28 = arith.constant 0.000000e+00 : f32
    %44 = vector.broadcast %cst_28 : f32 to vector<1x512xf32>
    %45 = arith.cmpf ogt, %43, %44 : vector<1x512xf32>
    %cst_29 = arith.constant -9.000000e+15 : f32
    %46 = vector.shape_cast %45 : vector<1x512xi1> to vector<1x512xi1>
    %47 = vector.broadcast %46 : vector<1x512xi1> to vector<4x512xi1>
    %48 = vector.broadcast %cst_29 : f32 to vector<4x512xf32>
    %49 = arith.select %47, %42, %48 : vector<4x512xi1>, vector<4x512xf32>
    %50 = arith.truncf %49 : vector<4x512xf32> to vector<4x512xbf16>
    %c0_30 = arith.constant 0 : index
    %c0_31 = arith.constant 0 : index
    %51 = vector.load %arg11[%c0_30, %c0_31] : memref<4x512xbf16, #tpu.memory_space<vmem>>, vector<4x512xbf16>
    tpu.vector_store %arg11[%c0_30, %c0_31], %50 {strides = array<i32>} : memref<4x512xbf16, #tpu.memory_space<vmem>>, vector<4x512xbf16>,
    return
  }
  func.func @transform_0(%arg0: i32) -> (i32, i32) {
    %c0_i32 = arith.constant 0 : i32
    %c0_i32_0 = arith.constant 0 : i32
    return %arg0, %c0_i32 : i32, i32
  }
  func.func @transform_1(%arg0: i32) -> (i32, i32) {
    %c0_i32 = arith.constant 0 : i32
    %c0_i32_0 = arith.constant 0 : i32
    return %c0_i32, %arg0 : i32, i32
  }
  func.func @transform_2(%arg0: i32) -> (i32, i32) {
    %c0_i32 = arith.constant 0 : i32
    %c0_i32_0 = arith.constant 0 : i32
    %c0_i32_1 = arith.constant 0 : i32
    return %c0_i32, %c0_i32_0 : i32, i32
  }
  func.func @transform_3(%arg0: i32) -> (i32, i32) {
    %c0_i32 = arith.constant 0 : i32
    %c0_i32_0 = arith.constant 0 : i32
    %c0_i32_1 = arith.constant 0 : i32
    return %c0_i32, %c0_i32_0 : i32, i32
  }
  func.func @transform_4(%arg0: i32) -> (i32, i32) {
    %c0_i32 = arith.constant 0 : i32
    %c0_i32_0 = arith.constant 0 : i32
    %c0_i32_1 = arith.constant 0 : i32
    return %c0_i32, %c0_i32_0 : i32, i32
  }
  func.func @transform_5(%arg0: i32) -> (i32, i32) {
    %c0_i32 = arith.constant 0 : i32
    %c0_i32_0 = arith.constant 0 : i32
    %c0_i32_1 = arith.constant 0 : i32
    return %c0_i32, %c0_i32_0 : i32, i32
  }
  func.func @transform_6(%arg0: i32) -> (i32, i32) {
    %c0_i32 = arith.constant 0 : i32
    %c0_i32_0 = arith.constant 0 : i32
    %c0_i32_1 = arith.constant 0 : i32
    return %c0_i32, %c0_i32_0 : i32, i32
  }
  func.func @transform_7(%arg0: i32) -> (i32, i32) {
    %c0_i32 = arith.constant 0 : i32
    %c0_i32_0 = arith.constant 0 : i32
    %c0_i32_1 = arith.constant 0 : i32
    return %c0_i32, %c0_i32_0 : i32, i32
  }
  func.func @transform_8(%arg0: i32) -> (i32, i32) {
    %c0_i32 = arith.constant 0 : i32
    %c0_i32_0 = arith.constant 0 : i32
    %c0_i32_1 = arith.constant 0 : i32
    return %c0_i32, %c0_i32_0 : i32, i32
  }
  func.func @transform_9(%arg0: i32) -> (i32, i32) {
    %c0_i32 = arith.constant 0 : i32
    %c0_i32_0 = arith.constant 0 : i32
    %c0_i32_1 = arith.constant 0 : i32
    return %c0_i32, %c0_i32_0 : i32, i32
  }
  func.func @transform_10(%arg0: i32) -> (i32, i32) {
    %c0_i32 = arith.constant 0 : i32
    %c0_i32_0 = arith.constant 0 : i32
    return %c0_i32, %arg0 : i32, i32
  }
}

module attributes {stable_mosaic.version = 11 : i64} {
  func.func @_head_norm_kernel(%arg0: i32, %arg1: memref<2x16x64xf32, #tpu.memory_space<vmem>>, %arg2: memref<64x4xf32, #tpu.memory_space<vmem>>, %arg3: memref<4x64xf32, #tpu.memory_space<vmem>>, %arg4: memref<2x16x64xf32, #tpu.memory_space<vmem>>) attributes {dimension_semantics = [#tpu.dimension_semantics<parallel>], iteration_bounds = array<i64: 1>, scalar_prefetch = 0 : i64, scratch_operands = 0 : i64, tpu.core_type = #tpu.core_type<tc>, window_params = [{transform_indices = @transform_0, window_bounds = array<i64: 2, 16, 64>}, {pipeline_mode = #tpu.pipeline_mode<synchronous>, transform_indices = @transform_1, window_bounds = array<i64: 64, 4>}, {pipeline_mode = #tpu.pipeline_mode<synchronous>, transform_indices = @transform_2, window_bounds = array<i64: 4, 64>}, {transform_indices = @transform_3, window_bounds = array<i64: 2, 16, 64>}]} {
    %c0 = arith.constant 0 : index
    %c0_0 = arith.constant 0 : index
    %c0_1 = arith.constant 0 : index
    %0 = vector.load %arg1[%c0, %c0_0, %c0_1] : memref<2x16x64xf32, #tpu.memory_space<vmem>>, vector<2x16x64xf32>
    %c0_2 = arith.constant 0 : index
    %c0_3 = arith.constant 0 : index
    %1 = vector.load %arg2[%c0_2, %c0_3] : memref<64x4xf32, #tpu.memory_space<vmem>>, vector<64x4xf32>
    %c0_4 = arith.constant 0 : index
    %c0_5 = arith.constant 0 : index
    %2 = vector.load %arg3[%c0_4, %c0_5] : memref<4x64xf32, #tpu.memory_space<vmem>>, vector<4x64xf32>
    %cst = arith.constant dense<0.000000e+00> : vector<16x64xf32>
    %3 = vector.multi_reduction <add>, %0, %cst [0] : vector<2x16x64xf32> to vector<16x64xf32>
    %cst_6 = arith.constant dense<0.000000e+00> : vector<16x4xf32>
    %4 = tpu.matmul %3, %1, %cst_6 {dimension_numbers = #tpu.dot_dimension_numbers<[1], [0], [0], [1], [0, 0, 1, 1], [], []>} : vector<16x64xf32>, vector<64x4xf32>, vector<16x4xf32> -> vector<16x4xf32>
    %cst_7 = arith.constant 3.125000e-02 : f32
    %5 = vector.broadcast %cst_7 : f32 to vector<16x4xf32>
    %6 = arith.mulf %4, %5 : vector<16x4xf32>
    %cst_8 = arith.constant dense<0.000000e+00> : vector<16x64xf32>
    %7 = tpu.matmul %6, %2, %cst_8 {dimension_numbers = #tpu.dot_dimension_numbers<[1], [0], [0], [1], [0, 0, 1, 1], [], []>} : vector<16x4xf32>, vector<4x64xf32>, vector<16x64xf32> -> vector<16x64xf32>
    %8 = vector.shape_cast %7 : vector<16x64xf32> to vector<1x16x64xf32>
    %9 = vector.broadcast %8 : vector<1x16x64xf32> to vector<2x16x64xf32>
    %10 = arith.subf %0, %9 : vector<2x16x64xf32>
    %11 = arith.mulf %10, %10 : vector<2x16x64xf32>
    %cst_9 = arith.constant dense<0.000000e+00> : vector<16x64xf32>
    %12 = vector.multi_reduction <add>, %11, %cst_9 [0] : vector<2x16x64xf32> to vector<16x64xf32>
    %cst_10 = arith.constant dense<0.000000e+00> : vector<16x4xf32>
    %13 = tpu.matmul %12, %1, %cst_10 {dimension_numbers = #tpu.dot_dimension_numbers<[1], [0], [0], [1], [0, 0, 1, 1], [], []>} : vector<16x64xf32>, vector<64x4xf32>, vector<16x4xf32> -> vector<16x4xf32>
    %cst_11 = arith.constant 3.125000e-02 : f32
    %14 = vector.broadcast %cst_11 : f32 to vector<16x4xf32>
    %15 = arith.mulf %13, %14 : vector<16x4xf32>
    %cst_12 = arith.constant 9.99999974E-6 : f32
    %16 = vector.broadcast %cst_12 : f32 to vector<16x4xf32>
    %17 = arith.addf %16, %15 : vector<16x4xf32>
    %18 = math.rsqrt %17 : vector<16x4xf32>
    %cst_13 = arith.constant dense<0.000000e+00> : vector<16x64xf32>
    %19 = tpu.matmul %18, %2, %cst_13 {dimension_numbers = #tpu.dot_dimension_numbers<[1], [0], [0], [1], [0, 0, 1, 1], [], []>} : vector<16x4xf32>, vector<4x64xf32>, vector<16x64xf32> -> vector<16x64xf32>
    %20 = vector.shape_cast %19 : vector<16x64xf32> to vector<1x16x64xf32>
    %21 = vector.broadcast %20 : vector<1x16x64xf32> to vector<2x16x64xf32>
    %22 = arith.mulf %10, %21 : vector<2x16x64xf32>
    %cst_14 = arith.constant 0.000000e+00 : f32
    %23 = vector.broadcast %cst_14 : f32 to vector<2x16x64xf32>
    %24 = arith.cmpf oge, %22, %23 : vector<2x16x64xf32>
    %cst_15 = arith.constant 2.000000e-01 : f32
    %25 = vector.broadcast %cst_15 : f32 to vector<2x16x64xf32>
    %26 = arith.mulf %25, %22 : vector<2x16x64xf32>
    %27 = arith.select %24, %22, %26 : vector<2x16x64xi1>, vector<2x16x64xf32>
    %c0_16 = arith.constant 0 : index
    %c0_17 = arith.constant 0 : index
    %c0_18 = arith.constant 0 : index
    %28 = vector.load %arg4[%c0_16, %c0_17, %c0_18] : memref<2x16x64xf32, #tpu.memory_space<vmem>>, vector<2x16x64xf32>
    tpu.vector_store %arg4[%c0_16, %c0_17, %c0_18], %27 {strides = array<i32>} : memref<2x16x64xf32, #tpu.memory_space<vmem>>, vector<2x16x64xf32>,
    return
  }
  func.func @transform_0(%arg0: i32) -> (i32, i32, i32) {
    %c0_i32 = arith.constant 0 : i32
    %c0_i32_0 = arith.constant 0 : i32
    %c0_i32_1 = arith.constant 0 : i32
    return %c0_i32, %arg0, %c0_i32_0 : i32, i32, i32
  }
  func.func @transform_1(%arg0: i32) -> (i32, i32) {
    %c0_i32 = arith.constant 0 : i32
    %c0_i32_0 = arith.constant 0 : i32
    %c0_i32_1 = arith.constant 0 : i32
    return %c0_i32, %c0_i32_0 : i32, i32
  }
  func.func @transform_2(%arg0: i32) -> (i32, i32) {
    %c0_i32 = arith.constant 0 : i32
    %c0_i32_0 = arith.constant 0 : i32
    %c0_i32_1 = arith.constant 0 : i32
    return %c0_i32, %c0_i32_0 : i32, i32
  }
  func.func @transform_3(%arg0: i32) -> (i32, i32, i32) {
    %c0_i32 = arith.constant 0 : i32
    %c0_i32_0 = arith.constant 0 : i32
    %c0_i32_1 = arith.constant 0 : i32
    return %c0_i32, %arg0, %c0_i32_0 : i32, i32, i32
  }
}

module attributes {stable_mosaic.version = 11 : i64} {
  func.func @_gat_attn_kernel(%arg0: i32, %arg1: i32, %arg2: memref<1x16x32xf32, #tpu.memory_space<vmem>>, %arg3: memref<4x1x16x16xbf16, #tpu.memory_space<vmem>>, %arg4: memref<32x68xf32, #tpu.memory_space<vmem>>, %arg5: memref<1x68xf32, #tpu.memory_space<vmem>>, %arg6: memref<4x32xf32, #tpu.memory_space<vmem>>, %arg7: memref<4x1xf32, #tpu.memory_space<vmem>>, %arg8: memref<1x16x64xf32, #tpu.memory_space<vmem>>, %arg9: memref<16x64xbf16, #tpu.memory_space<vmem>>, %arg10: memref<16x4xf32, #tpu.memory_space<vmem>>, %arg11: memref<4x16xf32, #tpu.memory_space<vmem>>) attributes {dimension_semantics = [#tpu.dimension_semantics<parallel>, #tpu.dimension_semantics<arbitrary>], iteration_bounds = array<i64: 2, 1>, scalar_prefetch = 0 : i64, scratch_operands = 3 : i64, tpu.core_type = #tpu.core_type<tc>, window_params = [{transform_indices = @transform_0, window_bounds = array<i64: 1, 16, 32>}, {transform_indices = @transform_1, window_bounds = array<i64: 4, 1, 16, 16>}, {pipeline_mode = #tpu.pipeline_mode<synchronous>, transform_indices = @transform_2, window_bounds = array<i64: 32, 68>}, {pipeline_mode = #tpu.pipeline_mode<synchronous>, transform_indices = @transform_3, window_bounds = array<i64: 1, 68>}, {pipeline_mode = #tpu.pipeline_mode<synchronous>, transform_indices = @transform_4, window_bounds = array<i64: 4, 32>}, {pipeline_mode = #tpu.pipeline_mode<synchronous>, transform_indices = @transform_5, window_bounds = array<i64: 4, 1>}, {transform_indices = @transform_6, window_bounds = array<i64: 1, 16, 64>}]} {
    %c0_i32 = arith.constant 0 : i32
    %0 = arith.cmpi eq, %arg1, %c0_i32 : i32
    %1 = arith.extui %0 : i1 to i32
    %c0_i32_0 = arith.constant 0 : i32
    %2 = arith.cmpi ne, %1, %c0_i32_0 : i32
    scf.if %2 {
      %c0_58 = arith.constant 0 : index
      %c0_59 = arith.constant 0 : index
      %c0_60 = arith.constant 0 : index
      %127 = vector.load %arg2[%c0_58, %c0_59, %c0_60] : memref<1x16x32xf32, #tpu.memory_space<vmem>>, vector<1x16x32xf32>
      %128 = vector.shape_cast %127 : vector<1x16x32xf32> to vector<16x32xf32>
      %129 = arith.truncf %128 : vector<16x32xf32> to vector<16x32xbf16>
      %c0_61 = arith.constant 0 : index
      %c0_62 = arith.constant 0 : index
      %130 = vector.load %arg4[%c0_61, %c0_62] : memref<32x68xf32, #tpu.memory_space<vmem>>, vector<32x68xf32>
      %131 = arith.truncf %130 : vector<32x68xf32> to vector<32x68xbf16>
      %cst_63 = arith.constant dense<0.000000e+00> : vector<16x68xf32>
      %132 = tpu.matmul %129, %131, %cst_63 {dimension_numbers = #tpu.dot_dimension_numbers<[1], [0], [0], [1], [0, 0, 1, 1], [], []>} : vector<16x32xbf16>, vector<32x68xbf16>, vector<16x68xf32> -> vector<16x68xf32>
      %c0_64 = arith.constant 0 : index
      %c0_65 = arith.constant 0 : index
      %133 = vector.load %arg5[%c0_64, %c0_65] : memref<1x68xf32, #tpu.memory_space<vmem>>, vector<1x68xf32>
      %134 = vector.broadcast %133 : vector<1x68xf32> to vector<16x68xf32>
      %135 = arith.addf %132, %134 : vector<16x68xf32>
      %136 = vector.extract_strided_slice %135 {offsets = [0, 0], sizes = [16, 64], strides = [1, 1]} : vector<16x68xf32> to vector<16x64xf32>
      %137 = arith.truncf %136 : vector<16x64xf32> to vector<16x64xbf16>
      %c0_66 = arith.constant 0 : index
      %c0_67 = arith.constant 0 : index
      %138 = vector.load %arg9[%c0_66, %c0_67] : memref<16x64xbf16, #tpu.memory_space<vmem>>, vector<16x64xbf16>
      tpu.vector_store %arg9[%c0_66, %c0_67], %137 {strides = array<i32>} : memref<16x64xbf16, #tpu.memory_space<vmem>>, vector<16x64xbf16>,
      %139 = vector.extract_strided_slice %135 {offsets = [0, 64], sizes = [16, 4], strides = [1, 1]} : vector<16x68xf32> to vector<16x4xf32>
      %c0_68 = arith.constant 0 : index
      %c0_69 = arith.constant 0 : index
      %140 = vector.load %arg10[%c0_68, %c0_69] : memref<16x4xf32, #tpu.memory_space<vmem>>, vector<16x4xf32>
      tpu.vector_store %arg10[%c0_68, %c0_69], %139 {strides = array<i32>} : memref<16x4xf32, #tpu.memory_space<vmem>>, vector<16x4xf32>,
      %c0_70 = arith.constant 0 : index
      %c0_71 = arith.constant 0 : index
      %141 = vector.load %arg6[%c0_70, %c0_71] : memref<4x32xf32, #tpu.memory_space<vmem>>, vector<4x32xf32>
      %142 = arith.truncf %141 : vector<4x32xf32> to vector<4x32xbf16>
      %cst_72 = arith.constant dense<0.000000e+00> : vector<4x16xf32>
      %143 = tpu.matmul %142, %129, %cst_72 {dimension_numbers = #tpu.dot_dimension_numbers<[1], [1], [0], [0], [0, 0, 1, 0], [], []>} : vector<4x32xbf16>, vector<16x32xbf16>, vector<4x16xf32> -> vector<4x16xf32>
      %c0_73 = arith.constant 0 : index
      %c0_74 = arith.constant 0 : index
      %144 = vector.load %arg7[%c0_73, %c0_74] : memref<4x1xf32, #tpu.memory_space<vmem>>, vector<4x1xf32>
      %145 = vector.broadcast %144 : vector<4x1xf32> to vector<4x16xf32>
      %146 = arith.addf %143, %145 : vector<4x16xf32>
      %c0_75 = arith.constant 0 : index
      %c0_76 = arith.constant 0 : index
      %147 = vector.load %arg11[%c0_75, %c0_76] : memref<4x16xf32, #tpu.memory_space<vmem>>, vector<4x16xf32>
      tpu.vector_store %arg11[%c0_75, %c0_76], %146 {strides = array<i32>} : memref<4x16xf32, #tpu.memory_space<vmem>>, vector<4x16xf32>,
    } else {
    }
    %c16_i32 = arith.constant 16 : i32
    %3 = arith.muli %arg1, %c16_i32 : i32
    %4 = tpu.assume_multiple %3, 16 : i32
    %5 = arith.index_cast %4 : i32 to index
    %c0 = arith.constant 0 : index
    %6 = vector.load %arg10[%5, %c0] : memref<16x4xf32, #tpu.memory_space<vmem>>, vector<16x4xf32>
    %7 = vector.extract_strided_slice %6 {offsets = [0, 0], sizes = [16, 1], strides = [1, 1]} : vector<16x4xf32> to vector<16x1xf32>
    %c0_1 = arith.constant 0 : index
    %c0_2 = arith.constant 0 : index
    %8 = vector.load %arg11[%c0_1, %c0_2] : memref<4x16xf32, #tpu.memory_space<vmem>>, vector<1x16xf32>
    %9 = vector.broadcast %7 : vector<16x1xf32> to vector<16x16xf32>
    %10 = vector.broadcast %8 : vector<1x16xf32> to vector<16x16xf32>
    %11 = arith.addf %9, %10 : vector<16x16xf32>
    %cst = arith.constant 0.000000e+00 : f32
    %12 = vector.broadcast %cst : f32 to vector<16x16xf32>
    %13 = arith.cmpf oge, %11, %12 : vector<16x16xf32>
    %cst_3 = arith.constant 2.000000e-01 : f32
    %14 = vector.broadcast %cst_3 : f32 to vector<16x16xf32>
    %15 = arith.mulf %14, %11 : vector<16x16xf32>
    %16 = arith.select %13, %11, %15 : vector<16x16xi1>, vector<16x16xf32>
    %c0_4 = arith.constant 0 : index
    %c0_5 = arith.constant 0 : index
    %c0_6 = arith.constant 0 : index
    %c0_7 = arith.constant 0 : index
    %17 = vector.load %arg3[%c0_4, %c0_5, %c0_6, %c0_7] : memref<4x1x16x16xbf16, #tpu.memory_space<vmem>>, vector<1x1x16x16xbf16>
    %18 = vector.shape_cast %17 : vector<1x1x16x16xbf16> to vector<16x16xbf16>
    %19 = arith.extf %18 : vector<16x16xbf16> to vector<16x16xf32>
    %20 = arith.addf %16, %19 : vector<16x16xf32>
    %cst_8 = arith.constant dense<0xFF800000> : vector<16xf32>
    %21 = vector.multi_reduction <maximumf>, %20, %cst_8 [1] : vector<16x16xf32> to vector<16xf32>
    %22 = vector.shape_cast %21 : vector<16xf32> to vector<16x1xf32>
    %23 = vector.broadcast %22 : vector<16x1xf32> to vector<16x16xf32>
    %24 = arith.subf %20, %23 : vector<16x16xf32>
    %25 = math.exp %24 : vector<16x16xf32>
    %cst_9 = arith.constant dense<0.000000e+00> : vector<16xf32>
    %26 = vector.multi_reduction <add>, %25, %cst_9 [1] : vector<16x16xf32> to vector<16xf32>
    %27 = vector.shape_cast %26 : vector<16xf32> to vector<16x1xf32>
    %28 = tpu.reciprocal %27 {approx = true} : vector<16x1xf32> -> vector<16x1xf32>
    %29 = vector.broadcast %28 : vector<16x1xf32> to vector<16x16xf32>
    %30 = arith.mulf %25, %29 : vector<16x16xf32>
    %31 = arith.truncf %30 : vector<16x16xf32> to vector<16x16xbf16>
    %c0_10 = arith.constant 0 : index
    %c0_11 = arith.constant 0 : index
    %32 = vector.load %arg9[%c0_10, %c0_11] : memref<16x64xbf16, #tpu.memory_space<vmem>>, vector<16x16xbf16>
    %cst_12 = arith.constant dense<0.000000e+00> : vector<16x16xf32>
    %33 = tpu.matmul %31, %32, %cst_12 {dimension_numbers = #tpu.dot_dimension_numbers<[1], [0], [0], [1], [0, 0, 1, 1], [], []>} : vector<16x16xbf16>, vector<16x16xbf16>, vector<16x16xf32> -> vector<16x16xf32>
    %c0_13 = arith.constant 0 : index
    %c0_14 = arith.constant 0 : index
    %c0_15 = arith.constant 0 : index
    %34 = vector.load %arg8[%c0_13, %c0_14, %c0_15] : memref<1x16x64xf32, #tpu.memory_space<vmem>>, vector<1x16x16xf32>
    %35 = vector.shape_cast %34 : vector<1x16x16xf32> to vector<16x16xf32>
    %36 = vector.shape_cast %33 : vector<16x16xf32> to vector<1x16x16xf32>
    tpu.vector_store %arg8[%c0_13, %c0_14, %c0_15], %36 {strides = array<i32>} : memref<1x16x64xf32, #tpu.memory_space<vmem>>, vector<1x16x16xf32>,
    %37 = vector.extract_strided_slice %6 {offsets = [0, 1], sizes = [16, 1], strides = [1, 1]} : vector<16x4xf32> to vector<16x1xf32>
    %c1 = arith.constant 1 : index
    %c0_16 = arith.constant 0 : index
    %38 = vector.load %arg11[%c1, %c0_16] : memref<4x16xf32, #tpu.memory_space<vmem>>, vector<1x16xf32>
    %39 = vector.broadcast %37 : vector<16x1xf32> to vector<16x16xf32>
    %40 = vector.broadcast %38 : vector<1x16xf32> to vector<16x16xf32>
    %41 = arith.addf %39, %40 : vector<16x16xf32>
    %cst_17 = arith.constant 0.000000e+00 : f32
    %42 = vector.broadcast %cst_17 : f32 to vector<16x16xf32>
    %43 = arith.cmpf oge, %41, %42 : vector<16x16xf32>
    %cst_18 = arith.constant 2.000000e-01 : f32
    %44 = vector.broadcast %cst_18 : f32 to vector<16x16xf32>
    %45 = arith.mulf %44, %41 : vector<16x16xf32>
    %46 = arith.select %43, %41, %45 : vector<16x16xi1>, vector<16x16xf32>
    %c1_19 = arith.constant 1 : index
    %c0_20 = arith.constant 0 : index
    %c0_21 = arith.constant 0 : index
    %c0_22 = arith.constant 0 : index
    %47 = vector.load %arg3[%c1_19, %c0_20, %c0_21, %c0_22] : memref<4x1x16x16xbf16, #tpu.memory_space<vmem>>, vector<1x1x16x16xbf16>
    %48 = vector.shape_cast %47 : vector<1x1x16x16xbf16> to vector<16x16xbf16>
    %49 = arith.extf %48 : vector<16x16xbf16> to vector<16x16xf32>
    %50 = arith.addf %46, %49 : vector<16x16xf32>
    %cst_23 = arith.constant dense<0xFF800000> : vector<16xf32>
    %51 = vector.multi_reduction <maximumf>, %50, %cst_23 [1] : vector<16x16xf32> to vector<16xf32>
    %52 = vector.shape_cast %51 : vector<16xf32> to vector<16x1xf32>
    %53 = vector.broadcast %52 : vector<16x1xf32> to vector<16x16xf32>
    %54 = arith.subf %50, %53 : vector<16x16xf32>
    %55 = math.exp %54 : vector<16x16xf32>
    %cst_24 = arith.constant dense<0.000000e+00> : vector<16xf32>
    %56 = vector.multi_reduction <add>, %55, %cst_24 [1] : vector<16x16xf32> to vector<16xf32>
    %57 = vector.shape_cast %56 : vector<16xf32> to vector<16x1xf32>
    %58 = tpu.reciprocal %57 {approx = true} : vector<16x1xf32> -> vector<16x1xf32>
    %59 = vector.broadcast %58 : vector<16x1xf32> to vector<16x16xf32>
    %60 = arith.mulf %55, %59 : vector<16x16xf32>
    %61 = arith.truncf %60 : vector<16x16xf32> to vector<16x16xbf16>
    %c0_25 = arith.constant 0 : index
    %c16 = arith.constant 16 : index
    %62 = vector.load %arg9[%c0_25, %c16] : memref<16x64xbf16, #tpu.memory_space<vmem>>, vector<16x16xbf16>
    %cst_26 = arith.constant dense<0.000000e+00> : vector<16x16xf32>
    %63 = tpu.matmul %61, %62, %cst_26 {dimension_numbers = #tpu.dot_dimension_numbers<[1], [0], [0], [1], [0, 0, 1, 1], [], []>} : vector<16x16xbf16>, vector<16x16xbf16>, vector<16x16xf32> -> vector<16x16xf32>
    %c0_27 = arith.constant 0 : index
    %c0_28 = arith.constant 0 : index
    %c16_29 = arith.constant 16 : index
    %64 = vector.load %arg8[%c0_27, %c0_28, %c16_29] : memref<1x16x64xf32, #tpu.memory_space<vmem>>, vector<1x16x16xf32>
    %65 = vector.shape_cast %64 : vector<1x16x16xf32> to vector<16x16xf32>
    %66 = vector.shape_cast %63 : vector<16x16xf32> to vector<1x16x16xf32>
    tpu.vector_store %arg8[%c0_27, %c0_28, %c16_29], %66 {strides = array<i32>} : memref<1x16x64xf32, #tpu.memory_space<vmem>>, vector<1x16x16xf32>,
    %67 = vector.extract_strided_slice %6 {offsets = [0, 2], sizes = [16, 1], strides = [1, 1]} : vector<16x4xf32> to vector<16x1xf32>
    %c2 = arith.constant 2 : index
    %c0_30 = arith.constant 0 : index
    %68 = vector.load %arg11[%c2, %c0_30] : memref<4x16xf32, #tpu.memory_space<vmem>>, vector<1x16xf32>
    %69 = vector.broadcast %67 : vector<16x1xf32> to vector<16x16xf32>
    %70 = vector.broadcast %68 : vector<1x16xf32> to vector<16x16xf32>
    %71 = arith.addf %69, %70 : vector<16x16xf32>
    %cst_31 = arith.constant 0.000000e+00 : f32
    %72 = vector.broadcast %cst_31 : f32 to vector<16x16xf32>
    %73 = arith.cmpf oge, %71, %72 : vector<16x16xf32>
    %cst_32 = arith.constant 2.000000e-01 : f32
    %74 = vector.broadcast %cst_32 : f32 to vector<16x16xf32>
    %75 = arith.mulf %74, %71 : vector<16x16xf32>
    %76 = arith.select %73, %71, %75 : vector<16x16xi1>, vector<16x16xf32>
    %c2_33 = arith.constant 2 : index
    %c0_34 = arith.constant 0 : index
    %c0_35 = arith.constant 0 : index
    %c0_36 = arith.constant 0 : index
    %77 = vector.load %arg3[%c2_33, %c0_34, %c0_35, %c0_36] : memref<4x1x16x16xbf16, #tpu.memory_space<vmem>>, vector<1x1x16x16xbf16>
    %78 = vector.shape_cast %77 : vector<1x1x16x16xbf16> to vector<16x16xbf16>
    %79 = arith.extf %78 : vector<16x16xbf16> to vector<16x16xf32>
    %80 = arith.addf %76, %79 : vector<16x16xf32>
    %cst_37 = arith.constant dense<0xFF800000> : vector<16xf32>
    %81 = vector.multi_reduction <maximumf>, %80, %cst_37 [1] : vector<16x16xf32> to vector<16xf32>
    %82 = vector.shape_cast %81 : vector<16xf32> to vector<16x1xf32>
    %83 = vector.broadcast %82 : vector<16x1xf32> to vector<16x16xf32>
    %84 = arith.subf %80, %83 : vector<16x16xf32>
    %85 = math.exp %84 : vector<16x16xf32>
    %cst_38 = arith.constant dense<0.000000e+00> : vector<16xf32>
    %86 = vector.multi_reduction <add>, %85, %cst_38 [1] : vector<16x16xf32> to vector<16xf32>
    %87 = vector.shape_cast %86 : vector<16xf32> to vector<16x1xf32>
    %88 = tpu.reciprocal %87 {approx = true} : vector<16x1xf32> -> vector<16x1xf32>
    %89 = vector.broadcast %88 : vector<16x1xf32> to vector<16x16xf32>
    %90 = arith.mulf %85, %89 : vector<16x16xf32>
    %91 = arith.truncf %90 : vector<16x16xf32> to vector<16x16xbf16>
    %c0_39 = arith.constant 0 : index
    %c32 = arith.constant 32 : index
    %92 = vector.load %arg9[%c0_39, %c32] : memref<16x64xbf16, #tpu.memory_space<vmem>>, vector<16x16xbf16>
    %cst_40 = arith.constant dense<0.000000e+00> : vector<16x16xf32>
    %93 = tpu.matmul %91, %92, %cst_40 {dimension_numbers = #tpu.dot_dimension_numbers<[1], [0], [0], [1], [0, 0, 1, 1], [], []>} : vector<16x16xbf16>, vector<16x16xbf16>, vector<16x16xf32> -> vector<16x16xf32>
    %c0_41 = arith.constant 0 : index
    %c0_42 = arith.constant 0 : index
    %c32_43 = arith.constant 32 : index
    %94 = vector.load %arg8[%c0_41, %c0_42, %c32_43] : memref<1x16x64xf32, #tpu.memory_space<vmem>>, vector<1x16x16xf32>
    %95 = vector.shape_cast %94 : vector<1x16x16xf32> to vector<16x16xf32>
    %96 = vector.shape_cast %93 : vector<16x16xf32> to vector<1x16x16xf32>
    tpu.vector_store %arg8[%c0_41, %c0_42, %c32_43], %96 {strides = array<i32>} : memref<1x16x64xf32, #tpu.memory_space<vmem>>, vector<1x16x16xf32>,
    %97 = vector.extract_strided_slice %6 {offsets = [0, 3], sizes = [16, 1], strides = [1, 1]} : vector<16x4xf32> to vector<16x1xf32>
    %c3 = arith.constant 3 : index
    %c0_44 = arith.constant 0 : index
    %98 = vector.load %arg11[%c3, %c0_44] : memref<4x16xf32, #tpu.memory_space<vmem>>, vector<1x16xf32>
    %99 = vector.broadcast %97 : vector<16x1xf32> to vector<16x16xf32>
    %100 = vector.broadcast %98 : vector<1x16xf32> to vector<16x16xf32>
    %101 = arith.addf %99, %100 : vector<16x16xf32>
    %cst_45 = arith.constant 0.000000e+00 : f32
    %102 = vector.broadcast %cst_45 : f32 to vector<16x16xf32>
    %103 = arith.cmpf oge, %101, %102 : vector<16x16xf32>
    %cst_46 = arith.constant 2.000000e-01 : f32
    %104 = vector.broadcast %cst_46 : f32 to vector<16x16xf32>
    %105 = arith.mulf %104, %101 : vector<16x16xf32>
    %106 = arith.select %103, %101, %105 : vector<16x16xi1>, vector<16x16xf32>
    %c3_47 = arith.constant 3 : index
    %c0_48 = arith.constant 0 : index
    %c0_49 = arith.constant 0 : index
    %c0_50 = arith.constant 0 : index
    %107 = vector.load %arg3[%c3_47, %c0_48, %c0_49, %c0_50] : memref<4x1x16x16xbf16, #tpu.memory_space<vmem>>, vector<1x1x16x16xbf16>
    %108 = vector.shape_cast %107 : vector<1x1x16x16xbf16> to vector<16x16xbf16>
    %109 = arith.extf %108 : vector<16x16xbf16> to vector<16x16xf32>
    %110 = arith.addf %106, %109 : vector<16x16xf32>
    %cst_51 = arith.constant dense<0xFF800000> : vector<16xf32>
    %111 = vector.multi_reduction <maximumf>, %110, %cst_51 [1] : vector<16x16xf32> to vector<16xf32>
    %112 = vector.shape_cast %111 : vector<16xf32> to vector<16x1xf32>
    %113 = vector.broadcast %112 : vector<16x1xf32> to vector<16x16xf32>
    %114 = arith.subf %110, %113 : vector<16x16xf32>
    %115 = math.exp %114 : vector<16x16xf32>
    %cst_52 = arith.constant dense<0.000000e+00> : vector<16xf32>
    %116 = vector.multi_reduction <add>, %115, %cst_52 [1] : vector<16x16xf32> to vector<16xf32>
    %117 = vector.shape_cast %116 : vector<16xf32> to vector<16x1xf32>
    %118 = tpu.reciprocal %117 {approx = true} : vector<16x1xf32> -> vector<16x1xf32>
    %119 = vector.broadcast %118 : vector<16x1xf32> to vector<16x16xf32>
    %120 = arith.mulf %115, %119 : vector<16x16xf32>
    %121 = arith.truncf %120 : vector<16x16xf32> to vector<16x16xbf16>
    %c0_53 = arith.constant 0 : index
    %c48 = arith.constant 48 : index
    %122 = vector.load %arg9[%c0_53, %c48] : memref<16x64xbf16, #tpu.memory_space<vmem>>, vector<16x16xbf16>
    %cst_54 = arith.constant dense<0.000000e+00> : vector<16x16xf32>
    %123 = tpu.matmul %121, %122, %cst_54 {dimension_numbers = #tpu.dot_dimension_numbers<[1], [0], [0], [1], [0, 0, 1, 1], [], []>} : vector<16x16xbf16>, vector<16x16xbf16>, vector<16x16xf32> -> vector<16x16xf32>
    %c0_55 = arith.constant 0 : index
    %c0_56 = arith.constant 0 : index
    %c48_57 = arith.constant 48 : index
    %124 = vector.load %arg8[%c0_55, %c0_56, %c48_57] : memref<1x16x64xf32, #tpu.memory_space<vmem>>, vector<1x16x16xf32>
    %125 = vector.shape_cast %124 : vector<1x16x16xf32> to vector<16x16xf32>
    %126 = vector.shape_cast %123 : vector<16x16xf32> to vector<1x16x16xf32>
    tpu.vector_store %arg8[%c0_55, %c0_56, %c48_57], %126 {strides = array<i32>} : memref<1x16x64xf32, #tpu.memory_space<vmem>>, vector<1x16x16xf32>,
    return
  }
  func.func @transform_0(%arg0: i32, %arg1: i32) -> (i32, i32, i32) {
    %c0_i32 = arith.constant 0 : i32
    %c0_i32_0 = arith.constant 0 : i32
    %c0_i32_1 = arith.constant 0 : i32
    return %arg0, %c0_i32, %c0_i32_0 : i32, i32, i32
  }
  func.func @transform_1(%arg0: i32, %arg1: i32) -> (i32, i32, i32, i32) {
    %c0_i32 = arith.constant 0 : i32
    %c0_i32_0 = arith.constant 0 : i32
    %c0_i32_1 = arith.constant 0 : i32
    return %c0_i32, %arg0, %arg1, %c0_i32_0 : i32, i32, i32, i32
  }
  func.func @transform_2(%arg0: i32, %arg1: i32) -> (i32, i32) {
    %c0_i32 = arith.constant 0 : i32
    %c0_i32_0 = arith.constant 0 : i32
    %c0_i32_1 = arith.constant 0 : i32
    return %c0_i32, %c0_i32_0 : i32, i32
  }
  func.func @transform_3(%arg0: i32, %arg1: i32) -> (i32, i32) {
    %c0_i32 = arith.constant 0 : i32
    %c0_i32_0 = arith.constant 0 : i32
    %c0_i32_1 = arith.constant 0 : i32
    return %c0_i32, %c0_i32_0 : i32, i32
  }
  func.func @transform_4(%arg0: i32, %arg1: i32) -> (i32, i32) {
    %c0_i32 = arith.constant 0 : i32
    %c0_i32_0 = arith.constant 0 : i32
    %c0_i32_1 = arith.constant 0 : i32
    return %c0_i32, %c0_i32_0 : i32, i32
  }
  func.func @transform_5(%arg0: i32, %arg1: i32) -> (i32, i32) {
    %c0_i32 = arith.constant 0 : i32
    %c0_i32_0 = arith.constant 0 : i32
    %c0_i32_1 = arith.constant 0 : i32
    return %c0_i32, %c0_i32_0 : i32, i32
  }
  func.func @transform_6(%arg0: i32, %arg1: i32) -> (i32, i32, i32) {
    %c0_i32 = arith.constant 0 : i32
    %c0_i32_0 = arith.constant 0 : i32
    return %arg0, %arg1, %c0_i32 : i32, i32, i32
  }
}

module attributes {stable_mosaic.version = 11 : i64} {
  func.func @_gat_attn_kernel(%arg0: i32, %arg1: i32, %arg2: memref<1x16x64xf32, #tpu.memory_space<vmem>>, %arg3: memref<2x1x16x16xbf16, #tpu.memory_space<vmem>>, %arg4: memref<64x34xf32, #tpu.memory_space<vmem>>, %arg5: memref<1x34xf32, #tpu.memory_space<vmem>>, %arg6: memref<2x64xf32, #tpu.memory_space<vmem>>, %arg7: memref<2x1xf32, #tpu.memory_space<vmem>>, %arg8: memref<1x16x32xf32, #tpu.memory_space<vmem>>, %arg9: memref<16x32xbf16, #tpu.memory_space<vmem>>, %arg10: memref<16x2xf32, #tpu.memory_space<vmem>>, %arg11: memref<2x16xf32, #tpu.memory_space<vmem>>) attributes {dimension_semantics = [#tpu.dimension_semantics<parallel>, #tpu.dimension_semantics<arbitrary>], iteration_bounds = array<i64: 2, 1>, scalar_prefetch = 0 : i64, scratch_operands = 3 : i64, tpu.core_type = #tpu.core_type<tc>, window_params = [{transform_indices = @transform_0, window_bounds = array<i64: 1, 16, 64>}, {transform_indices = @transform_1, window_bounds = array<i64: 2, 1, 16, 16>}, {pipeline_mode = #tpu.pipeline_mode<synchronous>, transform_indices = @transform_2, window_bounds = array<i64: 64, 34>}, {pipeline_mode = #tpu.pipeline_mode<synchronous>, transform_indices = @transform_3, window_bounds = array<i64: 1, 34>}, {pipeline_mode = #tpu.pipeline_mode<synchronous>, transform_indices = @transform_4, window_bounds = array<i64: 2, 64>}, {pipeline_mode = #tpu.pipeline_mode<synchronous>, transform_indices = @transform_5, window_bounds = array<i64: 2, 1>}, {transform_indices = @transform_6, window_bounds = array<i64: 1, 16, 32>}]} {
    %c0_i32 = arith.constant 0 : i32
    %0 = arith.cmpi eq, %arg1, %c0_i32 : i32
    %1 = arith.extui %0 : i1 to i32
    %c0_i32_0 = arith.constant 0 : i32
    %2 = arith.cmpi ne, %1, %c0_i32_0 : i32
    scf.if %2 {
      %c0_30 = arith.constant 0 : index
      %c0_31 = arith.constant 0 : index
      %c0_32 = arith.constant 0 : index
      %67 = vector.load %arg2[%c0_30, %c0_31, %c0_32] : memref<1x16x64xf32, #tpu.memory_space<vmem>>, vector<1x16x64xf32>
      %68 = vector.shape_cast %67 : vector<1x16x64xf32> to vector<16x64xf32>
      %69 = arith.truncf %68 : vector<16x64xf32> to vector<16x64xbf16>
      %c0_33 = arith.constant 0 : index
      %c0_34 = arith.constant 0 : index
      %70 = vector.load %arg4[%c0_33, %c0_34] : memref<64x34xf32, #tpu.memory_space<vmem>>, vector<64x34xf32>
      %71 = arith.truncf %70 : vector<64x34xf32> to vector<64x34xbf16>
      %cst_35 = arith.constant dense<0.000000e+00> : vector<16x34xf32>
      %72 = tpu.matmul %69, %71, %cst_35 {dimension_numbers = #tpu.dot_dimension_numbers<[1], [0], [0], [1], [0, 0, 1, 1], [], []>} : vector<16x64xbf16>, vector<64x34xbf16>, vector<16x34xf32> -> vector<16x34xf32>
      %c0_36 = arith.constant 0 : index
      %c0_37 = arith.constant 0 : index
      %73 = vector.load %arg5[%c0_36, %c0_37] : memref<1x34xf32, #tpu.memory_space<vmem>>, vector<1x34xf32>
      %74 = vector.broadcast %73 : vector<1x34xf32> to vector<16x34xf32>
      %75 = arith.addf %72, %74 : vector<16x34xf32>
      %76 = vector.extract_strided_slice %75 {offsets = [0, 0], sizes = [16, 32], strides = [1, 1]} : vector<16x34xf32> to vector<16x32xf32>
      %77 = arith.truncf %76 : vector<16x32xf32> to vector<16x32xbf16>
      %c0_38 = arith.constant 0 : index
      %c0_39 = arith.constant 0 : index
      %78 = vector.load %arg9[%c0_38, %c0_39] : memref<16x32xbf16, #tpu.memory_space<vmem>>, vector<16x32xbf16>
      tpu.vector_store %arg9[%c0_38, %c0_39], %77 {strides = array<i32>} : memref<16x32xbf16, #tpu.memory_space<vmem>>, vector<16x32xbf16>,
      %79 = vector.extract_strided_slice %75 {offsets = [0, 32], sizes = [16, 2], strides = [1, 1]} : vector<16x34xf32> to vector<16x2xf32>
      %c0_40 = arith.constant 0 : index
      %c0_41 = arith.constant 0 : index
      %80 = vector.load %arg10[%c0_40, %c0_41] : memref<16x2xf32, #tpu.memory_space<vmem>>, vector<16x2xf32>
      tpu.vector_store %arg10[%c0_40, %c0_41], %79 {strides = array<i32>} : memref<16x2xf32, #tpu.memory_space<vmem>>, vector<16x2xf32>,
      %c0_42 = arith.constant 0 : index
      %c0_43 = arith.constant 0 : index
      %81 = vector.load %arg6[%c0_42, %c0_43] : memref<2x64xf32, #tpu.memory_space<vmem>>, vector<2x64xf32>
      %82 = arith.truncf %81 : vector<2x64xf32> to vector<2x64xbf16>
      %cst_44 = arith.constant dense<0.000000e+00> : vector<2x16xf32>
      %83 = tpu.matmul %82, %69, %cst_44 {dimension_numbers = #tpu.dot_dimension_numbers<[1], [1], [0], [0], [0, 0, 1, 0], [], []>} : vector<2x64xbf16>, vector<16x64xbf16>, vector<2x16xf32> -> vector<2x16xf32>
      %c0_45 = arith.constant 0 : index
      %c0_46 = arith.constant 0 : index
      %84 = vector.load %arg7[%c0_45, %c0_46] : memref<2x1xf32, #tpu.memory_space<vmem>>, vector<2x1xf32>
      %85 = vector.broadcast %84 : vector<2x1xf32> to vector<2x16xf32>
      %86 = arith.addf %83, %85 : vector<2x16xf32>
      %c0_47 = arith.constant 0 : index
      %c0_48 = arith.constant 0 : index
      %87 = vector.load %arg11[%c0_47, %c0_48] : memref<2x16xf32, #tpu.memory_space<vmem>>, vector<2x16xf32>
      tpu.vector_store %arg11[%c0_47, %c0_48], %86 {strides = array<i32>} : memref<2x16xf32, #tpu.memory_space<vmem>>, vector<2x16xf32>,
    } else {
    }
    %c16_i32 = arith.constant 16 : i32
    %3 = arith.muli %arg1, %c16_i32 : i32
    %4 = tpu.assume_multiple %3, 16 : i32
    %5 = arith.index_cast %4 : i32 to index
    %c0 = arith.constant 0 : index
    %6 = vector.load %arg10[%5, %c0] : memref<16x2xf32, #tpu.memory_space<vmem>>, vector<16x2xf32>
    %7 = vector.extract_strided_slice %6 {offsets = [0, 0], sizes = [16, 1], strides = [1, 1]} : vector<16x2xf32> to vector<16x1xf32>
    %c0_1 = arith.constant 0 : index
    %c0_2 = arith.constant 0 : index
    %8 = vector.load %arg11[%c0_1, %c0_2] : memref<2x16xf32, #tpu.memory_space<vmem>>, vector<1x16xf32>
    %9 = vector.broadcast %7 : vector<16x1xf32> to vector<16x16xf32>
    %10 = vector.broadcast %8 : vector<1x16xf32> to vector<16x16xf32>
    %11 = arith.addf %9, %10 : vector<16x16xf32>
    %cst = arith.constant 0.000000e+00 : f32
    %12 = vector.broadcast %cst : f32 to vector<16x16xf32>
    %13 = arith.cmpf oge, %11, %12 : vector<16x16xf32>
    %cst_3 = arith.constant 2.000000e-01 : f32
    %14 = vector.broadcast %cst_3 : f32 to vector<16x16xf32>
    %15 = arith.mulf %14, %11 : vector<16x16xf32>
    %16 = arith.select %13, %11, %15 : vector<16x16xi1>, vector<16x16xf32>
    %c0_4 = arith.constant 0 : index
    %c0_5 = arith.constant 0 : index
    %c0_6 = arith.constant 0 : index
    %c0_7 = arith.constant 0 : index
    %17 = vector.load %arg3[%c0_4, %c0_5, %c0_6, %c0_7] : memref<2x1x16x16xbf16, #tpu.memory_space<vmem>>, vector<1x1x16x16xbf16>
    %18 = vector.shape_cast %17 : vector<1x1x16x16xbf16> to vector<16x16xbf16>
    %19 = arith.extf %18 : vector<16x16xbf16> to vector<16x16xf32>
    %20 = arith.addf %16, %19 : vector<16x16xf32>
    %cst_8 = arith.constant dense<0xFF800000> : vector<16xf32>
    %21 = vector.multi_reduction <maximumf>, %20, %cst_8 [1] : vector<16x16xf32> to vector<16xf32>
    %22 = vector.shape_cast %21 : vector<16xf32> to vector<16x1xf32>
    %23 = vector.broadcast %22 : vector<16x1xf32> to vector<16x16xf32>
    %24 = arith.subf %20, %23 : vector<16x16xf32>
    %25 = math.exp %24 : vector<16x16xf32>
    %cst_9 = arith.constant dense<0.000000e+00> : vector<16xf32>
    %26 = vector.multi_reduction <add>, %25, %cst_9 [1] : vector<16x16xf32> to vector<16xf32>
    %27 = vector.shape_cast %26 : vector<16xf32> to vector<16x1xf32>
    %28 = tpu.reciprocal %27 {approx = true} : vector<16x1xf32> -> vector<16x1xf32>
    %29 = vector.broadcast %28 : vector<16x1xf32> to vector<16x16xf32>
    %30 = arith.mulf %25, %29 : vector<16x16xf32>
    %31 = arith.truncf %30 : vector<16x16xf32> to vector<16x16xbf16>
    %c0_10 = arith.constant 0 : index
    %c0_11 = arith.constant 0 : index
    %32 = vector.load %arg9[%c0_10, %c0_11] : memref<16x32xbf16, #tpu.memory_space<vmem>>, vector<16x16xbf16>
    %cst_12 = arith.constant dense<0.000000e+00> : vector<16x16xf32>
    %33 = tpu.matmul %31, %32, %cst_12 {dimension_numbers = #tpu.dot_dimension_numbers<[1], [0], [0], [1], [0, 0, 1, 1], [], []>} : vector<16x16xbf16>, vector<16x16xbf16>, vector<16x16xf32> -> vector<16x16xf32>
    %c0_13 = arith.constant 0 : index
    %c0_14 = arith.constant 0 : index
    %c0_15 = arith.constant 0 : index
    %34 = vector.load %arg8[%c0_13, %c0_14, %c0_15] : memref<1x16x32xf32, #tpu.memory_space<vmem>>, vector<1x16x16xf32>
    %35 = vector.shape_cast %34 : vector<1x16x16xf32> to vector<16x16xf32>
    %36 = vector.shape_cast %33 : vector<16x16xf32> to vector<1x16x16xf32>
    tpu.vector_store %arg8[%c0_13, %c0_14, %c0_15], %36 {strides = array<i32>} : memref<1x16x32xf32, #tpu.memory_space<vmem>>, vector<1x16x16xf32>,
    %37 = vector.extract_strided_slice %6 {offsets = [0, 1], sizes = [16, 1], strides = [1, 1]} : vector<16x2xf32> to vector<16x1xf32>
    %c1 = arith.constant 1 : index
    %c0_16 = arith.constant 0 : index
    %38 = vector.load %arg11[%c1, %c0_16] : memref<2x16xf32, #tpu.memory_space<vmem>>, vector<1x16xf32>
    %39 = vector.broadcast %37 : vector<16x1xf32> to vector<16x16xf32>
    %40 = vector.broadcast %38 : vector<1x16xf32> to vector<16x16xf32>
    %41 = arith.addf %39, %40 : vector<16x16xf32>
    %cst_17 = arith.constant 0.000000e+00 : f32
    %42 = vector.broadcast %cst_17 : f32 to vector<16x16xf32>
    %43 = arith.cmpf oge, %41, %42 : vector<16x16xf32>
    %cst_18 = arith.constant 2.000000e-01 : f32
    %44 = vector.broadcast %cst_18 : f32 to vector<16x16xf32>
    %45 = arith.mulf %44, %41 : vector<16x16xf32>
    %46 = arith.select %43, %41, %45 : vector<16x16xi1>, vector<16x16xf32>
    %c1_19 = arith.constant 1 : index
    %c0_20 = arith.constant 0 : index
    %c0_21 = arith.constant 0 : index
    %c0_22 = arith.constant 0 : index
    %47 = vector.load %arg3[%c1_19, %c0_20, %c0_21, %c0_22] : memref<2x1x16x16xbf16, #tpu.memory_space<vmem>>, vector<1x1x16x16xbf16>
    %48 = vector.shape_cast %47 : vector<1x1x16x16xbf16> to vector<16x16xbf16>
    %49 = arith.extf %48 : vector<16x16xbf16> to vector<16x16xf32>
    %50 = arith.addf %46, %49 : vector<16x16xf32>
    %cst_23 = arith.constant dense<0xFF800000> : vector<16xf32>
    %51 = vector.multi_reduction <maximumf>, %50, %cst_23 [1] : vector<16x16xf32> to vector<16xf32>
    %52 = vector.shape_cast %51 : vector<16xf32> to vector<16x1xf32>
    %53 = vector.broadcast %52 : vector<16x1xf32> to vector<16x16xf32>
    %54 = arith.subf %50, %53 : vector<16x16xf32>
    %55 = math.exp %54 : vector<16x16xf32>
    %cst_24 = arith.constant dense<0.000000e+00> : vector<16xf32>
    %56 = vector.multi_reduction <add>, %55, %cst_24 [1] : vector<16x16xf32> to vector<16xf32>
    %57 = vector.shape_cast %56 : vector<16xf32> to vector<16x1xf32>
    %58 = tpu.reciprocal %57 {approx = true} : vector<16x1xf32> -> vector<16x1xf32>
    %59 = vector.broadcast %58 : vector<16x1xf32> to vector<16x16xf32>
    %60 = arith.mulf %55, %59 : vector<16x16xf32>
    %61 = arith.truncf %60 : vector<16x16xf32> to vector<16x16xbf16>
    %c0_25 = arith.constant 0 : index
    %c16 = arith.constant 16 : index
    %62 = vector.load %arg9[%c0_25, %c16] : memref<16x32xbf16, #tpu.memory_space<vmem>>, vector<16x16xbf16>
    %cst_26 = arith.constant dense<0.000000e+00> : vector<16x16xf32>
    %63 = tpu.matmul %61, %62, %cst_26 {dimension_numbers = #tpu.dot_dimension_numbers<[1], [0], [0], [1], [0, 0, 1, 1], [], []>} : vector<16x16xbf16>, vector<16x16xbf16>, vector<16x16xf32> -> vector<16x16xf32>
    %c0_27 = arith.constant 0 : index
    %c0_28 = arith.constant 0 : index
    %c16_29 = arith.constant 16 : index
    %64 = vector.load %arg8[%c0_27, %c0_28, %c16_29] : memref<1x16x32xf32, #tpu.memory_space<vmem>>, vector<1x16x16xf32>
    %65 = vector.shape_cast %64 : vector<1x16x16xf32> to vector<16x16xf32>
    %66 = vector.shape_cast %63 : vector<16x16xf32> to vector<1x16x16xf32>
    tpu.vector_store %arg8[%c0_27, %c0_28, %c16_29], %66 {strides = array<i32>} : memref<1x16x32xf32, #tpu.memory_space<vmem>>, vector<1x16x16xf32>,
    return
  }
  func.func @transform_0(%arg0: i32, %arg1: i32) -> (i32, i32, i32) {
    %c0_i32 = arith.constant 0 : i32
    %c0_i32_0 = arith.constant 0 : i32
    %c0_i32_1 = arith.constant 0 : i32
    return %arg0, %c0_i32, %c0_i32_0 : i32, i32, i32
  }
  func.func @transform_1(%arg0: i32, %arg1: i32) -> (i32, i32, i32, i32) {
    %c0_i32 = arith.constant 0 : i32
    %c0_i32_0 = arith.constant 0 : i32
    %c0_i32_1 = arith.constant 0 : i32
    return %c0_i32, %arg0, %arg1, %c0_i32_0 : i32, i32, i32, i32
  }
  func.func @transform_2(%arg0: i32, %arg1: i32) -> (i32, i32) {
    %c0_i32 = arith.constant 0 : i32
    %c0_i32_0 = arith.constant 0 : i32
    %c0_i32_1 = arith.constant 0 : i32
    return %c0_i32, %c0_i32_0 : i32, i32
  }
  func.func @transform_3(%arg0: i32, %arg1: i32) -> (i32, i32) {
    %c0_i32 = arith.constant 0 : i32
    %c0_i32_0 = arith.constant 0 : i32
    %c0_i32_1 = arith.constant 0 : i32
    return %c0_i32, %c0_i32_0 : i32, i32
  }
  func.func @transform_4(%arg0: i32, %arg1: i32) -> (i32, i32) {
    %c0_i32 = arith.constant 0 : i32
    %c0_i32_0 = arith.constant 0 : i32
    %c0_i32_1 = arith.constant 0 : i32
    return %c0_i32, %c0_i32_0 : i32, i32
  }
  func.func @transform_5(%arg0: i32, %arg1: i32) -> (i32, i32) {
    %c0_i32 = arith.constant 0 : i32
    %c0_i32_0 = arith.constant 0 : i32
    %c0_i32_1 = arith.constant 0 : i32
    return %c0_i32, %c0_i32_0 : i32, i32
  }
  func.func @transform_6(%arg0: i32, %arg1: i32) -> (i32, i32, i32) {
    %c0_i32 = arith.constant 0 : i32
    %c0_i32_0 = arith.constant 0 : i32
    return %arg0, %arg1, %c0_i32 : i32, i32, i32
  }
}

module attributes {stable_mosaic.version = 11 : i64} {
  func.func @_head_norm_kernel(%arg0: i32, %arg1: memref<2x16x32xf32, #tpu.memory_space<vmem>>, %arg2: memref<32x2xf32, #tpu.memory_space<vmem>>, %arg3: memref<2x32xf32, #tpu.memory_space<vmem>>, %arg4: memref<32x16xf32, #tpu.memory_space<vmem>>, %arg5: memref<2x16x16xf32, #tpu.memory_space<vmem>>) attributes {dimension_semantics = [#tpu.dimension_semantics<parallel>], iteration_bounds = array<i64: 1>, scalar_prefetch = 0 : i64, scratch_operands = 0 : i64, tpu.core_type = #tpu.core_type<tc>, window_params = [{transform_indices = @transform_0, window_bounds = array<i64: 2, 16, 32>}, {pipeline_mode = #tpu.pipeline_mode<synchronous>, transform_indices = @transform_1, window_bounds = array<i64: 32, 2>}, {pipeline_mode = #tpu.pipeline_mode<synchronous>, transform_indices = @transform_2, window_bounds = array<i64: 2, 32>}, {pipeline_mode = #tpu.pipeline_mode<synchronous>, transform_indices = @transform_3, window_bounds = array<i64: 32, 16>}, {transform_indices = @transform_4, window_bounds = array<i64: 2, 16, 16>}]} {
    %c0 = arith.constant 0 : index
    %c0_0 = arith.constant 0 : index
    %c0_1 = arith.constant 0 : index
    %0 = vector.load %arg1[%c0, %c0_0, %c0_1] : memref<2x16x32xf32, #tpu.memory_space<vmem>>, vector<2x16x32xf32>
    %c0_2 = arith.constant 0 : index
    %c0_3 = arith.constant 0 : index
    %1 = vector.load %arg2[%c0_2, %c0_3] : memref<32x2xf32, #tpu.memory_space<vmem>>, vector<32x2xf32>
    %c0_4 = arith.constant 0 : index
    %c0_5 = arith.constant 0 : index
    %2 = vector.load %arg3[%c0_4, %c0_5] : memref<2x32xf32, #tpu.memory_space<vmem>>, vector<2x32xf32>
    %cst = arith.constant dense<0.000000e+00> : vector<16x32xf32>
    %3 = vector.multi_reduction <add>, %0, %cst [0] : vector<2x16x32xf32> to vector<16x32xf32>
    %cst_6 = arith.constant dense<0.000000e+00> : vector<16x2xf32>
    %4 = tpu.matmul %3, %1, %cst_6 {dimension_numbers = #tpu.dot_dimension_numbers<[1], [0], [0], [1], [0, 0, 1, 1], [], []>} : vector<16x32xf32>, vector<32x2xf32>, vector<16x2xf32> -> vector<16x2xf32>
    %cst_7 = arith.constant 3.125000e-02 : f32
    %5 = vector.broadcast %cst_7 : f32 to vector<16x2xf32>
    %6 = arith.mulf %4, %5 : vector<16x2xf32>
    %cst_8 = arith.constant dense<0.000000e+00> : vector<16x32xf32>
    %7 = tpu.matmul %6, %2, %cst_8 {dimension_numbers = #tpu.dot_dimension_numbers<[1], [0], [0], [1], [0, 0, 1, 1], [], []>} : vector<16x2xf32>, vector<2x32xf32>, vector<16x32xf32> -> vector<16x32xf32>
    %8 = vector.shape_cast %7 : vector<16x32xf32> to vector<1x16x32xf32>
    %9 = vector.broadcast %8 : vector<1x16x32xf32> to vector<2x16x32xf32>
    %10 = arith.subf %0, %9 : vector<2x16x32xf32>
    %11 = arith.mulf %10, %10 : vector<2x16x32xf32>
    %cst_9 = arith.constant dense<0.000000e+00> : vector<16x32xf32>
    %12 = vector.multi_reduction <add>, %11, %cst_9 [0] : vector<2x16x32xf32> to vector<16x32xf32>
    %cst_10 = arith.constant dense<0.000000e+00> : vector<16x2xf32>
    %13 = tpu.matmul %12, %1, %cst_10 {dimension_numbers = #tpu.dot_dimension_numbers<[1], [0], [0], [1], [0, 0, 1, 1], [], []>} : vector<16x32xf32>, vector<32x2xf32>, vector<16x2xf32> -> vector<16x2xf32>
    %cst_11 = arith.constant 3.125000e-02 : f32
    %14 = vector.broadcast %cst_11 : f32 to vector<16x2xf32>
    %15 = arith.mulf %13, %14 : vector<16x2xf32>
    %cst_12 = arith.constant 9.99999974E-6 : f32
    %16 = vector.broadcast %cst_12 : f32 to vector<16x2xf32>
    %17 = arith.addf %16, %15 : vector<16x2xf32>
    %18 = math.rsqrt %17 : vector<16x2xf32>
    %cst_13 = arith.constant dense<0.000000e+00> : vector<16x32xf32>
    %19 = tpu.matmul %18, %2, %cst_13 {dimension_numbers = #tpu.dot_dimension_numbers<[1], [0], [0], [1], [0, 0, 1, 1], [], []>} : vector<16x2xf32>, vector<2x32xf32>, vector<16x32xf32> -> vector<16x32xf32>
    %20 = vector.shape_cast %19 : vector<16x32xf32> to vector<1x16x32xf32>
    %21 = vector.broadcast %20 : vector<1x16x32xf32> to vector<2x16x32xf32>
    %22 = arith.mulf %10, %21 : vector<2x16x32xf32>
    %c0_14 = arith.constant 0 : index
    %c0_15 = arith.constant 0 : index
    %23 = vector.load %arg4[%c0_14, %c0_15] : memref<32x16xf32, #tpu.memory_space<vmem>>, vector<32x16xf32>
    %24 = vector.shape_cast %22 : vector<2x16x32xf32> to vector<32x32xf32>
    %cst_16 = arith.constant dense<0.000000e+00> : vector<32x16xf32>
    %25 = tpu.matmul %24, %23, %cst_16 {dimension_numbers = #tpu.dot_dimension_numbers<[1], [0], [0], [1], [0, 0, 1, 1], [], []>} : vector<32x32xf32>, vector<32x16xf32>, vector<32x16xf32> -> vector<32x16xf32>
    %cst_17 = arith.constant 0.000000e+00 : f32
    %26 = vector.broadcast %cst_17 : f32 to vector<32x16xf32>
    %27 = arith.maximumf %25, %26 : vector<32x16xf32>
    %28 = vector.shape_cast %27 : vector<32x16xf32> to vector<2x16x16xf32>
    %c0_18 = arith.constant 0 : index
    %c0_19 = arith.constant 0 : index
    %c0_20 = arith.constant 0 : index
    %29 = vector.load %arg5[%c0_18, %c0_19, %c0_20] : memref<2x16x16xf32, #tpu.memory_space<vmem>>, vector<2x16x16xf32>
    tpu.vector_store %arg5[%c0_18, %c0_19, %c0_20], %28 {strides = array<i32>} : memref<2x16x16xf32, #tpu.memory_space<vmem>>, vector<2x16x16xf32>,
    return
  }
  func.func @transform_0(%arg0: i32) -> (i32, i32, i32) {
    %c0_i32 = arith.constant 0 : i32
    %c0_i32_0 = arith.constant 0 : i32
    %c0_i32_1 = arith.constant 0 : i32
    return %c0_i32, %arg0, %c0_i32_0 : i32, i32, i32
  }
  func.func @transform_1(%arg0: i32) -> (i32, i32) {
    %c0_i32 = arith.constant 0 : i32
    %c0_i32_0 = arith.constant 0 : i32
    %c0_i32_1 = arith.constant 0 : i32
    return %c0_i32, %c0_i32_0 : i32, i32
  }
  func.func @transform_2(%arg0: i32) -> (i32, i32) {
    %c0_i32 = arith.constant 0 : i32
    %c0_i32_0 = arith.constant 0 : i32
    %c0_i32_1 = arith.constant 0 : i32
    return %c0_i32, %c0_i32_0 : i32, i32
  }
  func.func @transform_3(%arg0: i32) -> (i32, i32) {
    %c0_i32 = arith.constant 0 : i32
    %c0_i32_0 = arith.constant 0 : i32
    %c0_i32_1 = arith.constant 0 : i32
    return %c0_i32, %c0_i32_0 : i32, i32
  }
  func.func @transform_4(%arg0: i32) -> (i32, i32, i32) {
    %c0_i32 = arith.constant 0 : i32
    %c0_i32_0 = arith.constant 0 : i32
    %c0_i32_1 = arith.constant 0 : i32
    return %c0_i32, %arg0, %c0_i32_0 : i32, i32, i32
  }
}

module attributes {stable_mosaic.version = 11 : i64} {
  func.func @_mlp2_kernel(%arg0: i32, %arg1: memref<32x16xf32, #tpu.memory_space<vmem>>, %arg2: memref<16x8xf32, #tpu.memory_space<vmem>>, %arg3: memref<1x8xf32, #tpu.memory_space<vmem>>, %arg4: memref<8x1xf32, #tpu.memory_space<vmem>>, %arg5: memref<1x1xf32, #tpu.memory_space<vmem>>, %arg6: memref<32x1xf32, #tpu.memory_space<vmem>>) attributes {dimension_semantics = [#tpu.dimension_semantics<parallel>], iteration_bounds = array<i64: 1>, scalar_prefetch = 0 : i64, scratch_operands = 0 : i64, tpu.core_type = #tpu.core_type<tc>, window_params = [{transform_indices = @transform_0, window_bounds = array<i64: 32, 16>}, {pipeline_mode = #tpu.pipeline_mode<synchronous>, transform_indices = @transform_1, window_bounds = array<i64: 16, 8>}, {pipeline_mode = #tpu.pipeline_mode<synchronous>, transform_indices = @transform_2, window_bounds = array<i64: 1, 8>}, {pipeline_mode = #tpu.pipeline_mode<synchronous>, transform_indices = @transform_3, window_bounds = array<i64: 8, 1>}, {pipeline_mode = #tpu.pipeline_mode<synchronous>, transform_indices = @transform_4, window_bounds = array<i64: 1, 1>}, {transform_indices = @transform_5, window_bounds = array<i64: 32, 1>}]} {
    %c0 = arith.constant 0 : index
    %c0_0 = arith.constant 0 : index
    %0 = vector.load %arg1[%c0, %c0_0] : memref<32x16xf32, #tpu.memory_space<vmem>>, vector<32x16xf32>
    %1 = arith.truncf %0 : vector<32x16xf32> to vector<32x16xbf16>
    %c0_1 = arith.constant 0 : index
    %c0_2 = arith.constant 0 : index
    %2 = vector.load %arg2[%c0_1, %c0_2] : memref<16x8xf32, #tpu.memory_space<vmem>>, vector<16x8xf32>
    %3 = arith.truncf %2 : vector<16x8xf32> to vector<16x8xbf16>
    %cst = arith.constant dense<0.000000e+00> : vector<32x8xf32>
    %4 = tpu.matmul %1, %3, %cst {dimension_numbers = #tpu.dot_dimension_numbers<[1], [0], [0], [1], [0, 0, 1, 1], [], []>} : vector<32x16xbf16>, vector<16x8xbf16>, vector<32x8xf32> -> vector<32x8xf32>
    %c0_3 = arith.constant 0 : index
    %c0_4 = arith.constant 0 : index
    %5 = vector.load %arg3[%c0_3, %c0_4] : memref<1x8xf32, #tpu.memory_space<vmem>>, vector<1x8xf32>
    %6 = vector.broadcast %5 : vector<1x8xf32> to vector<32x8xf32>
    %7 = arith.addf %4, %6 : vector<32x8xf32>
    %cst_5 = arith.constant 0.000000e+00 : f32
    %8 = vector.broadcast %cst_5 : f32 to vector<32x8xf32>
    %9 = arith.maximumf %7, %8 : vector<32x8xf32>
    %10 = arith.truncf %9 : vector<32x8xf32> to vector<32x8xbf16>
    %c0_6 = arith.constant 0 : index
    %c0_7 = arith.constant 0 : index
    %11 = vector.load %arg4[%c0_6, %c0_7] : memref<8x1xf32, #tpu.memory_space<vmem>>, vector<8x1xf32>
    %12 = arith.truncf %11 : vector<8x1xf32> to vector<8x1xbf16>
    %cst_8 = arith.constant dense<0.000000e+00> : vector<32x1xf32>
    %13 = tpu.matmul %10, %12, %cst_8 {dimension_numbers = #tpu.dot_dimension_numbers<[1], [0], [0], [1], [0, 0, 1, 1], [], []>} : vector<32x8xbf16>, vector<8x1xbf16>, vector<32x1xf32> -> vector<32x1xf32>
    %c0_9 = arith.constant 0 : index
    %c0_10 = arith.constant 0 : index
    %14 = vector.load %arg5[%c0_9, %c0_10] : memref<1x1xf32, #tpu.memory_space<vmem>>, vector<1x1xf32>
    %15 = vector.broadcast %14 : vector<1x1xf32> to vector<32x1xf32>
    %16 = arith.addf %13, %15 : vector<32x1xf32>
    %c0_11 = arith.constant 0 : index
    %c0_12 = arith.constant 0 : index
    %17 = vector.load %arg6[%c0_11, %c0_12] : memref<32x1xf32, #tpu.memory_space<vmem>>, vector<32x1xf32>
    tpu.vector_store %arg6[%c0_11, %c0_12], %16 {strides = array<i32>} : memref<32x1xf32, #tpu.memory_space<vmem>>, vector<32x1xf32>,
    return
  }
  func.func @transform_0(%arg0: i32) -> (i32, i32) {
    %c0_i32 = arith.constant 0 : i32
    %c0_i32_0 = arith.constant 0 : i32
    return %arg0, %c0_i32 : i32, i32
  }
  func.func @transform_1(%arg0: i32) -> (i32, i32) {
    %c0_i32 = arith.constant 0 : i32
    %c0_i32_0 = arith.constant 0 : i32
    %c0_i32_1 = arith.constant 0 : i32
    return %c0_i32, %c0_i32_0 : i32, i32
  }
  func.func @transform_2(%arg0: i32) -> (i32, i32) {
    %c0_i32 = arith.constant 0 : i32
    %c0_i32_0 = arith.constant 0 : i32
    %c0_i32_1 = arith.constant 0 : i32
    return %c0_i32, %c0_i32_0 : i32, i32
  }
  func.func @transform_3(%arg0: i32) -> (i32, i32) {
    %c0_i32 = arith.constant 0 : i32
    %c0_i32_0 = arith.constant 0 : i32
    %c0_i32_1 = arith.constant 0 : i32
    return %c0_i32, %c0_i32_0 : i32, i32
  }
  func.func @transform_4(%arg0: i32) -> (i32, i32) {
    %c0_i32 = arith.constant 0 : i32
    %c0_i32_0 = arith.constant 0 : i32
    %c0_i32_1 = arith.constant 0 : i32
    return %c0_i32, %c0_i32_0 : i32, i32
  }
  func.func @transform_5(%arg0: i32) -> (i32, i32) {
    %c0_i32 = arith.constant 0 : i32
    %c0_i32_0 = arith.constant 0 : i32
    return %arg0, %c0_i32 : i32, i32
  }
}

</mosaic_0001>

<bundles_post_ra>
// kernel: gat_efa_forward.8
= control target key start
LH: loop header
LB: loop body
LE: loop exit
PB: predicated region body
PF: predicated region fallthrough
CT: control target
= control target key end

     0   :  { %vm40_vm0 = vcmask 1042432   ;;  %vm33_vm1 = vcmask 48128   ;;  %vm79_vm2 = vcmask 261120   ;;  %s207_s1 = inlined_call_operand.vmem [shape: f32[6,32], index: 1, kind: input, shape index: {}]   ;;  %s208_s0 = inlined_call_operand.vmem [shape: f32[32,6], index: 0, kind: input, shape index: {}]   ;;  %s209_s2 = inlined_call_operand.vmem [shape: f32[1,32], index: 2, kind: input, shape index: {}]   ;;  %s210_s4 = inlined_call_operand.vmem [shape: f32[1,32], index: 4, kind: input, shape index: {}]   ;;  %s211_s3 = inlined_call_operand.vmem [shape: f32[32,32], index: 3, kind: input, shape index: {}]   ;;  %s212_s5 = inlined_call_operand.vmem [shape: f32[32,32], index: 5, kind: output, shape index: {}]  }
   0x1   :  { %v27_v0 = vld [vmem:[%s207_s1] sm:$0x3f]  ;;  %v22_v2 = vld [vmem:[%s208_s0 + $0x8] sm:$0xff]  ;;  %v23_v4 = vld [vmem:[%s208_s0 + $0x10] sm:$0xff] }
   0x2   :  { %v21_v1 = vld [vmem:[%s208_s0] sm:$0xff]  ;;  %v28_v3 = vpack.c.bf16 %v27_v0, %v27_v0  ;;  %v24_v5 = vld [vmem:[%s208_s0 + $0x18] sm:$0xff]  ;;  %v71_v9 = vld [vmem:[%s211_s3 + $0x10] sm:$0xff] }
   0x3   :  { %v25_v7 = vpack.c.bf16 %v22_v2, %v21_v1  ;;  %v26_v8 = vpack.c.bf16 %v24_v5, %v23_v4  ;;  %v72_v10 = vld [vmem:[%s211_s3 + $0x18] sm:$0xff]  ;;  %v69_v12 = vld [vmem:[%s211_s3] sm:$0xff]  ;;  %v70_v13 = vld [vmem:[%s211_s3 + $0x8] sm:$0xff] }
   0x4   :  { %v42_v6 = vsel %vm40_vm0, %v28_v3, 0  ;;  %v74_v11 = vpack.c.bf16 %v72_v10, %v71_v9  ;;  %v73_v14 = vpack.c.bf16 %v70_v13, %v69_v12  ;;  %v124_v16 = vld [vmem:[%s209_s2] ss:$0 sm:$0xff] }
   0x5   :  { %51 = vmatpush.bf16.msra.mxu0 %v42_v6  ;;  %121 = vmatpush.bf16.msra.mxu3 %v42_v6  ;;  %v125_v30 = vld [vmem:[%s210_s4] ss:$0 sm:$0xff] }
   0x6   :  { %92 = vmatpush.bf16.msra.mxu1 %v74_v11  ;;  %122 = vmatpush.bf16.msra.mxu2 %v74_v11 }
   0x8   :  { %117 = vmatmul.msk.bf16.vlgmr.msra.gmra.mxu0 %vm33_vm1, %v25_v7  ;;  %118 = vmatmul.msk.bf16.vlgmr.msra.gmra.mxu3 %vm33_vm1, %v26_v8 }
   0xa   :  { %93 = vmatpush.bf16.msra.mxu1 %v73_v14  ;;  %123 = vmatpush.bf16.msra.mxu2 %v73_v14 }
  0x85   :  { %v53_v15 = vpop.f32.mrf.mxu0 }
  0x86   :  { %v54_v17 = vadd.f32 %v124_v16, %v53_v15 }
  0x88   :  { %v63_v20 = vmax.f32 %v54_v17, 0.0 }
  0x8b   :  { %v58_v18 = vpop.f32.mrf.mxu3 }
  0x8c   :  { %v59_v23 = vadd.f32 %v124_v16, %v58_v18 }
  0x8d   :  { %v55_v19 = vpop.f32.mrf.mxu0 }
  0x8e   :  { %v56_v21 = vadd.f32 %v124_v16, %v55_v19  ;;  %v65_v27 = vmax.f32 %v59_v23, 0.0 }
  0x90   :  { %v64_v22 = vmax.f32 %v56_v21, 0.0 }
  0x92   :  { %v67_v24 = vpack.c.bf16 %v64_v22, %v63_v20 }
  0x93   :  { %v60_v25 = vpop.f32.mrf.mxu3 }
  0x94   :  { %v61_v26 = vadd.f32 %v124_v16, %v60_v25  ;;  %119 = vmatmul.msk.bf16.vlgmr.msra.gmra.mxu1 %vm79_vm2, %v67_v24 }
  0x96   :  { %v66_v28 = vmax.f32 %v61_v26, 0.0 }
  0x98   :  { %v68_v29 = vpack.c.bf16 %v66_v28, %v65_v27 }
  0x9a   :  { %120 = vmatmul.msk.bf16.vlgmr.msra.gmra.mxu2 %vm79_vm2, %v68_v29 }
 0x111   :  { %v95_v31 = vpop.f32.mrf.mxu1 }
 0x112   :  { %v96_v32 = vadd.f32 %v125_v30, %v95_v31 }
 0x114   :  { %v105_v33 = vmax.f32 %v96_v32, 0.0 }
 0x116   :  { %109 = vst.msk [vmem:[%s212_s5] sm:$0xff] %vm79_vm2, %v105_v33 }
 0x119   :  { %v97_v34 = vpop.f32.mrf.mxu1 }
 0x11a   :  { %v98_v35 = vadd.f32 %v125_v30, %v97_v34 }
 0x11c   :  { %v106_v36 = vmax.f32 %v98_v35, 0.0 }
 0x11d   :  { %v100_v37 = vpop.f32.mrf.mxu2 }
 0x11e   :  { %110 = vst.msk [vmem:[%s212_s5 + $0x8] sm:$0xff] %vm79_vm2, %v106_v36  ;;  %v101_v38 = vadd.f32 %v125_v30, %v100_v37 }
 0x120   :  { %v107_v39 = vmax.f32 %v101_v38, 0.0 }
 0x122   :  { %111 = vst.msk [vmem:[%s212_s5 + $0x10] sm:$0xff] %vm79_vm2, %v107_v39 }
 0x125   :  { %v102_v40 = vpop.f32.mrf.mxu2 }
 0x126   :  { %v103_v41 = vadd.f32 %v125_v30, %v102_v40 }
 0x128   :  { %v108_v42 = vmax.f32 %v103_v41, 0.0 }
 0x12a   :  { %112 = vst.msk [vmem:[%s212_s5 + $0x18] sm:$0xff] %vm79_vm2, %v108_v42 }

// kernel: gat_efa_forward.11
= control target key start
LH: loop header
LB: loop body
LE: loop exit
PB: predicated region body
PF: predicated region fallthrough
CT: control target
= control target key end

     0   :  { %vm27_vm0 = vcmask 523264   ;;  %vm72_vm1 = vcmask 1043456   ;;  %vm65_vm2 = vcmask 31744   ;;  %s324_s1 = inlined_call_operand.vmem [shape: f32[64,4], index: 1, kind: input, shape index: {}]   ;;  %s325_s0 = inlined_call_operand.vmem [shape: f32[2,16,64], index: 0, kind: input, shape index: {}]   ;;  %s326_s2 = inlined_call_operand.vmem [shape: f32[4,64], index: 2, kind: input, shape index: {}]   ;;  %s327_s3 = inlined_call_operand.vmem [shape: f32[2,16,64], index: 3, kind: output, shape index: {}]  }
   0x1   :  { %v25_v0 = vld [vmem:[%s324_s1 + $0x38] sm:$0xff]  ;;  %v24_v1 = vld [vmem:[%s324_s1 + $0x30] sm:$0xff]  ;;  %v23_v2 = vld [vmem:[%s324_s1 + $0x28] sm:$0xff] }
   0x2   :  { %48 = vmatpush.msra.mxu0 %v25_v0  ;;  %127 = vmatpush.msra.mxu2 %v25_v0  ;;  %v22_v3 = vld [vmem:[%s324_s1 + $0x20] sm:$0xff]  ;;  %v21_v4 = vld [vmem:[%s324_s1 + $0x18] sm:$0xff]  ;;  %v16_v6 = vld [vmem:[%s325_s0 + $0x10] sm:$0xff] }
   0x3   :  { %v14_v5 = vld [vmem:[%s325_s0] sm:$0xff]  ;;  %v20_v7 = vld [vmem:[%s324_s1 + $0x10] sm:$0xff]  ;;  %v29_v9 = vsel %vm27_vm0, %v16_v6, 0.0  ;;  %v19_v10 = vld [vmem:[%s324_s1 + $0x8] sm:$0xff] }
   0x4   :  { %49 = vmatpush.msra.mxu0 %v24_v1  ;;  %128 = vmatpush.msra.mxu2 %v24_v1  ;;  %v28_v8 = vsel %vm27_vm0, %v14_v5, 0.0  ;;  %v18_v11 = vld [vmem:[%s324_s1] sm:$0xff]  ;;  %v15_v13 = vld [vmem:[%s325_s0 + $0x8] sm:$0xff]  ;;  %v17_v14 = vld [vmem:[%s325_s0 + $0x18] sm:$0xff] }
   0x5   :  { %v30_v12 = vadd.f32 %v29_v9, %v28_v8  ;;  %v31_v15 = vsel %vm27_vm0, %v15_v13, 0.0  ;;  %v32_v16 = vsel %vm27_vm0, %v17_v14, 0.0  ;;  %v26_v18 = vld [vmem:[%s326_s2] sm:$0xf] }
   0x6   :  { %50 = vmatpush.msra.mxu0 %v23_v2  ;;  %129 = vmatpush.msra.mxu2 %v23_v2  ;;  %v33_v17 = vadd.f32 %v32_v16, %v31_v15 }
   0x7   :  { %221 = vmatpush.msk.msra.mxu1 %vm72_vm1, %v26_v18  ;;  %226 = vmatpush.msk.msra.mxu3 %vm72_vm1, %v26_v18 }
   0x8   :  { %51 = vmatpush.msra.mxu0 %v22_v3  ;;  %130 = vmatpush.msra.mxu2 %v22_v3 }
   0xa   :  { %52 = vmatpush.msra.mxu0 %v21_v4  ;;  %131 = vmatpush.msra.mxu2 %v21_v4 }
   0xc   :  { %53 = vmatpush.msra.mxu0 %v20_v7  ;;  %132 = vmatpush.msra.mxu2 %v20_v7 }
   0xe   :  { %54 = vmatpush.msra.mxu0 %v19_v10  ;;  %133 = vmatpush.msra.mxu2 %v19_v10 }
  0x10   :  { %55 = vmatpush.msra.mxu0 %v18_v11  ;;  %134 = vmatpush.msra.mxu2 %v18_v11 }
  0x11   :  { %219 = vmatmul.msk.f32.vlgmr.msra.gmra.mxu0 %vm27_vm0, %v30_v12 }
  0x19   :  { %220 = vmatmul.msk.f32.gmra.mxu0 %vm27_vm0, %v33_v17 }
  0x8e   :  { %v57_v19 = vpop.f32.mrf.mxu0 }
  0x8f   :  { %v63_v20 = vmul.f32 0.03125, %v57_v19 }
  0x91   :  { %222 = vmatmul.msk.f32.vlgmr.msra.gmra.mxu1 %vm65_vm2, %v63_v20 }
  0x96   :  { %v60_v21 = vpop.f32.mrf.mxu0 }
  0x97   :  { %v64_v22 = vmul.f32 0.03125, %v60_v21 }
  0x99   :  { %223 = vmatmul.msk.f32.gmra.mxu1 %vm65_vm2, %v64_v22 }
 0x10e   :  { %v93_v23 = vpop.f32.mrf.mxu1 }
 0x10f   :  { %v99_v24 = vsub.f32 %v14_v5, %v93_v23  ;;  %v101_v25 = vsub.f32 %v16_v6, %v93_v23 }
 0x111   :  { %v103_v26 = vmul.f32 %v99_v24, %v99_v24  ;;  %v105_v27 = vmul.f32 %v101_v25, %v101_v25 }
 0x113   :  { %v107_v28 = vsel %vm27_vm0, %v103_v26, 0.0  ;;  %v108_v29 = vsel %vm27_vm0, %v105_v27, 0.0 }
 0x114   :  { %v109_v30 = vadd.f32 %v108_v29, %v107_v28 }
 0x116   :  { %v96_v31 = vpop.f32.mrf.mxu1  ;;  %224 = vmatmul.msk.f32.vlgmr.msra.gmra.mxu2 %vm27_vm0, %v109_v30 }
 0x117   :  { %v100_v32 = vsub.f32 %v15_v13, %v96_v31  ;;  %v102_v33 = vsub.f32 %v17_v14, %v96_v31 }
 0x119   :  { %v104_v34 = vmul.f32 %v100_v32, %v100_v32  ;;  %v106_v35 = vmul.f32 %v102_v33, %v102_v33 }
 0x11b   :  { %v110_v36 = vsel %vm27_vm0, %v104_v34, 0.0  ;;  %v111_v37 = vsel %vm27_vm0, %v106_v35, 0.0 }
 0x11c   :  { %v112_v38 = vadd.f32 %v111_v37, %v110_v36 }
 0x11e   :  { %225 = vmatmul.msk.f32.gmra.mxu2 %vm27_vm0, %v112_v38 }
 0x199   :  { %v136_v39 = vpop.f32.mrf.mxu2 }
 0x19a   :  { %v142_v40 = vmul.f32 0.03125, %v136_v39 }
 0x19c   :  { %v144_v41 = vadd.f32 1e-05, %v142_v40 }
 0x19e   :  { %229 = vrsqrt.f32 %v144_v41  ;;  %vm152_vm4 = vweird.f32 %v144_v41 }
 0x1a1   :  { %v139_v42 = vpop.f32.mrf.mxu2 }
 0x1a2   :  { %v143_v43 = vmul.f32 0.03125, %v139_v42 }
 0x1a4   :  { %v230_v44 = vpop.eup %229  ;;  %v145_v45 = vadd.f32 1e-05, %v143_v43 }
 0x1a5   :  { %v147_v46 = vmul.f32 %v230_v44, %v144_v41  ;;  %vm153_vm3 = vweird.f32 %v230_v44 }
 0x1a6   :  { %231 = vrsqrt.f32 %v145_v45  ;;  %vm154_vm5 = vmor %vm152_vm4, %vm153_vm3  ;;  %vm162_vm7 = vweird.f32 %v145_v45 }
 0x1a7   :  { %v148_v47 = vmul.f32 %v230_v44, %v147_v46 }
 0x1a9   :  { %v149_v48 = vmul.f32 0.5, %v148_v47 }
 0x1ab   :  { %v150_v49 = vsub.f32 1.5, %v149_v48 }
 0x1ac   :  { %v232_v50 = vpop.eup %231 }
 0x1ad   :  { %v157_v51 = vmul.f32 %v232_v50, %v145_v45  ;;  %v151_v52 = vmul.f32 %v230_v44, %v150_v49  ;;  %vm163_vm6 = vweird.f32 %v232_v50 }
 0x1ae   :  { %vm164_vm8 = vmor %vm162_vm7, %vm163_vm6 }
 0x1af   :  { %v158_v53 = vmul.f32 %v232_v50, %v157_v51  ;;  %v155_v54 = vsel %vm154_vm5, %v230_v44, %v151_v52 }
 0x1b0   :  { %227 = vmatmul.msk.f32.vlgmr.msra.gmra.mxu3 %vm65_vm2, %v155_v54 }
 0x1b1   :  { %v159_v55 = vmul.f32 0.5, %v158_v53 }
 0x1b3   :  { %v160_v56 = vsub.f32 1.5, %v159_v55 }
 0x1b5   :  { %v161_v57 = vmul.f32 %v232_v50, %v160_v56 }
 0x1b7   :  { %v165_v58 = vsel %vm164_vm8, %v232_v50, %v161_v57 }
 0x1b8   :  { %228 = vmatmul.msk.f32.gmra.mxu3 %vm65_vm2, %v165_v58 }
 0x233   :  { %v189_v59 = vpop.f32.mrf.mxu3 }
 0x234   :  { %v195_v60 = vmul.f32 %v189_v59, %v99_v24  ;;  %v197_v61 = vmul.f32 %v189_v59, %v101_v25 }
 0x236   :  { %vm199_vm9 = vcmp.ge.f32.partialorder %v195_v60, 0.0  ;;  %vm201_vm10 = vcmp.ge.f32.partialorder %v197_v61, 0.0  ;;  %v203_v62 = vmul.f32 0.2, %v195_v60  ;;  %v205_v63 = vmul.f32 0.2, %v197_v61 }
 0x238   :  { %v207_v0 = vsel %vm199_vm9, %v195_v60, %v203_v62  ;;  %v209_v1 = vsel %vm201_vm10, %v197_v61, %v205_v63 }
 0x239   :  { %211 = vst.msk [vmem:[%s327_s3] sm:$0xff] %vm27_vm0, %v207_v0 }
 0x23a   :  { %213 = vst.msk [vmem:[%s327_s3 + $0x10] sm:$0xff] %vm27_vm0, %v209_v1 }
 0x23b   :  { %v192_v2 = vpop.f32.mrf.mxu3 }
 0x23c   :  { %v196_v3 = vmul.f32 %v192_v2, %v100_v32  ;;  %v198_v4 = vmul.f32 %v192_v2, %v102_v33 }
 0x23e   :  { %vm200_vm11 = vcmp.ge.f32.partialorder %v196_v3, 0.0  ;;  %vm202_vm12 = vcmp.ge.f32.partialorder %v198_v4, 0.0  ;;  %v204_v5 = vmul.f32 0.2, %v196_v3  ;;  %v206_v6 = vmul.f32 0.2, %v198_v4 }
 0x240   :  { %v208_v7 = vsel %vm200_vm11, %v196_v3, %v204_v5  ;;  %v210_v8 = vsel %vm202_vm12, %v198_v4, %v206_v6 }
 0x241   :  { %212 = vst.msk [vmem:[%s327_s3 + $0x8] sm:$0xff] %vm27_vm0, %v208_v7 }
 0x242   :  { %214 = vst.msk [vmem:[%s327_s3 + $0x18] sm:$0xff] %vm27_vm0, %v210_v8 }

// kernel: gat_efa_forward.12
= control target key start
LH: loop header
LB: loop body
LE: loop exit
PB: predicated region body
PF: predicated region fallthrough
CT: control target
= control target key end

     0   :  { %vm235_vm0 = vcmask 1040384   ;;  %vm138_vm1 = vcmask 15360   ;;  %vm511_vm2 = vcmask 130048   ;;  %s2509_s2 = inlined_call_operand.vmem [shape: f32[2,16], index: 2, kind: input, shape index: {}]   ;;  %s2510_s0 = inlined_call_operand.vmem [shape: f32[512,2], index: 0, kind: input, shape index: {}]   ;;  %s2511_s3 = inlined_call_operand.vmem [shape: f32[1,16], index: 3, kind: input, shape index: {}]   ;;  %s2512_s4 = inlined_call_operand.vmem [shape: f32[16,16], index: 4, kind: input, shape index: {}]   ;;  %s2513_s5 = inlined_call_operand.vmem [shape: f32[1,16], index: 5, kind: input, shape index: {}]   ;;  %s2514_s6 = inlined_call_operand.vmem [shape: f32[16,32], index: 6, kind: input, shape index: {}]   ;;  %s2515_s7 = inlined_call_operand.vmem [shape: f32[1,32], index: 7, kind: input, shape index: {}]   ;;  %s2516_s8 = inlined_call_operand.vmem [shape: f32[2,32], index: 8, kind: input, shape index: {}]   ;;  %s2517_s9 = inlined_call_operand.vmem [shape: f32[2,1], index: 9, kind: input, shape index: {}]   ;;  %s2518_s1 = inlined_call_operand.vmem [shape: f32[1,512], index: 1, kind: input, shape index: {}]   ;;  %s2519_s10 = inlined_call_operand.vmem [shape: bf16[2,512], index: 10, kind: output, shape index: {}]  }
   0x1   :  { %v132_v0 = vld [vmem:[%s2509_s2] sm:$0x3]  ;;  %v37_v2 = vld [vmem:[%s2510_s0 + $0x8] sm:$0xff]  ;;  %v38_v6 = vld [vmem:[%s2510_s0 + $0x10] sm:$0xff] }
   0x2   :  { %v36_v1 = vld [vmem:[%s2510_s0] sm:$0xff]  ;;  %v133_v3 = vpack.c.bf16 %v132_v0, %v132_v0  ;;  %v39_v7 = vld [vmem:[%s2510_s0 + $0x18] sm:$0xff]  ;;  %v41_v10 = vld [vmem:[%s2510_s0 + $0x28] sm:$0xff] }
   0x3   :  { %v100_v5 = vpack.c.bf16 %v37_v2, %v36_v1  ;;  %v101_v8 = vpack.c.bf16 %v39_v7, %v38_v6  ;;  %v40_v9 = vld [vmem:[%s2510_s0 + $0x20] sm:$0xff]  ;;  %v42_v12 = vld [vmem:[%s2510_s0 + $0x30] sm:$0xff]  ;;  %v43_v13 = vld [vmem:[%s2510_s0 + $0x38] sm:$0xff] }
   0x4   :  { %v237_v4 = vsel %vm235_vm0, %v133_v3, 0  ;;  %v102_v11 = vpack.c.bf16 %v41_v10, %v40_v9  ;;  %v103_v14 = vpack.c.bf16 %v43_v13, %v42_v12  ;;  %v44_v15 = vld [vmem:[%s2510_s0 + $0x40] sm:$0xff]  ;;  %v45_v16 = vld [vmem:[%s2510_s0 + $0x48] sm:$0xff]  ;;  %v46_v18 = vld [vmem:[%s2510_s0 + $0x50] sm:$0xff] }
   0x5   :  { %246 = vmatpush.bf16.msra.mxu0 %v237_v4  ;;  %1678 = vmatpush.bf16.msra.mxu3 %v237_v4  ;;  %v104_v17 = vpack.c.bf16 %v45_v16, %v44_v15  ;;  %v47_v19 = vld [vmem:[%s2510_s0 + $0x58] sm:$0xff]  ;;  %v48_v21 = vld [vmem:[%s2510_s0 + $0x60] sm:$0xff]  ;;  %v49_v22 = vld [vmem:[%s2510_s0 + $0x68] sm:$0xff] }
   0x6   :  { %v105_v20 = vpack.c.bf16 %v47_v19, %v46_v18  ;;  %v106_v23 = vpack.c.bf16 %v49_v22, %v48_v21  ;;  %v504_v24 = vld [vmem:[%s2512_s4] sm:$0xff]  ;;  %v505_v25 = vld [vmem:[%s2512_s4 + $0x8] sm:$0xff]  ;;  %v50_v27 = vld [vmem:[%s2510_s0 + $0x70] sm:$0xff] }
   0x7   :  { %v506_v26 = vpack.c.bf16 %v505_v25, %v504_v24  ;;  %v51_v28 = vld [vmem:[%s2510_s0 + $0x78] sm:$0xff]  ;;  %v52_v30 = vld [vmem:[%s2510_s0 + $0x80] sm:$0xff]  ;;  %v53_v31 = vld [vmem:[%s2510_s0 + $0x88] sm:$0xff] }
   0x8   :  { %1578 = vmatmul.msk.bf16.vlgmr.msra.gmra.mxu0 %vm138_vm1, %v100_v5  ;;  %v107_v29 = vpack.c.bf16 %v51_v28, %v50_v27  ;;  %v108_v32 = vpack.c.bf16 %v53_v31, %v52_v30  ;;  %v1820_v34 = vld [vmem:[%s2511_s3] ss:$0 sm:$0xff]  ;;  %v54_v40 = vld [vmem:[%s2510_s0 + $0x90] sm:$0xff]  ;;  %v55_v41 = vld [vmem:[%s2510_s0 + $0x98] sm:$0xff] }
   0x9   :  { %615 = vmatpush.bf16.msra.mxu1 %v506_v26  ;;  %1679 = vmatpush.bf16.msrb.mxu3 %v506_v26  ;;  %v109_v43 = vpack.c.bf16 %v55_v41, %v54_v40  ;;  %v56_v50 = vld [vmem:[%s2510_s0 + $0xa0] sm:$0xff]  ;;  %v57_v51 = vld [vmem:[%s2510_s0 + $0xa8] sm:$0xff]  ;;  %v58_v60 = vld [vmem:[%s2510_s0 + $0xb0] sm:$0xff] }
   0xa   :  { %v110_v53 = vpack.c.bf16 %v57_v51, %v56_v50  ;;  %v59_v61 = vld [vmem:[%s2510_s0 + $0xb8] sm:$0xff]  ;;  %v60_v6 = vld [vmem:[%s2510_s0 + $0xc0] sm:$0xff]  ;;  %v61_v7 = vld [vmem:[%s2510_s0 + $0xc8] sm:$0xff] }
   0xb   :  { %v111_v63 = vpack.c.bf16 %v59_v61, %v58_v60  ;;  %v112_v9 = vpack.c.bf16 %v61_v7, %v60_v6  ;;  %v62_v16 = vld [vmem:[%s2510_s0 + $0xd0] sm:$0xff]  ;;  %v64_v26 = vld [vmem:[%s2510_s0 + $0xe0] sm:$0xff]  ;;  %v65_v27 = vld [vmem:[%s2510_s0 + $0xe8] sm:$0xff] }
   0xc   :  { %v68_v50 = vld [vmem:[%s2510_s0 + $0x100] sm:$0xff]  ;;  %v69_v51 = vld [vmem:[%s2510_s0 + $0x108] sm:$0xff]  ;;  %v70_v61 = vld [vmem:[%s2510_s0 + $0x110] sm:$0xff] }
  0x18   :  { %1579 = vmatmul.msk.bf16.gmra.mxu0 %vm138_vm1, %v101_v8 }
  0x28   :  { %1580 = vmatmul.msk.bf16.gmra.mxu0 %vm138_vm1, %v102_v11 }
  0x38   :  { %1581 = vmatmul.msk.bf16.gmra.mxu0 %vm138_vm1, %v103_v14 }
  0x48   :  { %1582 = vmatmul.msk.bf16.gmra.mxu0 %vm138_vm1, %v104_v17  ;;  %v63_v17 = vld [vmem:[%s2510_s0 + $0xd8] sm:$0xff] }
  0x49   :  { %v113_v19 = vpack.c.bf16 %v63_v17, %v62_v16  ;;  %v73_v16 = vld [vmem:[%s2510_s0 + $0x128] sm:$0xff] }
  0x58   :  { %1583 = vmatmul.msk.bf16.gmra.mxu0 %vm138_vm1, %v105_v20 }
  0x68   :  { %1584 = vmatmul.msk.bf16.gmra.mxu0 %vm138_vm1, %v106_v23 }
  0x78   :  { %1585 = vmatmul.msk.bf16.gmra.mxu0 %vm138_vm1, %v107_v29  ;;  %v114_v29 = vpack.c.bf16 %v65_v27, %v64_v26 }
  0x85   :  { %v248_v33 = vpop.f32.mrf.mxu0 }
  0x86   :  { %v249_v35 = vadd.f32 %v1820_v34, %v248_v33 }
  0x88   :  { %1586 = vmatmul.msk.bf16.gmra.mxu0 %vm138_vm1, %v108_v32  ;;  %v408_v38 = vmax.f32 %v249_v35, 0.0 }
  0x8d   :  { %v250_v36 = vpop.f32.mrf.mxu0 }
  0x8e   :  { %v251_v37 = vadd.f32 %v1820_v34, %v250_v36 }
  0x90   :  { %v409_v39 = vmax.f32 %v251_v37, 0.0  ;;  %v66_v37 = vld [vmem:[%s2510_s0 + $0xf0] sm:$0xff] }
  0x92   :  { %v472_v42 = vpack.c.bf16 %v409_v39, %v408_v38  ;;  %v67_v38 = vld [vmem:[%s2510_s0 + $0xf8] sm:$0xff] }
  0x93   :  { %v115_v40 = vpack.c.bf16 %v67_v38, %v66_v37 }
  0x94   :  { %1610 = vmatmul.msk.bf16.vlgmr.msra.gmra.mxu1 %vm511_vm2, %v472_v42  ;;  %v873_v42 = vld [vmem:[%s2514_s6] sm:$0xff] }
  0x95   :  { %v253_v44 = vpop.f32.mrf.mxu0 }
  0x96   :  { %v254_v45 = vadd.f32 %v1820_v34, %v253_v44 }
  0x98   :  { %1587 = vmatmul.msk.bf16.gmra.mxu0 %vm138_vm1, %v109_v43  ;;  %v410_v48 = vmax.f32 %v254_v45, 0.0  ;;  %v874_v43 = vld [vmem:[%s2514_s6 + $0x8] sm:$0xff] }
  0x99   :  { %v1899_v44 = vpack.c.bf16 %v874_v43, %v873_v42 }
  0x9b   :  { %983 = vmatpush.bf16.msra.mxu2 %v1899_v44 }
  0x9d   :  { %v255_v46 = vpop.f32.mrf.mxu0 }
  0x9e   :  { %v256_v47 = vadd.f32 %v1820_v34, %v255_v46 }
  0xa0   :  { %v411_v49 = vmax.f32 %v256_v47, 0.0 }
  0xa2   :  { %v473_v52 = vpack.c.bf16 %v411_v49, %v410_v48 }
  0xa4   :  { %1611 = vmatmul.msk.bf16.gmra.mxu1 %vm511_vm2, %v473_v52 }
  0xa5   :  { %v258_v54 = vpop.f32.mrf.mxu0 }
  0xa6   :  { %v259_v55 = vadd.f32 %v1820_v34, %v258_v54 }
  0xa8   :  { %1588 = vmatmul.msk.bf16.gmra.mxu0 %vm138_vm1, %v110_v53  ;;  %v412_v58 = vmax.f32 %v259_v55, 0.0  ;;  %v116_v53 = vpack.c.bf16 %v69_v51, %v68_v50 }
  0xad   :  { %v260_v56 = vpop.f32.mrf.mxu0 }
  0xae   :  { %v261_v57 = vadd.f32 %v1820_v34, %v260_v56 }
  0xb0   :  { %v413_v59 = vmax.f32 %v261_v57, 0.0 }
  0xb2   :  { %v474_v62 = vpack.c.bf16 %v413_v59, %v412_v58 }
  0xb4   :  { %1612 = vmatmul.msk.bf16.gmra.mxu1 %vm511_vm2, %v474_v62  ;;  %v71_v62 = vld [vmem:[%s2510_s0 + $0x118] sm:$0xff] }
  0xb5   :  { %v263_v0 = vpop.f32.mrf.mxu0 }
  0xb6   :  { %v264_v1 = vadd.f32 %v1820_v34, %v263_v0  ;;  %v1923_v0 = vld [vmem:[%s2513_s5] ss:$0 sm:$0xff] }
  0xb8   :  { %1589 = vmatmul.msk.bf16.gmra.mxu0 %vm138_vm1, %v111_v63  ;;  %v414_v4 = vmax.f32 %v264_v1, 0.0  ;;  %v117_v1 = vpack.c.bf16 %v71_v62, %v70_v61 }
  0xbd   :  { %v265_v2 = vpop.f32.mrf.mxu0 }
  0xbe   :  { %v266_v3 = vadd.f32 %v1820_v34, %v265_v2 }
  0xc0   :  { %v415_v5 = vmax.f32 %v266_v3, 0.0 }
  0xc2   :  { %v475_v8 = vpack.c.bf16 %v415_v5, %v414_v4 }
  0xc4   :  { %1613 = vmatmul.msk.bf16.gmra.mxu1 %vm511_vm2, %v475_v8 }
  0xc5   :  { %v268_v10 = vpop.f32.mrf.mxu0 }
  0xc6   :  { %v269_v11 = vadd.f32 %v1820_v34, %v268_v10 }
  0xc8   :  { %1590 = vmatmul.msk.bf16.gmra.mxu0 %vm138_vm1, %v112_v9  ;;  %v416_v14 = vmax.f32 %v269_v11, 0.0 }
  0xcd   :  { %v270_v12 = vpop.f32.mrf.mxu0 }
  0xce   :  { %v271_v13 = vadd.f32 %v1820_v34, %v270_v12 }
  0xd0   :  { %v417_v15 = vmax.f32 %v271_v13, 0.0 }
  0xd2   :  { %v476_v18 = vpack.c.bf16 %v417_v15, %v416_v14  ;;  %v72_v15 = vld [vmem:[%s2510_s0 + $0x120] sm:$0xff] }
  0xd4   :  { %1614 = vmatmul.msk.bf16.gmra.mxu1 %vm511_vm2, %v476_v18  ;;  %v118_v18 = vpack.c.bf16 %v73_v16, %v72_v15  ;;  %v96_v16 = vld [vmem:[%s2510_s0 + $0x1e0] sm:$0xff] }
  0xd5   :  { %v273_v20 = vpop.f32.mrf.mxu0 }
  0xd6   :  { %v274_v21 = vadd.f32 %v1820_v34, %v273_v20 }
  0xd8   :  { %1591 = vmatmul.msk.bf16.gmra.mxu0 %vm138_vm1, %v113_v19  ;;  %v418_v24 = vmax.f32 %v274_v21, 0.0 }
  0xdd   :  { %v275_v22 = vpop.f32.mrf.mxu0 }
  0xde   :  { %v276_v23 = vadd.f32 %v1820_v34, %v275_v22 }
  0xe0   :  { %v419_v25 = vmax.f32 %v276_v23, 0.0 }
  0xe2   :  { %v477_v28 = vpack.c.bf16 %v419_v25, %v418_v24 }
  0xe4   :  { %1615 = vmatmul.msk.bf16.gmra.mxu1 %vm511_vm2, %v477_v28 }
  0xe5   :  { %v278_v30 = vpop.f32.mrf.mxu0 }
  0xe6   :  { %v279_v31 = vadd.f32 %v1820_v34, %v278_v30 }
  0xe8   :  { %1592 = vmatmul.msk.bf16.gmra.mxu0 %vm138_vm1, %v114_v29  ;;  %v420_v35 = vmax.f32 %v279_v31, 0.0 }
  0xed   :  { %v280_v32 = vpop.f32.mrf.mxu0 }
  0xee   :  { %v281_v33 = vadd.f32 %v1820_v34, %v280_v32  ;;  %v74_v32 = vld [vmem:[%s2510_s0 + $0x130] sm:$0xff] }
  0xf0   :  { %v421_v36 = vmax.f32 %v281_v33, 0.0  ;;  %v75_v33 = vld [vmem:[%s2510_s0 + $0x138] sm:$0xff] }
  0xf2   :  { %v478_v39 = vpack.c.bf16 %v421_v36, %v420_v35  ;;  %v119_v36 = vpack.c.bf16 %v75_v33, %v74_v32 }
  0xf4   :  { %1616 = vmatmul.msk.bf16.gmra.mxu1 %vm511_vm2, %v478_v39  ;;  %v92_v39 = vld [vmem:[%s2510_s0 + $0x1c0] sm:$0xff] }
  0xf5   :  { %v283_v41 = vpop.f32.mrf.mxu0 }
  0xf6   :  { %v284_v45 = vadd.f32 %v1820_v34, %v283_v41 }
  0xf8   :  { %1593 = vmatmul.msk.bf16.gmra.mxu0 %vm138_vm1, %v115_v40  ;;  %v422_v48 = vmax.f32 %v284_v45, 0.0  ;;  %v93_v40 = vld [vmem:[%s2510_s0 + $0x1c8] sm:$0xff] }
  0xf9   :  { %v128_v42 = vpack.c.bf16 %v93_v40, %v92_v39 }
  0xfb   :  { %1606 = vmatmul.msk.bf16.vlgmr.msra.gmra.mxu3 %vm138_vm1, %v128_v42 }
  0xfc   :  { %1680 = vmatpush.bf16.msra.mxu3 %v1899_v44 }
  0xfd   :  { %v285_v46 = vpop.f32.mrf.mxu0 }
  0xfe   :  { %v286_v47 = vadd.f32 %v1820_v34, %v285_v46 }
 0x100   :  { %v423_v49 = vmax.f32 %v286_v47, 0.0 }
 0x102   :  { %v479_v52 = vpack.c.bf16 %v423_v49, %v422_v48 }
 0x104   :  { %1617 = vmatmul.msk.bf16.gmra.mxu1 %vm511_vm2, %v479_v52 }
 0x105   :  { %v288_v54 = vpop.f32.mrf.mxu0 }
 0x106   :  { %v289_v55 = vadd.f32 %v1820_v34, %v288_v54  ;;  %v76_v54 = vld [vmem:[%s2510_s0 + $0x140] sm:$0xff] }
 0x108   :  { %1594 = vmatmul.msk.bf16.gmra.mxu0 %vm138_vm1, %v116_v53  ;;  %v424_v58 = vmax.f32 %v289_v55, 0.0  ;;  %v77_v55 = vld [vmem:[%s2510_s0 + $0x148] sm:$0xff] }
 0x109   :  { %v120_v44 = vpack.c.bf16 %v77_v55, %v76_v54 }
 0x10d   :  { %v290_v56 = vpop.f32.mrf.mxu0 }
 0x10e   :  { %v291_v57 = vadd.f32 %v1820_v34, %v290_v56 }
 0x110   :  { %v425_v59 = vmax.f32 %v291_v57, 0.0 }
 0x111   :  { %v617_v60 = vpop.f32.mrf.mxu1 }
 0x112   :  { %v480_v63 = vpack.c.bf16 %v425_v59, %v424_v58  ;;  %v618_v3 = vadd.f32 %v1923_v0, %v617_v60  ;;  %v94_v59 = vld [vmem:[%s2510_s0 + $0x1d0] sm:$0xff]  ;;  %v95_v60 = vld [vmem:[%s2510_s0 + $0x1d8] sm:$0xff] }
 0x113   :  { %v129_v62 = vpack.c.bf16 %v95_v60, %v94_v59 }
 0x114   :  { %1618 = vmatmul.msk.bf16.gmra.mxu1 %vm511_vm2, %v480_v63  ;;  %v777_v6 = vmax.f32 %v618_v3, 0.0 }
 0x115   :  { %v293_v2 = vpop.f32.mrf.mxu0  ;;  %1607 = vmatmul.msk.bf16.gmra.mxu3 %vm138_vm1, %v129_v62 }
 0x116   :  { %v294_v7 = vadd.f32 %v1820_v34, %v293_v2 }
 0x118   :  { %1595 = vmatmul.msk.bf16.gmra.mxu0 %vm138_vm1, %v117_v1  ;;  %v426_v12 = vmax.f32 %v294_v7, 0.0 }
 0x119   :  { %v619_v4 = vpop.f32.mrf.mxu1 }
 0x11a   :  { %v620_v5 = vadd.f32 %v1923_v0, %v619_v4 }
 0x11c   :  { %v778_v8 = vmax.f32 %v620_v5, 0.0 }
 0x11d   :  { %v295_v9 = vpop.f32.mrf.mxu0 }
 0x11e   :  { %v296_v10 = vadd.f32 %v1820_v34, %v295_v9  ;;  %v841_v11 = vpack.c.bf16 %v778_v8, %v777_v6 }
 0x120   :  { %v427_v13 = vmax.f32 %v296_v10, 0.0  ;;  %1642 = vmatmul.msk.bf16.vlgmr.msra.gmra.mxu2 %vm511_vm2, %v841_v11  ;;  %v78_v10 = vld [vmem:[%s2510_s0 + $0x150] sm:$0xff]  ;;  %v79_v11 = vld [vmem:[%s2510_s0 + $0x158] sm:$0xff] }
 0x121   :  { %v622_v14 = vpop.f32.mrf.mxu1 }
 0x122   :  { %v481_v17 = vpack.c.bf16 %v427_v13, %v426_v12  ;;  %v623_v20 = vadd.f32 %v1923_v0, %v622_v14  ;;  %v121_v13 = vpack.c.bf16 %v79_v11, %v78_v10 }
 0x124   :  { %1619 = vmatmul.msk.bf16.gmra.mxu1 %vm511_vm2, %v481_v17  ;;  %v779_v23 = vmax.f32 %v623_v20, 0.0  ;;  %v97_v17 = vld [vmem:[%s2510_s0 + $0x1e8] sm:$0xff] }
 0x125   :  { %v298_v19 = vpop.f32.mrf.mxu0 }
 0x126   :  { %v299_v24 = vadd.f32 %v1820_v34, %v298_v19  ;;  %v130_v19 = vpack.c.bf16 %v97_v17, %v96_v16 }
 0x128   :  { %1596 = vmatmul.msk.bf16.gmra.mxu0 %vm138_vm1, %v118_v18  ;;  %v428_v29 = vmax.f32 %v299_v24, 0.0  ;;  %1608 = vmatmul.msk.bf16.gmra.mxu3 %vm138_vm1, %v130_v19 }
 0x129   :  { %v624_v21 = vpop.f32.mrf.mxu1 }
 0x12a   :  { %v625_v22 = vadd.f32 %v1923_v0, %v624_v21 }
 0x12c   :  { %v780_v25 = vmax.f32 %v625_v22, 0.0 }
 0x12d   :  { %v300_v26 = vpop.f32.mrf.mxu0 }
 0x12e   :  { %v301_v27 = vadd.f32 %v1820_v34, %v300_v26  ;;  %v842_v28 = vpack.c.bf16 %v780_v25, %v779_v23 }
 0x130   :  { %v429_v30 = vmax.f32 %v301_v27, 0.0  ;;  %1643 = vmatmul.msk.bf16.gmra.mxu2 %vm511_vm2, %v842_v28 }
 0x131   :  { %v627_v31 = vpop.f32.mrf.mxu1 }
 0x132   :  { %v482_v35 = vpack.c.bf16 %v429_v30, %v428_v29  ;;  %v628_v38 = vadd.f32 %v1923_v0, %v627_v31  ;;  %v80_v30 = vld [vmem:[%s2510_s0 + $0x160] sm:$0xff]  ;;  %v81_v31 = vld [vmem:[%s2510_s0 + $0x168] sm:$0xff] }
 0x133   :  { %v122_v33 = vpack.c.bf16 %v81_v31, %v80_v30 }
 0x134   :  { %1620 = vmatmul.msk.bf16.gmra.mxu1 %vm511_vm2, %v482_v35  ;;  %v781_v45 = vmax.f32 %v628_v38, 0.0  ;;  %v99_v38 = vld [vmem:[%s2510_s0 + $0x1f8] sm:$0xff] }
 0x135   :  { %v303_v37 = vpop.f32.mrf.mxu0 }
 0x136   :  { %v304_v46 = vadd.f32 %v1820_v34, %v303_v37  ;;  %v98_v37 = vld [vmem:[%s2510_s0 + $0x1f0] sm:$0xff] }
 0x137   :  { %v131_v40 = vpack.c.bf16 %v99_v38, %v98_v37 }
 0x138   :  { %1597 = vmatmul.msk.bf16.gmra.mxu0 %vm138_vm1, %v119_v36  ;;  %v430_v51 = vmax.f32 %v304_v46, 0.0 }
 0x139   :  { %v629_v41 = vpop.f32.mrf.mxu1  ;;  %1609 = vmatmul.msk.bf16.gmra.mxu3 %vm138_vm1, %v131_v40  ;;  %v88_v40 = vld [vmem:[%s2510_s0 + $0x1a0] sm:$0xff] }
 0x13a   :  { %v630_v43 = vadd.f32 %v1923_v0, %v629_v41 }
 0x13c   :  { %v782_v47 = vmax.f32 %v630_v43, 0.0 }
 0x13d   :  { %v305_v48 = vpop.f32.mrf.mxu0 }
 0x13e   :  { %v306_v49 = vadd.f32 %v1820_v34, %v305_v48  ;;  %v843_v50 = vpack.c.bf16 %v782_v47, %v781_v45 }
 0x140   :  { %v431_v52 = vmax.f32 %v306_v49, 0.0  ;;  %1644 = vmatmul.msk.bf16.gmra.mxu2 %vm511_vm2, %v843_v50 }
 0x141   :  { %v632_v53 = vpop.f32.mrf.mxu1 }
 0x142   :  { %v483_v56 = vpack.c.bf16 %v431_v52, %v430_v51  ;;  %v633_v58 = vadd.f32 %v1923_v0, %v632_v53  ;;  %v82_v52 = vld [vmem:[%s2510_s0 + $0x170] sm:$0xff]  ;;  %v83_v53 = vld [vmem:[%s2510_s0 + $0x178] sm:$0xff] }
 0x143   :  { %v123_v55 = vpack.c.bf16 %v83_v53, %v82_v52 }
 0x144   :  { %1621 = vmatmul.msk.bf16.gmra.mxu1 %vm511_vm2, %v483_v56  ;;  %v783_v1 = vmax.f32 %v633_v58, 0.0 }
 0x145   :  { %v308_v57 = vpop.f32.mrf.mxu0 }
 0x146   :  { %v309_v2 = vadd.f32 %v1820_v34, %v308_v57 }
 0x148   :  { %1598 = vmatmul.msk.bf16.gmra.mxu0 %vm138_vm1, %v120_v44  ;;  %v432_v7 = vmax.f32 %v309_v2, 0.0 }
 0x149   :  { %v634_v61 = vpop.f32.mrf.mxu1 }
 0x14a   :  { %v635_v63 = vadd.f32 %v1923_v0, %v634_v61 }
 0x14c   :  { %v784_v3 = vmax.f32 %v635_v63, 0.0 }
 0x14d   :  { %v310_v4 = vpop.f32.mrf.mxu0 }
 0x14e   :  { %v311_v5 = vadd.f32 %v1820_v34, %v310_v4  ;;  %v844_v6 = vpack.c.bf16 %v784_v3, %v783_v1 }
 0x150   :  { %v433_v8 = vmax.f32 %v311_v5, 0.0  ;;  %1645 = vmatmul.msk.bf16.gmra.mxu2 %vm511_vm2, %v844_v6  ;;  %v84_v5 = vld [vmem:[%s2510_s0 + $0x180] sm:$0xff]  ;;  %v85_v6 = vld [vmem:[%s2510_s0 + $0x188] sm:$0xff] }
 0x151   :  { %v637_v9 = vpop.f32.mrf.mxu1 }
 0x152   :  { %v484_v12 = vpack.c.bf16 %v433_v8, %v432_v7  ;;  %v638_v15 = vadd.f32 %v1923_v0, %v637_v9  ;;  %v124_v8 = vpack.c.bf16 %v85_v6, %v84_v5 }
 0x154   :  { %1622 = vmatmul.msk.bf16.gmra.mxu1 %vm511_vm2, %v484_v12  ;;  %v785_v21 = vmax.f32 %v638_v15, 0.0 }
 0x155   :  { %v313_v14 = vpop.f32.mrf.mxu0 }
 0x156   :  { %v314_v22 = vadd.f32 %v1820_v34, %v313_v14 }
 0x158   :  { %1599 = vmatmul.msk.bf16.gmra.mxu0 %vm138_vm1, %v121_v13  ;;  %v434_v27 = vmax.f32 %v314_v22, 0.0  ;;  %v86_v22 = vld [vmem:[%s2510_s0 + $0x190] sm:$0xff] }
 0x159   :  { %v639_v18 = vpop.f32.mrf.mxu1 }
 0x15a   :  { %v640_v20 = vadd.f32 %v1923_v0, %v639_v18 }
 0x15c   :  { %v786_v23 = vmax.f32 %v640_v20, 0.0 }
 0x15d   :  { %v315_v24 = vpop.f32.mrf.mxu0 }
 0x15e   :  { %v316_v25 = vadd.f32 %v1820_v34, %v315_v24  ;;  %v845_v26 = vpack.c.bf16 %v786_v23, %v785_v21  ;;  %v87_v23 = vld [vmem:[%s2510_s0 + $0x198] sm:$0xff] }
 0x160   :  { %v435_v28 = vmax.f32 %v316_v25, 0.0  ;;  %1646 = vmatmul.msk.bf16.gmra.mxu2 %vm511_vm2, %v845_v26  ;;  %v125_v25 = vpack.c.bf16 %v87_v23, %v86_v22 }
 0x161   :  { %v642_v29 = vpop.f32.mrf.mxu1 }
 0x162   :  { %v485_v32 = vpack.c.bf16 %v435_v28, %v434_v27  ;;  %v643_v36 = vadd.f32 %v1923_v0, %v642_v29 }
 0x164   :  { %1623 = vmatmul.msk.bf16.gmra.mxu1 %vm511_vm2, %v485_v32  ;;  %v787_v42 = vmax.f32 %v643_v36, 0.0 }
 0x165   :  { %v318_v35 = vpop.f32.mrf.mxu0 }
 0x166   :  { %v319_v43 = vadd.f32 %v1820_v34, %v318_v35 }
 0x168   :  { %1600 = vmatmul.msk.bf16.gmra.mxu0 %vm138_vm1, %v122_v33  ;;  %v436_v49 = vmax.f32 %v319_v43, 0.0 }
 0x169   :  { %v644_v39 = vpop.f32.mrf.mxu1 }
 0x16a   :  { %v645_v41 = vadd.f32 %v1923_v0, %v644_v39 }
 0x16c   :  { %v788_v45 = vmax.f32 %v645_v41, 0.0  ;;  %v89_v41 = vld [vmem:[%s2510_s0 + $0x1a8] sm:$0xff] }
 0x16d   :  { %v320_v46 = vpop.f32.mrf.mxu0 }
 0x16e   :  { %v321_v47 = vadd.f32 %v1820_v34, %v320_v46  ;;  %v846_v48 = vpack.c.bf16 %v788_v45, %v787_v42  ;;  %v2074_v45 = vld [vmem:[%s2515_s7] ss:$0 sm:$0xff]  ;;  %v126_v46 = vpack.c.bf16 %v89_v41, %v88_v40 }
 0x170   :  { %v437_v50 = vmax.f32 %v321_v47, 0.0  ;;  %1647 = vmatmul.msk.bf16.gmra.mxu2 %vm511_vm2, %v846_v48 }
 0x171   :  { %v647_v51 = vpop.f32.mrf.mxu1 }
 0x172   :  { %v486_v54 = vpack.c.bf16 %v437_v50, %v436_v49  ;;  %v648_v44 = vadd.f32 %v1923_v0, %v647_v51 }
 0x174   :  { %1624 = vmatmul.msk.bf16.gmra.mxu1 %vm511_vm2, %v486_v54  ;;  %v789_v59 = vmax.f32 %v648_v44, 0.0 }
 0x175   :  { %v323_v56 = vpop.f32.mrf.mxu0 }
 0x176   :  { %v324_v60 = vadd.f32 %v1820_v34, %v323_v56 }
 0x178   :  { %1601 = vmatmul.msk.bf16.gmra.mxu0 %vm138_vm1, %v123_v55  ;;  %v438_v2 = vmax.f32 %v324_v60, 0.0 }
 0x179   :  { %v649_v57 = vpop.f32.mrf.mxu1 }
 0x17a   :  { %v650_v58 = vadd.f32 %v1923_v0, %v649_v57 }
 0x17c   :  { %v790_v61 = vmax.f32 %v650_v58, 0.0 }
 0x17d   :  { %v325_v62 = vpop.f32.mrf.mxu0 }
 0x17e   :  { %v326_v63 = vadd.f32 %v1820_v34, %v325_v62  ;;  %v847_v1 = vpack.c.bf16 %v790_v61, %v789_v59 }
 0x180   :  { %v439_v3 = vmax.f32 %v326_v63, 0.0  ;;  %1648 = vmatmul.msk.bf16.gmra.mxu2 %vm511_vm2, %v847_v1 }
 0x181   :  { %v652_v4 = vpop.f32.mrf.mxu1 }
 0x182   :  { %v487_v7 = vpack.c.bf16 %v439_v3, %v438_v2  ;;  %v653_v10 = vadd.f32 %v1923_v0, %v652_v4  ;;  %v90_v3 = vld [vmem:[%s2510_s0 + $0x1b0] sm:$0xff]  ;;  %v91_v4 = vld [vmem:[%s2510_s0 + $0x1b8] sm:$0xff] }
 0x184   :  { %1625 = vmatmul.msk.bf16.gmra.mxu1 %vm511_vm2, %v487_v7  ;;  %v791_v13 = vmax.f32 %v653_v10, 0.0 }
 0x185   :  { %v328_v9 = vpop.f32.mrf.mxu0 }
 0x186   :  { %v329_v14 = vadd.f32 %v1820_v34, %v328_v9 }
 0x188   :  { %1602 = vmatmul.msk.bf16.gmra.mxu0 %vm138_vm1, %v124_v8  ;;  %v440_v19 = vmax.f32 %v329_v14, 0.0  ;;  %v127_v8 = vpack.c.bf16 %v91_v4, %v90_v3 }
 0x189   :  { %v654_v11 = vpop.f32.mrf.mxu1 }
 0x18a   :  { %v655_v12 = vadd.f32 %v1923_v0, %v654_v11 }
 0x18c   :  { %v792_v15 = vmax.f32 %v655_v12, 0.0 }
 0x18d   :  { %v330_v16 = vpop.f32.mrf.mxu0 }
 0x18e   :  { %v331_v17 = vadd.f32 %v1820_v34, %v330_v16  ;;  %v848_v18 = vpack.c.bf16 %v792_v15, %v791_v13 }
 0x190   :  { %v441_v20 = vmax.f32 %v331_v17, 0.0  ;;  %1649 = vmatmul.msk.bf16.gmra.mxu2 %vm511_vm2, %v848_v18 }
 0x191   :  { %v657_v21 = vpop.f32.mrf.mxu1 }
 0x192   :  { %v488_v24 = vpack.c.bf16 %v441_v20, %v440_v19  ;;  %v658_v27 = vadd.f32 %v1923_v0, %v657_v21 }
 0x194   :  { %1626 = vmatmul.msk.bf16.gmra.mxu1 %vm511_vm2, %v488_v24  ;;  %v793_v30 = vmax.f32 %v658_v27, 0.0  ;;  %v388_v24 = vpop.f32.mrf.mxu3 }
 0x195   :  { %v333_v26 = vpop.f32.mrf.mxu0 }
 0x196   :  { %v334_v31 = vadd.f32 %v1820_v34, %v333_v26 }
 0x198   :  { %1603 = vmatmul.msk.bf16.gmra.mxu0 %vm138_vm1, %v125_v25  ;;  %v442_v37 = vmax.f32 %v334_v31, 0.0 }
 0x199   :  { %v659_v28 = vpop.f32.mrf.mxu1 }
 0x19a   :  { %v660_v29 = vadd.f32 %v1923_v0, %v659_v28 }
 0x19c   :  { %v794_v32 = vmax.f32 %v660_v29, 0.0 }
 0x19d   :  { %v335_v33 = vpop.f32.mrf.mxu0 }
 0x19e   :  { %v336_v35 = vadd.f32 %v1820_v34, %v335_v33  ;;  %v849_v36 = vpack.c.bf16 %v794_v32, %v793_v30  ;;  %v389_v33 = vadd.f32 %v1820_v34, %v388_v24 }
 0x1a0   :  { %v443_v38 = vmax.f32 %v336_v35, 0.0  ;;  %1650 = vmatmul.msk.bf16.gmra.mxu2 %vm511_vm2, %v849_v36  ;;  %v390_v36 = vpop.f32.mrf.mxu3 }
 0x1a1   :  { %v662_v39 = vpop.f32.mrf.mxu1 }
 0x1a2   :  { %v489_v42 = vpack.c.bf16 %v443_v38, %v442_v37  ;;  %v663_v48 = vadd.f32 %v1923_v0, %v662_v39  ;;  %v464_v38 = vmax.f32 %v389_v33, 0.0  ;;  %v391_v39 = vadd.f32 %v1820_v34, %v390_v36 }
 0x1a3   :  { %v985_v43 = vpop.f32.mrf.mxu2 }
 0x1a4   :  { %1627 = vmatmul.msk.bf16.gmra.mxu1 %vm511_vm2, %v489_v42  ;;  %v986_v49 = vadd.f32 %v2074_v45, %v985_v43  ;;  %v795_v52 = vmax.f32 %v663_v48, 0.0  ;;  %v465_v42 = vmax.f32 %v391_v39, 0.0 }
 0x1a5   :  { %v338_v47 = vpop.f32.mrf.mxu0 }
 0x1a6   :  { %v1209_v54 = vmul.f32 0.2, %v986_v49  ;;  %v339_v55 = vadd.f32 %v1820_v34, %v338_v47  ;;  %vm1145_vm3 = vcmp.ge.f32.partialorder %v986_v49, 0.0  ;;  %v500_v48 = vpack.c.bf16 %v465_v42, %v464_v38 }
 0x1a8   :  { %1604 = vmatmul.msk.bf16.gmra.mxu0 %vm138_vm1, %v126_v46  ;;  %v444_v61 = vmax.f32 %v339_v55, 0.0  ;;  %v2085_v63 = vsel %vm1145_vm3, %v986_v49, %v1209_v54  ;;  %1638 = vmatmul.msk.bf16.vlgmr.msrb.gmra.mxu3 %vm511_vm2, %v500_v48 }
 0x1a9   :  { %v664_v50 = vpop.f32.mrf.mxu1 }
 0x1aa   :  { %v665_v51 = vadd.f32 %v1923_v0, %v664_v50 }
 0x1ab   :  { %v987_v53 = vpop.f32.mrf.mxu2 }
 0x1ac   :  { %v796_v56 = vmax.f32 %v665_v51, 0.0  ;;  %v988_v44 = vadd.f32 %v2074_v45, %v987_v53 }
 0x1ad   :  { %v340_v57 = vpop.f32.mrf.mxu0 }
 0x1ae   :  { %vm1146_vm4 = vcmp.ge.f32.partialorder %v988_v44, 0.0  ;;  %v1210_v58 = vmul.f32 0.2, %v988_v44  ;;  %v341_v59 = vadd.f32 %v1820_v34, %v340_v57  ;;  %v850_v60 = vpack.c.bf16 %v796_v56, %v795_v52 }
 0x1b0   :  { %v445_v62 = vmax.f32 %v341_v59, 0.0  ;;  %1651 = vmatmul.msk.bf16.gmra.mxu2 %vm511_vm2, %v850_v60  ;;  %v2087_v1 = vsel %vm1146_vm4, %v988_v44, %v1210_v58  ;;  %v393_v44 = vpop.f32.mrf.mxu3 }
 0x1b1   :  { %v667_v2 = vpop.f32.mrf.mxu1  ;;  %v1339_v5 = vpack.c.bf16 %v2087_v1, %v2085_v63  ;;  %v394_v4 = vadd.f32 %v1820_v34, %v393_v44 }
 0x1b2   :  { %v490_v6 = vpack.c.bf16 %v445_v62, %v444_v61  ;;  %v668_v10 = vadd.f32 %v1923_v0, %v667_v2 }
 0x1b3   :  { %v990_v7 = vpop.f32.mrf.mxu2 }
 0x1b4   :  { %1628 = vmatmul.msk.bf16.gmra.mxu1 %vm511_vm2, %v490_v6  ;;  %v991_v11 = vadd.f32 %v2074_v45, %v990_v7  ;;  %v797_v14 = vmax.f32 %v668_v10, 0.0 }
 0x1b5   :  { %v343_v9 = vpop.f32.mrf.mxu0 }
 0x1b6   :  { %v1211_v16 = vmul.f32 0.2, %v991_v11  ;;  %v344_v17 = vadd.f32 %v1820_v34, %v343_v9  ;;  %vm1147_vm5 = vcmp.ge.f32.partialorder %v991_v11, 0.0  ;;  %v466_v9 = vmax.f32 %v394_v4, 0.0 }
 0x1b8   :  { %1605 = vmatmul.msk.bf16.gmra.mxu0 %vm138_vm1, %v127_v8  ;;  %v446_v25 = vmax.f32 %v344_v17, 0.0  ;;  %v2106_v27 = vsel %vm1147_vm5, %v991_v11, %v1211_v16  ;;  %v395_v7 = vpop.f32.mrf.mxu3  ;;  %vm1377_vm1 = vcmask 261120  }
 0x1b9   :  { %v669_v12 = vpop.f32.mrf.mxu1  ;;  %v396_v10 = vadd.f32 %v1820_v34, %v395_v7 }
 0x1ba   :  { %v670_v13 = vadd.f32 %v1923_v0, %v669_v12 }
 0x1bb   :  { %v992_v15 = vpop.f32.mrf.mxu2 }
 0x1bc   :  { %v798_v18 = vmax.f32 %v670_v13, 0.0  ;;  %v993_v19 = vadd.f32 %v2074_v45, %v992_v15  ;;  %v467_v13 = vmax.f32 %v396_v10, 0.0 }
 0x1bd   :  { %v345_v20 = vpop.f32.mrf.mxu0 }
 0x1be   :  { %vm1148_vm6 = vcmp.ge.f32.partialorder %v993_v19, 0.0  ;;  %v1212_v21 = vmul.f32 0.2, %v993_v19  ;;  %v346_v22 = vadd.f32 %v1820_v34, %v345_v20  ;;  %v851_v23 = vpack.c.bf16 %v798_v18, %v797_v14 }
 0x1bf   :  { %v501_v17 = vpack.c.bf16 %v467_v13, %v466_v9 }
 0x1c0   :  { %v447_v26 = vmax.f32 %v346_v22, 0.0  ;;  %1652 = vmatmul.msk.bf16.gmra.mxu2 %vm511_vm2, %v851_v23  ;;  %v2108_v28 = vsel %vm1148_vm6, %v993_v19, %v1212_v21 }
 0x1c1   :  { %v672_v29 = vpop.f32.mrf.mxu1  ;;  %v1340_v30 = vpack.c.bf16 %v2108_v28, %v2106_v27  ;;  %1639 = vmatmul.msk.bf16.gmra.mxu3 %vm511_vm2, %v501_v17  ;;  %v1382_v27 = vsel %vm1377_vm1, %v1339_v5, 0 }
 0x1c2   :  { %v491_v31 = vpack.c.bf16 %v447_v26, %v446_v25  ;;  %v673_v37 = vadd.f32 %v1923_v0, %v672_v29  ;;  %v398_v26 = vpop.f32.mrf.mxu3 }
 0x1c3   :  { %v995_v32 = vpop.f32.mrf.mxu2  ;;  %v399_v39 = vadd.f32 %v1820_v34, %v398_v26 }
 0x1c4   :  { %1629 = vmatmul.msk.bf16.gmra.mxu1 %vm511_vm2, %v491_v31  ;;  %v996_v40 = vadd.f32 %v2074_v45, %v995_v32  ;;  %v799_v46 = vmax.f32 %v673_v37, 0.0 }
 0x1c5   :  { %v348_v35 = vpop.f32.mrf.mxu0 }
 0x1c6   :  { %v1213_v49 = vmul.f32 0.2, %v996_v40  ;;  %v349_v50 = vadd.f32 %v1820_v34, %v348_v35  ;;  %vm1149_vm7 = vcmp.ge.f32.partialorder %v996_v40, 0.0 }
 0x1c8   :  { %v448_v57 = vmax.f32 %v349_v50, 0.0  ;;  %v2123_v59 = vsel %vm1149_vm7, %v996_v40, %v1213_v49 }
 0x1c9   :  { %v674_v41 = vpop.f32.mrf.mxu1 }
 0x1ca   :  { %v675_v43 = vadd.f32 %v1923_v0, %v674_v41  ;;  %v400_v41 = vpop.f32.mrf.mxu3 }
 0x1cb   :  { %v997_v47 = vpop.f32.mrf.mxu2 }
 0x1cc   :  { %v800_v51 = vmax.f32 %v675_v43, 0.0  ;;  %v998_v52 = vadd.f32 %v2074_v45, %v997_v47  ;;  %v468_v43 = vmax.f32 %v399_v39, 0.0 }
 0x1cd   :  { %v350_v53 = vpop.f32.mrf.mxu0 }
 0x1ce   :  { %vm1150_vm8 = vcmp.ge.f32.partialorder %v998_v52, 0.0  ;;  %v1214_v54 = vmul.f32 0.2, %v998_v52  ;;  %v351_v55 = vadd.f32 %v1820_v34, %v350_v53  ;;  %v852_v56 = vpack.c.bf16 %v800_v51, %v799_v46 }
 0x1cf   :  { %v401_v46 = vadd.f32 %v1820_v34, %v400_v41 }
 0x1d0   :  { %v449_v58 = vmax.f32 %v351_v55, 0.0  ;;  %1653 = vmatmul.msk.bf16.gmra.mxu2 %vm511_vm2, %v852_v56  ;;  %v2125_v60 = vsel %vm1150_vm8, %v998_v52, %v1214_v54 }
 0x1d1   :  { %v677_v61 = vpop.f32.mrf.mxu1  ;;  %v1341_v62 = vpack.c.bf16 %v2125_v60, %v2123_v59  ;;  %v469_v49 = vmax.f32 %v401_v46, 0.0 }
 0x1d2   :  { %v492_v2 = vpack.c.bf16 %v449_v58, %v448_v57  ;;  %v678_v8 = vadd.f32 %v1923_v0, %v677_v61 }
 0x1d3   :  { %v1000_v3 = vpop.f32.mrf.mxu2  ;;  %v502_v53 = vpack.c.bf16 %v469_v49, %v468_v43 }
 0x1d4   :  { %1630 = vmatmul.msk.bf16.gmra.mxu1 %vm511_vm2, %v492_v2  ;;  %v1001_v11 = vadd.f32 %v2074_v45, %v1000_v3  ;;  %v801_v15 = vmax.f32 %v678_v8, 0.0  ;;  %v403_v3 = vpop.f32.mrf.mxu3 }
 0x1d5   :  { %v353_v6 = vpop.f32.mrf.mxu0  ;;  %1640 = vmatmul.msk.bf16.gmra.mxu3 %vm511_vm2, %v502_v53  ;;  %v404_v13 = vadd.f32 %v1820_v34, %v403_v3 }
 0x1d6   :  { %v1215_v18 = vmul.f32 0.2, %v1001_v11  ;;  %v354_v19 = vadd.f32 %v1820_v34, %v353_v6  ;;  %vm1151_vm9 = vcmp.ge.f32.partialorder %v1001_v11, 0.0 }
 0x1d8   :  { %v450_v29 = vmax.f32 %v354_v19, 0.0  ;;  %v2140_v32 = vsel %vm1151_vm9, %v1001_v11, %v1215_v18 }
 0x1d9   :  { %v679_v12 = vpop.f32.mrf.mxu1 }
 0x1da   :  { %v680_v14 = vadd.f32 %v1923_v0, %v679_v12 }
 0x1db   :  { %v1002_v16 = vpop.f32.mrf.mxu2 }
 0x1dc   :  { %v802_v20 = vmax.f32 %v680_v14, 0.0  ;;  %v1003_v21 = vadd.f32 %v2074_v45, %v1002_v16  ;;  %v470_v16 = vmax.f32 %v404_v13, 0.0 }
 0x1dd   :  { %v355_v22 = vpop.f32.mrf.mxu0 }
 0x1de   :  { %v853_v23 = vpack.c.bf16 %v802_v20, %v801_v15  ;;  %vm1152_vm10 = vcmp.ge.f32.partialorder %v1003_v21, 0.0  ;;  %v1216_v24 = vmul.f32 0.2, %v1003_v21  ;;  %v356_v25 = vadd.f32 %v1820_v34, %v355_v22  ;;  %v405_v15 = vpop.f32.mrf.mxu3 }
 0x1df   :  { %v406_v17 = vadd.f32 %v1820_v34, %v405_v15 }
 0x1e0   :  { %v451_v31 = vmax.f32 %v356_v25, 0.0  ;;  %1654 = vmatmul.msk.bf16.gmra.mxu2 %vm511_vm2, %v853_v23  ;;  %v2142_v33 = vsel %vm1152_vm10, %v1003_v21, %v1216_v24 }
 0x1e1   :  { %v682_v35 = vpop.f32.mrf.mxu1  ;;  %v1342_v36 = vpack.c.bf16 %v2142_v33, %v2140_v32  ;;  %v471_v20 = vmax.f32 %v406_v17, 0.0  ;;  %v1388_v32 = vsel %vm1377_vm1, %v1341_v62, 0 }
 0x1e2   :  { %v493_v37 = vpack.c.bf16 %v451_v31, %v450_v29  ;;  %v683_v42 = vadd.f32 %v1923_v0, %v682_v35 }
 0x1e3   :  { %v1005_v38 = vpop.f32.mrf.mxu2  ;;  %v503_v23 = vpack.c.bf16 %v471_v20, %v470_v16 }
 0x1e4   :  { %1631 = vmatmul.msk.bf16.gmra.mxu1 %vm511_vm2, %v493_v37  ;;  %v1006_v47 = vadd.f32 %v2074_v45, %v1005_v38  ;;  %v803_v51 = vmax.f32 %v683_v42, 0.0 }
 0x1e5   :  { %v358_v40 = vpop.f32.mrf.mxu0  ;;  %1641 = vmatmul.msk.bf16.gmra.mxu3 %vm511_vm2, %v503_v23 }
 0x1e6   :  { %v1217_v54 = vmul.f32 0.2, %v1006_v47  ;;  %v359_v55 = vadd.f32 %v1820_v34, %v358_v40  ;;  %vm1153_vm11 = vcmp.ge.f32.partialorder %v1006_v47, 0.0 }
 0x1e8   :  { %v452_v4 = vmax.f32 %v359_v55, 0.0  ;;  %v2157_v7 = vsel %vm1153_vm11, %v1006_v47, %v1217_v54  ;;  %v2181_v47 = vld [vmem:[%s2511_s3] ss:$0 sm:$0xff] }
 0x1e9   :  { %v684_v48 = vpop.f32.mrf.mxu1 }
 0x1ea   :  { %v685_v50 = vadd.f32 %v1923_v0, %v684_v48 }
 0x1eb   :  { %v1007_v52 = vpop.f32.mrf.mxu2 }
 0x1ec   :  { %v804_v56 = vmax.f32 %v685_v50, 0.0  ;;  %v1008_v44 = vadd.f32 %v2074_v45, %v1007_v52 }
 0x1ed   :  { %v360_v57 = vpop.f32.mrf.mxu0 }
 0x1ee   :  { %v854_v58 = vpack.c.bf16 %v804_v56, %v803_v51  ;;  %vm1154_vm12 = vcmp.ge.f32.partialorder %v1008_v44, 0.0  ;;  %v1218_v61 = vmul.f32 0.2, %v1008_v44  ;;  %v361_v2 = vadd.f32 %v1820_v34, %v360_v57 }
 0x1f0   :  { %v453_v6 = vmax.f32 %v361_v2, 0.0  ;;  %1655 = vmatmul.msk.bf16.gmra.mxu2 %vm511_vm2, %v854_v58  ;;  %v2159_v8 = vsel %vm1154_vm12, %v1008_v44, %v1218_v61 }
 0x1f1   :  { %v687_v9 = vpop.f32.mrf.mxu1  ;;  %v1343_v10 = vpack.c.bf16 %v2159_v8, %v2157_v7 }
 0x1f2   :  { %v494_v11 = vpack.c.bf16 %v453_v6, %v452_v4  ;;  %v688_v18 = vadd.f32 %v1923_v0, %v687_v9 }
 0x1f3   :  { %v2163_v12 = vpop.f32.mrf.mxu2 }
 0x1f4   :  { %1632 = vmatmul.msk.bf16.gmra.mxu1 %vm511_vm2, %v494_v11  ;;  %v805_v24 = vmax.f32 %v688_v18, 0.0 }
 0x1f5   :  { %v363_v14 = vpop.f32.mrf.mxu0 }
 0x1f6   :  { %v364_v25 = vadd.f32 %v1820_v34, %v363_v14 }
 0x1f8   :  { %v454_v37 = vmax.f32 %v364_v25, 0.0 }
 0x1f9   :  { %v689_v19 = vpop.f32.mrf.mxu1 }
 0x1fa   :  { %v690_v21 = vadd.f32 %v1923_v0, %v689_v19 }
 0x1fb   :  { %v2170_v22 = vpop.f32.mrf.mxu2 }
 0x1fc   :  { %v806_v26 = vmax.f32 %v690_v21, 0.0 }
 0x1fd   :  { %v365_v29 = vpop.f32.mrf.mxu0 }
 0x1fe   :  { %v855_v31 = vpack.c.bf16 %v806_v26, %v805_v24  ;;  %v366_v35 = vadd.f32 %v1820_v34, %v365_v29 }
 0x200   :  { %v455_v38 = vmax.f32 %v366_v35, 0.0  ;;  %1656 = vmatmul.msk.bf16.gmra.mxu2 %vm511_vm2, %v855_v31 }
 0x201   :  { %v692_v39 = vpop.f32.mrf.mxu1 }
 0x202   :  { %v495_v40 = vpack.c.bf16 %v455_v38, %v454_v37  ;;  %v693_v43 = vadd.f32 %v1923_v0, %v692_v39 }
 0x203   :  { %v1015_v41 = vpop.f32.mrf.mxu2 }
 0x204   :  { %1633 = vmatmul.msk.bf16.gmra.mxu1 %vm511_vm2, %v495_v40  ;;  %v807_v50 = vmax.f32 %v693_v43, 0.0  ;;  %v1016_v18 = vadd.f32 %v2074_v45, %v1015_v41  ;;  %v1013_v40 = vadd.f32 %v2074_v45, %v2170_v22 }
 0x205   :  { %v368_v42 = vpop.f32.mrf.mxu0 }
 0x206   :  { %v369_v34 = vadd.f32 %v2181_v47, %v368_v42  ;;  %v1221_v38 = vmul.f32 0.2, %v1016_v18  ;;  %vm1157_vm3 = vcmp.ge.f32.partialorder %v1016_v18, 0.0  ;;  %vm1156_vm4 = vcmp.ge.f32.partialorder %v1013_v40, 0.0 }
 0x208   :  { %v456_v53 = vmax.f32 %v369_v34, 0.0 }
 0x209   :  { %v694_v46 = vpop.f32.mrf.mxu1 }
 0x20a   :  { %v695_v48 = vadd.f32 %v1923_v0, %v694_v46  ;;  %v1011_v46 = vadd.f32 %v2074_v45, %v2163_v12 }
 0x20b   :  { %v1017_v49 = vpop.f32.mrf.mxu2 }
 0x20c   :  { %v808_v51 = vmax.f32 %v695_v48, 0.0  ;;  %v1018_v11 = vadd.f32 %v2074_v45, %v1017_v49  ;;  %v1285_v48 = vsel %vm1157_vm3, %v1016_v18, %v1221_v38  ;;  %v1220_v49 = vmul.f32 0.2, %v1013_v40 }
 0x20d   :  { %v370_v52 = vpop.f32.mrf.mxu0  ;;  %vm1155_vm5 = vcmp.ge.f32.partialorder %v1011_v46, 0.0  ;;  %v1394_v38 = vsel %vm1377_vm1, %v1343_v10, 0 }
 0x20e   :  { %v856_v54 = vpack.c.bf16 %v808_v51, %v807_v50  ;;  %v371_v55 = vadd.f32 %v2181_v47, %v370_v52  ;;  %v1222_v25 = vmul.f32 0.2, %v1018_v11  ;;  %vm1158_vm15 = vcmp.ge.f32.partialorder %v1018_v11, 0.0 }
 0x20f   :  { %v1219_v52 = vmul.f32 0.2, %v1011_v46  ;;  %v1284_v12 = vsel %vm1156_vm4, %v1013_v40, %v1220_v49 }
 0x210   :  { %v457_v56 = vmax.f32 %v371_v55, 0.0  ;;  %1657 = vmatmul.msk.bf16.gmra.mxu2 %vm511_vm2, %v856_v54  ;;  %v1286_v43 = vsel %vm1158_vm15, %v1018_v11, %v1222_v25 }
 0x211   :  { %v697_v44 = vpop.f32.mrf.mxu1  ;;  %v1345_v50 = vpack.c.bf16 %v1286_v43, %v1285_v48 }
 0x212   :  { %v496_v57 = vpack.c.bf16 %v457_v56, %v456_v53  ;;  %v698_v2 = vadd.f32 %v1923_v0, %v697_v44 }
 0x213   :  { %v1020_v58 = vpop.f32.mrf.mxu2  ;;  %v1400_v44 = vsel %vm1377_vm1, %v1345_v50, 0 }
 0x214   :  { %1634 = vmatmul.msk.bf16.gmra.mxu1 %vm511_vm2, %v496_v57  ;;  %v1021_v3 = vadd.f32 %v2074_v45, %v1020_v58  ;;  %v809_v14 = vmax.f32 %v698_v2, 0.0 }
 0x215   :  { %v373_v61 = vpop.f32.mrf.mxu0 }
 0x216   :  { %v374_v4 = vadd.f32 %v2181_v47, %v373_v61  ;;  %v1223_v15 = vmul.f32 0.2, %v1021_v3  ;;  %vm1159_vm13 = vcmp.ge.f32.partialorder %v1021_v3, 0.0 }
 0x218   :  { %v458_v19 = vmax.f32 %v374_v4, 0.0  ;;  %v1287_v26 = vsel %vm1159_vm13, %v1021_v3, %v1223_v15 }
 0x219   :  { %v699_v6 = vpop.f32.mrf.mxu1 }
 0x21a   :  { %v700_v9 = vadd.f32 %v1923_v0, %v699_v6  ;;  %v1283_v6 = vsel %vm1155_vm5, %v1011_v46, %v1219_v52  ;;  %v1391_v52 = vsel %vm1377_vm1, %v1342_v36, 0 }
 0x21b   :  { %v1022_v13 = vpop.f32.mrf.mxu2 }
 0x21c   :  { %v810_v16 = vmax.f32 %v700_v9, 0.0  ;;  %v1023_v17 = vadd.f32 %v2074_v45, %v1022_v13 }
 0x21d   :  { %v375_v20 = vpop.f32.mrf.mxu0 }
 0x21e   :  { %v857_v21 = vpack.c.bf16 %v810_v16, %v809_v14  ;;  %vm1160_vm14 = vcmp.ge.f32.partialorder %v1023_v17, 0.0  ;;  %v1224_v23 = vmul.f32 0.2, %v1023_v17  ;;  %v376_v24 = vadd.f32 %v2181_v47, %v375_v20 }
 0x21f   :  { %v1344_v14 = vpack.c.bf16 %v1284_v12, %v1283_v6  ;;  %v1385_v6 = vsel %vm1377_vm1, %v1340_v30, 0 }
 0x220   :  { %v1288_v29 = vsel %vm1160_vm14, %v1023_v17, %v1224_v23  ;;  %v459_v31 = vmax.f32 %v376_v24, 0.0  ;;  %1658 = vmatmul.msk.bf16.gmra.mxu2 %vm511_vm2, %v857_v21 }
 0x221   :  { %v702_v35 = vpop.f32.mrf.mxu1  ;;  %v1346_v37 = vpack.c.bf16 %v1288_v29, %v1287_v26  ;;  %v1397_v23 = vsel %vm1377_vm1, %v1344_v14, 0 }
 0x222   :  { %v497_v39 = vpack.c.bf16 %v459_v31, %v458_v19  ;;  %v703_v51 = vadd.f32 %v1923_v0, %v702_v35 }
 0x223   :  { %v1025_v41 = vpop.f32.mrf.mxu2  ;;  %v1403_v42 = vsel %vm1377_vm1, %v1346_v37, 0 }
 0x224   :  { %1635 = vmatmul.msk.bf16.gmra.mxu1 %vm511_vm2, %v497_v39  ;;  %1477 = vmatpush.bf16.xpose.msrb.mxu3 %v1403_v42  ;;  %v1026_v22 = vadd.f32 %v2074_v45, %v1025_v41  ;;  %v811_v57 = vmax.f32 %v703_v51, 0.0 }
 0x225   :  { %v378_v34 = vpop.f32.mrf.mxu0 }
 0x226   :  { %v379_v53 = vadd.f32 %v2181_v47, %v378_v34  ;;  %v1225_v58 = vmul.f32 0.2, %v1026_v22  ;;  %vm1161_vm6 = vcmp.ge.f32.partialorder %v1026_v22, 0.0 }
 0x228   :  { %v460_v3 = vmax.f32 %v379_v53, 0.0  ;;  %v2211_v16 = vsel %vm1161_vm6, %v1026_v22, %v1225_v58 }
 0x229   :  { %v704_v54 = vpop.f32.mrf.mxu1 }
 0x22a   :  { %v705_v55 = vadd.f32 %v1923_v0, %v704_v54 }
 0x22b   :  { %v1027_v56 = vpop.f32.mrf.mxu2 }
 0x22c   :  { %v812_v61 = vmax.f32 %v705_v55, 0.0  ;;  %v1028_v2 = vadd.f32 %v2074_v45, %v1027_v56  ;;  %1478 = vmatpush.bf16.xpose.msrb.mxu3 %v1400_v44 }
 0x22d   :  { %v380_v4 = vpop.f32.mrf.mxu0 }
 0x22e   :  { %v858_v9 = vpack.c.bf16 %v812_v61, %v811_v57  ;;  %vm1162_vm7 = vcmp.ge.f32.partialorder %v1028_v2, 0.0  ;;  %v1226_v11 = vmul.f32 0.2, %v1028_v2  ;;  %v381_v13 = vadd.f32 %v2181_v47, %v380_v4 }
 0x230   :  { %v461_v15 = vmax.f32 %v381_v13, 0.0  ;;  %1659 = vmatmul.msk.bf16.gmra.mxu2 %vm511_vm2, %v858_v9  ;;  %v2213_v17 = vsel %vm1162_vm7, %v1028_v2, %v1226_v11  ;;  %v757_v2 = vpop.f32.mrf.mxu3 }
 0x231   :  { %v707_v18 = vpop.f32.mrf.mxu1  ;;  %v1347_v19 = vpack.c.bf16 %v2213_v17, %v2211_v16 }
 0x232   :  { %v498_v20 = vpack.c.bf16 %v461_v15, %v460_v3  ;;  %v708_v25 = vadd.f32 %v1923_v0, %v707_v18 }
 0x233   :  { %v1030_v21 = vpop.f32.mrf.mxu2 }
 0x234   :  { %1636 = vmatmul.msk.bf16.gmra.mxu1 %vm511_vm2, %v498_v20  ;;  %1479 = vmatpush.bf16.xpose.msrb.mxu3 %v1397_v23  ;;  %v1031_v26 = vadd.f32 %v2074_v45, %v1030_v21  ;;  %v813_v39 = vmax.f32 %v708_v25, 0.0 }
 0x235   :  { %v383_v24 = vpop.f32.mrf.mxu0 }
 0x236   :  { %v384_v29 = vadd.f32 %v2181_v47, %v383_v24  ;;  %v1227_v40 = vmul.f32 0.2, %v1031_v26  ;;  %vm1163_vm8 = vcmp.ge.f32.partialorder %v1031_v26, 0.0 }
 0x238   :  { %v462_v43 = vmax.f32 %v384_v29, 0.0  ;;  %v2230_v7 = vsel %vm1163_vm8, %v1031_v26, %v1227_v40  ;;  %v759_v14 = vpop.f32.mrf.mxu3 }
 0x239   :  { %v709_v31 = vpop.f32.mrf.mxu1 }
 0x23a   :  { %v710_v35 = vadd.f32 %v1923_v0, %v709_v31 }
 0x23b   :  { %v1032_v37 = vpop.f32.mrf.mxu2 }
 0x23c   :  { %v814_v41 = vmax.f32 %v710_v35, 0.0  ;;  %v1033_v42 = vadd.f32 %v2074_v45, %v1032_v37  ;;  %1480 = vmatpush.bf16.xpose.msrb.mxu3 %v1394_v38 }
 0x23d   :  { %v385_v46 = vpop.f32.mrf.mxu0 }
 0x23e   :  { %v859_v34 = vpack.c.bf16 %v814_v41, %v813_v39  ;;  %vm1164_vm9 = vcmp.ge.f32.partialorder %v1033_v42, 0.0  ;;  %v1228_v48 = vmul.f32 0.2, %v1033_v42  ;;  %v386_v0 = vadd.f32 %v2181_v47, %v385_v46  ;;  %v2244_v47 = vld [vmem:[%s2513_s5] ss:$0 sm:$0xff] }
 0x23f   :  { %v758_v9 = vadd.f32 %v2244_v47, %v757_v2  ;;  %v760_v20 = vadd.f32 %v2244_v47, %v759_v14 }
 0x240   :  { %v463_v49 = vmax.f32 %v386_v0, 0.0  ;;  %1660 = vmatmul.msk.bf16.gmra.mxu2 %vm511_vm2, %v859_v34  ;;  %v2232_v8 = vsel %vm1164_vm9, %v1033_v42, %v1228_v48 }
 0x241   :  { %v712_v10 = vpop.f32.mrf.mxu1  ;;  %v1348_v50 = vpack.c.bf16 %v2232_v8, %v2230_v7  ;;  %v833_v18 = vmax.f32 %v758_v9, 0.0  ;;  %v834_v28 = vmax.f32 %v760_v20, 0.0 }
 0x242   :  { %v499_v51 = vpack.c.bf16 %v463_v49, %v462_v43  ;;  %v713_v53 = vadd.f32 %v2244_v47, %v712_v10 }
 0x243   :  { %v1035_v22 = vpop.f32.mrf.mxu2  ;;  %v869_v29 = vpack.c.bf16 %v834_v28, %v833_v18 }
 0x244   :  { %1637 = vmatmul.msk.bf16.gmra.mxu1 %vm511_vm2, %v499_v51  ;;  %1481 = vmatpush.bf16.xpose.msrb.mxu3 %v1391_v52  ;;  %v1036_v54 = vadd.f32 %v2074_v45, %v1035_v22  ;;  %v815_v33 = vmax.f32 %v713_v53, 0.0  ;;  %v762_v37 = vpop.f32.mrf.mxu3 }
 0x245   :  { %1670 = vmatmul.msk.bf16.vlgmr.msra.gmra.mxu3 %vm511_vm2, %v869_v29  ;;  %v763_v40 = vadd.f32 %v2244_v47, %v762_v37 }
 0x246   :  { %v1229_v36 = vmul.f32 0.2, %v1036_v54  ;;  %vm1165_vm10 = vcmp.ge.f32.partialorder %v1036_v54, 0.0 }
 0x247   :  { %v835_v34 = vmax.f32 %v763_v40, 0.0 }
 0x248   :  { %v2255_v3 = vsel %vm1165_vm10, %v1036_v54, %v1229_v36 }
 0x249   :  { %v714_v55 = vpop.f32.mrf.mxu1 }
 0x24a   :  { %v715_v56 = vadd.f32 %v2244_v47, %v714_v55 }
 0x24b   :  { %v1037_v44 = vpop.f32.mrf.mxu2 }
 0x24c   :  { %v816_v12 = vmax.f32 %v715_v56, 0.0  ;;  %v1038_v57 = vadd.f32 %v2074_v45, %v1037_v44  ;;  %1482 = vmatpush.bf16.xpose.msrb.mxu3 %v1388_v32  ;;  %v764_v43 = vpop.f32.mrf.mxu3 }
 0x24d   :  { %v765_v48 = vadd.f32 %v2244_v47, %v764_v43 }
 0x24e   :  { %v860_v58 = vpack.c.bf16 %v816_v12, %v815_v33  ;;  %vm1166_vm11 = vcmp.ge.f32.partialorder %v1038_v57, 0.0  ;;  %v1230_v61 = vmul.f32 0.2, %v1038_v57 }
 0x24f   :  { %v836_v10 = vmax.f32 %v765_v48, 0.0 }
 0x250   :  { %1661 = vmatmul.msk.bf16.gmra.mxu2 %vm511_vm2, %v860_v58  ;;  %v2257_v4 = vsel %vm1166_vm11, %v1038_v57, %v1230_v61 }
 0x251   :  { %v717_v59 = vpop.f32.mrf.mxu1  ;;  %v1349_v60 = vpack.c.bf16 %v2257_v4, %v2255_v3  ;;  %v870_v54 = vpack.c.bf16 %v836_v10, %v835_v34 }
 0x252   :  { %v718_v11 = vadd.f32 %v2244_v47, %v717_v59 }
 0x253   :  { %v1040_v62 = vpop.f32.mrf.mxu2 }
 0x254   :  { %1483 = vmatpush.bf16.xpose.msrb.mxu3 %v1385_v6  ;;  %v1041_v13 = vadd.f32 %v2074_v45, %v1040_v62  ;;  %v817_v30 = vmax.f32 %v718_v11, 0.0 }
 0x255   :  { %1671 = vmatmul.msk.bf16.gmra.mxu3 %vm511_vm2, %v870_v54 }
 0x256   :  { %v1231_v24 = vmul.f32 0.2, %v1041_v13  ;;  %vm1167_vm12 = vcmp.ge.f32.partialorder %v1041_v13, 0.0 }
 0x258   :  { %v2277_v63 = vsel %vm1167_vm12, %v1041_v13, %v1231_v24  ;;  %v767_v44 = vpop.f32.mrf.mxu3 }
 0x259   :  { %v719_v15 = vpop.f32.mrf.mxu1  ;;  %v768_v58 = vadd.f32 %v2244_v47, %v767_v44 }
 0x25a   :  { %v720_v21 = vadd.f32 %v2244_v47, %v719_v15 }
 0x25b   :  { %v1042_v23 = vpop.f32.mrf.mxu2  ;;  %v837_v62 = vmax.f32 %v768_v58, 0.0 }
 0x25c   :  { %v818_v25 = vmax.f32 %v720_v21, 0.0  ;;  %v1043_v26 = vadd.f32 %v2074_v45, %v1042_v23  ;;  %1484 = vmatpush.bf16.xpose.msrb.mxu3 %v1382_v27 }
 0x25e   :  { %v861_v31 = vpack.c.bf16 %v818_v25, %v817_v30  ;;  %vm1168_vm13 = vcmp.ge.f32.partialorder %v1043_v26, 0.0  ;;  %v1232_v35 = vmul.f32 0.2, %v1043_v26 }
 0x260   :  { %1662 = vmatmul.msk.bf16.gmra.mxu2 %vm511_vm2, %v861_v31  ;;  %v2279_v1 = vsel %vm1168_vm13, %v1043_v26, %v1232_v35  ;;  %v769_v2 = vpop.f32.mrf.mxu3 }
 0x261   :  { %v722_v5 = vpop.f32.mrf.mxu1  ;;  %v1350_v38 = vpack.c.bf16 %v2279_v1, %v2277_v63  ;;  %v770_v6 = vadd.f32 %v2244_v47, %v769_v2  ;;  %v1412_v63 = vsel %vm1377_vm1, %v1349_v60, 0  ;;  %v1409_v60 = vsel %vm1377_vm1, %v1348_v50, 0 }
 0x262   :  { %v723_v41 = vadd.f32 %v2244_v47, %v722_v5 }
 0x263   :  { %v1045_v39 = vpop.f32.mrf.mxu2  ;;  %v838_v13 = vmax.f32 %v770_v6, 0.0 }
 0x264   :  { %v1046_v42 = vadd.f32 %v2074_v45, %v1045_v39  ;;  %v819_v51 = vmax.f32 %v723_v41, 0.0 }
 0x265   :  { %v871_v18 = vpack.c.bf16 %v838_v13, %v837_v62 }
 0x266   :  { %v1233_v22 = vmul.f32 0.2, %v1046_v42  ;;  %vm1169_vm14 = vcmp.ge.f32.partialorder %v1046_v42, 0.0 }
 0x267   :  { %1672 = vmatmul.msk.bf16.gmra.mxu3 %vm511_vm2, %v871_v18 }
 0x268   :  { %v2291_v32 = vsel %vm1169_vm14, %v1046_v42, %v1233_v22  ;;  %v772_v21 = vpop.f32.mrf.mxu3 }
 0x269   :  { %v724_v46 = vpop.f32.mrf.mxu1  ;;  %v773_v28 = vadd.f32 %v2244_v47, %v772_v21 }
 0x26a   :  { %v725_v0 = vadd.f32 %v2244_v47, %v724_v46 }
 0x26b   :  { %v1047_v49 = vpop.f32.mrf.mxu2  ;;  %v839_v26 = vmax.f32 %v773_v28, 0.0 }
 0x26c   :  { %v820_v52 = vmax.f32 %v725_v0, 0.0  ;;  %v1048_v53 = vadd.f32 %v2074_v45, %v1047_v49 }
 0x26e   :  { %v862_v55 = vpack.c.bf16 %v820_v52, %v819_v51  ;;  %vm1170_vm15 = vcmp.ge.f32.partialorder %v1048_v53, 0.0  ;;  %v1234_v56 = vmul.f32 0.2, %v1048_v53 }
 0x270   :  { %1663 = vmatmul.msk.bf16.gmra.mxu2 %vm511_vm2, %v862_v55  ;;  %v2293_v33 = vsel %vm1170_vm15, %v1048_v53, %v1234_v56  ;;  %v774_v24 = vpop.f32.mrf.mxu3 }
 0x271   :  { %v727_v36 = vpop.f32.mrf.mxu1  ;;  %v1351_v12 = vpack.c.bf16 %v2293_v33, %v2291_v32  ;;  %v775_v29 = vadd.f32 %v2244_v47, %v774_v24 }
 0x272   :  { %v728_v61 = vadd.f32 %v2244_v47, %v727_v36 }
 0x273   :  { %v2297_v57 = vpop.f32.mrf.mxu2  ;;  %v840_v37 = vmax.f32 %v775_v29, 0.0 }
 0x274   :  { %v821_v14 = vmax.f32 %v728_v61, 0.0 }
 0x275   :  { %v872_v40 = vpack.c.bf16 %v840_v37, %v839_v26 }
 0x277   :  { %1673 = vmatmul.msk.bf16.gmra.mxu3 %vm511_vm2, %v872_v40 }
 0x279   :  { %v729_v59 = vpop.f32.mrf.mxu1 }
 0x27a   :  { %v730_v9 = vadd.f32 %v2244_v47, %v729_v59 }
 0x27b   :  { %v1052_v11 = vpop.f32.mrf.mxu2 }
 0x27c   :  { %v822_v15 = vmax.f32 %v730_v9, 0.0  ;;  %v1053_v9 = vadd.f32 %v2074_v45, %v1052_v11 }
 0x27e   :  { %v863_v20 = vpack.c.bf16 %v822_v15, %v821_v14  ;;  %v1051_v14 = vadd.f32 %v2074_v45, %v2297_v57  ;;  %v1236_v21 = vmul.f32 0.2, %v1053_v9  ;;  %vm1172_vm7 = vcmp.ge.f32.partialorder %v1053_v9, 0.0 }
 0x280   :  { %1664 = vmatmul.msk.bf16.gmra.mxu2 %vm511_vm2, %v863_v20  ;;  %v1235_v28 = vmul.f32 0.2, %v1051_v14  ;;  %vm1171_vm8 = vcmp.ge.f32.partialorder %v1051_v14, 0.0 }
 0x281   :  { %v732_v23 = vpop.f32.mrf.mxu1 }
 0x282   :  { %v733_v30 = vadd.f32 %v2244_v47, %v732_v23 }
 0x283   :  { %v1055_v27 = vpop.f32.mrf.mxu2 }
 0x284   :  { %v823_v5 = vmax.f32 %v733_v30, 0.0  ;;  %v1056_v54 = vadd.f32 %v2074_v45, %v1055_v27 }
 0x286   :  { %v1237_v59 = vmul.f32 0.2, %v1056_v54  ;;  %vm1173_vm6 = vcmp.ge.f32.partialorder %v1056_v54, 0.0 }
 0x288   :  { %v1301_v18 = vsel %vm1173_vm6, %v1056_v54, %v1237_v59 }
 0x289   :  { %v734_v25 = vpop.f32.mrf.mxu1 }
 0x28a   :  { %v735_v31 = vadd.f32 %v2244_v47, %v734_v25 }
 0x28b   :  { %v1057_v35 = vpop.f32.mrf.mxu2 }
 0x28c   :  { %v824_v39 = vmax.f32 %v735_v31, 0.0  ;;  %v1058_v51 = vadd.f32 %v2074_v45, %v1057_v35  ;;  %v1300_v31 = vsel %vm1172_vm7, %v1053_v9, %v1236_v21 }
 0x28e   :  { %v864_v41 = vpack.c.bf16 %v824_v39, %v823_v5  ;;  %v1238_v44 = vmul.f32 0.2, %v1058_v51  ;;  %vm1174_vm5 = vcmp.ge.f32.partialorder %v1058_v51, 0.0  ;;  %v1299_v5 = vsel %vm1171_vm8, %v1051_v14, %v1235_v28 }
 0x28f   :  { %v1352_v39 = vpack.c.bf16 %v1300_v31, %v1299_v5  ;;  %v1337_v5 = vld [vmem:[%s2516_s8] sm:$0x3] }
 0x290   :  { %1665 = vmatmul.msk.bf16.gmra.mxu2 %vm511_vm2, %v864_v41  ;;  %v1302_v13 = vsel %vm1174_vm5, %v1058_v51, %v1238_v44 }
 0x291   :  { %v737_v42 = vpop.f32.mrf.mxu1  ;;  %v1353_v20 = vpack.c.bf16 %v1302_v13, %v1301_v18 }
 0x292   :  { %v738_v46 = vadd.f32 %v2244_v47, %v737_v42 }
 0x293   :  { %v1060_v43 = vpop.f32.mrf.mxu2  ;;  %v1424_v25 = vsel %vm1377_vm1, %v1353_v20, 0 }
 0x294   :  { %v1061_v34 = vadd.f32 %v2074_v45, %v1060_v43  ;;  %v825_v0 = vmax.f32 %v738_v46, 0.0 }
 0x296   :  { %v1239_v22 = vmul.f32 0.2, %v1061_v34  ;;  %vm1175_vm3 = vcmp.ge.f32.partialorder %v1061_v34, 0.0 }
 0x298   :  { %v1303_v36 = vsel %vm1175_vm3, %v1061_v34, %v1239_v22  ;;  %v1421_v34 = vsel %vm1377_vm1, %v1352_v39, 0 }
 0x299   :  { %v739_v48 = vpop.f32.mrf.mxu1 }
 0x29a   :  { %v740_v49 = vadd.f32 %v2244_v47, %v739_v48 }
 0x29b   :  { %v1062_v10 = vpop.f32.mrf.mxu2 }
 0x29c   :  { %v826_v52 = vmax.f32 %v740_v49, 0.0  ;;  %v1063_v53 = vadd.f32 %v2074_v45, %v1062_v10 }
 0x29e   :  { %v865_v55 = vpack.c.bf16 %v826_v52, %v825_v0  ;;  %vm1176_vm4 = vcmp.ge.f32.partialorder %v1063_v53, 0.0  ;;  %v1240_v56 = vmul.f32 0.2, %v1063_v53  ;;  %v1418_v52 = vsel %vm1377_vm1, %v1351_v12, 0 }
 0x2a0   :  { %v1304_v58 = vsel %vm1176_vm4, %v1063_v53, %v1240_v56  ;;  %1666 = vmatmul.msk.bf16.gmra.mxu2 %vm511_vm2, %v865_v55 }
 0x2a1   :  { %v742_v61 = vpop.f32.mrf.mxu1  ;;  %v1354_v2 = vpack.c.bf16 %v1304_v58, %v1303_v36 }
 0x2a2   :  { %v743_v15 = vadd.f32 %v2244_v47, %v742_v61 }
 0x2a3   :  { %v1065_v62 = vpop.f32.mrf.mxu2  ;;  %v1427_v6 = vsel %vm1377_vm1, %v1354_v2, 0  ;;  %v2358_v2 = vld [vmem:[%s2515_s7] ss:$0 sm:$0xff] }
 0x2a4   :  { %1490 = vmatpush.bf16.xpose.msra.mxu3 %v1427_v6  ;;  %v1066_v23 = vadd.f32 %v2074_v45, %v1065_v62  ;;  %v827_v30 = vmax.f32 %v743_v15, 0.0 }
 0x2a6   :  { %v1241_v26 = vmul.f32 0.2, %v1066_v23  ;;  %vm1177_vm9 = vcmp.ge.f32.partialorder %v1066_v23, 0.0 }
 0x2a8   :  { %v2328_v40 = vsel %vm1177_vm9, %v1066_v23, %v1241_v26 }
 0x2a9   :  { %v744_v27 = vpop.f32.mrf.mxu1 }
 0x2aa   :  { %v745_v24 = vadd.f32 %v2244_v47, %v744_v27  ;;  %v1406_v27 = vsel %vm1377_vm1, %v1347_v19, 0 }
 0x2ab   :  { %v1067_v11 = vpop.f32.mrf.mxu2 }
 0x2ac   :  { %v828_v29 = vmax.f32 %v745_v24, 0.0  ;;  %v1068_v57 = vadd.f32 %v2074_v45, %v1067_v11  ;;  %1491 = vmatpush.bf16.xpose.msra.mxu3 %v1424_v25 }
 0x2ae   :  { %v866_v35 = vpack.c.bf16 %v828_v29, %v827_v30  ;;  %vm1178_vm10 = vcmp.ge.f32.partialorder %v1068_v57, 0.0  ;;  %v1242_v37 = vmul.f32 0.2, %v1068_v57 }
 0x2b0   :  { %1667 = vmatmul.msk.bf16.gmra.mxu2 %vm511_vm2, %v866_v35  ;;  %v2330_v41 = vsel %vm1178_vm10, %v1068_v57, %v1242_v37 }
 0x2b1   :  { %v747_v42 = vpop.f32.mrf.mxu1  ;;  %v1355_v43 = vpack.c.bf16 %v2330_v41, %v2328_v40 }
 0x2b2   :  { %v748_v48 = vadd.f32 %v2244_v47, %v747_v42  ;;  %v2397_v42 = vpack.c.bf16 %v1337_v5, %v1337_v5 }
 0x2b3   :  { %v1070_v46 = vpop.f32.mrf.mxu2 }
 0x2b4   :  { %1492 = vmatpush.bf16.xpose.msra.mxu3 %v1421_v34  ;;  %v1071_v0 = vadd.f32 %v2074_v45, %v1070_v46  ;;  %v829_v10 = vmax.f32 %v748_v48, 0.0 }
 0x2b5   :  { %1674 = vmatmul.msk.bf16.vlgmr.msrb.gmra.mxu3 %vm1377_vm1, %v2397_v42 }
 0x2b6   :  { %v1243_v53 = vmul.f32 0.2, %v1071_v0  ;;  %vm1179_vm11 = vcmp.ge.f32.partialorder %v1071_v0, 0.0 }
 0x2b8   :  { %v2344_v36 = vsel %vm1179_vm11, %v1071_v0, %v1243_v53 }
 0x2b9   :  { %v749_v49 = vpop.f32.mrf.mxu1 }
 0x2ba   :  { %v750_v51 = vadd.f32 %v2244_v47, %v749_v49 }
 0x2bb   :  { %v1072_v22 = vpop.f32.mrf.mxu2 }
 0x2bc   :  { %v830_v54 = vmax.f32 %v750_v51, 0.0  ;;  %v1073_v55 = vadd.f32 %v2074_v45, %v1072_v22  ;;  %1493 = vmatpush.bf16.xpose.msra.mxu3 %v1418_v52  ;;  %v1415_v45 = vsel %vm1377_vm1, %v1350_v38, 0 }
 0x2be   :  { %v867_v56 = vpack.c.bf16 %v830_v54, %v829_v10  ;;  %vm1180_vm12 = vcmp.ge.f32.partialorder %v1073_v55, 0.0  ;;  %v1244_v44 = vmul.f32 0.2, %v1073_v55  ;;  %v1689_v54 = vmov 0  }
 0x2bf   :  { %1682 = vset.pattern.permute.xlu0 %v1689_v54 }
 0x2c0   :  { %1668 = vmatmul.msk.bf16.gmra.mxu2 %vm511_vm2, %v867_v56  ;;  %v2346_v58 = vsel %vm1180_vm12, %v1073_v55, %v1244_v44  ;;  %v1371_v55 = vld [vmem:[%s2517_s9] sm:$0x3] }
 0x2c1   :  { %v752_v61 = vpop.f32.mrf.mxu1  ;;  %v1356_v32 = vpack.c.bf16 %v2346_v58, %v2344_v36  ;;  %1374 = vperm.xlu0 %1682, %v1371_v55   ;;  %v1430_v36 = vsel %vm1377_vm1, %v1355_v43, 0 }
 0x2c2   :  { %v753_v12 = vadd.f32 %v2244_v47, %v752_v61 }
 0x2c3   :  { %v1075_v33 = vpop.f32.mrf.mxu2 }
 0x2c4   :  { %1494 = vmatpush.bf16.xpose.msra.mxu3 %v1415_v45  ;;  %v1076_v59 = vadd.f32 %v2358_v2, %v1075_v33  ;;  %v831_v6 = vmax.f32 %v753_v12, 0.0 }
 0x2c6   :  { %v1245_v1 = vmul.f32 0.2, %v1076_v59  ;;  %vm1181_vm13 = vcmp.ge.f32.partialorder %v1076_v59, 0.0 }
 0x2c8   :  { %v2368_v20 = vsel %vm1181_vm13, %v1076_v59, %v1245_v1  ;;  %v1125_v50 = vpop.f32.mrf.mxu3 }
 0x2c9   :  { %v754_v62 = vpop.f32.mrf.mxu1  ;;  %v1126_v16 = vadd.f32 %v2358_v2, %v1125_v50 }
 0x2ca   :  { %v755_v9 = vadd.f32 %v2244_v47, %v754_v62 }
 0x2cb   :  { %v1077_v13 = vpop.f32.mrf.mxu2  ;;  %v1265_v29 = vmul.f32 0.2, %v1126_v16  ;;  %vm1201_vm3 = vcmp.ge.f32.partialorder %v1126_v16, 0.0 }
 0x2cc   :  { %v832_v38 = vmax.f32 %v755_v9, 0.0  ;;  %v1078_v14 = vadd.f32 %v2358_v2, %v1077_v13  ;;  %1495 = vmatpush.bf16.xpose.msra.mxu3 %v1412_v63 }
 0x2cd   :  { %v2399_v46 = vsel %vm1201_vm3, %v1126_v16, %v1265_v29 }
 0x2ce   :  { %v868_v15 = vpack.c.bf16 %v832_v38, %v831_v6  ;;  %vm1182_vm14 = vcmp.ge.f32.partialorder %v1078_v14, 0.0  ;;  %v1246_v18 = vmul.f32 0.2, %v1078_v14 }
 0x2d0   :  { %1669 = vmatmul.msk.bf16.gmra.mxu2 %vm511_vm2, %v868_v15  ;;  %v2370_v47 = vsel %vm1182_vm14, %v1078_v14, %v1246_v18  ;;  %v1127_v19 = vpop.f32.mrf.mxu3 }
 0x2d1   :  { %v1357_v3 = vpack.c.bf16 %v2370_v47, %v2368_v20  ;;  %v1128_v57 = vadd.f32 %v2358_v2, %v1127_v19 }
 0x2d3   :  { %v1080_v4 = vpop.f32.mrf.mxu2  ;;  %vm1202_vm5 = vcmp.ge.f32.partialorder %v1128_v57, 0.0  ;;  %v1266_v37 = vmul.f32 0.2, %v1128_v57 }
 0x2d4   :  { %1496 = vmatpush.bf16.xpose.msra.mxu3 %v1409_v60  ;;  %v1081_v21 = vadd.f32 %v2358_v2, %v1080_v4 }
 0x2d5   :  { %v2401_v34 = vsel %vm1202_vm5, %v1128_v57, %v1266_v37 }
 0x2d6   :  { %v1247_v28 = vmul.f32 0.2, %v1081_v21  ;;  %vm1183_vm2 = vcmp.ge.f32.partialorder %v1081_v21, 0.0  ;;  %v1367_v49 = vpack.c.bf16 %v2401_v34, %v2399_v46 }
 0x2d8   :  { %v2384_v11 = vsel %vm1183_vm2, %v1081_v21, %v1247_v28  ;;  %v2419_v44 = vpop.f32.mrf.mxu3 }
 0x2db   :  { %v1082_v23 = vpop.f32.mrf.mxu2 }
 0x2dc   :  { %v1083_v30 = vadd.f32 %v2358_v2, %v1082_v23  ;;  %1497 = vmatpush.bf16.xpose.msra.mxu3 %v1406_v27 }
 0x2de   :  { %vm1184_vm15 = vcmp.ge.f32.partialorder %v1083_v30, 0.0  ;;  %v1248_v24 = vmul.f32 0.2, %v1083_v30 }
 0x2e0   :  { %v2386_v7 = vsel %vm1184_vm15, %v1083_v30, %v1248_v24  ;;  %v2425_v14 = vpop.f32.mrf.mxu3 }
 0x2e1   :  { %v1358_v8 = vpack.c.bf16 %v2386_v7, %v2384_v11  ;;  %v1433_v11 = vsel %vm1377_vm1, %v1356_v32, 0  ;;  %v1131_v32 = vadd.f32 %v2358_v2, %v2419_v44 }
 0x2e3   :  { %v1085_v25 = vpop.f32.mrf.mxu2  ;;  %1675 = vmatmul.msk.bf16.vlgmr.msra.gmra.mxu3 %vm1377_vm1, %v2397_v42  ;;  %vm1203_vm5 = vcmp.ge.f32.partialorder %v1131_v32, 0.0 }
 0x2e4   :  { %v1086_v17 = vadd.f32 %v2358_v2, %v1085_v25 }
 0x2e6   :  { %v1249_v31 = vmul.f32 0.2, %v1086_v17  ;;  %vm1185_vm4 = vcmp.ge.f32.partialorder %v1086_v17, 0.0 }
 0x2e8   :  { %v2405_v48 = vsel %vm1185_vm4, %v1086_v17, %v1249_v31 }
 0x2ea   :  { %v1135_v17 = vpop.f32.mrf.mxu3 }
 0x2eb   :  { %v1087_v26 = vpop.f32.mrf.mxu2  ;;  %v1136_v20 = vadd.f32 %v2358_v2, %v1135_v17  ;;  %v1541_v17 = vld [vmem:[%s2518_s1] sm:$0xf] }
 0x2ec   :  { %v1088_v35 = vadd.f32 %v2358_v2, %v1087_v26 }
 0x2ed   :  { %vm1205_vm3 = vcmp.ge.f32.partialorder %v1136_v20, 0.0 }
 0x2ee   :  { %vm1186_vm6 = vcmp.ge.f32.partialorder %v1088_v35, 0.0  ;;  %v1250_v39 = vmul.f32 0.2, %v1088_v35 }
 0x2f0   :  { %v2407_v0 = vsel %vm1186_vm6, %v1088_v35, %v1250_v39 }
 0x2f1   :  { %v1359_v10 = vpack.c.bf16 %v2407_v0, %v2405_v48 }
 0x2f2   :  { %v1137_v48 = vpop.f32.mrf.mxu3 }
 0x2f3   :  { %v1090_v51 = vpop.f32.mrf.mxu2  ;;  %v1138_v47 = vadd.f32 %v2358_v2, %v1137_v48 }
 0x2f4   :  { %v1091_v21 = vadd.f32 %v2358_v2, %v1090_v51  ;;  %v1442_v51 = vsel %vm1377_vm1, %v1359_v10, 0 }
 0x2f5   :  { %vm1206_vm4 = vcmp.ge.f32.partialorder %v1138_v47, 0.0 }
 0x2f6   :  { %v1251_v24 = vmul.f32 0.2, %v1091_v21  ;;  %vm1187_vm12 = vcmp.ge.f32.partialorder %v1091_v21, 0.0 }
 0x2f8   :  { %v1315_v57 = vsel %vm1187_vm12, %v1091_v21, %v1251_v24 }
 0x2fb   :  { %v1092_v22 = vpop.f32.mrf.mxu2 }
 0x2fc   :  { %v1093_v4 = vadd.f32 %v2358_v2, %v1092_v22  ;;  %v1140_v22 = vpop.f32.mrf.mxu3 }
 0x2fd   :  { %v1141_v10 = vadd.f32 %v2358_v2, %v1140_v22 }
 0x2fe   :  { %v1252_v30 = vmul.f32 0.2, %v1093_v4  ;;  %vm1188_vm11 = vcmp.ge.f32.partialorder %v1093_v4, 0.0 }
 0x2ff   :  { %vm1207_vm2 = vcmp.ge.f32.partialorder %v1141_v10, 0.0 }
 0x300   :  { %v1316_v26 = vsel %vm1188_vm11, %v1093_v4, %v1252_v30  ;;  %v1466_v30 = vsel %vm1377_vm1, %v1367_v49, 0 }
 0x301   :  { %v1360_v35 = vpack.c.bf16 %v1316_v26, %v1315_v57 }
 0x303   :  { %v1095_v52 = vpop.f32.mrf.mxu2  ;;  %v1445_v39 = vsel %vm1377_vm1, %v1360_v35, 0 }
 0x304   :  { %v1096_v62 = vadd.f32 %v2358_v2, %v1095_v52  ;;  %v1142_v55 = vpop.f32.mrf.mxu3 }
 0x306   :  { %v1253_v38 = vmul.f32 0.2, %v1096_v62  ;;  %vm1189_vm10 = vcmp.ge.f32.partialorder %v1096_v62, 0.0 }
 0x308   :  { %v1317_v27 = vsel %vm1189_vm10, %v1096_v62, %v1253_v38  ;;  %v1269_v62 = vmul.f32 0.2, %v1136_v20 }
 0x30b   :  { %v1097_v53 = vpop.f32.mrf.mxu2 }
 0x30c   :  { %v1098_v45 = vadd.f32 %v2358_v2, %v1097_v53  ;;  %v1439_v53 = vsel %vm1377_vm1, %v1358_v8, 0 }
 0x30e   :  { %v1254_v9 = vmul.f32 0.2, %v1098_v45  ;;  %vm1190_vm9 = vcmp.ge.f32.partialorder %v1098_v45, 0.0 }
 0x310   :  { %v1318_v60 = vsel %vm1190_vm9, %v1098_v45, %v1254_v9  ;;  %v1271_v45 = vmul.f32 0.2, %v1141_v10  ;;  %v1133_v9 = vadd.f32 %v2358_v2, %v2425_v14  ;;  %vm1542_vm9 = vcmp.gt.f32.partialorder %v1541_v17, 0.0 }
 0x311   :  { %v1361_v28 = vpack.c.bf16 %v1318_v60, %v1317_v27  ;;  %v1543_v34 = vsel %vm1542_vm9, 1, %v1689_v54 }
 0x312   :  { %vm1204_vm6 = vcmp.ge.f32.partialorder %v1133_v9, 0.0 }
 0x313   :  { %v1100_v56 = vpop.f32.mrf.mxu2  ;;  %v1448_v16 = vsel %vm1377_vm1, %v1361_v28, 0 }
 0x314   :  { %v1101_v61 = vadd.f32 %v2358_v2, %v1100_v56  ;;  %v1436_v56 = vsel %vm1377_vm1, %v1357_v3, 0  ;;  %v1335_v3 = vsel %vm1207_vm2, %v1141_v10, %v1271_v45 }
 0x316   :  { %v1255_v12 = vmul.f32 0.2, %v1101_v61  ;;  %vm1191_vm7 = vcmp.ge.f32.partialorder %v1101_v61, 0.0 }
 0x318   :  { %v1319_v13 = vsel %vm1191_vm7, %v1101_v61, %v1255_v12 }
 0x31b   :  { %v1102_v33 = vpop.f32.mrf.mxu2 }
 0x31c   :  { %v1103_v59 = vadd.f32 %v2358_v2, %v1102_v33  ;;  %v1143_v33 = vadd.f32 %v2358_v2, %v1142_v55 }
 0x31e   :  { %vm1192_vm8 = vcmp.ge.f32.partialorder %v1103_v59, 0.0  ;;  %v1256_v6 = vmul.f32 0.2, %v1103_v59  ;;  %v1272_v12 = vmul.f32 0.2, %v1143_v33  ;;  %vm1208_vm15 = vcmp.ge.f32.partialorder %v1143_v33, 0.0 }
 0x320   :  { %v1320_v63 = vsel %vm1192_vm8, %v1103_v59, %v1256_v6  ;;  %v1336_v7 = vsel %vm1208_vm15, %v1143_v33, %v1272_v12  ;;  %v1270_v6 = vmul.f32 0.2, %v1138_v47 }
 0x321   :  { %v1362_v1 = vpack.c.bf16 %v1320_v63, %v1319_v13  ;;  %v1370_v59 = vpack.c.bf16 %v1336_v7, %v1335_v3  ;;  %v1333_v13 = vsel %vm1205_vm3, %v1136_v20, %v1269_v62 }
 0x322   :  { %v1334_v63 = vsel %vm1206_vm4, %v1138_v47, %v1270_v6 }
 0x323   :  { %v1105_v15 = vpop.f32.mrf.mxu2  ;;  %v1451_v18 = vsel %vm1377_vm1, %v1362_v1, 0  ;;  %v1475_v58 = vsel %vm1377_vm1, %v1370_v59, 0  ;;  %v1369_v38 = vpack.c.bf16 %v1334_v63, %v1333_v13  ;;  %v1546_v13 = vperm.slane %v1543_v34, 2 }
 0x324   :  { %1503 = vmatpush.bf16.xpose.msrb.mxu3 %v1451_v18  ;;  %v1106_v23 = vadd.f32 %v2358_v2, %v1105_v15  ;;  %v1267_v15 = vmul.f32 0.2, %v1131_v32  ;;  %v1268_v18 = vmul.f32 0.2, %v1133_v9  ;;  %v1547_v63 = vperm.slane %v1543_v34, 3 }
 0x325   :  { %v1472_v40 = vsel %vm1377_vm1, %v1369_v38, 0 }
 0x326   :  { %v1257_v50 = vmul.f32 0.2, %v1106_v23  ;;  %vm1193_vm13 = vcmp.ge.f32.partialorder %v1106_v23, 0.0  ;;  %v1331_v41 = vsel %vm1203_vm5, %v1131_v32, %v1267_v15  ;;  %v1332_v43 = vsel %vm1204_vm6, %v1133_v9, %v1268_v18 }
 0x327   :  { %v1368_v44 = vpack.c.bf16 %v1332_v43, %v1331_v41  ;;  %vm1550_vm5 = vcmp.eq.s32.totalorder %v1546_v13, 1  ;;  %vm1551_vm6 = vcmp.eq.s32.totalorder %v1547_v63, 1 }
 0x328   :  { %v2433_v31 = vsel %vm1193_vm13, %v1106_v23, %v1257_v50 }
 0x329   :  { %v1469_v14 = vsel %vm1377_vm1, %v1368_v44, 0 }
 0x32b   :  { %v1107_v25 = vpop.f32.mrf.mxu2 }
 0x32c   :  { %v1108_v19 = vadd.f32 %v2358_v2, %v1107_v25  ;;  %1504 = vmatpush.bf16.xpose.msrb.mxu3 %v1448_v16 }
 0x32e   :  { %vm1194_vm14 = vcmp.ge.f32.partialorder %v1108_v19, 0.0  ;;  %v1258_v29 = vmul.f32 0.2, %v1108_v19 }
 0x330   :  { %v2435_v37 = vsel %vm1194_vm14, %v1108_v19, %v1258_v29 }
 0x331   :  { %v1363_v5 = vpack.c.bf16 %v2435_v37, %v2433_v31 }
 0x333   :  { %v2440_v0 = vpop.f32.mrf.mxu2 }
 0x334   :  { %1505 = vmatpush.bf16.xpose.msrb.mxu3 %v1445_v39  ;;  %v1111_v57 = vadd.f32 %v2358_v2, %v2440_v0 }
 0x336   :  { %vm1195_vm12 = vcmp.ge.f32.partialorder %v1111_v57, 0.0 }
 0x338   :  { %v1486_v28 = vpop.f32.mrf.mxu3 }
 0x33b   :  { %v2443_v52 = vpop.f32.mrf.mxu2 }
 0x33c   :  { %1506 = vmatpush.bf16.xpose.msrb.mxu3 %v1442_v51  ;;  %v1113_v35 = vadd.f32 %v2358_v2, %v2443_v52  ;;  %v1544_v51 = vperm.slane %v1543_v34, 0 }
 0x33e   :  { %v1260_v55 = vmul.f32 0.2, %v1113_v35  ;;  %vm1196_vm13 = vcmp.ge.f32.partialorder %v1113_v35, 0.0  ;;  %vm2491_vm14 = vcmp.eq.s32.totalorder %v1544_v51, 1 }
 0x340   :  { %v1488_v46 = vpop.f32.mrf.mxu3  ;;  %v1324_v45 = vsel %vm1196_vm13, %v1113_v35, %v1260_v55 }
 0x343   :  { %v1115_v61 = vpop.f32.mrf.mxu2 }
 0x344   :  { %1507 = vmatpush.bf16.xpose.msrb.mxu3 %v1439_v53  ;;  %v1116_v24 = vadd.f32 %v2358_v2, %v1115_v61  ;;  %v1259_v53 = vmul.f32 0.2, %v1111_v57  ;;  %v1375_v61 = vpop.permute.xlu0 %1374 }
 0x345   :  { %v1487_v54 = vadd.f32 %v1486_v28, %v1375_v61 }
 0x346   :  { %v1261_v26 = vmul.f32 0.2, %v1116_v24  ;;  %vm1197_vm10 = vcmp.ge.f32.partialorder %v1116_v24, 0.0  ;;  %v1323_v52 = vsel %vm1195_vm12, %v1111_v57, %v1259_v53 }
 0x347   :  { %vm1529_vm2 = vcmp.ge.f32.partialorder %v1487_v54, 0.0  ;;  %v1533_v12 = vmul.f32 0.2, %v1487_v54  ;;  %v1364_v47 = vpack.c.bf16 %v1324_v45, %v1323_v52 }
 0x348   :  { %v1325_v39 = vsel %vm1197_vm10, %v1116_v24, %v1261_v26 }
 0x349   :  { %v1537_v20 = vsel %vm1529_vm2, %v1487_v54, %v1533_v12  ;;  %v1457_v6 = vsel %vm1377_vm1, %v1364_v47, 0 }
 0x34a   :  { %v1552_v7 = vsel %vm2491_vm14, %v1537_v20, -9e+15 }
 0x34b   :  { %v1117_v8 = vpop.f32.mrf.mxu2 }
 0x34c   :  { %1508 = vmatpush.bf16.xpose.msrb.mxu3 %v1436_v56  ;;  %v1118_v50 = vadd.f32 %v2358_v2, %v1117_v8  ;;  %v1545_v56 = vperm.slane %v1543_v34, 1 }
 0x34e   :  { %v1262_v29 = vmul.f32 0.2, %v1118_v50  ;;  %vm1198_vm11 = vcmp.ge.f32.partialorder %v1118_v50, 0.0  ;;  %vm1549_vm15 = vcmp.eq.s32.totalorder %v1545_v56, 1 }
 0x350   :  { %v1326_v48 = vsel %vm1198_vm11, %v1118_v50, %v1262_v29 }
 0x351   :  { %v1365_v22 = vpack.c.bf16 %v1326_v48, %v1325_v39 }
 0x353   :  { %v1120_v1 = vpop.f32.mrf.mxu2  ;;  %v1460_v0 = vsel %vm1377_vm1, %v1365_v22, 0 }
 0x354   :  { %1509 = vmatpush.bf16.xpose.msrb.mxu3 %v1433_v11  ;;  %v1121_v60 = vadd.f32 %v2358_v2, %v1120_v1 }
 0x356   :  { %v1263_v23 = vmul.f32 0.2, %v1121_v60  ;;  %vm1199_vm7 = vcmp.ge.f32.partialorder %v1121_v60, 0.0 }
 0x358   :  { %v1327_v25 = vsel %vm1199_vm7, %v1121_v60, %v1263_v23 }
 0x35b   :  { %v1122_v4 = vpop.f32.mrf.mxu2 }
 0x35c   :  { %1510 = vmatpush.bf16.xpose.msrb.mxu3 %v1430_v36  ;;  %v1123_v21 = vadd.f32 %v2358_v2, %v1122_v4  ;;  %v1454_v36 = vsel %vm1377_vm1, %v1363_v5, 0 }
 0x35e   :  { %v1264_v27 = vmul.f32 0.2, %v1123_v21  ;;  %vm1200_vm8 = vcmp.ge.f32.partialorder %v1123_v21, 0.0 }
 0x360   :  { %v1328_v16 = vsel %vm1200_vm8, %v1123_v21, %v1264_v27  ;;  %vm1570_vm8 = vcmask 1041408  }
 0x361   :  { %v1366_v19 = vpack.c.bf16 %v1328_v16, %v1327_v25 }
 0x363   :  { %1676 = vmatmul.msk.bf16.vlgmr.msrb.gmra.mxu3 %vm1377_vm1, %v2397_v42  ;;  %v1463_v49 = vsel %vm1377_vm1, %v1366_v19, 0 }
 0x364   :  { %1516 = vmatpush.bf16.xpose.msra.mxu3 %v1475_v58 }
 0x366   :  { %v1499_v10 = vpop.f32.mrf.mxu3 }
 0x367   :  { %v1500_v2 = vadd.f32 %v1499_v10, %v1375_v61 }
 0x369   :  { %vm1530_vm3 = vcmp.ge.f32.partialorder %v1500_v2, 0.0  ;;  %v1534_v11 = vmul.f32 0.2, %v1500_v2 }
 0x36b   :  { %v1538_v3 = vsel %vm1530_vm3, %v1500_v2, %v1534_v11 }
 0x36c   :  { %1517 = vmatpush.bf16.xpose.msra.mxu3 %v1472_v40  ;;  %v1553_v8 = vsel %vm1549_vm15, %v1538_v3, -9e+15 }
 0x36d   :  { %v1556_v59 = vpack.c.bf16 %v1553_v8, %v1552_v7 }
 0x36e   :  { %v1501_v62 = vpop.f32.mrf.mxu3 }
 0x36f   :  { %v1560_v41 = vrot.slane %v1556_v59, 3 }
 0x374   :  { %1518 = vmatpush.bf16.xpose.msra.mxu3 %v1469_v14  ;;  %v1565_v14 = vsel %vm235_vm0, %v1556_v59, %v1560_v41 }
 0x37c   :  { %1519 = vmatpush.bf16.xpose.msra.mxu3 %v1466_v30 }
 0x384   :  { %1520 = vmatpush.bf16.xpose.msra.mxu3 %v1463_v49 }
 0x38c   :  { %1521 = vmatpush.bf16.xpose.msra.mxu3 %v1460_v0 }
 0x394   :  { %1522 = vmatpush.bf16.xpose.msra.mxu3 %v1457_v6 }
 0x39c   :  { %1523 = vmatpush.bf16.xpose.msra.mxu3 %v1454_v36 }
 0x3a3   :  { %1677 = vmatmul.msk.bf16.vlgmr.msra.gmra.mxu3 %vm1377_vm1, %v2397_v42  ;;  %vm1566_vm1 = vcmask 1042434  }
 0x3e6   :  { %v1512_v58 = vpop.f32.mrf.mxu3 }
 0x3e7   :  { %v1513_v9 = vadd.f32 %v1512_v58, %v1375_v61 }
 0x3e9   :  { %v1535_v1 = vmul.f32 0.2, %v1513_v9  ;;  %vm1531_vm4 = vcmp.ge.f32.partialorder %v1513_v9, 0.0 }
 0x3eb   :  { %v1539_v18 = vsel %vm1531_vm4, %v1513_v9, %v1535_v1 }
 0x3ec   :  { %v1554_v5 = vsel %vm1550_vm5, %v1539_v18, -9e+15 }
 0x3ee   :  { %v1514_v32 = vpop.f32.mrf.mxu3 }
 0x426   :  { %v1525_v38 = vpop.f32.mrf.mxu3 }
 0x427   :  { %v1526_v15 = vadd.f32 %v1525_v38, %v1375_v61 }
 0x429   :  { %vm1532_vm7 = vcmp.ge.f32.partialorder %v1526_v15, 0.0  ;;  %v1536_v31 = vmul.f32 0.2, %v1526_v15 }
 0x42b   :  { %v1540_v37 = vsel %vm1532_vm7, %v1526_v15, %v1536_v31 }
 0x42c   :  { %v1555_v40 = vsel %vm1551_vm6, %v1540_v37, -9e+15 }
 0x42d   :  { %v1557_v43 = vpack.c.bf16 %v1555_v40, %v1554_v5 }
 0x42e   :  { %v1527_v42 = vpop.f32.mrf.mxu3 }
 0x42f   :  { %v1561_v44 = vrot.slane %v1557_v43, 6  ;;  %v1562_v4 = vrot.slane %v1557_v43, 1 }
 0x431   :  { %v1569_v60 = vsel %vm1566_vm1, %v1561_v44, %v1562_v4 }
 0x432   :  { %v1571_v21 = vsel %vm1570_vm8, %v1565_v14, %v1569_v60 }
 0x433   :  { %1573 = vst [vmem:[%s2519_s10] sm:$0xf] %v1571_v21 }

// kernel: gat_efa_forward.10
= control target key start
LH: loop header
LB: loop body
LE: loop exit
PB: predicated region body
PF: predicated region fallthrough
CT: control target
= control target key end

     0   :  { %s1145_s21 = smov 0   ;;  %s1147_s22 = smov 0   ;;  %s1300_s0 = inlined_call_operand.vmem [shape: f32[2,16,32], index: 0, kind: input, shape index: {}]   ;;  %s1301_s1 = inlined_call_operand.vmem [shape: bf16[4,2,16,16], index: 1, kind: input, shape index: {}]   ;;  %s1302_s2 = inlined_call_operand.vmem [shape: f32[32,68], index: 2, kind: input, shape index: {}]   ;;  %s1303_s3 = inlined_call_operand.vmem [shape: f32[1,68], index: 3, kind: input, shape index: {}]   ;;  %s1304_s4 = inlined_call_operand.vmem [shape: f32[4,32], index: 4, kind: input, shape index: {}]   ;;  %s1305_s5 = inlined_call_operand.vmem [shape: f32[4,1], index: 5, kind: input, shape index: {}]   ;;  %s1306_s6 = inlined_call_operand.vmem [shape: f32[2,16,64], index: 6, kind: output, shape index: {}]  }
   0x1   :  { %s1149_s23 = smov 0   ;;  %s1151_s24 = smov 0  }
   0x2   :  { %s1153_s25 = smov 0  }
   0x3 LB: > { %s28_s26 = sadd.s32 1, %s1093_s24  ;;  %p70_p1 = scmp.ne.s32.totalorder %s1085_s22, %s1081_s21  ;;  %s1097_s25 = sphi %s1153_s25, %s16_s25   ;;  %s1093_s24 = sphi %s1151_s24, %s1310_s24   ;;  %s1089_s23 = sphi %s1149_s23, %s1309_s23   ;;  %s1085_s22 = sphi %s1147_s22, %s1308_s22   ;;  %s1081_s21 = sphi %s1145_s21, %s1307_s21  }
   0x4   : > { %p30_p0 = scmp.ge.s32.totalorder %s28_s26, 2  ;;  %p71_p2 = scmp.eq.s32.totalorder %s1097_s25, 0 }
   0x5   : > { %s63_s28 = sadd.s32 1, %s1085_s22  ;;  %p896_p5 = scmp.ge.s32.totalorder %s1097_s25, 2 }
   0x6   : > { %s1312_s26 = smov (%p30_p0, %s28_s26), 0  ;;  %p72_p3 = por %p71_p2, %p70_p1 }
   0x7   : > { %s58_s27 = ssub.s32 %s1093_s24, %s1312_s26  ;;  %220 = sbr.rel (%p896_p5) target bundleno = 20 (0x14), region = 32 }
   0x8   : > { %p61_p4 = scmp.eq.s32.totalorder %s58_s27, 0 }
   0xa   : > { %s1180_s29 = scalar_select %p61_p4, %s1085_s22, %s63_s28  }
   0xc   : > { %231 = sbr.rel (!%p72_p3) target bundleno = 20 (0x14), region = 40  ;;  %s233_s30 = sand.u32 (%p72_p3), 1, %s1085_s22  }
   0xd   : > { %s936_s7 = sshll.u32 (%p72_p3), %s1093_s24, 3  ;;  %s897_s8 = sshll.u32 (%p72_p3), %s233_s30, 5 }
   0xe   : > { %s240_s11 = scalar_lea.vmem (%p72_p3), %s1301_s1, %s936_s7  ;;  %s235_s12 = scalar_lea.vmem (%p72_p3), [#allocation5], %s897_s8 }
   0xf   : > { %v257_v0 = vld [vmem:[%s240_s11] sm:$0xff] (%p72_p3)   ;;  %v261_v1 = vld [vmem:[%s240_s11 + $0x10] sm:$0xff] (%p72_p3)  }
  0x10   : > { %v265_v2 = vld [vmem:[%s240_s11 + $0x20] sm:$0xff] (%p72_p3)   ;;  %258 = vst [vmem:[%s235_s12] sm:$0xff] (%p72_p3), %v257_v0   ;;  %v269_v3 = vld [vmem:[%s240_s11 + $0x30] sm:$0xff] (%p72_p3)  }
  0x11   : > { %262 = vst [vmem:[%s235_s12 + $0x8] sm:$0xff] %v261_v1  }
  0x12   : > { %266 = vst [vmem:[%s235_s12 + $0x10] sm:$0xff] %v265_v2  }
  0x13   : > { %270 = vst [vmem:[%s235_s12 + $0x18] sm:$0xff] %v269_v3  }
  0x14 PF: > { %p900_p6 = scmp.ge.s32.totalorder %s1097_s25, 1  ;;  %p311_p7 = scmp.lt.s32.totalorder %s1097_s25, 3 }
  0x16   : > { %p312_p8 = pnand %p900_p6, %p311_p7 }
  0x17   : > { %p356_p9 = scmp.lt.s32.totalorder (!%p312_p8), %s1089_s23, 1  ;;  %s1100_s14 = smov (!%p312_p8), 64  }
  0x18   : > { %315 = sbr.rel (%p312_p8) target bundleno = 965 (0x3c5), region = 81  ;;  %s318_s15 = sand.u32 (!%p312_p8), 1, %s1081_s21  }
  0x19   : > { %s901_s16 = sshll.u32 (!%p312_p8), %s318_s15, 5  ;;  %s1104_s21 = smov (!%p312_p8), 112  }
  0x1a   : > { %s1222_s17 = scalar_lea.vmem (!%p312_p8), [#allocation5], %s901_s16  ;;  %s1105_s18 = smov (!%p312_p8), 96  }
  0x1b   : > { %s1106_s19 = smov (!%p312_p8), 80  }
  0x1d   : > { %v382_v4 = vld [vmem:[%s1302_s2 + $0x10] sm:$0xff]  ;;  %v383_v5 = vld [vmem:[%s1302_s2 + $0x18] sm:$0xff]  ;;  %v380_v6 = vld [vmem:[%s1302_s2] sm:$0xff]  ;;  %s1314_s23 = smov (!%p356_p9, %s1089_s23), 1  ;;  %vm390_vm0 = vcmask 261120   ;;  %v1099_v16 = vmov 0  }
  0x1e   : > { %v385_v7 = vpack.c.bf16 %v383_v5, %v382_v4  ;;  %v381_v8 = vld [vmem:[%s1302_s2 + $0x8] sm:$0xff]  ;;  %s937_s27 = sshll.u32 %s1314_s23, 4  ;;  %v426_v14 = vld [vmem:[%s1305_s5] sm:$0xf]  ;;  %1013 = vset.pattern.permute.xlu1 %v1099_v16  ;;  %vm410_vm1 = vcmask 519168   ;;  %v1101_v26 = vmov 1  }
  0x1f   : > { %v384_v9 = vpack.c.bf16 %v381_v8, %v380_v6  ;;  %s360_s7 = scalar_lea.vmem %s1300_s0, %s937_s27  ;;  %v424_v15 = vld [vmem:[%s1304_s4] sm:$0xf]  ;;  %429 = vperm.xlu1 %1013, %v426_v14   ;;  %1014 = vset.pattern.permute.xlu2 %v1101_v26  ;;  %vm421_vm2 = vcmask 31744   ;;  %vm448_vm3 = vcmask 125952   ;;  %v1102_v35 = vmov 2   ;;  %v959_v38 = vld [vmem:[%s1222_s17 + $0x8] sm:$0xff]   ;;  %s1273_s30 = scalar_lea.vmem %s1306_s6, %s937_s27 }
  0x20   : > { %400 = vmatpush.bf16.msra.mxu0 %v385_v7  ;;  %v377_v10 = vld [vmem:[%s360_s7] sm:$0xff]  ;;  %v378_v11 = vld [vmem:[%s360_s7 + $0x8] sm:$0xff]  ;;  %v425_v17 = vpack.c.bf16 %v424_v15, %v424_v15  ;;  %1016 = vset.pattern.permute.xlu0 %v1101_v26  ;;  %v1103_v36 = vmov 3   ;;  %v949_v41 = vunpack.c.l.bf16 %v959_v38  ;;  %vm480_vm5 = vcmask 130048   ;;  %s1107_s7 = smov 16   ;;  %s1108_s23 = smov 32  }
  0x21   : > { %v379_v12 = vpack.c.bf16 %v378_v11, %v377_v10  ;;  %v1022_v18 = vld [vmem:[%s1303_s3] ss:$0 sm:$0xff]  ;;  %v960_v56 = vld [vmem:[%s1222_s17 + $0x10] sm:$0xff]   ;;  %v950_v14 = vunpack.c.h.bf16 %v959_v38  ;;  %s1109_s27 = smov 48   ;;  %vm614_vm13 = vcmask 261248   ;;  %vm700_vm14 = vcmask 392448  }
  0x22   : > { %v944_v47 = vld [vmem:[%s1222_s17] sm:$0xff]   ;;  %v954_v59 = vunpack.c.h.bf16 %v960_v56  ;;  %v953_v15 = vunpack.c.l.bf16 %v960_v56  ;;  %vm786_vm15 = vcmask 523648  }
  0x23   : > { %v392_v13 = vsel %vm390_vm0, %v379_v12, 0  ;;  %v946_v50 = vunpack.c.h.bf16 %v944_v47  ;;  %v945_v1 = vunpack.c.l.bf16 %v944_v47 }
  0x24   : > { %401 = vmatpush.bf16.msra.mxu0 %v384_v9  ;;  %442 = vmatpush.bf16.xpose.msra.mxu1 %v392_v13 }
  0x27   : > { %906 = vmatmul.msk.bf16.vlgmr.msra.gmra.mxu0 %vm390_vm0, %v379_v12 }
  0x2b   : > { %907 = vmatmul.msk.bf16.vlgmr.msra.gmra.mxu1 %vm390_vm0, %v425_v17 }
  0x91   : > { %v430_v28 = vpop.permute.xlu1 %429 }
  0xa4   : > { %v403_v19 = vpop.f32.mrf.mxu0 }
  0xa5   : > { %v404_v20 = vadd.f32 %v1022_v18, %v403_v19 }
  0xa7   : > { %v408_v21 = vpack.c.bf16 %v404_v20, %v404_v20  ;;  %415 = vrot.lane.b32.xlu0 %v404_v20, %s1100_s14 }
  0xa8   : > { %v444_v29 = vpop.f32.mrf.mxu1 }
  0xa9   : > { %411 = vst.msk [vmem:[#allocation2] sm:$0xf] %vm410_vm1, %v408_v21  ;;  %v445_v30 = vadd.f32 %v444_v29, %v430_v28  ;;  %v961_v21 = vld [vmem:[%s1222_s17 + $0x18] sm:$0xff]  }
  0xaa   : > { %v958_v26 = vunpack.c.h.bf16 %v961_v21 }
  0xab   : > { %449 = vst.msk [vmem:[#allocation4] sm:$0xf] %vm448_vm3, %v445_v30  ;;  %v957_v30 = vunpack.c.l.bf16 %v961_v21 }
  0xac   : > { %v405_v22 = vpop.f32.mrf.mxu0 }
  0xad   : > { %v406_v23 = vadd.f32 %v1022_v18, %v405_v22 }
  0xaf   : > { %v409_v24 = vpack.c.bf16 %v406_v23, %v406_v23  ;;  %417 = vrot.lane.b32.xlu0 %v406_v23, %s1100_s14 }
  0xb0   : > { %v446_v33 = vpop.f32.mrf.mxu1 }
  0xb1   : > { %412 = vst.msk [vmem:[#allocation2 + $0x4] sm:$0xf] %vm410_vm1, %v409_v24 }
  0xb2   : > { %v1023_v37 = vld [vmem:[#allocation4 + $0x1] ss:$0 sm:$0xff]  ;;  %v1024_v45 = vld [vmem:[#allocation4] ss:$0 sm:$0xff]  ;;  %v1025_v53 = vld [vmem:[#allocation4 + $0x2] ss:$0 sm:$0xff] }
  0xb3   : > { %v1026_v7 = vld [vmem:[#allocation4 + $0x3] ss:$0 sm:$0xff] }
  0xb8   : > { %v939_v25 = vld [vmem:[#allocation2] sm:$0xff] }
  0xb9   : > { %522 = vmatpush.bf16.msra.mxu2 %v939_v25 }
 0x119   : > { %v416_v27 = vpop.permute.xlu0 %415 }
 0x11a   : > { %422 = vst.msk [vmem:[#allocation3] sm:$0xff] %vm421_vm2, %v416_v27 }
 0x121   : > { %v418_v31 = vpop.permute.xlu0 %417  ;;  %v452_v32 = vld [vmem:[#allocation3] sm:$0xff] }
 0x122   : > { %423 = vst.msk [vmem:[#allocation3 + $0x8] sm:$0xff] %vm421_vm2, %v418_v31  ;;  %533 = vperm.xlu2 %1014, %v452_v32   ;;  %457 = vperm.xlu1 %1013, %v452_v32  }
 0x129   : > { %v453_v34 = vld [vmem:[#allocation3 + $0x8] sm:$0xff] }
 0x12a   : > { %1015 = vset.pattern.permute.xlu2 %v1099_v16  ;;  %1017 = vset.pattern.permute.xlu1 %v1102_v35 }
 0x12b   : > { %537 = vperm.xlu0 %1016, %v453_v34   ;;  %619 = vperm.xlu1 %1017, %v452_v32  }
 0x12c   : > { %462 = vperm.xlu2 %1015, %v453_v34  }
 0x133   : > { %1018 = vset.pattern.permute.xlu1 %v1103_v36  ;;  %1021 = vset.pattern.permute.xlu0 %v1103_v36 }
 0x134   : > { %1019 = vset.pattern.permute.xlu2 %v1102_v35  ;;  %705 = vperm.xlu1 %1018, %v452_v32  }
 0x135   : > { %623 = vperm.xlu2 %1019, %v453_v34  }
 0x13d   : > { %1020 = vset.pattern.permute.xlu2 %v1103_v36 }
 0x13e   : > { %709 = vperm.xlu2 %1020, %v453_v34  }
 0x17c   : > { %v534_v39 = vpop.permute.xlu2 %533 }
 0x17d   : > { %v541_v40 = vadd.f32 %v1023_v37, %v534_v39 }
 0x17f   : > { %vm543_vm4 = vcmp.ge.f32.partialorder %v541_v40, 0.0  ;;  %v545_v42 = vmul.f32 0.2, %v541_v40 }
 0x181   : > { %v547_v43 = vsel %vm543_vm4, %v541_v40, %v545_v42 }
 0x182   : > { %v1225_v44 = vadd.f32 %v949_v41, %v547_v43 }
 0x184   : > { %v556_v46 = vsel %vm480_vm5, %v1225_v44, -inf }
 0x185   : > { %557 = vmax.xlane.f32.xlu2 %v556_v46 }
 0x186   : > { %v463_v48 = vpop.permute.xlu2 %462 }
 0x187   : > { %v467_v49 = vadd.f32 %v1024_v45, %v463_v48 }
 0x189   : > { %vm469_vm6 = vcmp.ge.f32.partialorder %v467_v49, 0.0  ;;  %v471_v51 = vmul.f32 0.2, %v467_v49 }
 0x18b   : > { %v473_v52 = vsel %vm469_vm6, %v467_v49, %v471_v51 }
 0x18c   : > { %v1230_v54 = vadd.f32 %v946_v50, %v473_v52 }
 0x18e   : > { %v484_v55 = vsel %vm480_vm5, %v1230_v54, -inf }
 0x18f   : > { %v624_v57 = vpop.permute.xlu2 %623  ;;  %485 = vmax.xlane.f32.xlu1 %v484_v55 }
 0x190   : > { %v628_v58 = vadd.f32 %v1025_v53, %v624_v57 }
 0x192   : > { %vm630_vm7 = vcmp.ge.f32.partialorder %v628_v58, 0.0  ;;  %v632_v60 = vmul.f32 0.2, %v628_v58 }
 0x194   : > { %v458_v61 = vpop.permute.xlu1 %457  ;;  %v634_v62 = vsel %vm630_vm7, %v628_v58, %v632_v60 }
 0x195   : > { %v466_v63 = vadd.f32 %v1024_v45, %v458_v61  ;;  %v1235_v0 = vadd.f32 %v954_v59, %v634_v62 }
 0x197   : > { %vm468_vm8 = vcmp.ge.f32.partialorder %v466_v63, 0.0  ;;  %v470_v2 = vmul.f32 0.2, %v466_v63  ;;  %v645_v3 = vsel %vm480_vm5, %v1235_v0, -inf }
 0x198   : > { %646 = vmax.xlane.f32.xlu1 %v645_v3  ;;  %v710_v6 = vpop.permute.xlu2 %709 }
 0x199   : > { %v472_v4 = vsel %vm468_vm8, %v466_v63, %v470_v2  ;;  %v714_v11 = vadd.f32 %v1026_v7, %v710_v6  ;;  %v940_v6 = vld [vmem:[#allocation2] sm:$0xff] }
 0x19a   : > { %v478_v5 = vadd.f32 %v945_v1, %v472_v4 }
 0x19b   : > { %v718_v18 = vmul.f32 0.2, %v714_v11  ;;  %vm716_vm11 = vcmp.ge.f32.partialorder %v714_v11, 0.0 }
 0x19c   : > { %v481_v8 = vsel %vm480_vm5, %v478_v5, -inf }
 0x19d   : > { %v538_v9 = vpop.permute.xlu0 %537  ;;  %v620_v10 = vpop.permute.xlu1 %619  ;;  %482 = vmax.xlane.f32.xlu0 %v481_v8  ;;  %v720_v28 = vsel %vm716_vm11, %v714_v11, %v718_v18 }
 0x19e   : > { %v542_v12 = vadd.f32 %v1023_v37, %v538_v9  ;;  %v627_v13 = vadd.f32 %v1025_v53, %v620_v10  ;;  %v727_v32 = vadd.f32 %v958_v26, %v720_v28 }
 0x1a0   : > { %vm544_vm9 = vcmp.ge.f32.partialorder %v542_v12, 0.0  ;;  %v546_v16 = vmul.f32 0.2, %v542_v12  ;;  %vm629_vm10 = vcmp.ge.f32.partialorder %v627_v13, 0.0  ;;  %v631_v17 = vmul.f32 0.2, %v627_v13 }
 0x1a1   : > { %v731_v35 = vsel %vm480_vm5, %v727_v32, -inf }
 0x1a2   : > { %v548_v19 = vsel %vm544_vm9, %v542_v12, %v546_v16  ;;  %v633_v20 = vsel %vm629_vm10, %v627_v13, %v631_v17 }
 0x1a3   : > { %v555_v22 = vadd.f32 %v950_v14, %v548_v19  ;;  %v640_v23 = vadd.f32 %v953_v15, %v633_v20  ;;  %v941_v14 = vld [vmem:[#allocation2] sm:$0xff] }
 0x1a4   : > { %v942_v15 = vld [vmem:[#allocation2] sm:$0xff] }
 0x1a5   : > { %v559_v24 = vsel %vm480_vm5, %v555_v22, -inf  ;;  %v642_v25 = vsel %vm480_vm5, %v640_v23, -inf }
 0x1a6   : > { %560 = vmax.xlane.f32.xlu2 %v559_v24  ;;  %v706_v27 = vpop.permute.xlu1 %705  ;;  %643 = vmax.xlane.f32.xlu0 %v642_v25 }
 0x1a7   : > { %v713_v29 = vadd.f32 %v1026_v7, %v706_v27 }
 0x1a9   : > { %vm715_vm12 = vcmp.ge.f32.partialorder %v713_v29, 0.0  ;;  %v717_v31 = vmul.f32 0.2, %v713_v29 }
 0x1ab   : > { %v719_v33 = vsel %vm715_vm12, %v713_v29, %v717_v31 }
 0x1ac   : > { %v726_v34 = vadd.f32 %v957_v30, %v719_v33 }
 0x1ae   : > { %732 = vmax.xlane.f32.xlu0 %v731_v35  ;;  %v728_v36 = vsel %vm480_vm5, %v726_v34, -inf }
 0x1af   : > { %729 = vmax.xlane.f32.xlu2 %v728_v36 }
 0x1f8   : > { %v558_v37 = vpop.xlane.xlu2 %557 }
 0x1f9   : > { %v562_v38 = vsub.f32 %v1225_v44, %v558_v37 }
 0x1fb   : > { %v564_v39 = vmul.f32 1.442695, %v562_v38 }
 0x1fd   : > { %1027 = vpow2.f32 %v564_v39 }
 0x202   : > { %v486_v40 = vpop.xlane.xlu1 %485 }
 0x203   : > { %v1246_v41 = vpop.eup %1027  ;;  %v488_v42 = vsub.f32 %v1230_v54, %v486_v40 }
 0x204   : > { %v568_v43 = vsel %vm480_vm5, %v1246_v41, 0.0 }
 0x205   : > { %v491_v45 = vmul.f32 1.442695, %v488_v42  ;;  %569 = vadd.xlane.f32.xlu0 %v568_v43 }
 0x207   : > { %1029 = vpow2.f32 %v491_v45 }
 0x20b   : > { %v647_v50 = vpop.xlane.xlu1 %646 }
 0x20c   : > { %v649_v56 = vsub.f32 %v1235_v0, %v647_v50 }
 0x20d   : > { %v1251_v46 = vpop.eup %1029 }
 0x20e   : > { %v496_v47 = vsel %vm480_vm5, %v1251_v46, 0.0  ;;  %v652_v60 = vmul.f32 1.442695, %v649_v56 }
 0x20f   : > { %497 = vadd.xlane.f32.xlu2 %v496_v47 }
 0x210   : > { %v483_v44 = vpop.xlane.xlu0 %482 }
 0x211   : > { %v487_v48 = vsub.f32 %v478_v5, %v483_v44 }
 0x213   : > { %v489_v49 = vmul.f32 1.442695, %v487_v48 }
 0x215   : > { %1031 = vpow2.f32 %v489_v49 }
 0x219   : > { %v561_v51 = vpop.xlane.xlu2 %560  ;;  %v644_v52 = vpop.xlane.xlu0 %643 }
 0x21a   : > { %v563_v53 = vsub.f32 %v555_v22, %v561_v51  ;;  %v648_v54 = vsub.f32 %v640_v23, %v644_v52 }
 0x21b   : > { %v1032_v55 = vpop.eup %1031 }
 0x21c   : > { %v566_v57 = vmul.f32 1.442695, %v563_v53  ;;  %v650_v58 = vmul.f32 1.442695, %v648_v54  ;;  %v493_v59 = vsel %vm480_vm5, %v1032_v55, 0.0 }
 0x21d   : > { %494 = vadd.xlane.f32.xlu1 %v493_v59 }
 0x21e   : > { %1033 = vpow2.f32 %v566_v57 }
 0x21f   : > { %1035 = vpow2.f32 %v650_v58 }
 0x220   : > { %1037 = vpow2.f32 %v652_v60 }
 0x221   : > { %v733_v61 = vpop.xlane.xlu0 %732 }
 0x222   : > { %v730_v62 = vpop.xlane.xlu2 %729  ;;  %v735_v2 = vsub.f32 %v727_v32, %v733_v61 }
 0x223   : > { %v734_v63 = vsub.f32 %v726_v34, %v730_v62 }
 0x224   : > { %v1034_v1 = vpop.eup %1033  ;;  %v738_v7 = vmul.f32 1.442695, %v735_v2 }
 0x225   : > { %v1036_v3 = vpop.eup %1035  ;;  %v736_v4 = vmul.f32 1.442695, %v734_v63  ;;  %v571_v5 = vsel %vm480_vm5, %v1034_v1, 0.0 }
 0x226   : > { %572 = vadd.xlane.f32.xlu1 %v571_v5  ;;  %v654_v0 = vsel %vm480_vm5, %v1036_v3, 0.0  ;;  %v1038_v8 = vpop.eup %1037 }
 0x227   : > { %1039 = vpow2.f32 %v736_v4  ;;  %586 = vrot.lane.b32.xlu2 %v940_v6, %s1104_s21  ;;  %655 = vadd.xlane.f32.xlu0 %v654_v0  ;;  %v657_v10 = vsel %vm480_vm5, %v1038_v8, 0.0 }
 0x228   : > { %1041 = vpow2.f32 %v738_v7 }
 0x22d   : > { %v1040_v9 = vpop.eup %1039 }
 0x22e   : > { %658 = vadd.xlane.f32.xlu1 %v657_v10  ;;  %v740_v11 = vsel %vm480_vm5, %v1040_v9, 0.0  ;;  %v1042_v12 = vpop.eup %1041 }
 0x22f   : > { %741 = vadd.xlane.f32.xlu0 %v740_v11  ;;  %v743_v13 = vsel %vm480_vm5, %v1042_v12, 0.0 }
 0x236   : > { %744 = vadd.xlane.f32.xlu1 %v743_v13 }
 0x243   : > { %672 = vrot.lane.b32.xlu0 %v941_v14, %s1105_s18 }
 0x24f   : > { %758 = vrot.lane.b32.xlu1 %v942_v15, %s1106_s19 }
 0x278   : > { %v570_v20 = vpop.xlane.xlu0 %569 }
 0x282   : > { %v498_v16 = vpop.xlane.xlu2 %497 }
 0x283   : > { %1043 = vrcp.f32 %v498_v16 }
 0x289   : > { %v1044_v19 = vpop.eup %1043 }
 0x28a   : > { %v587_v17 = vpop.permute.xlu2 %586  ;;  %v502_v23 = vmul.f32 %v1044_v19, %v1251_v46 }
 0x28b   : > { %599 = vmatpush.bf16.msra.mxu3 %v587_v17 }
 0x290   : > { %v495_v18 = vpop.xlane.xlu1 %494 }
 0x291   : > { %1045 = vrcp.f32 %v495_v18 }
 0x292   : > { %1047 = vrcp.f32 %v570_v20 }
 0x297   : > { %v1046_v21 = vpop.eup %1045 }
 0x298   : > { %v501_v22 = vmul.f32 %v1046_v21, %v1032_v55  ;;  %v1048_v26 = vpop.eup %1047 }
 0x299   : > { %v573_v24 = vpop.xlane.xlu1 %572  ;;  %v576_v28 = vmul.f32 %v1048_v26, %v1246_v41 }
 0x29a   : > { %1049 = vrcp.f32 %v573_v24  ;;  %v503_v25 = vpack.c.bf16 %v502_v23, %v501_v22  ;;  %v656_v30 = vpop.xlane.xlu0 %655 }
 0x29c   : > { %912 = vmatmul.msk.bf16.vlgmr.msra.gmra.mxu2 %vm480_vm5, %v503_v25 }
 0x2a0   : > { %v1050_v27 = vpop.eup %1049 }
 0x2a1   : > { %v577_v29 = vmul.f32 %v1050_v27, %v1034_v1  ;;  %v659_v32 = vpop.xlane.xlu1 %658 }
 0x2a2   : > { %1051 = vrcp.f32 %v659_v32  ;;  %v742_v33 = vpop.xlane.xlu0 %741 }
 0x2a3   : > { %v578_v31 = vpack.c.bf16 %v577_v29, %v576_v28  ;;  %1053 = vrcp.f32 %v656_v30 }
 0x2a5   : > { %919 = vmatmul.msk.bf16.vlgmr.msra.gmra.mxu3 %vm480_vm5, %v578_v31 }
 0x2a8   : > { %v1052_v34 = vpop.eup %1051 }
 0x2a9   : > { %v1054_v35 = vpop.eup %1053  ;;  %v663_v36 = vmul.f32 %v1052_v34, %v1038_v8  ;;  %v745_v37 = vpop.xlane.xlu1 %744 }
 0x2aa   : > { %v662_v38 = vmul.f32 %v1054_v35, %v1036_v3  ;;  %1055 = vrcp.f32 %v745_v37 }
 0x2ab   : > { %1057 = vrcp.f32 %v742_v33 }
 0x2ac   : > { %v664_v40 = vpack.c.bf16 %v663_v36, %v662_v38 }
 0x2b0   : > { %v1056_v41 = vpop.eup %1055 }
 0x2b1   : > { %v1058_v42 = vpop.eup %1057  ;;  %v749_v43 = vmul.f32 %v1056_v41, %v1042_v12 }
 0x2b2   : > { %v748_v45 = vmul.f32 %v1058_v42, %v1040_v9 }
 0x2b4   : > { %v750_v47 = vpack.c.bf16 %v749_v43, %v748_v45 }
 0x2b5   : > { %v673_v39 = vpop.permute.xlu0 %672 }
 0x2b6   : > { %685 = vmatpush.bf16.msrb.mxu2 %v673_v39 }
 0x2b9   : > { %926 = vmatmul.msk.bf16.vlgmr.msrb.gmra.mxu2 %vm480_vm5, %v664_v40 }
 0x2c1   : > { %v759_v46 = vpop.permute.xlu1 %758 }
 0x2c2   : > { %771 = vmatpush.bf16.msrb.mxu3 %v759_v46 }
 0x2c5   : > { %933 = vmatmul.msk.bf16.vlgmr.msrb.gmra.mxu3 %vm480_vm5, %v750_v47 }
 0x31f   : > { %v524_v44 = vpop.f32.mrf.mxu2 }
 0x320   : > { %529 = vst.msk [vmem:[%s1273_s30] sm:$0xff] %vm480_vm5, %v524_v44 }
 0x327   : > { %v526_v48 = vpop.f32.mrf.mxu2 }
 0x328   : > { %530 = vst.msk [vmem:[%s1273_s30 + $0x8] sm:$0xff] %vm480_vm5, %v526_v48  ;;  %v601_v49 = vpop.f32.mrf.mxu3 }
 0x329   : > { %608 = vrot.lane.b32.xlu2 %v601_v49, %s1107_s7 }
 0x330   : > { %v603_v50 = vpop.f32.mrf.mxu3 }
 0x331   : > { %610 = vrot.lane.b32.xlu2 %v603_v50, %s1107_s7 }
 0x33c   : > { %v687_v51 = vpop.f32.mrf.mxu2 }
 0x33d   : > { %694 = vrot.lane.b32.xlu0 %v687_v51, %s1108_s23 }
 0x344   : > { %v689_v52 = vpop.f32.mrf.mxu2 }
 0x345   : > { %696 = vrot.lane.b32.xlu2 %v689_v52, %s1108_s23 }
 0x348   : > { %v773_v53 = vpop.f32.mrf.mxu3 }
 0x349   : > { %780 = vrot.lane.b32.xlu1 %v773_v53, %s1109_s27 }
 0x350   : > { %v775_v54 = vpop.f32.mrf.mxu3 }
 0x351   : > { %782 = vrot.lane.b32.xlu0 %v775_v54, %s1109_s27 }
 0x383   : > { %v609_v55 = vpop.permute.xlu2 %608 }
 0x384   : > { %615 = vst.msk [vmem:[%s1273_s30] sm:$0xff] %vm614_vm13, %v609_v55 }
 0x38b   : > { %v611_v56 = vpop.permute.xlu2 %610 }
 0x38c   : > { %616 = vst.msk [vmem:[%s1273_s30 + $0x8] sm:$0xff] %vm614_vm13, %v611_v56 }
 0x39f   : > { %v697_v57 = vpop.permute.xlu2 %696 }
 0x3a0   : > { %702 = vst.msk [vmem:[%s1273_s30 + $0x8] sm:$0xff] %vm700_vm14, %v697_v57 }
 0x3af   : > { %v695_v58 = vpop.permute.xlu0 %694 }
 0x3b0   : > { %701 = vst.msk [vmem:[%s1273_s30] sm:$0xff] %vm700_vm14, %v695_v58 }
 0x3bb   : > { %v781_v59 = vpop.permute.xlu1 %780 }
 0x3bc   : > { %787 = vst.msk [vmem:[%s1273_s30] sm:$0xff] %vm786_vm15, %v781_v59 }
 0x3c3   : > { %v783_v60 = vpop.permute.xlu0 %782 }
 0x3c4   : > { %788 = vst.msk [vmem:[%s1273_s30 + $0x8] sm:$0xff] %vm786_vm15, %v783_v60 }
 0x3c5 PF: > { %s16_s25 = sadd.s32 1, %s1097_s25   ;;  %s1307_s21 = smov %s1085_s22 }
 0x3c6   : > { %p13_p10 = scmp.ge.s32.totalorder %s16_s25, 4   ;;  %s1308_s22 = smov %s1180_s29 }
 0x3c7   : > { %s1309_s23 = smov %s1093_s24  ;;  %s1310_s24 = smov %s1312_s26 }
 0x3c8   :  { %15 = sbr.rel (!%p13_p10) target bundleno = 3 (0x3), region = 131 }

// kernel: gat_efa_forward.9
= control target key start
LH: loop header
LB: loop body
LE: loop exit
PB: predicated region body
PF: predicated region fallthrough
CT: control target
= control target key end

     0   :  { %vm235_vm0 = vcmask 1040384   ;;  %vm138_vm1 = vcmask 15360   ;;  %vm511_vm2 = vcmask 130048   ;;  %s2508_s2 = inlined_call_operand.vmem [shape: f32[2,16], index: 2, kind: input, shape index: {}]   ;;  %s2509_s0 = inlined_call_operand.vmem [shape: f32[512,2], index: 0, kind: input, shape index: {}]   ;;  %s2510_s3 = inlined_call_operand.vmem [shape: f32[1,16], index: 3, kind: input, shape index: {}]   ;;  %s2511_s4 = inlined_call_operand.vmem [shape: f32[16,16], index: 4, kind: input, shape index: {}]   ;;  %s2512_s5 = inlined_call_operand.vmem [shape: f32[1,16], index: 5, kind: input, shape index: {}]   ;;  %s2513_s6 = inlined_call_operand.vmem [shape: f32[16,64], index: 6, kind: input, shape index: {}]   ;;  %s2514_s7 = inlined_call_operand.vmem [shape: f32[1,64], index: 7, kind: input, shape index: {}]   ;;  %s2515_s8 = inlined_call_operand.vmem [shape: f32[4,64], index: 8, kind: input, shape index: {}]   ;;  %s2516_s9 = inlined_call_operand.vmem [shape: f32[4,1], index: 9, kind: input, shape index: {}]   ;;  %s2517_s1 = inlined_call_operand.vmem [shape: f32[1,512], index: 1, kind: input, shape index: {}]   ;;  %s2518_s10 = inlined_call_operand.vmem [shape: bf16[4,512], index: 10, kind: output, shape index: {}]  }
   0x1   :  { %v132_v0 = vld [vmem:[%s2508_s2] sm:$0x3]  ;;  %v37_v2 = vld [vmem:[%s2509_s0 + $0x8] sm:$0xff]  ;;  %v38_v6 = vld [vmem:[%s2509_s0 + $0x10] sm:$0xff] }
   0x2   :  { %v36_v1 = vld [vmem:[%s2509_s0] sm:$0xff]  ;;  %v133_v3 = vpack.c.bf16 %v132_v0, %v132_v0  ;;  %v39_v7 = vld [vmem:[%s2509_s0 + $0x18] sm:$0xff]  ;;  %v41_v10 = vld [vmem:[%s2509_s0 + $0x28] sm:$0xff] }
   0x3   :  { %v100_v5 = vpack.c.bf16 %v37_v2, %v36_v1  ;;  %v101_v8 = vpack.c.bf16 %v39_v7, %v38_v6  ;;  %v40_v9 = vld [vmem:[%s2509_s0 + $0x20] sm:$0xff]  ;;  %v42_v12 = vld [vmem:[%s2509_s0 + $0x30] sm:$0xff]  ;;  %v43_v13 = vld [vmem:[%s2509_s0 + $0x38] sm:$0xff] }
   0x4   :  { %v237_v4 = vsel %vm235_vm0, %v133_v3, 0  ;;  %v102_v11 = vpack.c.bf16 %v41_v10, %v40_v9  ;;  %v103_v14 = vpack.c.bf16 %v43_v13, %v42_v12  ;;  %v44_v15 = vld [vmem:[%s2509_s0 + $0x40] sm:$0xff]  ;;  %v45_v16 = vld [vmem:[%s2509_s0 + $0x48] sm:$0xff]  ;;  %v46_v18 = vld [vmem:[%s2509_s0 + $0x50] sm:$0xff]  ;;  %vm1377_vm0 = vcmask 523264  }
   0x5   :  { %246 = vmatpush.bf16.msra.mxu0 %v237_v4  ;;  %1679 = vmatpush.bf16.msra.mxu3 %v237_v4  ;;  %v104_v17 = vpack.c.bf16 %v45_v16, %v44_v15  ;;  %v47_v19 = vld [vmem:[%s2509_s0 + $0x58] sm:$0xff]  ;;  %v48_v21 = vld [vmem:[%s2509_s0 + $0x60] sm:$0xff]  ;;  %v49_v22 = vld [vmem:[%s2509_s0 + $0x68] sm:$0xff] }
   0x6   :  { %v105_v20 = vpack.c.bf16 %v47_v19, %v46_v18  ;;  %v106_v23 = vpack.c.bf16 %v49_v22, %v48_v21  ;;  %v504_v24 = vld [vmem:[%s2511_s4] sm:$0xff]  ;;  %v505_v25 = vld [vmem:[%s2511_s4 + $0x8] sm:$0xff]  ;;  %v50_v27 = vld [vmem:[%s2509_s0 + $0x70] sm:$0xff] }
   0x7   :  { %v506_v26 = vpack.c.bf16 %v505_v25, %v504_v24  ;;  %v51_v28 = vld [vmem:[%s2509_s0 + $0x78] sm:$0xff]  ;;  %v52_v30 = vld [vmem:[%s2509_s0 + $0x80] sm:$0xff]  ;;  %v53_v31 = vld [vmem:[%s2509_s0 + $0x88] sm:$0xff] }
   0x8   :  { %1579 = vmatmul.msk.bf16.vlgmr.msra.gmra.mxu0 %vm138_vm1, %v100_v5  ;;  %v107_v29 = vpack.c.bf16 %v51_v28, %v50_v27  ;;  %v108_v32 = vpack.c.bf16 %v53_v31, %v52_v30  ;;  %v1820_v34 = vld [vmem:[%s2510_s3] ss:$0 sm:$0xff]  ;;  %v54_v40 = vld [vmem:[%s2509_s0 + $0x90] sm:$0xff]  ;;  %v55_v41 = vld [vmem:[%s2509_s0 + $0x98] sm:$0xff] }
   0x9   :  { %615 = vmatpush.bf16.msra.mxu1 %v506_v26  ;;  %1680 = vmatpush.bf16.msrb.mxu3 %v506_v26  ;;  %v109_v43 = vpack.c.bf16 %v55_v41, %v54_v40  ;;  %v56_v50 = vld [vmem:[%s2509_s0 + $0xa0] sm:$0xff]  ;;  %v57_v51 = vld [vmem:[%s2509_s0 + $0xa8] sm:$0xff]  ;;  %v58_v60 = vld [vmem:[%s2509_s0 + $0xb0] sm:$0xff] }
   0xa   :  { %v110_v53 = vpack.c.bf16 %v57_v51, %v56_v50  ;;  %v59_v61 = vld [vmem:[%s2509_s0 + $0xb8] sm:$0xff]  ;;  %v60_v6 = vld [vmem:[%s2509_s0 + $0xc0] sm:$0xff]  ;;  %v61_v7 = vld [vmem:[%s2509_s0 + $0xc8] sm:$0xff] }
   0xb   :  { %v111_v63 = vpack.c.bf16 %v59_v61, %v58_v60  ;;  %v112_v9 = vpack.c.bf16 %v61_v7, %v60_v6  ;;  %v62_v16 = vld [vmem:[%s2509_s0 + $0xd0] sm:$0xff]  ;;  %v64_v26 = vld [vmem:[%s2509_s0 + $0xe0] sm:$0xff]  ;;  %v65_v27 = vld [vmem:[%s2509_s0 + $0xe8] sm:$0xff] }
   0xc   :  { %v68_v50 = vld [vmem:[%s2509_s0 + $0x100] sm:$0xff]  ;;  %v69_v51 = vld [vmem:[%s2509_s0 + $0x108] sm:$0xff]  ;;  %v70_v61 = vld [vmem:[%s2509_s0 + $0x110] sm:$0xff] }
  0x18   :  { %1580 = vmatmul.msk.bf16.gmra.mxu0 %vm138_vm1, %v101_v8 }
  0x28   :  { %1581 = vmatmul.msk.bf16.gmra.mxu0 %vm138_vm1, %v102_v11 }
  0x38   :  { %1582 = vmatmul.msk.bf16.gmra.mxu0 %vm138_vm1, %v103_v14 }
  0x48   :  { %1583 = vmatmul.msk.bf16.gmra.mxu0 %vm138_vm1, %v104_v17  ;;  %v63_v17 = vld [vmem:[%s2509_s0 + $0xd8] sm:$0xff] }
  0x49   :  { %v113_v19 = vpack.c.bf16 %v63_v17, %v62_v16  ;;  %v73_v16 = vld [vmem:[%s2509_s0 + $0x128] sm:$0xff] }
  0x58   :  { %1584 = vmatmul.msk.bf16.gmra.mxu0 %vm138_vm1, %v105_v20 }
  0x68   :  { %1585 = vmatmul.msk.bf16.gmra.mxu0 %vm138_vm1, %v106_v23 }
  0x78   :  { %1586 = vmatmul.msk.bf16.gmra.mxu0 %vm138_vm1, %v107_v29  ;;  %v114_v29 = vpack.c.bf16 %v65_v27, %v64_v26 }
  0x85   :  { %v248_v33 = vpop.f32.mrf.mxu0 }
  0x86   :  { %v249_v35 = vadd.f32 %v1820_v34, %v248_v33 }
  0x88   :  { %1587 = vmatmul.msk.bf16.gmra.mxu0 %vm138_vm1, %v108_v32  ;;  %v408_v38 = vmax.f32 %v249_v35, 0.0 }
  0x8d   :  { %v250_v36 = vpop.f32.mrf.mxu0 }
  0x8e   :  { %v251_v37 = vadd.f32 %v1820_v34, %v250_v36 }
  0x90   :  { %v409_v39 = vmax.f32 %v251_v37, 0.0  ;;  %v66_v37 = vld [vmem:[%s2509_s0 + $0xf0] sm:$0xff] }
  0x92   :  { %v472_v42 = vpack.c.bf16 %v409_v39, %v408_v38  ;;  %v67_v38 = vld [vmem:[%s2509_s0 + $0xf8] sm:$0xff] }
  0x93   :  { %v115_v40 = vpack.c.bf16 %v67_v38, %v66_v37 }
  0x94   :  { %1611 = vmatmul.msk.bf16.vlgmr.msra.gmra.mxu1 %vm511_vm2, %v472_v42  ;;  %v873_v42 = vld [vmem:[%s2513_s6] sm:$0xff] }
  0x95   :  { %v253_v44 = vpop.f32.mrf.mxu0 }
  0x96   :  { %v254_v45 = vadd.f32 %v1820_v34, %v253_v44 }
  0x98   :  { %1588 = vmatmul.msk.bf16.gmra.mxu0 %vm138_vm1, %v109_v43  ;;  %v410_v48 = vmax.f32 %v254_v45, 0.0  ;;  %v874_v43 = vld [vmem:[%s2513_s6 + $0x8] sm:$0xff] }
  0x99   :  { %v1899_v44 = vpack.c.bf16 %v874_v43, %v873_v42 }
  0x9b   :  { %983 = vmatpush.bf16.msra.mxu2 %v1899_v44 }
  0x9d   :  { %v255_v46 = vpop.f32.mrf.mxu0 }
  0x9e   :  { %v256_v47 = vadd.f32 %v1820_v34, %v255_v46 }
  0xa0   :  { %v411_v49 = vmax.f32 %v256_v47, 0.0 }
  0xa2   :  { %v473_v52 = vpack.c.bf16 %v411_v49, %v410_v48 }
  0xa4   :  { %1612 = vmatmul.msk.bf16.gmra.mxu1 %vm511_vm2, %v473_v52 }
  0xa5   :  { %v258_v54 = vpop.f32.mrf.mxu0 }
  0xa6   :  { %v259_v55 = vadd.f32 %v1820_v34, %v258_v54 }
  0xa8   :  { %1589 = vmatmul.msk.bf16.gmra.mxu0 %vm138_vm1, %v110_v53  ;;  %v412_v58 = vmax.f32 %v259_v55, 0.0  ;;  %v116_v53 = vpack.c.bf16 %v69_v51, %v68_v50 }
  0xad   :  { %v260_v56 = vpop.f32.mrf.mxu0 }
  0xae   :  { %v261_v57 = vadd.f32 %v1820_v34, %v260_v56 }
  0xb0   :  { %v413_v59 = vmax.f32 %v261_v57, 0.0 }
  0xb2   :  { %v474_v62 = vpack.c.bf16 %v413_v59, %v412_v58 }
  0xb4   :  { %1613 = vmatmul.msk.bf16.gmra.mxu1 %vm511_vm2, %v474_v62  ;;  %v71_v62 = vld [vmem:[%s2509_s0 + $0x118] sm:$0xff] }
  0xb5   :  { %v263_v0 = vpop.f32.mrf.mxu0 }
  0xb6   :  { %v264_v1 = vadd.f32 %v1820_v34, %v263_v0  ;;  %v1923_v0 = vld [vmem:[%s2512_s5] ss:$0 sm:$0xff] }
  0xb8   :  { %1590 = vmatmul.msk.bf16.gmra.mxu0 %vm138_vm1, %v111_v63  ;;  %v414_v4 = vmax.f32 %v264_v1, 0.0  ;;  %v117_v1 = vpack.c.bf16 %v71_v62, %v70_v61 }
  0xbd   :  { %v265_v2 = vpop.f32.mrf.mxu0 }
  0xbe   :  { %v266_v3 = vadd.f32 %v1820_v34, %v265_v2 }
  0xc0   :  { %v415_v5 = vmax.f32 %v266_v3, 0.0 }
  0xc2   :  { %v475_v8 = vpack.c.bf16 %v415_v5, %v414_v4 }
  0xc4   :  { %1614 = vmatmul.msk.bf16.gmra.mxu1 %vm511_vm2, %v475_v8 }
  0xc5   :  { %v268_v10 = vpop.f32.mrf.mxu0 }
  0xc6   :  { %v269_v11 = vadd.f32 %v1820_v34, %v268_v10 }
  0xc8   :  { %1591 = vmatmul.msk.bf16.gmra.mxu0 %vm138_vm1, %v112_v9  ;;  %v416_v14 = vmax.f32 %v269_v11, 0.0 }
  0xcd   :  { %v270_v12 = vpop.f32.mrf.mxu0 }
  0xce   :  { %v271_v13 = vadd.f32 %v1820_v34, %v270_v12 }
  0xd0   :  { %v417_v15 = vmax.f32 %v271_v13, 0.0 }
  0xd2   :  { %v476_v18 = vpack.c.bf16 %v417_v15, %v416_v14  ;;  %v72_v15 = vld [vmem:[%s2509_s0 + $0x120] sm:$0xff] }
  0xd4   :  { %1615 = vmatmul.msk.bf16.gmra.mxu1 %vm511_vm2, %v476_v18  ;;  %v118_v18 = vpack.c.bf16 %v73_v16, %v72_v15  ;;  %v96_v16 = vld [vmem:[%s2509_s0 + $0x1e0] sm:$0xff] }
  0xd5   :  { %v273_v20 = vpop.f32.mrf.mxu0 }
  0xd6   :  { %v274_v21 = vadd.f32 %v1820_v34, %v273_v20 }
  0xd8   :  { %1592 = vmatmul.msk.bf16.gmra.mxu0 %vm138_vm1, %v113_v19  ;;  %v418_v24 = vmax.f32 %v274_v21, 0.0 }
  0xdd   :  { %v275_v22 = vpop.f32.mrf.mxu0 }
  0xde   :  { %v276_v23 = vadd.f32 %v1820_v34, %v275_v22 }
  0xe0   :  { %v419_v25 = vmax.f32 %v276_v23, 0.0 }
  0xe2   :  { %v477_v28 = vpack.c.bf16 %v419_v25, %v418_v24 }
  0xe4   :  { %1616 = vmatmul.msk.bf16.gmra.mxu1 %vm511_vm2, %v477_v28 }
  0xe5   :  { %v278_v30 = vpop.f32.mrf.mxu0 }
  0xe6   :  { %v279_v31 = vadd.f32 %v1820_v34, %v278_v30 }
  0xe8   :  { %1593 = vmatmul.msk.bf16.gmra.mxu0 %vm138_vm1, %v114_v29  ;;  %v420_v35 = vmax.f32 %v279_v31, 0.0 }
  0xed   :  { %v280_v32 = vpop.f32.mrf.mxu0 }
  0xee   :  { %v281_v33 = vadd.f32 %v1820_v34, %v280_v32  ;;  %v74_v32 = vld [vmem:[%s2509_s0 + $0x130] sm:$0xff] }
  0xf0   :  { %v421_v36 = vmax.f32 %v281_v33, 0.0  ;;  %v75_v33 = vld [vmem:[%s2509_s0 + $0x138] sm:$0xff] }
  0xf2   :  { %v478_v39 = vpack.c.bf16 %v421_v36, %v420_v35  ;;  %v119_v36 = vpack.c.bf16 %v75_v33, %v74_v32 }
  0xf4   :  { %1617 = vmatmul.msk.bf16.gmra.mxu1 %vm511_vm2, %v478_v39  ;;  %v92_v39 = vld [vmem:[%s2509_s0 + $0x1c0] sm:$0xff] }
  0xf5   :  { %v283_v41 = vpop.f32.mrf.mxu0 }
  0xf6   :  { %v284_v45 = vadd.f32 %v1820_v34, %v283_v41 }
  0xf8   :  { %1594 = vmatmul.msk.bf16.gmra.mxu0 %vm138_vm1, %v115_v40  ;;  %v422_v48 = vmax.f32 %v284_v45, 0.0  ;;  %v93_v40 = vld [vmem:[%s2509_s0 + $0x1c8] sm:$0xff] }
  0xf9   :  { %v128_v42 = vpack.c.bf16 %v93_v40, %v92_v39 }
  0xfb   :  { %1607 = vmatmul.msk.bf16.vlgmr.msra.gmra.mxu3 %vm138_vm1, %v128_v42 }
  0xfc   :  { %1681 = vmatpush.bf16.msra.mxu3 %v1899_v44 }
  0xfd   :  { %v285_v46 = vpop.f32.mrf.mxu0 }
  0xfe   :  { %v286_v47 = vadd.f32 %v1820_v34, %v285_v46 }
 0x100   :  { %v423_v49 = vmax.f32 %v286_v47, 0.0 }
 0x102   :  { %v479_v52 = vpack.c.bf16 %v423_v49, %v422_v48 }
 0x104   :  { %1618 = vmatmul.msk.bf16.gmra.mxu1 %vm511_vm2, %v479_v52 }
 0x105   :  { %v288_v54 = vpop.f32.mrf.mxu0 }
 0x106   :  { %v289_v55 = vadd.f32 %v1820_v34, %v288_v54  ;;  %v76_v54 = vld [vmem:[%s2509_s0 + $0x140] sm:$0xff] }
 0x108   :  { %1595 = vmatmul.msk.bf16.gmra.mxu0 %vm138_vm1, %v116_v53  ;;  %v424_v58 = vmax.f32 %v289_v55, 0.0  ;;  %v77_v55 = vld [vmem:[%s2509_s0 + $0x148] sm:$0xff] }
 0x109   :  { %v120_v44 = vpack.c.bf16 %v77_v55, %v76_v54 }
 0x10d   :  { %v290_v56 = vpop.f32.mrf.mxu0 }
 0x10e   :  { %v291_v57 = vadd.f32 %v1820_v34, %v290_v56 }
 0x110   :  { %v425_v59 = vmax.f32 %v291_v57, 0.0 }
 0x111   :  { %v617_v60 = vpop.f32.mrf.mxu1 }
 0x112   :  { %v480_v63 = vpack.c.bf16 %v425_v59, %v424_v58  ;;  %v618_v3 = vadd.f32 %v1923_v0, %v617_v60  ;;  %v94_v59 = vld [vmem:[%s2509_s0 + $0x1d0] sm:$0xff]  ;;  %v95_v60 = vld [vmem:[%s2509_s0 + $0x1d8] sm:$0xff] }
 0x113   :  { %v129_v62 = vpack.c.bf16 %v95_v60, %v94_v59 }
 0x114   :  { %1619 = vmatmul.msk.bf16.gmra.mxu1 %vm511_vm2, %v480_v63  ;;  %v777_v6 = vmax.f32 %v618_v3, 0.0 }
 0x115   :  { %v293_v2 = vpop.f32.mrf.mxu0  ;;  %1608 = vmatmul.msk.bf16.gmra.mxu3 %vm138_vm1, %v129_v62 }
 0x116   :  { %v294_v7 = vadd.f32 %v1820_v34, %v293_v2 }
 0x118   :  { %1596 = vmatmul.msk.bf16.gmra.mxu0 %vm138_vm1, %v117_v1  ;;  %v426_v12 = vmax.f32 %v294_v7, 0.0 }
 0x119   :  { %v619_v4 = vpop.f32.mrf.mxu1 }
 0x11a   :  { %v620_v5 = vadd.f32 %v1923_v0, %v619_v4 }
 0x11c   :  { %v778_v8 = vmax.f32 %v620_v5, 0.0 }
 0x11d   :  { %v295_v9 = vpop.f32.mrf.mxu0 }
 0x11e   :  { %v296_v10 = vadd.f32 %v1820_v34, %v295_v9  ;;  %v841_v11 = vpack.c.bf16 %v778_v8, %v777_v6 }
 0x120   :  { %v427_v13 = vmax.f32 %v296_v10, 0.0  ;;  %1643 = vmatmul.msk.bf16.vlgmr.msra.gmra.mxu2 %vm511_vm2, %v841_v11  ;;  %v78_v10 = vld [vmem:[%s2509_s0 + $0x150] sm:$0xff]  ;;  %v79_v11 = vld [vmem:[%s2509_s0 + $0x158] sm:$0xff] }
 0x121   :  { %v622_v14 = vpop.f32.mrf.mxu1 }
 0x122   :  { %v481_v17 = vpack.c.bf16 %v427_v13, %v426_v12  ;;  %v623_v20 = vadd.f32 %v1923_v0, %v622_v14  ;;  %v121_v13 = vpack.c.bf16 %v79_v11, %v78_v10 }
 0x124   :  { %1620 = vmatmul.msk.bf16.gmra.mxu1 %vm511_vm2, %v481_v17  ;;  %v779_v23 = vmax.f32 %v623_v20, 0.0  ;;  %v97_v17 = vld [vmem:[%s2509_s0 + $0x1e8] sm:$0xff] }
 0x125   :  { %v298_v19 = vpop.f32.mrf.mxu0 }
 0x126   :  { %v299_v24 = vadd.f32 %v1820_v34, %v298_v19  ;;  %v130_v19 = vpack.c.bf16 %v97_v17, %v96_v16 }
 0x128   :  { %1597 = vmatmul.msk.bf16.gmra.mxu0 %vm138_vm1, %v118_v18  ;;  %v428_v29 = vmax.f32 %v299_v24, 0.0  ;;  %1609 = vmatmul.msk.bf16.gmra.mxu3 %vm138_vm1, %v130_v19 }
 0x129   :  { %v624_v21 = vpop.f32.mrf.mxu1 }
 0x12a   :  { %v625_v22 = vadd.f32 %v1923_v0, %v624_v21 }
 0x12c   :  { %v780_v25 = vmax.f32 %v625_v22, 0.0 }
 0x12d   :  { %v300_v26 = vpop.f32.mrf.mxu0 }
 0x12e   :  { %v301_v27 = vadd.f32 %v1820_v34, %v300_v26  ;;  %v842_v28 = vpack.c.bf16 %v780_v25, %v779_v23 }
 0x130   :  { %v429_v30 = vmax.f32 %v301_v27, 0.0  ;;  %1644 = vmatmul.msk.bf16.gmra.mxu2 %vm511_vm2, %v842_v28 }
 0x131   :  { %v627_v31 = vpop.f32.mrf.mxu1 }
 0x132   :  { %v482_v35 = vpack.c.bf16 %v429_v30, %v428_v29  ;;  %v628_v38 = vadd.f32 %v1923_v0, %v627_v31  ;;  %v80_v30 = vld [vmem:[%s2509_s0 + $0x160] sm:$0xff]  ;;  %v81_v31 = vld [vmem:[%s2509_s0 + $0x168] sm:$0xff] }
 0x133   :  { %v122_v33 = vpack.c.bf16 %v81_v31, %v80_v30 }
 0x134   :  { %1621 = vmatmul.msk.bf16.gmra.mxu1 %vm511_vm2, %v482_v35  ;;  %v781_v45 = vmax.f32 %v628_v38, 0.0  ;;  %v99_v38 = vld [vmem:[%s2509_s0 + $0x1f8] sm:$0xff] }
 0x135   :  { %v303_v37 = vpop.f32.mrf.mxu0 }
 0x136   :  { %v304_v46 = vadd.f32 %v1820_v34, %v303_v37  ;;  %v98_v37 = vld [vmem:[%s2509_s0 + $0x1f0] sm:$0xff] }
 0x137   :  { %v131_v40 = vpack.c.bf16 %v99_v38, %v98_v37 }
 0x138   :  { %1598 = vmatmul.msk.bf16.gmra.mxu0 %vm138_vm1, %v119_v36  ;;  %v430_v51 = vmax.f32 %v304_v46, 0.0 }
 0x139   :  { %v629_v41 = vpop.f32.mrf.mxu1  ;;  %1610 = vmatmul.msk.bf16.gmra.mxu3 %vm138_vm1, %v131_v40  ;;  %v88_v40 = vld [vmem:[%s2509_s0 + $0x1a0] sm:$0xff] }
 0x13a   :  { %v630_v43 = vadd.f32 %v1923_v0, %v629_v41 }
 0x13c   :  { %v782_v47 = vmax.f32 %v630_v43, 0.0 }
 0x13d   :  { %v305_v48 = vpop.f32.mrf.mxu0 }
 0x13e   :  { %v306_v49 = vadd.f32 %v1820_v34, %v305_v48  ;;  %v843_v50 = vpack.c.bf16 %v782_v47, %v781_v45 }
 0x140   :  { %v431_v52 = vmax.f32 %v306_v49, 0.0  ;;  %1645 = vmatmul.msk.bf16.gmra.mxu2 %vm511_vm2, %v843_v50 }
 0x141   :  { %v632_v53 = vpop.f32.mrf.mxu1 }
 0x142   :  { %v483_v56 = vpack.c.bf16 %v431_v52, %v430_v51  ;;  %v633_v58 = vadd.f32 %v1923_v0, %v632_v53  ;;  %v82_v52 = vld [vmem:[%s2509_s0 + $0x170] sm:$0xff]  ;;  %v83_v53 = vld [vmem:[%s2509_s0 + $0x178] sm:$0xff] }
 0x143   :  { %v123_v55 = vpack.c.bf16 %v83_v53, %v82_v52 }
 0x144   :  { %1622 = vmatmul.msk.bf16.gmra.mxu1 %vm511_vm2, %v483_v56  ;;  %v783_v1 = vmax.f32 %v633_v58, 0.0 }
 0x145   :  { %v308_v57 = vpop.f32.mrf.mxu0 }
 0x146   :  { %v309_v2 = vadd.f32 %v1820_v34, %v308_v57 }
 0x148   :  { %1599 = vmatmul.msk.bf16.gmra.mxu0 %vm138_vm1, %v120_v44  ;;  %v432_v7 = vmax.f32 %v309_v2, 0.0 }
 0x149   :  { %v634_v61 = vpop.f32.mrf.mxu1 }
 0x14a   :  { %v635_v63 = vadd.f32 %v1923_v0, %v634_v61 }
 0x14c   :  { %v784_v3 = vmax.f32 %v635_v63, 0.0 }
 0x14d   :  { %v310_v4 = vpop.f32.mrf.mxu0 }
 0x14e   :  { %v311_v5 = vadd.f32 %v1820_v34, %v310_v4  ;;  %v844_v6 = vpack.c.bf16 %v784_v3, %v783_v1 }
 0x150   :  { %v433_v8 = vmax.f32 %v311_v5, 0.0  ;;  %1646 = vmatmul.msk.bf16.gmra.mxu2 %vm511_vm2, %v844_v6  ;;  %v84_v5 = vld [vmem:[%s2509_s0 + $0x180] sm:$0xff]  ;;  %v85_v6 = vld [vmem:[%s2509_s0 + $0x188] sm:$0xff] }
 0x151   :  { %v637_v9 = vpop.f32.mrf.mxu1 }
 0x152   :  { %v484_v12 = vpack.c.bf16 %v433_v8, %v432_v7  ;;  %v638_v15 = vadd.f32 %v1923_v0, %v637_v9  ;;  %v124_v8 = vpack.c.bf16 %v85_v6, %v84_v5 }
 0x154   :  { %1623 = vmatmul.msk.bf16.gmra.mxu1 %vm511_vm2, %v484_v12  ;;  %v785_v21 = vmax.f32 %v638_v15, 0.0 }
 0x155   :  { %v313_v14 = vpop.f32.mrf.mxu0 }
 0x156   :  { %v314_v22 = vadd.f32 %v1820_v34, %v313_v14 }
 0x158   :  { %1600 = vmatmul.msk.bf16.gmra.mxu0 %vm138_vm1, %v121_v13  ;;  %v434_v27 = vmax.f32 %v314_v22, 0.0  ;;  %v86_v22 = vld [vmem:[%s2509_s0 + $0x190] sm:$0xff] }
 0x159   :  { %v639_v18 = vpop.f32.mrf.mxu1 }
 0x15a   :  { %v640_v20 = vadd.f32 %v1923_v0, %v639_v18 }
 0x15c   :  { %v786_v23 = vmax.f32 %v640_v20, 0.0 }
 0x15d   :  { %v315_v24 = vpop.f32.mrf.mxu0 }
 0x15e   :  { %v316_v25 = vadd.f32 %v1820_v34, %v315_v24  ;;  %v845_v26 = vpack.c.bf16 %v786_v23, %v785_v21  ;;  %v87_v23 = vld [vmem:[%s2509_s0 + $0x198] sm:$0xff] }
 0x160   :  { %v435_v28 = vmax.f32 %v316_v25, 0.0  ;;  %1647 = vmatmul.msk.bf16.gmra.mxu2 %vm511_vm2, %v845_v26  ;;  %v125_v25 = vpack.c.bf16 %v87_v23, %v86_v22 }
 0x161   :  { %v642_v29 = vpop.f32.mrf.mxu1 }
 0x162   :  { %v485_v32 = vpack.c.bf16 %v435_v28, %v434_v27  ;;  %v643_v36 = vadd.f32 %v1923_v0, %v642_v29 }
 0x164   :  { %1624 = vmatmul.msk.bf16.gmra.mxu1 %vm511_vm2, %v485_v32  ;;  %v787_v42 = vmax.f32 %v643_v36, 0.0 }
 0x165   :  { %v318_v35 = vpop.f32.mrf.mxu0 }
 0x166   :  { %v319_v43 = vadd.f32 %v1820_v34, %v318_v35 }
 0x168   :  { %1601 = vmatmul.msk.bf16.gmra.mxu0 %vm138_vm1, %v122_v33  ;;  %v436_v49 = vmax.f32 %v319_v43, 0.0 }
 0x169   :  { %v644_v39 = vpop.f32.mrf.mxu1 }
 0x16a   :  { %v645_v41 = vadd.f32 %v1923_v0, %v644_v39 }
 0x16c   :  { %v788_v45 = vmax.f32 %v645_v41, 0.0  ;;  %v89_v41 = vld [vmem:[%s2509_s0 + $0x1a8] sm:$0xff] }
 0x16d   :  { %v320_v46 = vpop.f32.mrf.mxu0 }
 0x16e   :  { %v321_v47 = vadd.f32 %v1820_v34, %v320_v46  ;;  %v846_v48 = vpack.c.bf16 %v788_v45, %v787_v42  ;;  %v2074_v45 = vld [vmem:[%s2514_s7] ss:$0 sm:$0xff]  ;;  %v126_v46 = vpack.c.bf16 %v89_v41, %v88_v40 }
 0x170   :  { %v437_v50 = vmax.f32 %v321_v47, 0.0  ;;  %1648 = vmatmul.msk.bf16.gmra.mxu2 %vm511_vm2, %v846_v48 }
 0x171   :  { %v647_v51 = vpop.f32.mrf.mxu1 }
 0x172   :  { %v486_v54 = vpack.c.bf16 %v437_v50, %v436_v49  ;;  %v648_v44 = vadd.f32 %v1923_v0, %v647_v51 }
 0x174   :  { %1625 = vmatmul.msk.bf16.gmra.mxu1 %vm511_vm2, %v486_v54  ;;  %v789_v59 = vmax.f32 %v648_v44, 0.0 }
 0x175   :  { %v323_v56 = vpop.f32.mrf.mxu0 }
 0x176   :  { %v324_v60 = vadd.f32 %v1820_v34, %v323_v56 }
 0x178   :  { %1602 = vmatmul.msk.bf16.gmra.mxu0 %vm138_vm1, %v123_v55  ;;  %v438_v2 = vmax.f32 %v324_v60, 0.0 }
 0x179   :  { %v649_v57 = vpop.f32.mrf.mxu1 }
 0x17a   :  { %v650_v58 = vadd.f32 %v1923_v0, %v649_v57 }
 0x17c   :  { %v790_v61 = vmax.f32 %v650_v58, 0.0 }
 0x17d   :  { %v325_v62 = vpop.f32.mrf.mxu0 }
 0x17e   :  { %v326_v63 = vadd.f32 %v1820_v34, %v325_v62  ;;  %v847_v1 = vpack.c.bf16 %v790_v61, %v789_v59 }
 0x180   :  { %v439_v3 = vmax.f32 %v326_v63, 0.0  ;;  %1649 = vmatmul.msk.bf16.gmra.mxu2 %vm511_vm2, %v847_v1 }
 0x181   :  { %v652_v4 = vpop.f32.mrf.mxu1 }
 0x182   :  { %v487_v7 = vpack.c.bf16 %v439_v3, %v438_v2  ;;  %v653_v10 = vadd.f32 %v1923_v0, %v652_v4  ;;  %v90_v3 = vld [vmem:[%s2509_s0 + $0x1b0] sm:$0xff]  ;;  %v91_v4 = vld [vmem:[%s2509_s0 + $0x1b8] sm:$0xff] }
 0x184   :  { %1626 = vmatmul.msk.bf16.gmra.mxu1 %vm511_vm2, %v487_v7  ;;  %v791_v13 = vmax.f32 %v653_v10, 0.0 }
 0x185   :  { %v328_v9 = vpop.f32.mrf.mxu0 }
 0x186   :  { %v329_v14 = vadd.f32 %v1820_v34, %v328_v9 }
 0x188   :  { %1603 = vmatmul.msk.bf16.gmra.mxu0 %vm138_vm1, %v124_v8  ;;  %v440_v19 = vmax.f32 %v329_v14, 0.0  ;;  %v127_v8 = vpack.c.bf16 %v91_v4, %v90_v3 }
 0x189   :  { %v654_v11 = vpop.f32.mrf.mxu1 }
 0x18a   :  { %v655_v12 = vadd.f32 %v1923_v0, %v654_v11 }
 0x18c   :  { %v792_v15 = vmax.f32 %v655_v12, 0.0 }
 0x18d   :  { %v330_v16 = vpop.f32.mrf.mxu0 }
 0x18e   :  { %v331_v17 = vadd.f32 %v1820_v34, %v330_v16  ;;  %v848_v18 = vpack.c.bf16 %v792_v15, %v791_v13 }
 0x190   :  { %v441_v20 = vmax.f32 %v331_v17, 0.0  ;;  %1650 = vmatmul.msk.bf16.gmra.mxu2 %vm511_vm2, %v848_v18 }
 0x191   :  { %v657_v21 = vpop.f32.mrf.mxu1 }
 0x192   :  { %v488_v24 = vpack.c.bf16 %v441_v20, %v440_v19  ;;  %v658_v27 = vadd.f32 %v1923_v0, %v657_v21 }
 0x194   :  { %1627 = vmatmul.msk.bf16.gmra.mxu1 %vm511_vm2, %v488_v24  ;;  %v793_v30 = vmax.f32 %v658_v27, 0.0  ;;  %v388_v24 = vpop.f32.mrf.mxu3 }
 0x195   :  { %v333_v26 = vpop.f32.mrf.mxu0 }
 0x196   :  { %v334_v31 = vadd.f32 %v1820_v34, %v333_v26 }
 0x198   :  { %1604 = vmatmul.msk.bf16.gmra.mxu0 %vm138_vm1, %v125_v25  ;;  %v442_v37 = vmax.f32 %v334_v31, 0.0 }
 0x199   :  { %v659_v28 = vpop.f32.mrf.mxu1 }
 0x19a   :  { %v660_v29 = vadd.f32 %v1923_v0, %v659_v28 }
 0x19c   :  { %v794_v32 = vmax.f32 %v660_v29, 0.0 }
 0x19d   :  { %v335_v33 = vpop.f32.mrf.mxu0 }
 0x19e   :  { %v336_v35 = vadd.f32 %v1820_v34, %v335_v33  ;;  %v849_v36 = vpack.c.bf16 %v794_v32, %v793_v30  ;;  %v389_v33 = vadd.f32 %v1820_v34, %v388_v24 }
 0x1a0   :  { %v443_v38 = vmax.f32 %v336_v35, 0.0  ;;  %1651 = vmatmul.msk.bf16.gmra.mxu2 %vm511_vm2, %v849_v36  ;;  %v390_v36 = vpop.f32.mrf.mxu3 }
 0x1a1   :  { %v662_v39 = vpop.f32.mrf.mxu1 }
 0x1a2   :  { %v489_v42 = vpack.c.bf16 %v443_v38, %v442_v37  ;;  %v663_v48 = vadd.f32 %v1923_v0, %v662_v39  ;;  %v464_v38 = vmax.f32 %v389_v33, 0.0  ;;  %v391_v39 = vadd.f32 %v1820_v34, %v390_v36 }
 0x1a3   :  { %v985_v43 = vpop.f32.mrf.mxu2 }
 0x1a4   :  { %1628 = vmatmul.msk.bf16.gmra.mxu1 %vm511_vm2, %v489_v42  ;;  %v986_v49 = vadd.f32 %v2074_v45, %v985_v43  ;;  %v795_v52 = vmax.f32 %v663_v48, 0.0  ;;  %v465_v42 = vmax.f32 %v391_v39, 0.0 }
 0x1a5   :  { %v338_v47 = vpop.f32.mrf.mxu0 }
 0x1a6   :  { %v1209_v54 = vmul.f32 0.2, %v986_v49  ;;  %v339_v55 = vadd.f32 %v1820_v34, %v338_v47  ;;  %vm1145_vm3 = vcmp.ge.f32.partialorder %v986_v49, 0.0  ;;  %v500_v48 = vpack.c.bf16 %v465_v42, %v464_v38 }
 0x1a8   :  { %1605 = vmatmul.msk.bf16.gmra.mxu0 %vm138_vm1, %v126_v46  ;;  %v444_v61 = vmax.f32 %v339_v55, 0.0  ;;  %v2085_v63 = vsel %vm1145_vm3, %v986_v49, %v1209_v54  ;;  %1639 = vmatmul.msk.bf16.vlgmr.msrb.gmra.mxu3 %vm511_vm2, %v500_v48 }
 0x1a9   :  { %v664_v50 = vpop.f32.mrf.mxu1 }
 0x1aa   :  { %v665_v51 = vadd.f32 %v1923_v0, %v664_v50 }
 0x1ab   :  { %v987_v53 = vpop.f32.mrf.mxu2 }
 0x1ac   :  { %v796_v56 = vmax.f32 %v665_v51, 0.0  ;;  %v988_v44 = vadd.f32 %v2074_v45, %v987_v53 }
 0x1ad   :  { %v340_v57 = vpop.f32.mrf.mxu0 }
 0x1ae   :  { %vm1146_vm4 = vcmp.ge.f32.partialorder %v988_v44, 0.0  ;;  %v1210_v58 = vmul.f32 0.2, %v988_v44  ;;  %v341_v59 = vadd.f32 %v1820_v34, %v340_v57  ;;  %v850_v60 = vpack.c.bf16 %v796_v56, %v795_v52 }
 0x1b0   :  { %v445_v62 = vmax.f32 %v341_v59, 0.0  ;;  %1652 = vmatmul.msk.bf16.gmra.mxu2 %vm511_vm2, %v850_v60  ;;  %v2087_v1 = vsel %vm1146_vm4, %v988_v44, %v1210_v58  ;;  %v393_v44 = vpop.f32.mrf.mxu3 }
 0x1b1   :  { %v667_v2 = vpop.f32.mrf.mxu1  ;;  %v1339_v5 = vpack.c.bf16 %v2087_v1, %v2085_v63  ;;  %v394_v4 = vadd.f32 %v1820_v34, %v393_v44 }
 0x1b2   :  { %v490_v6 = vpack.c.bf16 %v445_v62, %v444_v61  ;;  %v668_v10 = vadd.f32 %v1923_v0, %v667_v2 }
 0x1b3   :  { %v990_v7 = vpop.f32.mrf.mxu2 }
 0x1b4   :  { %1629 = vmatmul.msk.bf16.gmra.mxu1 %vm511_vm2, %v490_v6  ;;  %v991_v11 = vadd.f32 %v2074_v45, %v990_v7  ;;  %v797_v14 = vmax.f32 %v668_v10, 0.0 }
 0x1b5   :  { %v343_v9 = vpop.f32.mrf.mxu0 }
 0x1b6   :  { %v1211_v16 = vmul.f32 0.2, %v991_v11  ;;  %v344_v17 = vadd.f32 %v1820_v34, %v343_v9  ;;  %vm1147_vm5 = vcmp.ge.f32.partialorder %v991_v11, 0.0  ;;  %v466_v9 = vmax.f32 %v394_v4, 0.0 }
 0x1b8   :  { %1606 = vmatmul.msk.bf16.gmra.mxu0 %vm138_vm1, %v127_v8  ;;  %v446_v25 = vmax.f32 %v344_v17, 0.0  ;;  %v2106_v27 = vsel %vm1147_vm5, %v991_v11, %v1211_v16  ;;  %v395_v7 = vpop.f32.mrf.mxu3 }
 0x1b9   :  { %v669_v12 = vpop.f32.mrf.mxu1  ;;  %v396_v10 = vadd.f32 %v1820_v34, %v395_v7 }
 0x1ba   :  { %v670_v13 = vadd.f32 %v1923_v0, %v669_v12 }
 0x1bb   :  { %v992_v15 = vpop.f32.mrf.mxu2 }
 0x1bc   :  { %v798_v18 = vmax.f32 %v670_v13, 0.0  ;;  %v993_v19 = vadd.f32 %v2074_v45, %v992_v15  ;;  %v467_v13 = vmax.f32 %v396_v10, 0.0 }
 0x1bd   :  { %v345_v20 = vpop.f32.mrf.mxu0 }
 0x1be   :  { %vm1148_vm6 = vcmp.ge.f32.partialorder %v993_v19, 0.0  ;;  %v1212_v21 = vmul.f32 0.2, %v993_v19  ;;  %v346_v22 = vadd.f32 %v1820_v34, %v345_v20  ;;  %v851_v23 = vpack.c.bf16 %v798_v18, %v797_v14 }
 0x1bf   :  { %v501_v17 = vpack.c.bf16 %v467_v13, %v466_v9 }
 0x1c0   :  { %v447_v26 = vmax.f32 %v346_v22, 0.0  ;;  %1653 = vmatmul.msk.bf16.gmra.mxu2 %vm511_vm2, %v851_v23  ;;  %v2108_v28 = vsel %vm1148_vm6, %v993_v19, %v1212_v21 }
 0x1c1   :  { %v672_v29 = vpop.f32.mrf.mxu1  ;;  %v1340_v30 = vpack.c.bf16 %v2108_v28, %v2106_v27  ;;  %1640 = vmatmul.msk.bf16.gmra.mxu3 %vm511_vm2, %v501_v17  ;;  %v1382_v27 = vsel %vm1377_vm0, %v1339_v5, 0 }
 0x1c2   :  { %v491_v31 = vpack.c.bf16 %v447_v26, %v446_v25  ;;  %v673_v37 = vadd.f32 %v1923_v0, %v672_v29  ;;  %v398_v26 = vpop.f32.mrf.mxu3 }
 0x1c3   :  { %v995_v32 = vpop.f32.mrf.mxu2  ;;  %v399_v39 = vadd.f32 %v1820_v34, %v398_v26 }
 0x1c4   :  { %1630 = vmatmul.msk.bf16.gmra.mxu1 %vm511_vm2, %v491_v31  ;;  %v996_v40 = vadd.f32 %v2074_v45, %v995_v32  ;;  %v799_v46 = vmax.f32 %v673_v37, 0.0 }
 0x1c5   :  { %v348_v35 = vpop.f32.mrf.mxu0 }
 0x1c6   :  { %v1213_v49 = vmul.f32 0.2, %v996_v40  ;;  %v349_v50 = vadd.f32 %v1820_v34, %v348_v35  ;;  %vm1149_vm7 = vcmp.ge.f32.partialorder %v996_v40, 0.0 }
 0x1c8   :  { %v448_v57 = vmax.f32 %v349_v50, 0.0  ;;  %v2123_v59 = vsel %vm1149_vm7, %v996_v40, %v1213_v49 }
 0x1c9   :  { %v674_v41 = vpop.f32.mrf.mxu1 }
 0x1ca   :  { %v675_v43 = vadd.f32 %v1923_v0, %v674_v41  ;;  %v400_v41 = vpop.f32.mrf.mxu3 }
 0x1cb   :  { %v997_v47 = vpop.f32.mrf.mxu2 }
 0x1cc   :  { %v800_v51 = vmax.f32 %v675_v43, 0.0  ;;  %v998_v52 = vadd.f32 %v2074_v45, %v997_v47  ;;  %v468_v43 = vmax.f32 %v399_v39, 0.0 }
 0x1cd   :  { %v350_v53 = vpop.f32.mrf.mxu0 }
 0x1ce   :  { %vm1150_vm8 = vcmp.ge.f32.partialorder %v998_v52, 0.0  ;;  %v1214_v54 = vmul.f32 0.2, %v998_v52  ;;  %v351_v55 = vadd.f32 %v1820_v34, %v350_v53  ;;  %v852_v56 = vpack.c.bf16 %v800_v51, %v799_v46 }
 0x1cf   :  { %v401_v46 = vadd.f32 %v1820_v34, %v400_v41 }
 0x1d0   :  { %v449_v58 = vmax.f32 %v351_v55, 0.0  ;;  %1654 = vmatmul.msk.bf16.gmra.mxu2 %vm511_vm2, %v852_v56  ;;  %v2125_v60 = vsel %vm1150_vm8, %v998_v52, %v1214_v54 }
 0x1d1   :  { %v677_v61 = vpop.f32.mrf.mxu1  ;;  %v1341_v62 = vpack.c.bf16 %v2125_v60, %v2123_v59  ;;  %v469_v49 = vmax.f32 %v401_v46, 0.0 }
 0x1d2   :  { %v492_v2 = vpack.c.bf16 %v449_v58, %v448_v57  ;;  %v678_v8 = vadd.f32 %v1923_v0, %v677_v61 }
 0x1d3   :  { %v1000_v3 = vpop.f32.mrf.mxu2  ;;  %v502_v53 = vpack.c.bf16 %v469_v49, %v468_v43 }
 0x1d4   :  { %1631 = vmatmul.msk.bf16.gmra.mxu1 %vm511_vm2, %v492_v2  ;;  %v1001_v11 = vadd.f32 %v2074_v45, %v1000_v3  ;;  %v801_v15 = vmax.f32 %v678_v8, 0.0  ;;  %v403_v3 = vpop.f32.mrf.mxu3 }
 0x1d5   :  { %v353_v6 = vpop.f32.mrf.mxu0  ;;  %1641 = vmatmul.msk.bf16.gmra.mxu3 %vm511_vm2, %v502_v53  ;;  %v404_v13 = vadd.f32 %v1820_v34, %v403_v3 }
 0x1d6   :  { %v1215_v18 = vmul.f32 0.2, %v1001_v11  ;;  %v354_v19 = vadd.f32 %v1820_v34, %v353_v6  ;;  %vm1151_vm9 = vcmp.ge.f32.partialorder %v1001_v11, 0.0 }
 0x1d8   :  { %v450_v29 = vmax.f32 %v354_v19, 0.0  ;;  %v2140_v32 = vsel %vm1151_vm9, %v1001_v11, %v1215_v18 }
 0x1d9   :  { %v679_v12 = vpop.f32.mrf.mxu1 }
 0x1da   :  { %v680_v14 = vadd.f32 %v1923_v0, %v679_v12 }
 0x1db   :  { %v1002_v16 = vpop.f32.mrf.mxu2 }
 0x1dc   :  { %v802_v20 = vmax.f32 %v680_v14, 0.0  ;;  %v1003_v21 = vadd.f32 %v2074_v45, %v1002_v16  ;;  %v470_v16 = vmax.f32 %v404_v13, 0.0 }
 0x1dd   :  { %v355_v22 = vpop.f32.mrf.mxu0 }
 0x1de   :  { %v853_v23 = vpack.c.bf16 %v802_v20, %v801_v15  ;;  %vm1152_vm10 = vcmp.ge.f32.partialorder %v1003_v21, 0.0  ;;  %v1216_v24 = vmul.f32 0.2, %v1003_v21  ;;  %v356_v25 = vadd.f32 %v1820_v34, %v355_v22  ;;  %v405_v15 = vpop.f32.mrf.mxu3 }
 0x1df   :  { %v406_v17 = vadd.f32 %v1820_v34, %v405_v15 }
 0x1e0   :  { %v451_v31 = vmax.f32 %v356_v25, 0.0  ;;  %1655 = vmatmul.msk.bf16.gmra.mxu2 %vm511_vm2, %v853_v23  ;;  %v2142_v33 = vsel %vm1152_vm10, %v1003_v21, %v1216_v24 }
 0x1e1   :  { %v682_v35 = vpop.f32.mrf.mxu1  ;;  %v1342_v36 = vpack.c.bf16 %v2142_v33, %v2140_v32  ;;  %v471_v20 = vmax.f32 %v406_v17, 0.0  ;;  %v1388_v32 = vsel %vm1377_vm0, %v1341_v62, 0 }
 0x1e2   :  { %v493_v37 = vpack.c.bf16 %v451_v31, %v450_v29  ;;  %v683_v42 = vadd.f32 %v1923_v0, %v682_v35 }
 0x1e3   :  { %v1005_v38 = vpop.f32.mrf.mxu2  ;;  %v503_v23 = vpack.c.bf16 %v471_v20, %v470_v16 }
 0x1e4   :  { %1632 = vmatmul.msk.bf16.gmra.mxu1 %vm511_vm2, %v493_v37  ;;  %v1006_v47 = vadd.f32 %v2074_v45, %v1005_v38  ;;  %v803_v51 = vmax.f32 %v683_v42, 0.0 }
 0x1e5   :  { %v358_v40 = vpop.f32.mrf.mxu0  ;;  %1642 = vmatmul.msk.bf16.gmra.mxu3 %vm511_vm2, %v503_v23 }
 0x1e6   :  { %v1217_v54 = vmul.f32 0.2, %v1006_v47  ;;  %v359_v55 = vadd.f32 %v1820_v34, %v358_v40  ;;  %vm1153_vm11 = vcmp.ge.f32.partialorder %v1006_v47, 0.0 }
 0x1e8   :  { %v452_v4 = vmax.f32 %v359_v55, 0.0  ;;  %v2157_v7 = vsel %vm1153_vm11, %v1006_v47, %v1217_v54  ;;  %v2181_v47 = vld [vmem:[%s2510_s3] ss:$0 sm:$0xff] }
 0x1e9   :  { %v684_v48 = vpop.f32.mrf.mxu1 }
 0x1ea   :  { %v685_v50 = vadd.f32 %v1923_v0, %v684_v48 }
 0x1eb   :  { %v1007_v52 = vpop.f32.mrf.mxu2 }
 0x1ec   :  { %v804_v56 = vmax.f32 %v685_v50, 0.0  ;;  %v1008_v44 = vadd.f32 %v2074_v45, %v1007_v52 }
 0x1ed   :  { %v360_v57 = vpop.f32.mrf.mxu0 }
 0x1ee   :  { %v854_v58 = vpack.c.bf16 %v804_v56, %v803_v51  ;;  %vm1154_vm12 = vcmp.ge.f32.partialorder %v1008_v44, 0.0  ;;  %v1218_v61 = vmul.f32 0.2, %v1008_v44  ;;  %v361_v2 = vadd.f32 %v1820_v34, %v360_v57 }
 0x1f0   :  { %v453_v6 = vmax.f32 %v361_v2, 0.0  ;;  %1656 = vmatmul.msk.bf16.gmra.mxu2 %vm511_vm2, %v854_v58  ;;  %v2159_v8 = vsel %vm1154_vm12, %v1008_v44, %v1218_v61 }
 0x1f1   :  { %v687_v9 = vpop.f32.mrf.mxu1  ;;  %v1343_v10 = vpack.c.bf16 %v2159_v8, %v2157_v7 }
 0x1f2   :  { %v494_v11 = vpack.c.bf16 %v453_v6, %v452_v4  ;;  %v688_v18 = vadd.f32 %v1923_v0, %v687_v9 }
 0x1f3   :  { %v2163_v12 = vpop.f32.mrf.mxu2 }
 0x1f4   :  { %1633 = vmatmul.msk.bf16.gmra.mxu1 %vm511_vm2, %v494_v11  ;;  %v805_v24 = vmax.f32 %v688_v18, 0.0 }
 0x1f5   :  { %v363_v14 = vpop.f32.mrf.mxu0 }
 0x1f6   :  { %v364_v25 = vadd.f32 %v1820_v34, %v363_v14 }
 0x1f8   :  { %v454_v37 = vmax.f32 %v364_v25, 0.0 }
 0x1f9   :  { %v689_v19 = vpop.f32.mrf.mxu1 }
 0x1fa   :  { %v690_v21 = vadd.f32 %v1923_v0, %v689_v19 }
 0x1fb   :  { %v2170_v22 = vpop.f32.mrf.mxu2 }
 0x1fc   :  { %v806_v26 = vmax.f32 %v690_v21, 0.0 }
 0x1fd   :  { %v365_v29 = vpop.f32.mrf.mxu0 }
 0x1fe   :  { %v855_v31 = vpack.c.bf16 %v806_v26, %v805_v24  ;;  %v366_v35 = vadd.f32 %v1820_v34, %v365_v29 }
 0x200   :  { %v455_v38 = vmax.f32 %v366_v35, 0.0  ;;  %1657 = vmatmul.msk.bf16.gmra.mxu2 %vm511_vm2, %v855_v31 }
 0x201   :  { %v692_v39 = vpop.f32.mrf.mxu1 }
 0x202   :  { %v495_v40 = vpack.c.bf16 %v455_v38, %v454_v37  ;;  %v693_v43 = vadd.f32 %v1923_v0, %v692_v39 }
 0x203   :  { %v1015_v41 = vpop.f32.mrf.mxu2 }
 0x204   :  { %1634 = vmatmul.msk.bf16.gmra.mxu1 %vm511_vm2, %v495_v40  ;;  %v807_v50 = vmax.f32 %v693_v43, 0.0  ;;  %v1016_v18 = vadd.f32 %v2074_v45, %v1015_v41  ;;  %v1013_v40 = vadd.f32 %v2074_v45, %v2170_v22 }
 0x205   :  { %v368_v42 = vpop.f32.mrf.mxu0 }
 0x206   :  { %v369_v34 = vadd.f32 %v2181_v47, %v368_v42  ;;  %v1221_v38 = vmul.f32 0.2, %v1016_v18  ;;  %vm1157_vm1 = vcmp.ge.f32.partialorder %v1016_v18, 0.0  ;;  %vm1156_vm3 = vcmp.ge.f32.partialorder %v1013_v40, 0.0 }
 0x208   :  { %v456_v53 = vmax.f32 %v369_v34, 0.0 }
 0x209   :  { %v694_v46 = vpop.f32.mrf.mxu1 }
 0x20a   :  { %v695_v48 = vadd.f32 %v1923_v0, %v694_v46  ;;  %v1011_v46 = vadd.f32 %v2074_v45, %v2163_v12 }
 0x20b   :  { %v1017_v49 = vpop.f32.mrf.mxu2 }
 0x20c   :  { %v808_v51 = vmax.f32 %v695_v48, 0.0  ;;  %v1018_v11 = vadd.f32 %v2074_v45, %v1017_v49  ;;  %v1285_v48 = vsel %vm1157_vm1, %v1016_v18, %v1221_v38  ;;  %v1220_v49 = vmul.f32 0.2, %v1013_v40 }
 0x20d   :  { %v370_v52 = vpop.f32.mrf.mxu0  ;;  %vm1155_vm4 = vcmp.ge.f32.partialorder %v1011_v46, 0.0  ;;  %v1394_v38 = vsel %vm1377_vm0, %v1343_v10, 0 }
 0x20e   :  { %v856_v54 = vpack.c.bf16 %v808_v51, %v807_v50  ;;  %v371_v55 = vadd.f32 %v2181_v47, %v370_v52  ;;  %v1222_v25 = vmul.f32 0.2, %v1018_v11  ;;  %vm1158_vm15 = vcmp.ge.f32.partialorder %v1018_v11, 0.0 }
 0x20f   :  { %v1219_v52 = vmul.f32 0.2, %v1011_v46  ;;  %v1284_v12 = vsel %vm1156_vm3, %v1013_v40, %v1220_v49 }
 0x210   :  { %v457_v56 = vmax.f32 %v371_v55, 0.0  ;;  %1658 = vmatmul.msk.bf16.gmra.mxu2 %vm511_vm2, %v856_v54  ;;  %v1286_v43 = vsel %vm1158_vm15, %v1018_v11, %v1222_v25 }
 0x211   :  { %v697_v44 = vpop.f32.mrf.mxu1  ;;  %v1345_v50 = vpack.c.bf16 %v1286_v43, %v1285_v48 }
 0x212   :  { %v496_v57 = vpack.c.bf16 %v457_v56, %v456_v53  ;;  %v698_v2 = vadd.f32 %v1923_v0, %v697_v44 }
 0x213   :  { %v1020_v58 = vpop.f32.mrf.mxu2  ;;  %v1400_v44 = vsel %vm1377_vm0, %v1345_v50, 0 }
 0x214   :  { %1635 = vmatmul.msk.bf16.gmra.mxu1 %vm511_vm2, %v496_v57  ;;  %v1021_v3 = vadd.f32 %v2074_v45, %v1020_v58  ;;  %v809_v14 = vmax.f32 %v698_v2, 0.0 }
 0x215   :  { %v373_v61 = vpop.f32.mrf.mxu0 }
 0x216   :  { %v374_v4 = vadd.f32 %v2181_v47, %v373_v61  ;;  %v1223_v15 = vmul.f32 0.2, %v1021_v3  ;;  %vm1159_vm13 = vcmp.ge.f32.partialorder %v1021_v3, 0.0 }
 0x218   :  { %v458_v19 = vmax.f32 %v374_v4, 0.0  ;;  %v1287_v26 = vsel %vm1159_vm13, %v1021_v3, %v1223_v15 }
 0x219   :  { %v699_v6 = vpop.f32.mrf.mxu1 }
 0x21a   :  { %v700_v9 = vadd.f32 %v1923_v0, %v699_v6  ;;  %v1283_v6 = vsel %vm1155_vm4, %v1011_v46, %v1219_v52  ;;  %v1391_v52 = vsel %vm1377_vm0, %v1342_v36, 0 }
 0x21b   :  { %v1022_v13 = vpop.f32.mrf.mxu2 }
 0x21c   :  { %v810_v16 = vmax.f32 %v700_v9, 0.0  ;;  %v1023_v17 = vadd.f32 %v2074_v45, %v1022_v13 }
 0x21d   :  { %v375_v20 = vpop.f32.mrf.mxu0 }
 0x21e   :  { %v857_v21 = vpack.c.bf16 %v810_v16, %v809_v14  ;;  %vm1160_vm14 = vcmp.ge.f32.partialorder %v1023_v17, 0.0  ;;  %v1224_v23 = vmul.f32 0.2, %v1023_v17  ;;  %v376_v24 = vadd.f32 %v2181_v47, %v375_v20 }
 0x21f   :  { %v1344_v14 = vpack.c.bf16 %v1284_v12, %v1283_v6  ;;  %v1385_v6 = vsel %vm1377_vm0, %v1340_v30, 0 }
 0x220   :  { %v1288_v29 = vsel %vm1160_vm14, %v1023_v17, %v1224_v23  ;;  %v459_v31 = vmax.f32 %v376_v24, 0.0  ;;  %1659 = vmatmul.msk.bf16.gmra.mxu2 %vm511_vm2, %v857_v21 }
 0x221   :  { %v702_v35 = vpop.f32.mrf.mxu1  ;;  %v1346_v37 = vpack.c.bf16 %v1288_v29, %v1287_v26  ;;  %v1397_v23 = vsel %vm1377_vm0, %v1344_v14, 0 }
 0x222   :  { %v497_v39 = vpack.c.bf16 %v459_v31, %v458_v19  ;;  %v703_v51 = vadd.f32 %v1923_v0, %v702_v35 }
 0x223   :  { %v1025_v41 = vpop.f32.mrf.mxu2  ;;  %v1403_v42 = vsel %vm1377_vm0, %v1346_v37, 0 }
 0x224   :  { %1636 = vmatmul.msk.bf16.gmra.mxu1 %vm511_vm2, %v497_v39  ;;  %1477 = vmatpush.bf16.xpose.msrb.mxu3 %v1403_v42  ;;  %v1026_v22 = vadd.f32 %v2074_v45, %v1025_v41  ;;  %v811_v57 = vmax.f32 %v703_v51, 0.0 }
 0x225   :  { %v378_v34 = vpop.f32.mrf.mxu0 }
 0x226   :  { %v379_v53 = vadd.f32 %v2181_v47, %v378_v34  ;;  %v1225_v58 = vmul.f32 0.2, %v1026_v22  ;;  %vm1161_vm5 = vcmp.ge.f32.partialorder %v1026_v22, 0.0 }
 0x228   :  { %v460_v3 = vmax.f32 %v379_v53, 0.0  ;;  %v2211_v16 = vsel %vm1161_vm5, %v1026_v22, %v1225_v58 }
 0x229   :  { %v704_v54 = vpop.f32.mrf.mxu1 }
 0x22a   :  { %v705_v55 = vadd.f32 %v1923_v0, %v704_v54 }
 0x22b   :  { %v1027_v56 = vpop.f32.mrf.mxu2 }
 0x22c   :  { %v812_v61 = vmax.f32 %v705_v55, 0.0  ;;  %v1028_v2 = vadd.f32 %v2074_v45, %v1027_v56  ;;  %1478 = vmatpush.bf16.xpose.msrb.mxu3 %v1400_v44 }
 0x22d   :  { %v380_v4 = vpop.f32.mrf.mxu0 }
 0x22e   :  { %v858_v9 = vpack.c.bf16 %v812_v61, %v811_v57  ;;  %vm1162_vm6 = vcmp.ge.f32.partialorder %v1028_v2, 0.0  ;;  %v1226_v11 = vmul.f32 0.2, %v1028_v2  ;;  %v381_v13 = vadd.f32 %v2181_v47, %v380_v4 }
 0x230   :  { %v461_v15 = vmax.f32 %v381_v13, 0.0  ;;  %1660 = vmatmul.msk.bf16.gmra.mxu2 %vm511_vm2, %v858_v9  ;;  %v2213_v17 = vsel %vm1162_vm6, %v1028_v2, %v1226_v11  ;;  %v757_v2 = vpop.f32.mrf.mxu3 }
 0x231   :  { %v707_v18 = vpop.f32.mrf.mxu1  ;;  %v1347_v19 = vpack.c.bf16 %v2213_v17, %v2211_v16 }
 0x232   :  { %v498_v20 = vpack.c.bf16 %v461_v15, %v460_v3  ;;  %v708_v25 = vadd.f32 %v1923_v0, %v707_v18 }
 0x233   :  { %v1030_v21 = vpop.f32.mrf.mxu2 }
 0x234   :  { %1637 = vmatmul.msk.bf16.gmra.mxu1 %vm511_vm2, %v498_v20  ;;  %1479 = vmatpush.bf16.xpose.msrb.mxu3 %v1397_v23  ;;  %v1031_v26 = vadd.f32 %v2074_v45, %v1030_v21  ;;  %v813_v39 = vmax.f32 %v708_v25, 0.0 }
 0x235   :  { %v383_v24 = vpop.f32.mrf.mxu0 }
 0x236   :  { %v384_v29 = vadd.f32 %v2181_v47, %v383_v24  ;;  %v1227_v40 = vmul.f32 0.2, %v1031_v26  ;;  %vm1163_vm7 = vcmp.ge.f32.partialorder %v1031_v26, 0.0 }
 0x238   :  { %v462_v43 = vmax.f32 %v384_v29, 0.0  ;;  %v2230_v7 = vsel %vm1163_vm7, %v1031_v26, %v1227_v40  ;;  %v759_v14 = vpop.f32.mrf.mxu3 }
 0x239   :  { %v709_v31 = vpop.f32.mrf.mxu1 }
 0x23a   :  { %v710_v35 = vadd.f32 %v1923_v0, %v709_v31 }
 0x23b   :  { %v1032_v37 = vpop.f32.mrf.mxu2 }
 0x23c   :  { %v814_v41 = vmax.f32 %v710_v35, 0.0  ;;  %v1033_v42 = vadd.f32 %v2074_v45, %v1032_v37  ;;  %1480 = vmatpush.bf16.xpose.msrb.mxu3 %v1394_v38 }
 0x23d   :  { %v385_v46 = vpop.f32.mrf.mxu0 }
 0x23e   :  { %v859_v34 = vpack.c.bf16 %v814_v41, %v813_v39  ;;  %vm1164_vm8 = vcmp.ge.f32.partialorder %v1033_v42, 0.0  ;;  %v1228_v48 = vmul.f32 0.2, %v1033_v42  ;;  %v386_v0 = vadd.f32 %v2181_v47, %v385_v46  ;;  %v2244_v47 = vld [vmem:[%s2512_s5] ss:$0 sm:$0xff] }
 0x23f   :  { %v758_v9 = vadd.f32 %v2244_v47, %v757_v2  ;;  %v760_v20 = vadd.f32 %v2244_v47, %v759_v14 }
 0x240   :  { %v463_v49 = vmax.f32 %v386_v0, 0.0  ;;  %1661 = vmatmul.msk.bf16.gmra.mxu2 %vm511_vm2, %v859_v34  ;;  %v2232_v8 = vsel %vm1164_vm8, %v1033_v42, %v1228_v48 }
 0x241   :  { %v712_v10 = vpop.f32.mrf.mxu1  ;;  %v1348_v50 = vpack.c.bf16 %v2232_v8, %v2230_v7  ;;  %v833_v18 = vmax.f32 %v758_v9, 0.0  ;;  %v834_v28 = vmax.f32 %v760_v20, 0.0 }
 0x242   :  { %v499_v51 = vpack.c.bf16 %v463_v49, %v462_v43  ;;  %v713_v53 = vadd.f32 %v2244_v47, %v712_v10 }
 0x243   :  { %v1035_v22 = vpop.f32.mrf.mxu2  ;;  %v869_v29 = vpack.c.bf16 %v834_v28, %v833_v18 }
 0x244   :  { %1638 = vmatmul.msk.bf16.gmra.mxu1 %vm511_vm2, %v499_v51  ;;  %1481 = vmatpush.bf16.xpose.msrb.mxu3 %v1391_v52  ;;  %v1036_v54 = vadd.f32 %v2074_v45, %v1035_v22  ;;  %v815_v33 = vmax.f32 %v713_v53, 0.0  ;;  %v762_v37 = vpop.f32.mrf.mxu3 }
 0x245   :  { %1671 = vmatmul.msk.bf16.vlgmr.msra.gmra.mxu3 %vm511_vm2, %v869_v29  ;;  %v763_v40 = vadd.f32 %v2244_v47, %v762_v37 }
 0x246   :  { %v1229_v36 = vmul.f32 0.2, %v1036_v54  ;;  %vm1165_vm9 = vcmp.ge.f32.partialorder %v1036_v54, 0.0 }
 0x247   :  { %v835_v34 = vmax.f32 %v763_v40, 0.0 }
 0x248   :  { %v2255_v3 = vsel %vm1165_vm9, %v1036_v54, %v1229_v36 }
 0x249   :  { %v714_v55 = vpop.f32.mrf.mxu1 }
 0x24a   :  { %v715_v56 = vadd.f32 %v2244_v47, %v714_v55 }
 0x24b   :  { %v1037_v44 = vpop.f32.mrf.mxu2 }
 0x24c   :  { %v816_v12 = vmax.f32 %v715_v56, 0.0  ;;  %v1038_v57 = vadd.f32 %v2074_v45, %v1037_v44  ;;  %1482 = vmatpush.bf16.xpose.msrb.mxu3 %v1388_v32  ;;  %v764_v43 = vpop.f32.mrf.mxu3 }
 0x24d   :  { %v765_v48 = vadd.f32 %v2244_v47, %v764_v43 }
 0x24e   :  { %v860_v58 = vpack.c.bf16 %v816_v12, %v815_v33  ;;  %vm1166_vm10 = vcmp.ge.f32.partialorder %v1038_v57, 0.0  ;;  %v1230_v61 = vmul.f32 0.2, %v1038_v57 }
 0x24f   :  { %v836_v10 = vmax.f32 %v765_v48, 0.0 }
 0x250   :  { %1662 = vmatmul.msk.bf16.gmra.mxu2 %vm511_vm2, %v860_v58  ;;  %v2257_v4 = vsel %vm1166_vm10, %v1038_v57, %v1230_v61 }
 0x251   :  { %v717_v59 = vpop.f32.mrf.mxu1  ;;  %v1349_v60 = vpack.c.bf16 %v2257_v4, %v2255_v3  ;;  %v870_v54 = vpack.c.bf16 %v836_v10, %v835_v34 }
 0x252   :  { %v718_v11 = vadd.f32 %v2244_v47, %v717_v59 }
 0x253   :  { %v1040_v62 = vpop.f32.mrf.mxu2 }
 0x254   :  { %1483 = vmatpush.bf16.xpose.msrb.mxu3 %v1385_v6  ;;  %v1041_v13 = vadd.f32 %v2074_v45, %v1040_v62  ;;  %v817_v30 = vmax.f32 %v718_v11, 0.0 }
 0x255   :  { %1672 = vmatmul.msk.bf16.gmra.mxu3 %vm511_vm2, %v870_v54 }
 0x256   :  { %v1231_v24 = vmul.f32 0.2, %v1041_v13  ;;  %vm1167_vm11 = vcmp.ge.f32.partialorder %v1041_v13, 0.0 }
 0x258   :  { %v2277_v63 = vsel %vm1167_vm11, %v1041_v13, %v1231_v24  ;;  %v767_v44 = vpop.f32.mrf.mxu3 }
 0x259   :  { %v719_v15 = vpop.f32.mrf.mxu1  ;;  %v768_v58 = vadd.f32 %v2244_v47, %v767_v44 }
 0x25a   :  { %v720_v21 = vadd.f32 %v2244_v47, %v719_v15 }
 0x25b   :  { %v1042_v23 = vpop.f32.mrf.mxu2  ;;  %v837_v62 = vmax.f32 %v768_v58, 0.0 }
 0x25c   :  { %v818_v25 = vmax.f32 %v720_v21, 0.0  ;;  %v1043_v26 = vadd.f32 %v2074_v45, %v1042_v23  ;;  %1484 = vmatpush.bf16.xpose.msrb.mxu3 %v1382_v27 }
 0x25e   :  { %v861_v31 = vpack.c.bf16 %v818_v25, %v817_v30  ;;  %vm1168_vm12 = vcmp.ge.f32.partialorder %v1043_v26, 0.0  ;;  %v1232_v35 = vmul.f32 0.2, %v1043_v26 }
 0x260   :  { %1663 = vmatmul.msk.bf16.gmra.mxu2 %vm511_vm2, %v861_v31  ;;  %v2279_v1 = vsel %vm1168_vm12, %v1043_v26, %v1232_v35  ;;  %v769_v2 = vpop.f32.mrf.mxu3 }
 0x261   :  { %v722_v5 = vpop.f32.mrf.mxu1  ;;  %v1350_v38 = vpack.c.bf16 %v2279_v1, %v2277_v63  ;;  %v770_v6 = vadd.f32 %v2244_v47, %v769_v2  ;;  %v1412_v63 = vsel %vm1377_vm0, %v1349_v60, 0  ;;  %v1409_v60 = vsel %vm1377_vm0, %v1348_v50, 0 }
 0x262   :  { %v723_v41 = vadd.f32 %v2244_v47, %v722_v5 }
 0x263   :  { %v1045_v39 = vpop.f32.mrf.mxu2  ;;  %v838_v13 = vmax.f32 %v770_v6, 0.0 }
 0x264   :  { %v1046_v42 = vadd.f32 %v2074_v45, %v1045_v39  ;;  %v819_v51 = vmax.f32 %v723_v41, 0.0 }
 0x265   :  { %v871_v18 = vpack.c.bf16 %v838_v13, %v837_v62 }
 0x266   :  { %v1233_v22 = vmul.f32 0.2, %v1046_v42  ;;  %vm1169_vm13 = vcmp.ge.f32.partialorder %v1046_v42, 0.0 }
 0x267   :  { %1673 = vmatmul.msk.bf16.gmra.mxu3 %vm511_vm2, %v871_v18 }
 0x268   :  { %v2291_v32 = vsel %vm1169_vm13, %v1046_v42, %v1233_v22  ;;  %v772_v21 = vpop.f32.mrf.mxu3 }
 0x269   :  { %v724_v46 = vpop.f32.mrf.mxu1  ;;  %v773_v28 = vadd.f32 %v2244_v47, %v772_v21 }
 0x26a   :  { %v725_v0 = vadd.f32 %v2244_v47, %v724_v46 }
 0x26b   :  { %v1047_v49 = vpop.f32.mrf.mxu2  ;;  %v839_v26 = vmax.f32 %v773_v28, 0.0 }
 0x26c   :  { %v820_v52 = vmax.f32 %v725_v0, 0.0  ;;  %v1048_v53 = vadd.f32 %v2074_v45, %v1047_v49 }
 0x26e   :  { %v862_v55 = vpack.c.bf16 %v820_v52, %v819_v51  ;;  %vm1170_vm14 = vcmp.ge.f32.partialorder %v1048_v53, 0.0  ;;  %v1234_v56 = vmul.f32 0.2, %v1048_v53 }
 0x270   :  { %1664 = vmatmul.msk.bf16.gmra.mxu2 %vm511_vm2, %v862_v55  ;;  %v2293_v33 = vsel %vm1170_vm14, %v1048_v53, %v1234_v56  ;;  %v774_v24 = vpop.f32.mrf.mxu3 }
 0x271   :  { %v727_v36 = vpop.f32.mrf.mxu1  ;;  %v1351_v12 = vpack.c.bf16 %v2293_v33, %v2291_v32  ;;  %v775_v29 = vadd.f32 %v2244_v47, %v774_v24 }
 0x272   :  { %v728_v61 = vadd.f32 %v2244_v47, %v727_v36 }
 0x273   :  { %v2297_v57 = vpop.f32.mrf.mxu2  ;;  %v840_v37 = vmax.f32 %v775_v29, 0.0 }
 0x274   :  { %v821_v14 = vmax.f32 %v728_v61, 0.0 }
 0x275   :  { %v872_v40 = vpack.c.bf16 %v840_v37, %v839_v26 }
 0x277   :  { %1674 = vmatmul.msk.bf16.gmra.mxu3 %vm511_vm2, %v872_v40 }
 0x279   :  { %v729_v59 = vpop.f32.mrf.mxu1 }
 0x27a   :  { %v730_v9 = vadd.f32 %v2244_v47, %v729_v59 }
 0x27b   :  { %v1052_v11 = vpop.f32.mrf.mxu2 }
 0x27c   :  { %v822_v15 = vmax.f32 %v730_v9, 0.0  ;;  %v1053_v9 = vadd.f32 %v2074_v45, %v1052_v11 }
 0x27e   :  { %v863_v20 = vpack.c.bf16 %v822_v15, %v821_v14  ;;  %v1051_v14 = vadd.f32 %v2074_v45, %v2297_v57  ;;  %v1236_v21 = vmul.f32 0.2, %v1053_v9  ;;  %vm1172_vm5 = vcmp.ge.f32.partialorder %v1053_v9, 0.0 }
 0x280   :  { %1665 = vmatmul.msk.bf16.gmra.mxu2 %vm511_vm2, %v863_v20  ;;  %v1235_v28 = vmul.f32 0.2, %v1051_v14  ;;  %vm1171_vm6 = vcmp.ge.f32.partialorder %v1051_v14, 0.0 }
 0x281   :  { %v732_v23 = vpop.f32.mrf.mxu1 }
 0x282   :  { %v733_v30 = vadd.f32 %v2244_v47, %v732_v23 }
 0x283   :  { %v1055_v27 = vpop.f32.mrf.mxu2 }
 0x284   :  { %v823_v5 = vmax.f32 %v733_v30, 0.0  ;;  %v1056_v54 = vadd.f32 %v2074_v45, %v1055_v27 }
 0x286   :  { %v1237_v59 = vmul.f32 0.2, %v1056_v54  ;;  %vm1173_vm4 = vcmp.ge.f32.partialorder %v1056_v54, 0.0 }
 0x288   :  { %v1301_v18 = vsel %vm1173_vm4, %v1056_v54, %v1237_v59 }
 0x289   :  { %v734_v25 = vpop.f32.mrf.mxu1 }
 0x28a   :  { %v735_v31 = vadd.f32 %v2244_v47, %v734_v25 }
 0x28b   :  { %v1057_v35 = vpop.f32.mrf.mxu2 }
 0x28c   :  { %v824_v39 = vmax.f32 %v735_v31, 0.0  ;;  %v1058_v51 = vadd.f32 %v2074_v45, %v1057_v35  ;;  %v1300_v31 = vsel %vm1172_vm5, %v1053_v9, %v1236_v21 }
 0x28e   :  { %v864_v41 = vpack.c.bf16 %v824_v39, %v823_v5  ;;  %v1238_v44 = vmul.f32 0.2, %v1058_v51  ;;  %vm1174_vm3 = vcmp.ge.f32.partialorder %v1058_v51, 0.0  ;;  %v1299_v5 = vsel %vm1171_vm6, %v1051_v14, %v1235_v28 }
 0x28f   :  { %v1352_v39 = vpack.c.bf16 %v1300_v31, %v1299_v5  ;;  %v1337_v5 = vld [vmem:[%s2515_s8] sm:$0xf] }
 0x290   :  { %1666 = vmatmul.msk.bf16.gmra.mxu2 %vm511_vm2, %v864_v41  ;;  %v1302_v13 = vsel %vm1174_vm3, %v1058_v51, %v1238_v44 }
 0x291   :  { %v737_v42 = vpop.f32.mrf.mxu1  ;;  %v1353_v20 = vpack.c.bf16 %v1302_v13, %v1301_v18 }
 0x292   :  { %v738_v46 = vadd.f32 %v2244_v47, %v737_v42 }
 0x293   :  { %v1060_v43 = vpop.f32.mrf.mxu2  ;;  %v1424_v25 = vsel %vm1377_vm0, %v1353_v20, 0 }
 0x294   :  { %v1061_v34 = vadd.f32 %v2074_v45, %v1060_v43  ;;  %v825_v0 = vmax.f32 %v738_v46, 0.0 }
 0x296   :  { %v1239_v22 = vmul.f32 0.2, %v1061_v34  ;;  %vm1175_vm15 = vcmp.ge.f32.partialorder %v1061_v34, 0.0 }
 0x298   :  { %v1303_v36 = vsel %vm1175_vm15, %v1061_v34, %v1239_v22  ;;  %v1421_v34 = vsel %vm1377_vm0, %v1352_v39, 0 }
 0x299   :  { %v739_v48 = vpop.f32.mrf.mxu1 }
 0x29a   :  { %v740_v49 = vadd.f32 %v2244_v47, %v739_v48 }
 0x29b   :  { %v1062_v10 = vpop.f32.mrf.mxu2 }
 0x29c   :  { %v826_v52 = vmax.f32 %v740_v49, 0.0  ;;  %v1063_v53 = vadd.f32 %v2074_v45, %v1062_v10 }
 0x29e   :  { %v865_v55 = vpack.c.bf16 %v826_v52, %v825_v0  ;;  %vm1176_vm1 = vcmp.ge.f32.partialorder %v1063_v53, 0.0  ;;  %v1240_v56 = vmul.f32 0.2, %v1063_v53  ;;  %v1418_v52 = vsel %vm1377_vm0, %v1351_v12, 0 }
 0x2a0   :  { %v1304_v58 = vsel %vm1176_vm1, %v1063_v53, %v1240_v56  ;;  %1667 = vmatmul.msk.bf16.gmra.mxu2 %vm511_vm2, %v865_v55 }
 0x2a1   :  { %v742_v61 = vpop.f32.mrf.mxu1  ;;  %v1354_v2 = vpack.c.bf16 %v1304_v58, %v1303_v36 }
 0x2a2   :  { %v743_v15 = vadd.f32 %v2244_v47, %v742_v61 }
 0x2a3   :  { %v1065_v62 = vpop.f32.mrf.mxu2  ;;  %v1427_v6 = vsel %vm1377_vm0, %v1354_v2, 0  ;;  %v2358_v2 = vld [vmem:[%s2514_s7] ss:$0 sm:$0xff] }
 0x2a4   :  { %1490 = vmatpush.bf16.xpose.msra.mxu3 %v1427_v6  ;;  %v1066_v23 = vadd.f32 %v2074_v45, %v1065_v62  ;;  %v827_v30 = vmax.f32 %v743_v15, 0.0 }
 0x2a6   :  { %v1241_v26 = vmul.f32 0.2, %v1066_v23  ;;  %vm1177_vm7 = vcmp.ge.f32.partialorder %v1066_v23, 0.0 }
 0x2a8   :  { %v2328_v40 = vsel %vm1177_vm7, %v1066_v23, %v1241_v26 }
 0x2a9   :  { %v744_v27 = vpop.f32.mrf.mxu1 }
 0x2aa   :  { %v745_v24 = vadd.f32 %v2244_v47, %v744_v27  ;;  %v1406_v27 = vsel %vm1377_vm0, %v1347_v19, 0 }
 0x2ab   :  { %v1067_v11 = vpop.f32.mrf.mxu2 }
 0x2ac   :  { %v828_v29 = vmax.f32 %v745_v24, 0.0  ;;  %v1068_v57 = vadd.f32 %v2074_v45, %v1067_v11  ;;  %1491 = vmatpush.bf16.xpose.msra.mxu3 %v1424_v25 }
 0x2ae   :  { %v866_v35 = vpack.c.bf16 %v828_v29, %v827_v30  ;;  %vm1178_vm8 = vcmp.ge.f32.partialorder %v1068_v57, 0.0  ;;  %v1242_v37 = vmul.f32 0.2, %v1068_v57 }
 0x2b0   :  { %1668 = vmatmul.msk.bf16.gmra.mxu2 %vm511_vm2, %v866_v35  ;;  %v2330_v41 = vsel %vm1178_vm8, %v1068_v57, %v1242_v37 }
 0x2b1   :  { %v747_v42 = vpop.f32.mrf.mxu1  ;;  %v1355_v43 = vpack.c.bf16 %v2330_v41, %v2328_v40 }
 0x2b2   :  { %v748_v48 = vadd.f32 %v2244_v47, %v747_v42  ;;  %v2397_v42 = vpack.c.bf16 %v1337_v5, %v1337_v5 }
 0x2b3   :  { %v1070_v46 = vpop.f32.mrf.mxu2 }
 0x2b4   :  { %1492 = vmatpush.bf16.xpose.msra.mxu3 %v1421_v34  ;;  %v1071_v0 = vadd.f32 %v2074_v45, %v1070_v46  ;;  %v829_v10 = vmax.f32 %v748_v48, 0.0 }
 0x2b5   :  { %1675 = vmatmul.msk.bf16.vlgmr.msrb.gmra.mxu3 %vm1377_vm0, %v2397_v42 }
 0x2b6   :  { %v1243_v53 = vmul.f32 0.2, %v1071_v0  ;;  %vm1179_vm9 = vcmp.ge.f32.partialorder %v1071_v0, 0.0 }
 0x2b8   :  { %v2344_v36 = vsel %vm1179_vm9, %v1071_v0, %v1243_v53 }
 0x2b9   :  { %v749_v49 = vpop.f32.mrf.mxu1 }
 0x2ba   :  { %v750_v51 = vadd.f32 %v2244_v47, %v749_v49 }
 0x2bb   :  { %v1072_v22 = vpop.f32.mrf.mxu2 }
 0x2bc   :  { %v830_v54 = vmax.f32 %v750_v51, 0.0  ;;  %v1073_v55 = vadd.f32 %v2074_v45, %v1072_v22  ;;  %1493 = vmatpush.bf16.xpose.msra.mxu3 %v1418_v52  ;;  %v1415_v45 = vsel %vm1377_vm0, %v1350_v38, 0 }
 0x2be   :  { %v867_v56 = vpack.c.bf16 %v830_v54, %v829_v10  ;;  %vm1180_vm10 = vcmp.ge.f32.partialorder %v1073_v55, 0.0  ;;  %v1244_v44 = vmul.f32 0.2, %v1073_v55  ;;  %v1690_v54 = vmov 0  }
 0x2bf   :  { %1683 = vset.pattern.permute.xlu0 %v1690_v54 }
 0x2c0   :  { %1669 = vmatmul.msk.bf16.gmra.mxu2 %vm511_vm2, %v867_v56  ;;  %v2346_v58 = vsel %vm1180_vm10, %v1073_v55, %v1244_v44  ;;  %v1371_v55 = vld [vmem:[%s2516_s9] sm:$0xf] }
 0x2c1   :  { %v752_v61 = vpop.f32.mrf.mxu1  ;;  %v1356_v32 = vpack.c.bf16 %v2346_v58, %v2344_v36  ;;  %1374 = vperm.xlu0 %1683, %v1371_v55   ;;  %v1430_v36 = vsel %vm1377_vm0, %v1355_v43, 0 }
 0x2c2   :  { %v753_v12 = vadd.f32 %v2244_v47, %v752_v61 }
 0x2c3   :  { %v1075_v33 = vpop.f32.mrf.mxu2 }
 0x2c4   :  { %1494 = vmatpush.bf16.xpose.msra.mxu3 %v1415_v45  ;;  %v1076_v59 = vadd.f32 %v2358_v2, %v1075_v33  ;;  %v831_v6 = vmax.f32 %v753_v12, 0.0 }
 0x2c6   :  { %v1245_v1 = vmul.f32 0.2, %v1076_v59  ;;  %vm1181_vm11 = vcmp.ge.f32.partialorder %v1076_v59, 0.0 }
 0x2c8   :  { %v2368_v20 = vsel %vm1181_vm11, %v1076_v59, %v1245_v1  ;;  %v1125_v50 = vpop.f32.mrf.mxu3 }
 0x2c9   :  { %v754_v62 = vpop.f32.mrf.mxu1  ;;  %v1126_v16 = vadd.f32 %v2358_v2, %v1125_v50 }
 0x2ca   :  { %v755_v9 = vadd.f32 %v2244_v47, %v754_v62 }
 0x2cb   :  { %v1077_v13 = vpop.f32.mrf.mxu2  ;;  %v1265_v29 = vmul.f32 0.2, %v1126_v16  ;;  %vm1201_vm14 = vcmp.ge.f32.partialorder %v1126_v16, 0.0 }
 0x2cc   :  { %v832_v38 = vmax.f32 %v755_v9, 0.0  ;;  %v1078_v14 = vadd.f32 %v2358_v2, %v1077_v13  ;;  %1495 = vmatpush.bf16.xpose.msra.mxu3 %v1412_v63 }
 0x2cd   :  { %v2399_v46 = vsel %vm1201_vm14, %v1126_v16, %v1265_v29 }
 0x2ce   :  { %v868_v15 = vpack.c.bf16 %v832_v38, %v831_v6  ;;  %vm1182_vm12 = vcmp.ge.f32.partialorder %v1078_v14, 0.0  ;;  %v1246_v18 = vmul.f32 0.2, %v1078_v14 }
 0x2d0   :  { %1670 = vmatmul.msk.bf16.gmra.mxu2 %vm511_vm2, %v868_v15  ;;  %v2370_v47 = vsel %vm1182_vm12, %v1078_v14, %v1246_v18  ;;  %v1127_v19 = vpop.f32.mrf.mxu3 }
 0x2d1   :  { %v1357_v3 = vpack.c.bf16 %v2370_v47, %v2368_v20  ;;  %v1128_v57 = vadd.f32 %v2358_v2, %v1127_v19 }
 0x2d3   :  { %v1080_v4 = vpop.f32.mrf.mxu2  ;;  %vm1202_vm1 = vcmp.ge.f32.partialorder %v1128_v57, 0.0  ;;  %v1266_v37 = vmul.f32 0.2, %v1128_v57 }
 0x2d4   :  { %1496 = vmatpush.bf16.xpose.msra.mxu3 %v1409_v60  ;;  %v1081_v21 = vadd.f32 %v2358_v2, %v1080_v4 }
 0x2d5   :  { %v2401_v34 = vsel %vm1202_vm1, %v1128_v57, %v1266_v37 }
 0x2d6   :  { %v1247_v28 = vmul.f32 0.2, %v1081_v21  ;;  %vm1183_vm2 = vcmp.ge.f32.partialorder %v1081_v21, 0.0  ;;  %v1367_v49 = vpack.c.bf16 %v2401_v34, %v2399_v46 }
 0x2d8   :  { %v2384_v11 = vsel %vm1183_vm2, %v1081_v21, %v1247_v28  ;;  %v2419_v44 = vpop.f32.mrf.mxu3 }
 0x2db   :  { %v1082_v23 = vpop.f32.mrf.mxu2 }
 0x2dc   :  { %v1083_v30 = vadd.f32 %v2358_v2, %v1082_v23  ;;  %1497 = vmatpush.bf16.xpose.msra.mxu3 %v1406_v27 }
 0x2de   :  { %vm1184_vm13 = vcmp.ge.f32.partialorder %v1083_v30, 0.0  ;;  %v1248_v24 = vmul.f32 0.2, %v1083_v30 }
 0x2e0   :  { %v2386_v7 = vsel %vm1184_vm13, %v1083_v30, %v1248_v24  ;;  %v2425_v14 = vpop.f32.mrf.mxu3 }
 0x2e1   :  { %v1358_v8 = vpack.c.bf16 %v2386_v7, %v2384_v11  ;;  %v1433_v11 = vsel %vm1377_vm0, %v1356_v32, 0  ;;  %v1131_v32 = vadd.f32 %v2358_v2, %v2419_v44 }
 0x2e3   :  { %v1085_v25 = vpop.f32.mrf.mxu2  ;;  %1676 = vmatmul.msk.bf16.vlgmr.msra.gmra.mxu3 %vm1377_vm0, %v2397_v42 }
 0x2e4   :  { %v1086_v17 = vadd.f32 %v2358_v2, %v1085_v25 }
 0x2e6   :  { %v1249_v31 = vmul.f32 0.2, %v1086_v17  ;;  %vm1185_vm15 = vcmp.ge.f32.partialorder %v1086_v17, 0.0 }
 0x2e8   :  { %v2405_v48 = vsel %vm1185_vm15, %v1086_v17, %v1249_v31  ;;  %vm1203_vm15 = vcmp.ge.f32.partialorder %v1131_v32, 0.0 }
 0x2ea   :  { %v1135_v17 = vpop.f32.mrf.mxu3 }
 0x2eb   :  { %v1087_v26 = vpop.f32.mrf.mxu2  ;;  %v1136_v20 = vadd.f32 %v2358_v2, %v1135_v17  ;;  %v1541_v17 = vld [vmem:[%s2517_s1] sm:$0xf] }
 0x2ec   :  { %v1088_v35 = vadd.f32 %v2358_v2, %v1087_v26 }
 0x2ed   :  { %vm1205_vm13 = vcmp.ge.f32.partialorder %v1136_v20, 0.0 }
 0x2ee   :  { %vm1186_vm3 = vcmp.ge.f32.partialorder %v1088_v35, 0.0  ;;  %v1250_v39 = vmul.f32 0.2, %v1088_v35 }
 0x2f0   :  { %v2407_v0 = vsel %vm1186_vm3, %v1088_v35, %v1250_v39 }
 0x2f1   :  { %v1359_v10 = vpack.c.bf16 %v2407_v0, %v2405_v48 }
 0x2f2   :  { %v1137_v48 = vpop.f32.mrf.mxu3 }
 0x2f3   :  { %v1090_v51 = vpop.f32.mrf.mxu2  ;;  %v1138_v47 = vadd.f32 %v2358_v2, %v1137_v48 }
 0x2f4   :  { %v1091_v21 = vadd.f32 %v2358_v2, %v1090_v51  ;;  %v1442_v51 = vsel %vm1377_vm0, %v1359_v10, 0 }
 0x2f5   :  { %vm1206_vm14 = vcmp.ge.f32.partialorder %v1138_v47, 0.0 }
 0x2f6   :  { %v1251_v24 = vmul.f32 0.2, %v1091_v21  ;;  %vm1187_vm9 = vcmp.ge.f32.partialorder %v1091_v21, 0.0 }
 0x2f8   :  { %v1315_v57 = vsel %vm1187_vm9, %v1091_v21, %v1251_v24 }
 0x2fb   :  { %v1092_v22 = vpop.f32.mrf.mxu2 }
 0x2fc   :  { %v1093_v4 = vadd.f32 %v2358_v2, %v1092_v22  ;;  %v1140_v22 = vpop.f32.mrf.mxu3 }
 0x2fd   :  { %v1141_v10 = vadd.f32 %v2358_v2, %v1140_v22 }
 0x2fe   :  { %v1252_v30 = vmul.f32 0.2, %v1093_v4  ;;  %vm1188_vm8 = vcmp.ge.f32.partialorder %v1093_v4, 0.0 }
 0x2ff   :  { %vm1207_vm12 = vcmp.ge.f32.partialorder %v1141_v10, 0.0 }
 0x300   :  { %v1316_v26 = vsel %vm1188_vm8, %v1093_v4, %v1252_v30  ;;  %v1466_v30 = vsel %vm1377_vm0, %v1367_v49, 0 }
 0x301   :  { %v1360_v35 = vpack.c.bf16 %v1316_v26, %v1315_v57 }
 0x303   :  { %v1095_v52 = vpop.f32.mrf.mxu2  ;;  %v1445_v39 = vsel %vm1377_vm0, %v1360_v35, 0 }
 0x304   :  { %v1096_v62 = vadd.f32 %v2358_v2, %v1095_v52  ;;  %v1142_v55 = vpop.f32.mrf.mxu3 }
 0x306   :  { %v1253_v38 = vmul.f32 0.2, %v1096_v62  ;;  %vm1189_vm7 = vcmp.ge.f32.partialorder %v1096_v62, 0.0 }
 0x308   :  { %v1317_v27 = vsel %vm1189_vm7, %v1096_v62, %v1253_v38  ;;  %v1269_v62 = vmul.f32 0.2, %v1136_v20 }
 0x30b   :  { %v1097_v53 = vpop.f32.mrf.mxu2 }
 0x30c   :  { %v1098_v45 = vadd.f32 %v2358_v2, %v1097_v53  ;;  %v1439_v53 = vsel %vm1377_vm0, %v1358_v8, 0 }
 0x30e   :  { %v1254_v9 = vmul.f32 0.2, %v1098_v45  ;;  %vm1190_vm6 = vcmp.ge.f32.partialorder %v1098_v45, 0.0 }
 0x310   :  { %v1318_v60 = vsel %vm1190_vm6, %v1098_v45, %v1254_v9  ;;  %v1271_v45 = vmul.f32 0.2, %v1141_v10  ;;  %v1133_v9 = vadd.f32 %v2358_v2, %v2425_v14 }
 0x311   :  { %v1361_v28 = vpack.c.bf16 %v1318_v60, %v1317_v27 }
 0x312   :  { %vm1204_vm1 = vcmp.ge.f32.partialorder %v1133_v9, 0.0 }
 0x313   :  { %v1100_v56 = vpop.f32.mrf.mxu2  ;;  %v1448_v16 = vsel %vm1377_vm0, %v1361_v28, 0 }
 0x314   :  { %v1101_v61 = vadd.f32 %v2358_v2, %v1100_v56  ;;  %v1436_v56 = vsel %vm1377_vm0, %v1357_v3, 0  ;;  %v1335_v3 = vsel %vm1207_vm12, %v1141_v10, %v1271_v45 }
 0x316   :  { %v1255_v12 = vmul.f32 0.2, %v1101_v61  ;;  %vm1191_vm4 = vcmp.ge.f32.partialorder %v1101_v61, 0.0 }
 0x318   :  { %v1319_v13 = vsel %vm1191_vm4, %v1101_v61, %v1255_v12 }
 0x31b   :  { %v1102_v33 = vpop.f32.mrf.mxu2 }
 0x31c   :  { %v1103_v59 = vadd.f32 %v2358_v2, %v1102_v33  ;;  %v1143_v33 = vadd.f32 %v2358_v2, %v1142_v55 }
 0x31e   :  { %vm1192_vm5 = vcmp.ge.f32.partialorder %v1103_v59, 0.0  ;;  %v1256_v6 = vmul.f32 0.2, %v1103_v59  ;;  %v1272_v12 = vmul.f32 0.2, %v1143_v33  ;;  %vm1208_vm2 = vcmp.ge.f32.partialorder %v1143_v33, 0.0 }
 0x320   :  { %v1320_v63 = vsel %vm1192_vm5, %v1103_v59, %v1256_v6  ;;  %v1336_v7 = vsel %vm1208_vm2, %v1143_v33, %v1272_v12  ;;  %v1270_v6 = vmul.f32 0.2, %v1138_v47  ;;  %vm1542_vm5 = vcmp.gt.f32.partialorder %v1541_v17, 0.0 }
 0x321   :  { %v1362_v1 = vpack.c.bf16 %v1320_v63, %v1319_v13  ;;  %v1370_v59 = vpack.c.bf16 %v1336_v7, %v1335_v3  ;;  %v1333_v13 = vsel %vm1205_vm13, %v1136_v20, %v1269_v62  ;;  %v1543_v34 = vsel %vm1542_vm5, 1, %v1690_v54 }
 0x322   :  { %v1334_v63 = vsel %vm1206_vm14, %v1138_v47, %v1270_v6 }
 0x323   :  { %v1105_v15 = vpop.f32.mrf.mxu2  ;;  %v1451_v18 = vsel %vm1377_vm0, %v1362_v1, 0  ;;  %v1475_v58 = vsel %vm1377_vm0, %v1370_v59, 0  ;;  %v1369_v38 = vpack.c.bf16 %v1334_v63, %v1333_v13  ;;  %v1546_v13 = vperm.slane %v1543_v34, 2 }
 0x324   :  { %1503 = vmatpush.bf16.xpose.msrb.mxu3 %v1451_v18  ;;  %v1106_v23 = vadd.f32 %v2358_v2, %v1105_v15  ;;  %v1267_v15 = vmul.f32 0.2, %v1131_v32  ;;  %v1268_v18 = vmul.f32 0.2, %v1133_v9  ;;  %v1547_v63 = vperm.slane %v1543_v34, 3 }
 0x325   :  { %v1472_v40 = vsel %vm1377_vm0, %v1369_v38, 0  ;;  %vm1550_vm14 = vcmp.eq.s32.totalorder %v1546_v13, 1 }
 0x326   :  { %v1257_v50 = vmul.f32 0.2, %v1106_v23  ;;  %vm1193_vm10 = vcmp.ge.f32.partialorder %v1106_v23, 0.0  ;;  %v1331_v41 = vsel %vm1203_vm15, %v1131_v32, %v1267_v15  ;;  %v1332_v43 = vsel %vm1204_vm1, %v1133_v9, %v1268_v18 }
 0x327   :  { %v1368_v44 = vpack.c.bf16 %v1332_v43, %v1331_v41  ;;  %vm1551_vm15 = vcmp.eq.s32.totalorder %v1547_v63, 1 }
 0x328   :  { %v2433_v31 = vsel %vm1193_vm10, %v1106_v23, %v1257_v50 }
 0x329   :  { %v1469_v14 = vsel %vm1377_vm0, %v1368_v44, 0 }
 0x32b   :  { %v1107_v25 = vpop.f32.mrf.mxu2 }
 0x32c   :  { %v1108_v19 = vadd.f32 %v2358_v2, %v1107_v25  ;;  %1504 = vmatpush.bf16.xpose.msrb.mxu3 %v1448_v16 }
 0x32e   :  { %vm1194_vm11 = vcmp.ge.f32.partialorder %v1108_v19, 0.0  ;;  %v1258_v29 = vmul.f32 0.2, %v1108_v19 }
 0x330   :  { %v2435_v37 = vsel %vm1194_vm11, %v1108_v19, %v1258_v29 }
 0x331   :  { %v1363_v5 = vpack.c.bf16 %v2435_v37, %v2433_v31 }
 0x333   :  { %v2440_v0 = vpop.f32.mrf.mxu2 }
 0x334   :  { %1505 = vmatpush.bf16.xpose.msrb.mxu3 %v1445_v39  ;;  %v1111_v57 = vadd.f32 %v2358_v2, %v2440_v0 }
 0x336   :  { %vm1195_vm8 = vcmp.ge.f32.partialorder %v1111_v57, 0.0 }
 0x338   :  { %v1486_v28 = vpop.f32.mrf.mxu3 }
 0x33b   :  { %v2443_v52 = vpop.f32.mrf.mxu2 }
 0x33c   :  { %1506 = vmatpush.bf16.xpose.msrb.mxu3 %v1442_v51  ;;  %v1113_v35 = vadd.f32 %v2358_v2, %v2443_v52  ;;  %v1544_v51 = vperm.slane %v1543_v34, 0 }
 0x33e   :  { %v1260_v55 = vmul.f32 0.2, %v1113_v35  ;;  %vm1196_vm9 = vcmp.ge.f32.partialorder %v1113_v35, 0.0  ;;  %vm2491_vm10 = vcmp.eq.s32.totalorder %v1544_v51, 1 }
 0x340   :  { %v1488_v46 = vpop.f32.mrf.mxu3  ;;  %v1324_v45 = vsel %vm1196_vm9, %v1113_v35, %v1260_v55 }
 0x343   :  { %v1115_v61 = vpop.f32.mrf.mxu2 }
 0x344   :  { %1507 = vmatpush.bf16.xpose.msrb.mxu3 %v1439_v53  ;;  %v1116_v24 = vadd.f32 %v2358_v2, %v1115_v61  ;;  %v1259_v53 = vmul.f32 0.2, %v1111_v57  ;;  %v1375_v61 = vpop.permute.xlu0 %1374 }
 0x345   :  { %v1487_v54 = vadd.f32 %v1486_v28, %v1375_v61 }
 0x346   :  { %v1261_v26 = vmul.f32 0.2, %v1116_v24  ;;  %vm1197_vm6 = vcmp.ge.f32.partialorder %v1116_v24, 0.0  ;;  %v1323_v52 = vsel %vm1195_vm8, %v1111_v57, %v1259_v53 }
 0x347   :  { %vm1529_vm11 = vcmp.ge.f32.partialorder %v1487_v54, 0.0  ;;  %v1533_v12 = vmul.f32 0.2, %v1487_v54  ;;  %v1364_v47 = vpack.c.bf16 %v1324_v45, %v1323_v52 }
 0x348   :  { %v1325_v39 = vsel %vm1197_vm6, %v1116_v24, %v1261_v26 }
 0x349   :  { %v1537_v20 = vsel %vm1529_vm11, %v1487_v54, %v1533_v12  ;;  %v1457_v6 = vsel %vm1377_vm0, %v1364_v47, 0 }
 0x34a   :  { %v1552_v7 = vsel %vm2491_vm10, %v1537_v20, -9e+15 }
 0x34b   :  { %v1117_v8 = vpop.f32.mrf.mxu2 }
 0x34c   :  { %1508 = vmatpush.bf16.xpose.msrb.mxu3 %v1436_v56  ;;  %v1118_v50 = vadd.f32 %v2358_v2, %v1117_v8  ;;  %v1545_v56 = vperm.slane %v1543_v34, 1 }
 0x34e   :  { %v1262_v29 = vmul.f32 0.2, %v1118_v50  ;;  %vm1198_vm7 = vcmp.ge.f32.partialorder %v1118_v50, 0.0  ;;  %vm1549_vm12 = vcmp.eq.s32.totalorder %v1545_v56, 1 }
 0x350   :  { %v1326_v48 = vsel %vm1198_vm7, %v1118_v50, %v1262_v29 }
 0x351   :  { %v1365_v22 = vpack.c.bf16 %v1326_v48, %v1325_v39 }
 0x353   :  { %v1120_v1 = vpop.f32.mrf.mxu2  ;;  %v1460_v0 = vsel %vm1377_vm0, %v1365_v22, 0 }
 0x354   :  { %1509 = vmatpush.bf16.xpose.msrb.mxu3 %v1433_v11  ;;  %v1121_v60 = vadd.f32 %v2358_v2, %v1120_v1 }
 0x356   :  { %v1263_v23 = vmul.f32 0.2, %v1121_v60  ;;  %vm1199_vm3 = vcmp.ge.f32.partialorder %v1121_v60, 0.0 }
 0x358   :  { %v1327_v25 = vsel %vm1199_vm3, %v1121_v60, %v1263_v23  ;;  %vm1567_vm3 = vcmask 1045508  }
 0x35b   :  { %v1122_v4 = vpop.f32.mrf.mxu2 }
 0x35c   :  { %1510 = vmatpush.bf16.xpose.msrb.mxu3 %v1430_v36  ;;  %v1123_v21 = vadd.f32 %v2358_v2, %v1122_v4  ;;  %v1454_v36 = vsel %vm1377_vm0, %v1363_v5, 0 }
 0x35e   :  { %v1264_v27 = vmul.f32 0.2, %v1123_v21  ;;  %vm1200_vm4 = vcmp.ge.f32.partialorder %v1123_v21, 0.0 }
 0x360   :  { %v1328_v16 = vsel %vm1200_vm4, %v1123_v21, %v1264_v27  ;;  %vm1571_vm4 = vcmask 1043456  }
 0x361   :  { %v1366_v19 = vpack.c.bf16 %v1328_v16, %v1327_v25 }
 0x363   :  { %1677 = vmatmul.msk.bf16.vlgmr.msrb.gmra.mxu3 %vm1377_vm0, %v2397_v42  ;;  %v1463_v49 = vsel %vm1377_vm0, %v1366_v19, 0 }
 0x364   :  { %1516 = vmatpush.bf16.xpose.msra.mxu3 %v1475_v58 }
 0x366   :  { %v1499_v10 = vpop.f32.mrf.mxu3 }
 0x367   :  { %v1500_v2 = vadd.f32 %v1499_v10, %v1375_v61 }
 0x369   :  { %vm1530_vm2 = vcmp.ge.f32.partialorder %v1500_v2, 0.0  ;;  %v1534_v11 = vmul.f32 0.2, %v1500_v2 }
 0x36b   :  { %v1538_v3 = vsel %vm1530_vm2, %v1500_v2, %v1534_v11 }
 0x36c   :  { %1517 = vmatpush.bf16.xpose.msra.mxu3 %v1472_v40  ;;  %v1553_v8 = vsel %vm1549_vm12, %v1538_v3, -9e+15 }
 0x36d   :  { %v1556_v59 = vpack.c.bf16 %v1553_v8, %v1552_v7 }
 0x36e   :  { %v1501_v62 = vpop.f32.mrf.mxu3 }
 0x36f   :  { %v1560_v41 = vrot.slane %v1556_v59, 2 }
 0x374   :  { %1518 = vmatpush.bf16.xpose.msra.mxu3 %v1469_v14 }
 0x37c   :  { %1519 = vmatpush.bf16.xpose.msra.mxu3 %v1466_v30 }
 0x384   :  { %1520 = vmatpush.bf16.xpose.msra.mxu3 %v1463_v49 }
 0x38c   :  { %1521 = vmatpush.bf16.xpose.msra.mxu3 %v1460_v0 }
 0x394   :  { %1522 = vmatpush.bf16.xpose.msra.mxu3 %v1457_v6 }
 0x39c   :  { %1523 = vmatpush.bf16.xpose.msra.mxu3 %v1454_v36 }
 0x3a3   :  { %1678 = vmatmul.msk.bf16.vlgmr.msra.gmra.mxu3 %vm1377_vm0, %v2397_v42  ;;  %vm1563_vm0 = vcmask 1041408  }
 0x3a4   :  { %v1566_v14 = vsel %vm1563_vm0, %v1556_v59, %v1560_v41 }
 0x3e6   :  { %v1512_v58 = vpop.f32.mrf.mxu3 }
 0x3e7   :  { %v1513_v9 = vadd.f32 %v1512_v58, %v1375_v61 }
 0x3e9   :  { %v1535_v1 = vmul.f32 0.2, %v1513_v9  ;;  %vm1531_vm13 = vcmp.ge.f32.partialorder %v1513_v9, 0.0 }
 0x3eb   :  { %v1539_v18 = vsel %vm1531_vm13, %v1513_v9, %v1535_v1 }
 0x3ec   :  { %v1554_v5 = vsel %vm1550_vm14, %v1539_v18, -9e+15 }
 0x3ee   :  { %v1514_v32 = vpop.f32.mrf.mxu3 }
 0x426   :  { %v1525_v38 = vpop.f32.mrf.mxu3 }
 0x427   :  { %v1526_v15 = vadd.f32 %v1525_v38, %v1375_v61 }
 0x429   :  { %vm1532_vm1 = vcmp.ge.f32.partialorder %v1526_v15, 0.0  ;;  %v1536_v31 = vmul.f32 0.2, %v1526_v15 }
 0x42b   :  { %v1540_v37 = vsel %vm1532_vm1, %v1526_v15, %v1536_v31 }
 0x42c   :  { %v1555_v40 = vsel %vm1551_vm15, %v1540_v37, -9e+15 }
 0x42d   :  { %v1557_v43 = vpack.c.bf16 %v1555_v40, %v1554_v5 }
 0x42e   :  { %v1527_v42 = vpop.f32.mrf.mxu3 }
 0x42f   :  { %v1561_v44 = vrot.slane %v1557_v43, 4  ;;  %v1562_v4 = vrot.slane %v1557_v43, 6 }
 0x431   :  { %v1570_v60 = vsel %vm1567_vm3, %v1561_v44, %v1562_v4 }
 0x432   :  { %v1572_v21 = vsel %vm1571_vm4, %v1566_v14, %v1570_v60 }
 0x433   :  { %1574 = vst [vmem:[%s2518_s10] sm:$0xff] %v1572_v21 }

// kernel: gat_efa_forward.13
= control target key start
LH: loop header
LB: loop body
LE: loop exit
PB: predicated region body
PF: predicated region fallthrough
CT: control target
= control target key end

     0   :  { %s904_s21 = smov 0   ;;  %s906_s22 = smov 0   ;;  %s1025_s0 = inlined_call_operand.vmem [shape: f32[2,16,64], index: 0, kind: input, shape index: {}]   ;;  %s1026_s1 = inlined_call_operand.vmem [shape: bf16[2,2,16,16], index: 1, kind: input, shape index: {}]   ;;  %s1027_s2 = inlined_call_operand.vmem [shape: f32[64,34], index: 2, kind: input, shape index: {}]   ;;  %s1028_s3 = inlined_call_operand.vmem [shape: f32[1,34], index: 3, kind: input, shape index: {}]   ;;  %s1029_s4 = inlined_call_operand.vmem [shape: f32[2,64], index: 4, kind: input, shape index: {}]   ;;  %s1030_s5 = inlined_call_operand.vmem [shape: f32[2,1], index: 5, kind: input, shape index: {}]   ;;  %s1031_s6 = inlined_call_operand.vmem [shape: f32[2,16,32], index: 6, kind: output, shape index: {}]  }
   0x1   :  { %s908_s23 = smov 0   ;;  %s910_s24 = smov 0  }
   0x2   :  { %s912_s25 = smov 0  }
   0x3 LB: > { %s28_s26 = sadd.s32 1, %s858_s24  ;;  %p70_p1 = scmp.ne.s32.totalorder %s850_s22, %s846_s21  ;;  %s862_s25 = sphi %s912_s25, %s16_s25   ;;  %s858_s24 = sphi %s910_s24, %s1035_s24   ;;  %s854_s23 = sphi %s908_s23, %s1034_s23   ;;  %s850_s22 = sphi %s906_s22, %s1033_s22   ;;  %s846_s21 = sphi %s904_s21, %s1032_s21  }
   0x4   : > { %p30_p0 = scmp.ge.s32.totalorder %s28_s26, 2  ;;  %p71_p2 = scmp.eq.s32.totalorder %s862_s25, 0 }
   0x5   : > { %s63_s28 = sadd.s32 1, %s850_s22  ;;  %p714_p5 = scmp.ge.s32.totalorder %s862_s25, 2 }
   0x6   : > { %s1037_s26 = smov (%p30_p0, %s28_s26), 0  ;;  %p72_p3 = por %p71_p2, %p70_p1 }
   0x7   : > { %s58_s27 = ssub.s32 %s858_s24, %s1037_s26  ;;  %220 = sbr.rel (%p714_p5) target bundleno = 18 (0x12), region = 32 }
   0x8   : > { %p61_p4 = scmp.eq.s32.totalorder %s58_s27, 0 }
   0xa   : > { %s939_s29 = scalar_select %p61_p4, %s850_s22, %s63_s28  }
   0xc   : > { %231 = sbr.rel (!%p72_p3) target bundleno = 18 (0x12), region = 40  ;;  %s233_s30 = sand.u32 (%p72_p3), 1, %s850_s22  }
   0xd   : > { %s740_s7 = sshll.u32 (%p72_p3), %s858_s24, 3  ;;  %s715_s8 = sshll.u32 (%p72_p3), %s233_s30, 4 }
   0xe   : > { %s240_s11 = scalar_lea.vmem (%p72_p3), %s1026_s1, %s740_s7  ;;  %s235_s12 = scalar_lea.vmem (%p72_p3), [#allocation5], %s715_s8 }
   0xf   : > { %v257_v0 = vld [vmem:[%s240_s11] sm:$0xff] (%p72_p3)   ;;  %v261_v1 = vld [vmem:[%s240_s11 + $0x10] sm:$0xff] (%p72_p3)  }
  0x10   : > { %258 = vst [vmem:[%s235_s12] sm:$0xff] (%p72_p3), %v257_v0  }
  0x11   : > { %262 = vst [vmem:[%s235_s12 + $0x8] sm:$0xff] %v261_v1  }
  0x12 PF: > { %p718_p6 = scmp.ge.s32.totalorder %s862_s25, 1  ;;  %p295_p7 = scmp.lt.s32.totalorder %s862_s25, 3 }
  0x14   : > { %p296_p8 = pnand %p718_p6, %p295_p7 }
  0x15   : > { %p340_p9 = scmp.lt.s32.totalorder (!%p296_p8), %s854_s23, 1  ;;  %s865_s28 = smov (!%p296_p8), 96  }
  0x16   : > { %299 = sbr.rel (%p296_p8) target bundleno = 946 (0x3b2), region = 81  ;;  %s302_s30 = sand.u32 (!%p296_p8), 1, %s846_s21  }
  0x17   : > { %s719_s7 = sshll.u32 (!%p296_p8), %s302_s30, 4  ;;  %s867_s21 = smov (!%p296_p8), 112  }
  0x18   : > { %s304_s9 = scalar_lea.vmem (!%p296_p8), [#allocation5], %s719_s7  ;;  %s868_s13 = smov (!%p296_p8), 16  }
  0x1b   : > { %v370_v2 = vld [vmem:[%s1027_s2 + $0x30] sm:$0xff]  ;;  %v371_v3 = vld [vmem:[%s1027_s2 + $0x38] sm:$0xff]  ;;  %v368_v4 = vld [vmem:[%s1027_s2 + $0x20] sm:$0xff]  ;;  %s1039_s23 = smov (!%p340_p9, %s854_s23), 1  ;;  %vm380_vm0 = vcmask 523264   ;;  %v864_v20 = vmov 0  }
  0x1c   : > { %v375_v5 = vpack.c.bf16 %v371_v3, %v370_v2  ;;  %v369_v6 = vld [vmem:[%s1027_s2 + $0x28] sm:$0xff]  ;;  %v366_v8 = vld [vmem:[%s1027_s2 + $0x10] sm:$0xff]  ;;  %v367_v9 = vld [vmem:[%s1027_s2 + $0x18] sm:$0xff]  ;;  %s741_s8 = sshll.u32 %s1039_s23, 4  ;;  %799 = vset.pattern.permute.xlu1 %v864_v20  ;;  %803 = vset.pattern.permute.xlu0 %v864_v20  ;;  %vm400_vm1 = vcmask 257024   ;;  %v866_v30 = vmov 1  }
  0x1d   : > { %v374_v7 = vpack.c.bf16 %v369_v6, %v368_v4  ;;  %v373_v10 = vpack.c.bf16 %v367_v9, %v366_v8  ;;  %v364_v11 = vld [vmem:[%s1027_s2] sm:$0xff]  ;;  %v365_v12 = vld [vmem:[%s1027_s2 + $0x8] sm:$0xff]  ;;  %s344_s15 = scalar_lea.vmem %s1025_s0, %s741_s8  ;;  %801 = vset.pattern.permute.xlu2 %v866_v30  ;;  %vm411_vm2 = vcmask 15360   ;;  %vm438_vm3 = vcmask 123904   ;;  %s354_s12 = scalar_lea.vmem %s1031_s6, %s741_s8 }
  0x1e   : > { %388 = vmatpush.bf16.msra.mxu0 %v375_v5  ;;  %v372_v13 = vpack.c.bf16 %v365_v12, %v364_v11  ;;  %v361_v14 = vld [vmem:[%s344_s15] sm:$0xff]  ;;  %v362_v15 = vld [vmem:[%s344_s15 + $0x8] sm:$0xff]  ;;  %vm470_vm5 = vcmask 130048   ;;  %vm604_vm9 = vcmask 261248  }
  0x1f   : > { %v363_v16 = vpack.c.bf16 %v362_v15, %v361_v14  ;;  %v416_v18 = vld [vmem:[%s1030_s5] sm:$0x3]  ;;  %v753_v40 = vld [vmem:[%s304_s9 + $0x8] sm:$0xff]  }
  0x20   : > { %v414_v19 = vld [vmem:[%s1029_s4] sm:$0x3]  ;;  %419 = vperm.xlu1 %799, %v416_v18   ;;  %v752_v43 = vunpack.c.h.bf16 %v753_v40  ;;  %v751_v59 = vunpack.c.l.bf16 %v753_v40 }
  0x21   : > { %v382_v17 = vsel %vm380_vm0, %v363_v16, 0  ;;  %v415_v21 = vpack.c.bf16 %v414_v19, %v414_v19  ;;  %v805_v22 = vld [vmem:[%s1028_s3] ss:$0 sm:$0xff] }
  0x22   : > { %389 = vmatpush.bf16.msra.mxu0 %v374_v7  ;;  %432 = vmatpush.bf16.xpose.msra.mxu1 %v382_v17  ;;  %v746_v49 = vld [vmem:[%s304_s9] sm:$0xff]  }
  0x23   : > { %v747_v52 = vunpack.c.l.bf16 %v746_v49  ;;  %v748_v2 = vunpack.c.h.bf16 %v746_v49 }
  0x26   : > { %390 = vmatpush.bf16.msra.mxu0 %v373_v10 }
  0x28   : > { %800 = vset.pattern.permute.xlu1 %v866_v30 }
  0x29   : > { %725 = vmatmul.msk.bf16.vlgmr.msra.gmra.mxu1 %vm380_vm0, %v415_v21 }
  0x2a   : > { %391 = vmatpush.bf16.msra.mxu0 %v372_v13 }
  0x2d   : > { %724 = vmatmul.msk.bf16.vlgmr.msra.gmra.mxu0 %vm380_vm0, %v363_v16 }
  0x92   : > { %v420_v32 = vpop.permute.xlu1 %419 }
  0xa6   : > { %v434_v33 = vpop.f32.mrf.mxu1 }
  0xa7   : > { %v435_v34 = vadd.f32 %v434_v33, %v420_v32 }
  0xa9   : > { %439 = vst.msk [vmem:[#allocation4] sm:$0x3] %vm438_vm3, %v435_v34 }
  0xaa   : > { %v393_v23 = vpop.f32.mrf.mxu0 }
  0xab   : > { %v394_v24 = vadd.f32 %v805_v22, %v393_v23 }
  0xad   : > { %v398_v25 = vpack.c.bf16 %v394_v24, %v394_v24  ;;  %405 = vrot.lane.b32.xlu0 %v394_v24, %s865_s28 }
  0xae   : > { %v436_v37 = vpop.f32.mrf.mxu1 }
  0xaf   : > { %401 = vst.msk [vmem:[#allocation2] sm:$0xf] %vm400_vm1, %v398_v25 }
  0xb0   : > { %v806_v39 = vld [vmem:[#allocation4 + $0x1] ss:$0 sm:$0xff]  ;;  %v807_v46 = vld [vmem:[#allocation4] ss:$0 sm:$0xff] }
  0xb2   : > { %v395_v26 = vpop.f32.mrf.mxu0 }
  0xb3   : > { %v396_v27 = vadd.f32 %v805_v22, %v395_v26 }
  0xb5   : > { %v399_v28 = vpack.c.bf16 %v396_v27, %v396_v27  ;;  %407 = vrot.lane.b32.xlu0 %v396_v27, %s865_s28 }
  0xb7   : > { %402 = vst.msk [vmem:[#allocation2 + $0x4] sm:$0xf] %vm400_vm1, %v399_v28 }
  0xbe   : > { %v743_v29 = vld [vmem:[#allocation2] sm:$0xff] }
  0xbf   : > { %512 = vmatpush.bf16.msra.mxu2 %v743_v29  ;;  %v744_v27 = vld [vmem:[#allocation2] sm:$0xff] }
 0x11f   : > { %v406_v31 = vpop.permute.xlu0 %405 }
 0x120   : > { %412 = vst.msk [vmem:[#allocation3] sm:$0xff] %vm411_vm2, %v406_v31 }
 0x127   : > { %v408_v35 = vpop.permute.xlu0 %407  ;;  %v442_v36 = vld [vmem:[#allocation3] sm:$0xff] }
 0x128   : > { %413 = vst.msk [vmem:[#allocation3 + $0x8] sm:$0xff] %vm411_vm2, %v408_v35  ;;  %523 = vperm.xlu1 %800, %v442_v36  }
 0x12f   : > { %v443_v38 = vld [vmem:[#allocation3 + $0x8] sm:$0xff] }
 0x130   : > { %452 = vperm.xlu0 %803, %v443_v38   ;;  %527 = vperm.xlu2 %801, %v443_v38  }
 0x138   : > { %802 = vset.pattern.permute.xlu2 %v864_v20  ;;  %804 = vset.pattern.permute.xlu0 %v866_v30 }
 0x139   : > { %447 = vperm.xlu2 %802, %v442_v36  }
 0x18a   : > { %v528_v41 = vpop.permute.xlu2 %527 }
 0x18b   : > { %v532_v42 = vadd.f32 %v806_v39, %v528_v41 }
 0x18d   : > { %vm534_vm4 = vcmp.ge.f32.partialorder %v532_v42, 0.0  ;;  %v536_v44 = vmul.f32 0.2, %v532_v42 }
 0x18f   : > { %v538_v45 = vsel %vm534_vm4, %v532_v42, %v536_v44 }
 0x190   : > { %v545_v47 = vadd.f32 %v752_v43, %v538_v45 }
 0x192   : > { %v549_v48 = vsel %vm470_vm5, %v545_v47, -inf }
 0x193   : > { %v448_v50 = vpop.permute.xlu2 %447  ;;  %550 = vmax.xlane.f32.xlu2 %v549_v48 }
 0x194   : > { %v456_v51 = vadd.f32 %v807_v46, %v448_v50 }
 0x196   : > { %vm458_vm6 = vcmp.ge.f32.partialorder %v456_v51, 0.0  ;;  %v460_v53 = vmul.f32 0.2, %v456_v51 }
 0x198   : > { %v462_v54 = vsel %vm458_vm6, %v456_v51, %v460_v53 }
 0x199   : > { %v468_v55 = vadd.f32 %v747_v52, %v462_v54 }
 0x19a   : > { %v524_v56 = vpop.permute.xlu1 %523 }
 0x19b   : > { %v531_v57 = vadd.f32 %v806_v39, %v524_v56  ;;  %v471_v58 = vsel %vm470_vm5, %v468_v55, -inf }
 0x19c   : > { %472 = vmax.xlane.f32.xlu0 %v471_v58 }
 0x19d   : > { %vm533_vm7 = vcmp.ge.f32.partialorder %v531_v57, 0.0  ;;  %v535_v60 = vmul.f32 0.2, %v531_v57 }
 0x19f   : > { %v537_v61 = vsel %vm533_vm7, %v531_v57, %v535_v60 }
 0x1a0   : > { %v544_v62 = vadd.f32 %v751_v59, %v537_v61 }
 0x1a2   : > { %v453_v63 = vpop.permute.xlu0 %452  ;;  %v546_v0 = vsel %vm470_vm5, %v544_v62, -inf }
 0x1a3   : > { %v457_v1 = vadd.f32 %v807_v46, %v453_v63  ;;  %547 = vmax.xlane.f32.xlu1 %v546_v0 }
 0x1a5   : > { %vm459_vm8 = vcmp.ge.f32.partialorder %v457_v1, 0.0  ;;  %v461_v3 = vmul.f32 0.2, %v457_v1 }
 0x1a7   : > { %v463_v4 = vsel %vm459_vm8, %v457_v1, %v461_v3 }
 0x1a8   : > { %v469_v5 = vadd.f32 %v748_v2, %v463_v4 }
 0x1aa   : > { %v474_v6 = vsel %vm470_vm5, %v469_v5, -inf }
 0x1ab   : > { %475 = vmax.xlane.f32.xlu2 %v474_v6 }
 0x206   : > { %v551_v7 = vpop.xlane.xlu2 %550 }
 0x207   : > { %v553_v8 = vsub.f32 %v545_v47, %v551_v7 }
 0x209   : > { %v556_v9 = vmul.f32 1.442695, %v553_v8 }
 0x20b   : > { %808 = vpow2.f32 %v556_v9 }
 0x20f   : > { %v473_v10 = vpop.xlane.xlu0 %472 }
 0x210   : > { %v477_v11 = vsub.f32 %v468_v55, %v473_v10 }
 0x211   : > { %v809_v12 = vpop.eup %808 }
 0x212   : > { %v479_v13 = vmul.f32 1.442695, %v477_v11  ;;  %v561_v14 = vsel %vm470_vm5, %v809_v12, 0.0 }
 0x213   : > { %562 = vadd.xlane.f32.xlu2 %v561_v14 }
 0x214   : > { %810 = vpow2.f32 %v479_v13 }
 0x216   : > { %v548_v15 = vpop.xlane.xlu1 %547 }
 0x217   : > { %v552_v16 = vsub.f32 %v544_v62, %v548_v15 }
 0x219   : > { %v554_v17 = vmul.f32 1.442695, %v552_v16 }
 0x21a   : > { %v811_v18 = vpop.eup %810 }
 0x21b   : > { %812 = vpow2.f32 %v554_v17  ;;  %v483_v19 = vsel %vm470_vm5, %v811_v18, 0.0 }
 0x21c   : > { %484 = vadd.xlane.f32.xlu2 %v483_v19 }
 0x21e   : > { %v476_v20 = vpop.xlane.xlu2 %475 }
 0x21f   : > { %v478_v21 = vsub.f32 %v469_v5, %v476_v20 }
 0x221   : > { %v813_v22 = vpop.eup %812  ;;  %v481_v23 = vmul.f32 1.442695, %v478_v21 }
 0x222   : > { %v558_v24 = vsel %vm470_vm5, %v813_v22, 0.0 }
 0x223   : > { %814 = vpow2.f32 %v481_v23  ;;  %559 = vadd.xlane.f32.xlu1 %v558_v24 }
 0x229   : > { %v815_v25 = vpop.eup %814 }
 0x22a   : > { %v486_v26 = vsel %vm470_vm5, %v815_v25, 0.0 }
 0x22b   : > { %487 = vadd.xlane.f32.xlu0 %v486_v26 }
 0x23c   : > { %576 = vrot.lane.b32.xlu1 %v744_v27, %s867_s21 }
 0x286   : > { %v563_v28 = vpop.xlane.xlu2 %562 }
 0x28f   : > { %v485_v29 = vpop.xlane.xlu2 %484 }
 0x290   : > { %816 = vrcp.f32 %v485_v29 }
 0x296   : > { %v560_v31 = vpop.xlane.xlu1 %559  ;;  %v817_v32 = vpop.eup %816 }
 0x297   : > { %v491_v34 = vmul.f32 %v817_v32, %v811_v18 }
 0x29e   : > { %v488_v30 = vpop.xlane.xlu0 %487 }
 0x29f   : > { %818 = vrcp.f32 %v488_v30 }
 0x2a0   : > { %820 = vrcp.f32 %v560_v31 }
 0x2a1   : > { %822 = vrcp.f32 %v563_v28 }
 0x2a5   : > { %v819_v33 = vpop.eup %818 }
 0x2a6   : > { %v492_v35 = vmul.f32 %v819_v33, %v815_v25  ;;  %v821_v37 = vpop.eup %820 }
 0x2a7   : > { %v823_v38 = vpop.eup %822  ;;  %v566_v39 = vmul.f32 %v821_v37, %v813_v22 }
 0x2a8   : > { %v493_v36 = vpack.c.bf16 %v492_v35, %v491_v34  ;;  %v567_v41 = vmul.f32 %v823_v38, %v809_v12 }
 0x2aa   : > { %730 = vmatmul.msk.bf16.vlgmr.msra.gmra.mxu2 %vm470_vm5, %v493_v36  ;;  %v568_v42 = vpack.c.bf16 %v567_v41, %v566_v39 }
 0x2ae   : > { %v577_v40 = vpop.permute.xlu1 %576 }
 0x2af   : > { %589 = vmatpush.bf16.msra.mxu3 %v577_v40 }
 0x2b2   : > { %737 = vmatmul.msk.bf16.vlgmr.msra.gmra.mxu3 %vm470_vm5, %v568_v42 }
 0x32d   : > { %v514_v43 = vpop.f32.mrf.mxu2 }
 0x32e   : > { %519 = vst.msk [vmem:[%s354_s12] sm:$0xff] %vm470_vm5, %v514_v43 }
 0x335   : > { %v516_v44 = vpop.f32.mrf.mxu2  ;;  %v591_v45 = vpop.f32.mrf.mxu3 }
 0x336   : > { %520 = vst.msk [vmem:[%s354_s12 + $0x8] sm:$0xff] %vm470_vm5, %v516_v44  ;;  %598 = vrot.lane.b32.xlu2 %v591_v45, %s868_s13 }
 0x33d   : > { %v593_v46 = vpop.f32.mrf.mxu3 }
 0x33e   : > { %600 = vrot.lane.b32.xlu0 %v593_v46, %s868_s13 }
 0x390   : > { %v599_v47 = vpop.permute.xlu2 %598 }
 0x391   : > { %605 = vst.msk [vmem:[%s354_s12] sm:$0xff] %vm604_vm9, %v599_v47 }
 0x3b0   : > { %v601_v48 = vpop.permute.xlu0 %600 }
 0x3b1   : > { %606 = vst.msk [vmem:[%s354_s12 + $0x8] sm:$0xff] %vm604_vm9, %v601_v48 }
 0x3b2 PF: > { %s16_s25 = sadd.s32 1, %s862_s25   ;;  %s1032_s21 = smov %s850_s22 }
 0x3b3   : > { %p13_p10 = scmp.ge.s32.totalorder %s16_s25, 4   ;;  %s1033_s22 = smov %s939_s29 }
 0x3b4   : > { %s1034_s23 = smov %s858_s24  ;;  %s1035_s24 = smov %s1037_s26 }
 0x3b5   :  { %15 = sbr.rel (!%p13_p10) target bundleno = 3 (0x3), region = 129 }

// kernel: gat_efa_forward.14
= control target key start
LH: loop header
LB: loop body
LE: loop exit
PB: predicated region body
PF: predicated region fallthrough
CT: control target
= control target key end

     0   :  { %vm26_vm0 = vcmask 261120   ;;  %vm71_vm1 = vcmask 1041408   ;;  %vm64_vm2 = vcmask 15360   ;;  %vm247_vm9 = vcmask 130048   ;;  %s380_s1 = inlined_call_operand.vmem [shape: f32[32,2], index: 1, kind: input, shape index: {}]   ;;  %s381_s0 = inlined_call_operand.vmem [shape: f32[2,16,32], index: 0, kind: input, shape index: {}]   ;;  %s382_s2 = inlined_call_operand.vmem [shape: f32[2,32], index: 2, kind: input, shape index: {}]   ;;  %s383_s3 = inlined_call_operand.vmem [shape: f32[32,16], index: 3, kind: input, shape index: {}]   ;;  %s384_s4 = inlined_call_operand.vmem [shape: f32[2,16,16], index: 4, kind: output, shape index: {}]  }
   0x1   :  { %v24_v0 = vld [vmem:[%s380_s1 + $0x18] sm:$0xff]  ;;  %v23_v1 = vld [vmem:[%s380_s1 + $0x10] sm:$0xff]  ;;  %v17_v2 = vld [vmem:[%s381_s0] sm:$0xff] }
   0x2   :  { %51 = vmatpush.msra.mxu0 %v24_v0  ;;  %v19_v3 = vld [vmem:[%s381_s0 + $0x10] sm:$0xff]  ;;  %130 = vmatpush.msra.mxu2 %v24_v0  ;;  %v22_v4 = vld [vmem:[%s380_s1 + $0x8] sm:$0xff]  ;;  %v27_v5 = vsel %vm26_vm0, %v17_v2, 0.0  ;;  %v25_v7 = vld [vmem:[%s382_s2] sm:$0x3] }
   0x3   :  { %v28_v6 = vsel %vm26_vm0, %v19_v3, 0.0  ;;  %270 = vmatpush.msk.msra.mxu1 %vm71_vm1, %v25_v7  ;;  %v21_v8 = vld [vmem:[%s380_s1] sm:$0xff]  ;;  %271 = vmatpush.msk.msra.mxu3 %vm71_vm1, %v25_v7  ;;  %v18_v10 = vld [vmem:[%s381_s0 + $0x8] sm:$0xff]  ;;  %v20_v11 = vld [vmem:[%s381_s0 + $0x18] sm:$0xff] }
   0x4   :  { %52 = vmatpush.msra.mxu0 %v23_v1  ;;  %v29_v9 = vadd.f32 %v28_v6, %v27_v5  ;;  %131 = vmatpush.msra.mxu2 %v23_v1  ;;  %v30_v12 = vsel %vm26_vm0, %v18_v10, 0.0  ;;  %v31_v13 = vsel %vm26_vm0, %v20_v11, 0.0  ;;  %v201_v35 = vld [vmem:[%s383_s3 + $0x18] sm:$0xff]  ;;  %v200_v36 = vld [vmem:[%s383_s3 + $0x10] sm:$0xff]  ;;  %v199_v39 = vld [vmem:[%s383_s3 + $0x8] sm:$0xff] }
   0x5   :  { %v32_v14 = vadd.f32 %v31_v13, %v30_v12  ;;  %272 = vmatpush.msrb.mxu3 %v201_v35  ;;  %226 = vmatpush.msrb.mxu1 %v201_v35  ;;  %v198_v58 = vld [vmem:[%s383_s3] sm:$0xff] }
   0x6   :  { %53 = vmatpush.msra.mxu0 %v22_v4  ;;  %132 = vmatpush.msra.mxu2 %v22_v4 }
   0x7   :  { %273 = vmatpush.msrb.mxu3 %v200_v36  ;;  %227 = vmatpush.msrb.mxu1 %v200_v36 }
   0x8   :  { %54 = vmatpush.msra.mxu0 %v21_v8  ;;  %133 = vmatpush.msra.mxu2 %v21_v8 }
   0x9   :  { %256 = vmatmul.msk.f32.vlgmr.msra.gmra.mxu0 %vm26_vm0, %v29_v9  ;;  %274 = vmatpush.msrb.mxu3 %v199_v39 }
   0xa   :  { %258 = vmatpush.msk.msrb.mxu0 %vm71_vm1, %v25_v7  ;;  %263 = vmatpush.msk.msrb.mxu2 %vm71_vm1, %v25_v7 }
   0xb   :  { %228 = vmatpush.msrb.mxu1 %v199_v39  ;;  %275 = vmatpush.msrb.mxu3 %v198_v58 }
   0xd   :  { %229 = vmatpush.msrb.mxu1 %v198_v58 }
  0x11   :  { %257 = vmatmul.msk.f32.gmra.mxu0 %vm26_vm0, %v32_v14 }
  0x86   :  { %v56_v15 = vpop.f32.mrf.mxu0 }
  0x87   :  { %v62_v16 = vmul.f32 0.03125, %v56_v15 }
  0x89   :  { %259 = vmatmul.msk.f32.vlgmr.msrb.gmra.mxu0 %vm64_vm2, %v62_v16 }
  0x8e   :  { %v59_v17 = vpop.f32.mrf.mxu0 }
  0x8f   :  { %v63_v18 = vmul.f32 0.03125, %v59_v17 }
  0x91   :  { %260 = vmatmul.msk.f32.vlgmr.msra.gmra.mxu1 %vm64_vm2, %v63_v18 }
 0x106   :  { %v92_v19 = vpop.f32.mrf.mxu0 }
 0x107   :  { %v98_v20 = vsub.f32 %v17_v2, %v92_v19  ;;  %v100_v21 = vsub.f32 %v19_v3, %v92_v19 }
 0x109   :  { %v102_v22 = vmul.f32 %v98_v20, %v98_v20  ;;  %v104_v23 = vmul.f32 %v100_v21, %v100_v21 }
 0x10b   :  { %v106_v24 = vsel %vm26_vm0, %v102_v22, 0.0  ;;  %v107_v25 = vsel %vm26_vm0, %v104_v23, 0.0 }
 0x10c   :  { %v108_v26 = vadd.f32 %v107_v25, %v106_v24 }
 0x10e   :  { %v95_v27 = vpop.f32.mrf.mxu1  ;;  %261 = vmatmul.msk.f32.vlgmr.msra.gmra.mxu2 %vm26_vm0, %v108_v26 }
 0x10f   :  { %v99_v28 = vsub.f32 %v18_v10, %v95_v27  ;;  %v101_v29 = vsub.f32 %v20_v11, %v95_v27 }
 0x111   :  { %v103_v30 = vmul.f32 %v99_v28, %v99_v28  ;;  %v105_v31 = vmul.f32 %v101_v29, %v101_v29 }
 0x113   :  { %v109_v32 = vsel %vm26_vm0, %v103_v30, 0.0  ;;  %v110_v33 = vsel %vm26_vm0, %v105_v31, 0.0 }
 0x114   :  { %v111_v34 = vadd.f32 %v110_v33, %v109_v32 }
 0x116   :  { %262 = vmatmul.msk.f32.gmra.mxu2 %vm26_vm0, %v111_v34 }
 0x191   :  { %v135_v37 = vpop.f32.mrf.mxu2 }
 0x192   :  { %v141_v38 = vmul.f32 0.03125, %v135_v37 }
 0x194   :  { %v143_v40 = vadd.f32 1e-05, %v141_v38 }
 0x196   :  { %276 = vrsqrt.f32 %v143_v40  ;;  %vm151_vm4 = vweird.f32 %v143_v40 }
 0x199   :  { %v138_v41 = vpop.f32.mrf.mxu2 }
 0x19a   :  { %v142_v42 = vmul.f32 0.03125, %v138_v41 }
 0x19c   :  { %v277_v43 = vpop.eup %276  ;;  %v144_v44 = vadd.f32 1e-05, %v142_v42 }
 0x19d   :  { %v146_v45 = vmul.f32 %v277_v43, %v143_v40  ;;  %vm152_vm3 = vweird.f32 %v277_v43 }
 0x19e   :  { %278 = vrsqrt.f32 %v144_v44  ;;  %vm153_vm5 = vmor %vm151_vm4, %vm152_vm3  ;;  %vm161_vm7 = vweird.f32 %v144_v44 }
 0x19f   :  { %v147_v46 = vmul.f32 %v277_v43, %v146_v45 }
 0x1a1   :  { %v148_v47 = vmul.f32 0.5, %v147_v46 }
 0x1a3   :  { %v149_v48 = vsub.f32 1.5, %v148_v47 }
 0x1a4   :  { %v279_v49 = vpop.eup %278 }
 0x1a5   :  { %v156_v50 = vmul.f32 %v279_v49, %v144_v44  ;;  %v150_v51 = vmul.f32 %v277_v43, %v149_v48  ;;  %vm162_vm6 = vweird.f32 %v279_v49 }
 0x1a6   :  { %vm163_vm8 = vmor %vm161_vm7, %vm162_vm6 }
 0x1a7   :  { %v157_v52 = vmul.f32 %v279_v49, %v156_v50  ;;  %v154_v53 = vsel %vm153_vm5, %v277_v43, %v150_v51 }
 0x1a8   :  { %264 = vmatmul.msk.f32.vlgmr.msrb.gmra.mxu2 %vm64_vm2, %v154_v53 }
 0x1a9   :  { %v158_v54 = vmul.f32 0.5, %v157_v52 }
 0x1ab   :  { %v159_v55 = vsub.f32 1.5, %v158_v54 }
 0x1ad   :  { %v160_v56 = vmul.f32 %v279_v49, %v159_v55 }
 0x1af   :  { %v164_v57 = vsel %vm163_vm8, %v279_v49, %v160_v56 }
 0x1b0   :  { %265 = vmatmul.msk.f32.vlgmr.msra.gmra.mxu3 %vm64_vm2, %v164_v57 }
 0x22b   :  { %v188_v59 = vpop.f32.mrf.mxu2 }
 0x22c   :  { %v194_v60 = vmul.f32 %v188_v59, %v98_v20  ;;  %v196_v61 = vmul.f32 %v188_v59, %v100_v21 }
 0x22e   :  { %266 = vmatmul.msk.f32.vlgmr.msrb.gmra.mxu1 %vm26_vm0, %v194_v60  ;;  %268 = vmatmul.msk.f32.vlgmr.msrb.gmra.mxu3 %vm26_vm0, %v196_v61 }
 0x233   :  { %v191_v62 = vpop.f32.mrf.mxu3 }
 0x234   :  { %v195_v63 = vmul.f32 %v191_v62, %v99_v28  ;;  %v197_v0 = vmul.f32 %v191_v62, %v101_v29 }
 0x236   :  { %267 = vmatmul.msk.f32.gmra.mxu1 %vm26_vm0, %v195_v63  ;;  %269 = vmatmul.msk.f32.gmra.mxu3 %vm26_vm0, %v197_v0 }
 0x2ab   :  { %v231_v1 = vpop.f32.mrf.mxu1 }
 0x2ac   :  { %v243_v2 = vmax.f32 %v231_v1, 0.0 }
 0x2ae   :  { %248 = vst.msk [vmem:[%s384_s4] sm:$0xff] %vm247_vm9, %v243_v2 }
 0x2b1   :  { %v237_v3 = vpop.f32.mrf.mxu3 }
 0x2b2   :  { %v245_v4 = vmax.f32 %v237_v3, 0.0 }
 0x2b3   :  { %v234_v5 = vpop.f32.mrf.mxu1 }
 0x2b4   :  { %250 = vst.msk [vmem:[%s384_s4 + $0x10] sm:$0xff] %vm247_vm9, %v245_v4  ;;  %v244_v6 = vmax.f32 %v234_v5, 0.0 }
 0x2b6   :  { %249 = vst.msk [vmem:[%s384_s4 + $0x8] sm:$0xff] %vm247_vm9, %v244_v6 }
 0x2b9   :  { %v240_v7 = vpop.f32.mrf.mxu3 }
 0x2ba   :  { %v246_v8 = vmax.f32 %v240_v7, 0.0 }
 0x2bc   :  { %251 = vst.msk [vmem:[%s384_s4 + $0x18] sm:$0xff] %vm247_vm9, %v246_v8 }

// kernel: gat_efa_forward.15
= control target key start
LH: loop header
LB: loop body
LE: loop exit
PB: predicated region body
PF: predicated region fallthrough
CT: control target
= control target key end

     0   :  { %vm36_vm0 = vcmask 130048   ;;  %vm81_vm1 = vcmask 1043456   ;;  %vm74_vm2 = vcmask 64512   ;;  %vm104_vm3 = vcmask 7168   ;;  %s190_s1 = inlined_call_operand.vmem [shape: f32[16,8], index: 1, kind: input, shape index: {}]   ;;  %s191_s0 = inlined_call_operand.vmem [shape: f32[32,16], index: 0, kind: input, shape index: {}]   ;;  %s192_s2 = inlined_call_operand.vmem [shape: f32[1,8], index: 2, kind: input, shape index: {}]   ;;  %s193_s3 = inlined_call_operand.vmem [shape: f32[8,1], index: 3, kind: input, shape index: {}]   ;;  %s194_s4 = inlined_call_operand.<no memory space> [shape: f32[1,1], index: 4, kind: input, shape index: {}]   ;;  %s195_s5 = inlined_call_operand.vmem [shape: f32[32,1], index: 5, kind: output, shape index: {}]  }
   0x1   :  { %v29_v0 = vld [vmem:[%s190_s1] sm:$0xff]  ;;  %v30_v1 = vld [vmem:[%s190_s1 + $0x8] sm:$0xff]  ;;  %v25_v5 = vld [vmem:[%s191_s0 + $0x10] sm:$0xff]  ;;  %v10_v12 = vstv %s194_s4 }
   0x2   :  { %v23_v2 = vld [vmem:[%s191_s0] sm:$0xff]  ;;  %v31_v3 = vpack.c.bf16 %v30_v1, %v29_v0  ;;  %v24_v4 = vld [vmem:[%s191_s0 + $0x8] sm:$0xff]  ;;  %v26_v6 = vld [vmem:[%s191_s0 + $0x18] sm:$0xff]  ;;  %11 = vst [vmem:[#allocation2] sm:$0x1] %v10_v12 }
   0x3   :  { %v27_v7 = vpack.c.bf16 %v24_v4, %v23_v2  ;;  %v28_v8 = vpack.c.bf16 %v26_v6, %v25_v5  ;;  %v68_v9 = vld [vmem:[%s193_s3] sm:$0xff] }
   0x4   :  { %50 = vmatpush.bf16.msra.mxu0 %v31_v3  ;;  %117 = vmatpush.bf16.msra.mxu2 %v31_v3  ;;  %v69_v10 = vpack.c.bf16 %v68_v9, %v68_v9  ;;  %v119_v14 = vld [vmem:[%s192_s2] ss:$0 sm:$0xff] }
   0x6   :  { %v83_v11 = vsel %vm81_vm1, %v69_v10, 0 }
   0x7   :  { %113 = vmatmul.msk.bf16.vlgmr.msra.gmra.mxu0 %vm36_vm0, %v27_v7  ;;  %114 = vmatmul.msk.bf16.vlgmr.msra.gmra.mxu2 %vm36_vm0, %v28_v8 }
   0x8   :  { %92 = vmatpush.bf16.msra.mxu1 %v83_v11  ;;  %118 = vmatpush.bf16.msra.mxu3 %v83_v11 }
   0x9   :  { %v120_v28 = vld [vmem:[#allocation2] ss:$0 sm:$0xff] }
  0x84   :  { %v52_v13 = vpop.f32.mrf.mxu0 }
  0x85   :  { %v53_v15 = vadd.f32 %v119_v14, %v52_v13 }
  0x87   :  { %v62_v18 = vmax.f32 %v53_v15, 0.0 }
  0x8a   :  { %v57_v16 = vpop.f32.mrf.mxu2 }
  0x8b   :  { %v58_v21 = vadd.f32 %v119_v14, %v57_v16 }
  0x8c   :  { %v54_v17 = vpop.f32.mrf.mxu0 }
  0x8d   :  { %v55_v19 = vadd.f32 %v119_v14, %v54_v17  ;;  %v64_v25 = vmax.f32 %v58_v21, 0.0 }
  0x8f   :  { %v63_v20 = vmax.f32 %v55_v19, 0.0 }
  0x91   :  { %v66_v22 = vpack.c.bf16 %v63_v20, %v62_v18 }
  0x92   :  { %v59_v23 = vpop.f32.mrf.mxu2 }
  0x93   :  { %v60_v24 = vadd.f32 %v119_v14, %v59_v23  ;;  %115 = vmatmul.msk.bf16.vlgmr.msra.gmra.mxu1 %vm74_vm2, %v66_v22 }
  0x95   :  { %v65_v26 = vmax.f32 %v60_v24, 0.0 }
  0x97   :  { %v67_v27 = vpack.c.bf16 %v65_v26, %v64_v25 }
  0x99   :  { %116 = vmatmul.msk.bf16.vlgmr.msra.gmra.mxu3 %vm74_vm2, %v67_v27 }
 0x110   :  { %v94_v29 = vpop.f32.mrf.mxu1 }
 0x111   :  { %v95_v30 = vadd.f32 %v120_v28, %v94_v29 }
 0x113   :  { %105 = vst.msk [vmem:[%s195_s5] sm:$0xff] %vm104_vm3, %v95_v30 }
 0x118   :  { %v96_v31 = vpop.f32.mrf.mxu1 }
 0x119   :  { %v97_v32 = vadd.f32 %v120_v28, %v96_v31 }
 0x11b   :  { %106 = vst.msk [vmem:[%s195_s5 + $0x8] sm:$0xff] %vm104_vm3, %v97_v32 }
 0x11c   :  { %v99_v33 = vpop.f32.mrf.mxu3 }
 0x11d   :  { %v100_v34 = vadd.f32 %v120_v28, %v99_v33 }
 0x11f   :  { %107 = vst.msk [vmem:[%s195_s5 + $0x10] sm:$0xff] %vm104_vm3, %v100_v34 }
 0x124   :  { %v101_v35 = vpop.f32.mrf.mxu3 }
 0x125   :  { %v102_v36 = vadd.f32 %v120_v28, %v101_v35 }
 0x127   :  { %108 = vst.msk [vmem:[%s195_s5 + $0x18] sm:$0xff] %vm104_vm3, %v102_v36 }

</bundles_post_ra>
